<compile_context>
chip_gen: v6e
topology: v6e:2x2x1
jax: 0.10.0
libtpu: 0.0.40
codegen_flags: <defaults>
</compile_context>

<pallas_src>
import functools

import jax
import jax.numpy as jnp
from jax.experimental import pallas as pl
from jax.experimental.pallas import tpu as pltpu

EPS = 1e-5


# ----------------------------------------------------------------------------
# align_corners=True bilinear interpolation matrix (out_size, in_size)
# ----------------------------------------------------------------------------
def _bilinear_matrix(in_size, out_size):
    rows = []
    for i in range(out_size):
        src = i * (in_size - 1) / (out_size - 1) if out_size > 1 else 0.0
        i0 = min(int(src), in_size - 1)
        i1 = min(i0 + 1, in_size - 1)
        frac = src - i0
        row = [0.0] * in_size
        row[i0] += 1.0 - frac
        row[i1] += frac
        rows.append(row)
    return jnp.array(rows, dtype=jnp.float32)


# ----------------------------------------------------------------------------
# fused decoder_block kernel (one image per grid step)
# ----------------------------------------------------------------------------
def _make_decoder_kernel(C0, C1, Cg, Cout, H, W):
    Ho, Wo = 2 * H, 2 * W
    Ccat = C0 + Cg

    def kernel(x_ref, s_ref, ah_ref, awt_ref,
               wg_ref, bg_ref, ws_ref, bs_ref, wo_ref, bo_ref,
               wc_ref, bc_ref, out_ref, xu_ref):
        # ---- 1) bilinear 2x upsample, batched over channels on the MXU.
        #         ah/awt are zero-padded so xu is already the zero-padded
        #         (for the 3x3 conv) upsampled activation.
        xb = x_ref[0]                                          # (C0, H, W) bf16
        ah = jnp.broadcast_to(ah_ref[...], (C0, Ho + 2, H))
        awt = jnp.broadcast_to(awt_ref[...], (C0, W, Wo + 2))
        dn = (((2,), (1,)), ((0,), (0,)))                      # contract, batch=c
        t = jax.lax.dot_general(ah, xb, dn,
                                preferred_element_type=jnp.float32)
        xu = jax.lax.dot_general(t.astype(jnp.bfloat16), awt, dn,
                                 preferred_element_type=jnp.float32)
        xu_ref[...] = xu.astype(jnp.bfloat16)                  # (C0, Ho+2, Wo+2)

        # row views (strided VMEM loads; rows are width(lane)-dense)
        xu_rows = [xu_ref[:, r, :] for r in range(Ho + 2)]     # each (C0, Wo+2)

        wg = wg_ref[...]; ws = ws_ref[...]; wo = wo_ref[...]; wc = wc_ref[...]
        bg = bg_ref[...]; bs = bs_ref[...]; bo = bo_ref[...]; bc = bc_ref[...]

        # ---- 2) attention gate (1x1 convs + folded BN), one row at a time.
        #         s is width-padded by the wrapper, so att * s is already the
        #         zero-padded gated skip connection.
        zero_row = jnp.zeros((Cg, Wo + 2), jnp.bfloat16)
        satt_rows = [zero_row]                                 # halo row (-1)
        for oh in range(Ho):
            s_row = s_ref[0, :, oh, :]                         # (C1, Wo+2) bf16
            a = jnp.dot(wg, xu_rows[oh + 1],
                        preferred_element_type=jnp.float32) + bg
            b = jnp.dot(ws, s_row,
                        preferred_element_type=jnp.float32) + bs
            r = jnp.maximum(a + b, 0.0).astype(jnp.bfloat16)
            logit = jnp.dot(wo, r,
                            preferred_element_type=jnp.float32) + bo
            att = jax.nn.sigmoid(logit)                        # EUP path
            satt_rows.append(
                (att * s_row.astype(jnp.float32)).astype(jnp.bfloat16))
        satt_rows.append(zero_row)                             # halo row (Ho)

        # ---- 3) fused im2col 3x3 conv + folded BN + ReLU on concat([x_up, s_att])
        for oh in range(Ho):
            parts = []
            for dy in range(3):
                xrow = xu_rows[oh + dy]                        # (C0, Wo+2)
                srow = satt_rows[oh + dy]                      # (Cg, Wo+2)
                for dx in range(3):
                    parts.append(xrow[:, dx:dx + Wo])
                    parts.append(srow[:, dx:dx + Wo])
            patch = jnp.concatenate(parts, axis=0)             # (9*Ccat, Wo)
            row = jnp.dot(wc, patch,
                          preferred_element_type=jnp.float32) + bc
            out_ref[0, oh] = jnp.maximum(row, 0.0)             # (Cout, Wo)

    return kernel


# ----------------------------------------------------------------------------
# wrapper: NCHW in, NCHW out (like PyTorch)
# ----------------------------------------------------------------------------
def decoder_block_forward(x_nchw, s_nchw, params):
    N, C0, H, W = x_nchw.shape
    Ho, Wo = 2 * H, 2 * W
    C1 = s_nchw.shape[1]
    Cg = params["wg"].shape[0]
    Cout = params["wc"].shape[0]
    assert s_nchw.shape == (N, C1, Ho, Wo)
    assert C1 == Cg, "gating multiply requires inc[1] == outc (as in PyTorch)"
    assert params["wc"].shape[1] == 9 * (C0 + Cg)

    bf = jnp.bfloat16
    x_b = x_nchw.astype(bf)
    # width zero-padding fuses with the bf16 cast in XLA; gives the conv its
    # width halo for the gated skip for free.
    s_b = jnp.pad(s_nchw.astype(bf), ((0, 0), (0, 0), (0, 0), (1, 1)))

    # zero-padded interpolation matrices -> kernel's x_up comes out zero-padded
    ah_p = jnp.pad(_bilinear_matrix(H, Ho), ((1, 1), (0, 0))).astype(bf)    # (Ho+2, H)
    awt_p = jnp.pad(_bilinear_matrix(W, Wo).T, ((0, 0), (1, 1))).astype(bf)  # (W, Wo+2)

    wg = params["wg"].astype(bf); bg = params["bg"]
    ws = params["ws"].astype(bf); bs = params["bs"]
    wo = params["wo"].astype(bf); bo = params["bo"]
    wc = params["wc"].astype(bf); bc = params["bc"]

    kernel = _make_decoder_kernel(C0, C1, Cg, Cout, H, W)
    out_nhcw = pl.pallas_call(
        kernel,
        out_shape=jax.ShapeDtypeStruct((N, Ho, Cout, Wo), jnp.float32),
        grid=(N,),
        in_specs=[
            pl.BlockSpec((1, C0, H, W), lambda n: (n, 0, 0, 0)),
            pl.BlockSpec((1, C1, Ho, Wo + 2), lambda n: (n, 0, 0, 0)),
            pl.BlockSpec((Ho + 2, H), lambda n: (0, 0)),
            pl.BlockSpec((W, Wo + 2), lambda n: (0, 0)),
            pl.BlockSpec((Cg, C0), lambda n: (0, 0)),
            pl.BlockSpec((Cg, 1), lambda n: (0, 0)),
            pl.BlockSpec((Cg, C1), lambda n: (0, 0)),
            pl.BlockSpec((Cg, 1), lambda n: (0, 0)),
            pl.BlockSpec((Cg, Cg), lambda n: (0, 0)),
            pl.BlockSpec((Cg, 1), lambda n: (0, 0)),
            pl.BlockSpec((Cout, 9 * (C0 + Cg)), lambda n: (0, 0)),
            pl.BlockSpec((Cout, 1), lambda n: (0, 0)),
        ],
        out_specs=pl.BlockSpec((1, Ho, Cout, Wo), lambda n: (n, 0, 0, 0)),
        scratch_shapes=[pltpu.VMEM((C0, Ho + 2, Wo + 2), jnp.bfloat16)],
        compiler_params=pltpu.CompilerParams(
            dimension_semantics=("parallel",)),
    )(x_b, s_b, ah_p, awt_p, wg, bg, ws, bs, wo, bo, wc, bc)

    # only remaining layout op: NHCW -> NCHW on the final (smallest) tensor
    return jnp.transpose(out_nhcw, (0, 2, 1, 3))


# ----------------------------------------------------------------------------
# deterministic parameter init (conv + BN folded to inference-mode affine)
# ----------------------------------------------------------------------------
def _fold_bn(w, b, kg, kb):
    cout = w.shape[0]
    gamma = 1.0 + 0.1 * jax.random.normal(kg, (cout,), jnp.float32)
    beta = 0.1 * jax.random.normal(kb, (cout,), jnp.float32)
    mean = jnp.zeros((cout,), jnp.float32)
    var = jnp.ones((cout,), jnp.float32)
    scale = gamma / jnp.sqrt(var + EPS)
    w_f = w * scale.reshape((-1,) + (1,) * (w.ndim - 1))
    b_f = (b - mean) * scale + beta
    return w_f, b_f


def init_params(key, inc, outc):
    inc0, inc1 = inc
    assert inc1 == outc, "PyTorch gating multiply requires inc[1] == outc"
    keys = jax.random.split(key, 14)
    # attention gate: Wg (1x1 conv + BN), Ws (1x1 conv + BN)
    wg = jax.random.normal(keys[0], (outc, inc0), jnp.float32) / jnp.sqrt(inc0)
    bg = 0.1 * jax.random.normal(keys[1], (outc,), jnp.float32)
    wg, bg = _fold_bn(wg, bg, keys[2], keys[3])
    ws = jax.random.normal(keys[4], (outc, inc1), jnp.float32) / jnp.sqrt(inc1)
    bs = 0.1 * jax.random.normal(keys[5], (outc,), jnp.float32)
    ws, bs = _fold_bn(ws, bs, keys[6], keys[7])
    # gate output 1x1 conv (no BN)
    wo = jax.random.normal(keys[8], (outc, outc), jnp.float32) / jnp.sqrt(outc)
    bo = 0.1 * jax.random.normal(keys[9], (outc,), jnp.float32)
    # conv_block: 3x3 conv + BN
    ccat = inc0 + outc
    k3 = jax.random.normal(keys[10], (outc, ccat, 3, 3), jnp.float32) / jnp.sqrt(9 * ccat)
    b3 = 0.1 * jax.random.normal(keys[11], (outc,), jnp.float32)
    k3, b3 = _fold_bn(k3, b3, keys[12], keys[13])
    # weight column index = (dy*3+dx)*Ccat + ci matches in-kernel patch order
    wc = jnp.transpose(k3, (0, 2, 3, 1)).reshape(outc, 9 * ccat)
    return {
        "wg": wg, "bg": bg.reshape(outc, 1),
        "ws": ws, "bs": bs.reshape(outc, 1),
        "wo": wo, "bo": bo.reshape(outc, 1),
        "wc": wc, "bc": b3.reshape(outc, 1),
    }


# ----------------------------------------------------------------------------
# pure-JAX (f32, XLA) reference for a numerical sanity check
# ----------------------------------------------------------------------------
def _reference_forward(x, s, params):
    N, C0, H, W = x.shape
    Ho, Wo = 2 * H, 2 * W
    ah = _bilinear_matrix(H, Ho)
    aw = _bilinear_matrix(W, Wo)
    xu = jnp.einsum('oh,nchw->ncow', ah, x)
    xu = jnp.einsum('pw,ncow->ncop', aw, xu)                    # (N, C0, Ho, Wo)
    bg = params["bg"][:, 0]; bs = params["bs"][:, 0]; bo = params["bo"][:, 0]
    a = jnp.einsum('gc,nchw->nghw', params["wg"], xu) + bg[None, :, None, None]
    b = jnp.einsum('gc,nchw->nghw', params["ws"], s) + bs[None, :, None, None]
    r = jax.nn.relu(a + b)
    logit = jnp.einsum('gc,nchw->nghw', params["wo"], r) + bo[None, :, None, None]
    s_att = jax.nn.sigmoid(logit) * s
    cat = jnp.concatenate([xu, s_att], axis=1)
    ccat = cat.shape[1]
    cout = params["wc"].shape[0]
    k = params["wc"].reshape(cout, 3, 3, ccat).transpose(0, 3, 1, 2)
    y = jax.lax.conv_general_dilated(
        cat, k, (1, 1), ((1, 1), (1, 1)),
        dimension_numbers=('NCHW', 'OIHW', 'NCHW'))
    y = y + params["bc"][:, 0][None, :, None, None]
    return jax.nn.relu(y)


if __name__ == "__main__":
    key = jax.random.PRNGKey(0)
    inc = (8, 4)      # inc[1] must equal outc for the PyTorch gating multiply
    outc = 4
    N, H, W = 2, 8, 8

    k_x, k_s, k_p = jax.random.split(key, 3)
    x = jax.random.normal(k_x, (N, inc[0], H, W), jnp.float32)
    s = jax.random.normal(k_s, (N, inc[1], 2 * H, 2 * W), jnp.float32)
    params = init_params(k_p, inc, outc)

    fwd = jax.jit(functools.partial(decoder_block_forward, params=params))
    out = fwd(x, s)
    jax.block_until_ready(out)

    assert out.shape == (N, outc, 2 * H, 2 * W), out.shape
    assert bool(jnp.all(jnp.isfinite(out)))

    # numerical check against the f32 XLA reference (kernel runs GEMMs in bf16)
    ref = _reference_forward(x, s, params)
    denom = jnp.maximum(jnp.max(jnp.abs(ref)), 1.0)
    rel_err = float(jnp.max(jnp.abs(out - ref)) / denom)
    assert rel_err < 5e-2, f"max relative error too large: {rel_err}"

    print("KERNEL_OK")
</pallas_src>

<mosaic_0001>
module attributes {stable_mosaic.version = 11 : i64} {
  func.func @kernel(%arg0: i32, %arg1: memref<1x8x8x8xbf16, #tpu.memory_space<vmem>>, %arg2: memref<1x4x16x18xbf16, #tpu.memory_space<vmem>>, %arg3: memref<18x8xbf16, #tpu.memory_space<vmem>>, %arg4: memref<8x18xbf16, #tpu.memory_space<vmem>>, %arg5: memref<4x8xbf16, #tpu.memory_space<vmem>>, %arg6: memref<4x1xf32, #tpu.memory_space<vmem>>, %arg7: memref<4x4xbf16, #tpu.memory_space<vmem>>, %arg8: memref<4x1xf32, #tpu.memory_space<vmem>>, %arg9: memref<4x4xbf16, #tpu.memory_space<vmem>>, %arg10: memref<4x1xf32, #tpu.memory_space<vmem>>, %arg11: memref<4x108xbf16, #tpu.memory_space<vmem>>, %arg12: memref<4x1xf32, #tpu.memory_space<vmem>>, %arg13: memref<1x16x4x16xf32, #tpu.memory_space<vmem>>, %arg14: memref<8x18x18xbf16, #tpu.memory_space<vmem>>) attributes {dimension_semantics = [#tpu.dimension_semantics<parallel>], iteration_bounds = array<i64: 2>, scalar_prefetch = 0 : i64, scratch_operands = 1 : i64, tpu.core_type = #tpu.core_type<tc>, window_params = [{transform_indices = @transform_0, window_bounds = array<i64: 1, 8, 8, 8>}, {transform_indices = @transform_1, window_bounds = array<i64: 1, 4, 16, 18>}, {pipeline_mode = #tpu.pipeline_mode<synchronous>, transform_indices = @transform_2, window_bounds = array<i64: 18, 8>}, {pipeline_mode = #tpu.pipeline_mode<synchronous>, transform_indices = @transform_3, window_bounds = array<i64: 8, 18>}, {pipeline_mode = #tpu.pipeline_mode<synchronous>, transform_indices = @transform_4, window_bounds = array<i64: 4, 8>}, {pipeline_mode = #tpu.pipeline_mode<synchronous>, transform_indices = @transform_5, window_bounds = array<i64: 4, 1>}, {pipeline_mode = #tpu.pipeline_mode<synchronous>, transform_indices = @transform_6, window_bounds = array<i64: 4, 4>}, {pipeline_mode = #tpu.pipeline_mode<synchronous>, transform_indices = @transform_7, window_bounds = array<i64: 4, 1>}, {pipeline_mode = #tpu.pipeline_mode<synchronous>, transform_indices = @transform_8, window_bounds = array<i64: 4, 4>}, {pipeline_mode = #tpu.pipeline_mode<synchronous>, transform_indices = @transform_9, window_bounds = array<i64: 4, 1>}, {pipeline_mode = #tpu.pipeline_mode<synchronous>, transform_indices = @transform_10, window_bounds = array<i64: 4, 108>}, {pipeline_mode = #tpu.pipeline_mode<synchronous>, transform_indices = @transform_11, window_bounds = array<i64: 4, 1>}, {transform_indices = @transform_12, window_bounds = array<i64: 1, 16, 4, 16>}]} {
    %c0 = arith.constant 0 : index
    %c0_0 = arith.constant 0 : index
    %c0_1 = arith.constant 0 : index
    %c0_2 = arith.constant 0 : index
    %0 = vector.load %arg1[%c0, %c0_0, %c0_1, %c0_2] : memref<1x8x8x8xbf16, #tpu.memory_space<vmem>>, vector<1x8x8x8xbf16>
    %1 = vector.shape_cast %0 : vector<1x8x8x8xbf16> to vector<8x8x8xbf16>
    %c0_3 = arith.constant 0 : index
    %c0_4 = arith.constant 0 : index
    %2 = vector.load %arg3[%c0_3, %c0_4] : memref<18x8xbf16, #tpu.memory_space<vmem>>, vector<18x8xbf16>
    %3 = vector.shape_cast %2 : vector<18x8xbf16> to vector<1x18x8xbf16>
    %4 = vector.broadcast %3 : vector<1x18x8xbf16> to vector<8x18x8xbf16>
    %c0_5 = arith.constant 0 : index
    %c0_6 = arith.constant 0 : index
    %5 = vector.load %arg4[%c0_5, %c0_6] : memref<8x18xbf16, #tpu.memory_space<vmem>>, vector<8x18xbf16>
    %6 = vector.shape_cast %5 : vector<8x18xbf16> to vector<1x8x18xbf16>
    %7 = vector.broadcast %6 : vector<1x8x18xbf16> to vector<8x8x18xbf16>
    %cst = arith.constant dense<0.000000e+00> : vector<8x18x8xf32>
    %8 = tpu.matmul %4, %1, %cst {dimension_numbers = #tpu.dot_dimension_numbers<[2], [1], [1], [2], [0, 0, 0, 1, 1, 2], [0], [0]>} : vector<8x18x8xbf16>, vector<8x8x8xbf16>, vector<8x18x8xf32> -> vector<8x18x8xf32>
    %9 = arith.truncf %8 : vector<8x18x8xf32> to vector<8x18x8xbf16>
    %cst_7 = arith.constant dense<0.000000e+00> : vector<8x18x18xf32>
    %10 = tpu.matmul %9, %7, %cst_7 {dimension_numbers = #tpu.dot_dimension_numbers<[2], [1], [1], [2], [0, 0, 0, 1, 1, 2], [0], [0]>} : vector<8x18x8xbf16>, vector<8x8x18xbf16>, vector<8x18x18xf32> -> vector<8x18x18xf32>
    %11 = arith.truncf %10 : vector<8x18x18xf32> to vector<8x18x18xbf16>
    %c0_8 = arith.constant 0 : index
    %c0_9 = arith.constant 0 : index
    %c0_10 = arith.constant 0 : index
    %12 = vector.load %arg14[%c0_8, %c0_9, %c0_10] : memref<8x18x18xbf16, #tpu.memory_space<vmem>>, vector<8x18x18xbf16>
    tpu.vector_store %arg14[%c0_8, %c0_9, %c0_10], %11 {strides = array<i32>} : memref<8x18x18xbf16, #tpu.memory_space<vmem>>, vector<8x18x18xbf16>,
    %c0_11 = arith.constant 0 : index
    %c0_12 = arith.constant 0 : index
    %c0_13 = arith.constant 0 : index
    %13 = vector.load %arg14[%c0_11, %c0_12, %c0_13] : memref<8x18x18xbf16, #tpu.memory_space<vmem>>, vector<8x1x18xbf16>
    %14 = vector.shape_cast %13 : vector<8x1x18xbf16> to vector<8x18xbf16>
    %c0_14 = arith.constant 0 : index
    %c1 = arith.constant 1 : index
    %c0_15 = arith.constant 0 : index
    %15 = vector.load %arg14[%c0_14, %c1, %c0_15] : memref<8x18x18xbf16, #tpu.memory_space<vmem>>, vector<8x1x18xbf16>
    %16 = vector.shape_cast %15 : vector<8x1x18xbf16> to vector<8x18xbf16>
    %c0_16 = arith.constant 0 : index
    %c2 = arith.constant 2 : index
    %c0_17 = arith.constant 0 : index
    %17 = vector.load %arg14[%c0_16, %c2, %c0_17] : memref<8x18x18xbf16, #tpu.memory_space<vmem>>, vector<8x1x18xbf16>
    %18 = vector.shape_cast %17 : vector<8x1x18xbf16> to vector<8x18xbf16>
    %c0_18 = arith.constant 0 : index
    %c3 = arith.constant 3 : index
    %c0_19 = arith.constant 0 : index
    %19 = vector.load %arg14[%c0_18, %c3, %c0_19] : memref<8x18x18xbf16, #tpu.memory_space<vmem>>, vector<8x1x18xbf16>
    %20 = vector.shape_cast %19 : vector<8x1x18xbf16> to vector<8x18xbf16>
    %c0_20 = arith.constant 0 : index
    %c4 = arith.constant 4 : index
    %c0_21 = arith.constant 0 : index
    %21 = vector.load %arg14[%c0_20, %c4, %c0_21] : memref<8x18x18xbf16, #tpu.memory_space<vmem>>, vector<8x1x18xbf16>
    %22 = vector.shape_cast %21 : vector<8x1x18xbf16> to vector<8x18xbf16>
    %c0_22 = arith.constant 0 : index
    %c5 = arith.constant 5 : index
    %c0_23 = arith.constant 0 : index
    %23 = vector.load %arg14[%c0_22, %c5, %c0_23] : memref<8x18x18xbf16, #tpu.memory_space<vmem>>, vector<8x1x18xbf16>
    %24 = vector.shape_cast %23 : vector<8x1x18xbf16> to vector<8x18xbf16>
    %c0_24 = arith.constant 0 : index
    %c6 = arith.constant 6 : index
    %c0_25 = arith.constant 0 : index
    %25 = vector.load %arg14[%c0_24, %c6, %c0_25] : memref<8x18x18xbf16, #tpu.memory_space<vmem>>, vector<8x1x18xbf16>
    %26 = vector.shape_cast %25 : vector<8x1x18xbf16> to vector<8x18xbf16>
    %c0_26 = arith.constant 0 : index
    %c7 = arith.constant 7 : index
    %c0_27 = arith.constant 0 : index
    %27 = vector.load %arg14[%c0_26, %c7, %c0_27] : memref<8x18x18xbf16, #tpu.memory_space<vmem>>, vector<8x1x18xbf16>
    %28 = vector.shape_cast %27 : vector<8x1x18xbf16> to vector<8x18xbf16>
    %c0_28 = arith.constant 0 : index
    %c8 = arith.constant 8 : index
    %c0_29 = arith.constant 0 : index
    %29 = vector.load %arg14[%c0_28, %c8, %c0_29] : memref<8x18x18xbf16, #tpu.memory_space<vmem>>, vector<8x1x18xbf16>
    %30 = vector.shape_cast %29 : vector<8x1x18xbf16> to vector<8x18xbf16>
    %c0_30 = arith.constant 0 : index
    %c9 = arith.constant 9 : index
    %c0_31 = arith.constant 0 : index
    %31 = vector.load %arg14[%c0_30, %c9, %c0_31] : memref<8x18x18xbf16, #tpu.memory_space<vmem>>, vector<8x1x18xbf16>
    %32 = vector.shape_cast %31 : vector<8x1x18xbf16> to vector<8x18xbf16>
    %c0_32 = arith.constant 0 : index
    %c10 = arith.constant 10 : index
    %c0_33 = arith.constant 0 : index
    %33 = vector.load %arg14[%c0_32, %c10, %c0_33] : memref<8x18x18xbf16, #tpu.memory_space<vmem>>, vector<8x1x18xbf16>
    %34 = vector.shape_cast %33 : vector<8x1x18xbf16> to vector<8x18xbf16>
    %c0_34 = arith.constant 0 : index
    %c11 = arith.constant 11 : index
    %c0_35 = arith.constant 0 : index
    %35 = vector.load %arg14[%c0_34, %c11, %c0_35] : memref<8x18x18xbf16, #tpu.memory_space<vmem>>, vector<8x1x18xbf16>
    %36 = vector.shape_cast %35 : vector<8x1x18xbf16> to vector<8x18xbf16>
    %c0_36 = arith.constant 0 : index
    %c12 = arith.constant 12 : index
    %c0_37 = arith.constant 0 : index
    %37 = vector.load %arg14[%c0_36, %c12, %c0_37] : memref<8x18x18xbf16, #tpu.memory_space<vmem>>, vector<8x1x18xbf16>
    %38 = vector.shape_cast %37 : vector<8x1x18xbf16> to vector<8x18xbf16>
    %c0_38 = arith.constant 0 : index
    %c13 = arith.constant 13 : index
    %c0_39 = arith.constant 0 : index
    %39 = vector.load %arg14[%c0_38, %c13, %c0_39] : memref<8x18x18xbf16, #tpu.memory_space<vmem>>, vector<8x1x18xbf16>
    %40 = vector.shape_cast %39 : vector<8x1x18xbf16> to vector<8x18xbf16>
    %c0_40 = arith.constant 0 : index
    %c14 = arith.constant 14 : index
    %c0_41 = arith.constant 0 : index
    %41 = vector.load %arg14[%c0_40, %c14, %c0_41] : memref<8x18x18xbf16, #tpu.memory_space<vmem>>, vector<8x1x18xbf16>
    %42 = vector.shape_cast %41 : vector<8x1x18xbf16> to vector<8x18xbf16>
    %c0_42 = arith.constant 0 : index
    %c15 = arith.constant 15 : index
    %c0_43 = arith.constant 0 : index
    %43 = vector.load %arg14[%c0_42, %c15, %c0_43] : memref<8x18x18xbf16, #tpu.memory_space<vmem>>, vector<8x1x18xbf16>
    %44 = vector.shape_cast %43 : vector<8x1x18xbf16> to vector<8x18xbf16>
    %c0_44 = arith.constant 0 : index
    %c16 = arith.constant 16 : index
    %c0_45 = arith.constant 0 : index
    %45 = vector.load %arg14[%c0_44, %c16, %c0_45] : memref<8x18x18xbf16, #tpu.memory_space<vmem>>, vector<8x1x18xbf16>
    %46 = vector.shape_cast %45 : vector<8x1x18xbf16> to vector<8x18xbf16>
    %c0_46 = arith.constant 0 : index
    %c17 = arith.constant 17 : index
    %c0_47 = arith.constant 0 : index
    %47 = vector.load %arg14[%c0_46, %c17, %c0_47] : memref<8x18x18xbf16, #tpu.memory_space<vmem>>, vector<8x1x18xbf16>
    %48 = vector.shape_cast %47 : vector<8x1x18xbf16> to vector<8x18xbf16>
    %c0_48 = arith.constant 0 : index
    %c0_49 = arith.constant 0 : index
    %49 = vector.load %arg5[%c0_48, %c0_49] : memref<4x8xbf16, #tpu.memory_space<vmem>>, vector<4x8xbf16>
    %c0_50 = arith.constant 0 : index
    %c0_51 = arith.constant 0 : index
    %50 = vector.load %arg7[%c0_50, %c0_51] : memref<4x4xbf16, #tpu.memory_space<vmem>>, vector<4x4xbf16>
    %c0_52 = arith.constant 0 : index
    %c0_53 = arith.constant 0 : index
    %51 = vector.load %arg9[%c0_52, %c0_53] : memref<4x4xbf16, #tpu.memory_space<vmem>>, vector<4x4xbf16>
    %c0_54 = arith.constant 0 : index
    %c0_55 = arith.constant 0 : index
    %52 = vector.load %arg11[%c0_54, %c0_55] : memref<4x108xbf16, #tpu.memory_space<vmem>>, vector<4x108xbf16>
    %c0_56 = arith.constant 0 : index
    %c0_57 = arith.constant 0 : index
    %53 = vector.load %arg6[%c0_56, %c0_57] : memref<4x1xf32, #tpu.memory_space<vmem>>, vector<4x1xf32>
    %c0_58 = arith.constant 0 : index
    %c0_59 = arith.constant 0 : index
    %54 = vector.load %arg8[%c0_58, %c0_59] : memref<4x1xf32, #tpu.memory_space<vmem>>, vector<4x1xf32>
    %c0_60 = arith.constant 0 : index
    %c0_61 = arith.constant 0 : index
    %55 = vector.load %arg10[%c0_60, %c0_61] : memref<4x1xf32, #tpu.memory_space<vmem>>, vector<4x1xf32>
    %c0_62 = arith.constant 0 : index
    %c0_63 = arith.constant 0 : index
    %56 = vector.load %arg12[%c0_62, %c0_63] : memref<4x1xf32, #tpu.memory_space<vmem>>, vector<4x1xf32>
    %cst_64 = arith.constant 0.000000e+00 : bf16
    %57 = vector.broadcast %cst_64 : bf16 to vector<4x18xbf16>
    %c0_65 = arith.constant 0 : index
    %c0_66 = arith.constant 0 : index
    %c0_67 = arith.constant 0 : index
    %c0_68 = arith.constant 0 : index
    %58 = vector.load %arg2[%c0_65, %c0_66, %c0_67, %c0_68] : memref<1x4x16x18xbf16, #tpu.memory_space<vmem>>, vector<1x4x1x18xbf16>
    %59 = vector.shape_cast %58 : vector<1x4x1x18xbf16> to vector<4x18xbf16>
    %cst_69 = arith.constant dense<0.000000e+00> : vector<4x18xf32>
    %60 = tpu.matmul %49, %16, %cst_69 {dimension_numbers = #tpu.dot_dimension_numbers<[1], [0], [0], [1], [0, 0, 1, 1], [], []>} : vector<4x8xbf16>, vector<8x18xbf16>, vector<4x18xf32> -> vector<4x18xf32>
    %61 = vector.broadcast %53 : vector<4x1xf32> to vector<4x18xf32>
    %62 = arith.addf %60, %61 : vector<4x18xf32>
    %cst_70 = arith.constant dense<0.000000e+00> : vector<4x18xf32>
    %63 = tpu.matmul %50, %59, %cst_70 {dimension_numbers = #tpu.dot_dimension_numbers<[1], [0], [0], [1], [0, 0, 1, 1], [], []>} : vector<4x4xbf16>, vector<4x18xbf16>, vector<4x18xf32> -> vector<4x18xf32>
    %64 = vector.broadcast %54 : vector<4x1xf32> to vector<4x18xf32>
    %65 = arith.addf %63, %64 : vector<4x18xf32>
    %66 = arith.addf %62, %65 : vector<4x18xf32>
    %cst_71 = arith.constant 0.000000e+00 : f32
    %67 = vector.broadcast %cst_71 : f32 to vector<4x18xf32>
    %68 = arith.maximumf %66, %67 : vector<4x18xf32>
    %69 = arith.truncf %68 : vector<4x18xf32> to vector<4x18xbf16>
    %cst_72 = arith.constant dense<0.000000e+00> : vector<4x18xf32>
    %70 = tpu.matmul %51, %69, %cst_72 {dimension_numbers = #tpu.dot_dimension_numbers<[1], [0], [0], [1], [0, 0, 1, 1], [], []>} : vector<4x4xbf16>, vector<4x18xbf16>, vector<4x18xf32> -> vector<4x18xf32>
    %71 = vector.broadcast %55 : vector<4x1xf32> to vector<4x18xf32>
    %72 = arith.addf %70, %71 : vector<4x18xf32>
    %73 = arith.negf %72 : vector<4x18xf32>
    %74 = math.exp %73 : vector<4x18xf32>
    %cst_73 = arith.constant 1.000000e+00 : f32
    %75 = vector.broadcast %cst_73 : f32 to vector<4x18xf32>
    %76 = arith.addf %75, %74 : vector<4x18xf32>
    %77 = arith.divf %75, %76 : vector<4x18xf32>
    %78 = arith.extf %59 : vector<4x18xbf16> to vector<4x18xf32>
    %79 = arith.mulf %77, %78 : vector<4x18xf32>
    %80 = arith.truncf %79 : vector<4x18xf32> to vector<4x18xbf16>
    %c0_74 = arith.constant 0 : index
    %c0_75 = arith.constant 0 : index
    %c1_76 = arith.constant 1 : index
    %c0_77 = arith.constant 0 : index
    %81 = vector.load %arg2[%c0_74, %c0_75, %c1_76, %c0_77] : memref<1x4x16x18xbf16, #tpu.memory_space<vmem>>, vector<1x4x1x18xbf16>
    %82 = vector.shape_cast %81 : vector<1x4x1x18xbf16> to vector<4x18xbf16>
    %cst_78 = arith.constant dense<0.000000e+00> : vector<4x18xf32>
    %83 = tpu.matmul %49, %18, %cst_78 {dimension_numbers = #tpu.dot_dimension_numbers<[1], [0], [0], [1], [0, 0, 1, 1], [], []>} : vector<4x8xbf16>, vector<8x18xbf16>, vector<4x18xf32> -> vector<4x18xf32>
    %84 = vector.broadcast %53 : vector<4x1xf32> to vector<4x18xf32>
    %85 = arith.addf %83, %84 : vector<4x18xf32>
    %cst_79 = arith.constant dense<0.000000e+00> : vector<4x18xf32>
    %86 = tpu.matmul %50, %82, %cst_79 {dimension_numbers = #tpu.dot_dimension_numbers<[1], [0], [0], [1], [0, 0, 1, 1], [], []>} : vector<4x4xbf16>, vector<4x18xbf16>, vector<4x18xf32> -> vector<4x18xf32>
    %87 = vector.broadcast %54 : vector<4x1xf32> to vector<4x18xf32>
    %88 = arith.addf %86, %87 : vector<4x18xf32>
    %89 = arith.addf %85, %88 : vector<4x18xf32>
    %cst_80 = arith.constant 0.000000e+00 : f32
    %90 = vector.broadcast %cst_80 : f32 to vector<4x18xf32>
    %91 = arith.maximumf %89, %90 : vector<4x18xf32>
    %92 = arith.truncf %91 : vector<4x18xf32> to vector<4x18xbf16>
    %cst_81 = arith.constant dense<0.000000e+00> : vector<4x18xf32>
    %93 = tpu.matmul %51, %92, %cst_81 {dimension_numbers = #tpu.dot_dimension_numbers<[1], [0], [0], [1], [0, 0, 1, 1], [], []>} : vector<4x4xbf16>, vector<4x18xbf16>, vector<4x18xf32> -> vector<4x18xf32>
    %94 = vector.broadcast %55 : vector<4x1xf32> to vector<4x18xf32>
    %95 = arith.addf %93, %94 : vector<4x18xf32>
    %96 = arith.negf %95 : vector<4x18xf32>
    %97 = math.exp %96 : vector<4x18xf32>
    %cst_82 = arith.constant 1.000000e+00 : f32
    %98 = vector.broadcast %cst_82 : f32 to vector<4x18xf32>
    %99 = arith.addf %98, %97 : vector<4x18xf32>
    %100 = arith.divf %98, %99 : vector<4x18xf32>
    %101 = arith.extf %82 : vector<4x18xbf16> to vector<4x18xf32>
    %102 = arith.mulf %100, %101 : vector<4x18xf32>
    %103 = arith.truncf %102 : vector<4x18xf32> to vector<4x18xbf16>
    %c0_83 = arith.constant 0 : index
    %c0_84 = arith.constant 0 : index
    %c2_85 = arith.constant 2 : index
    %c0_86 = arith.constant 0 : index
    %104 = vector.load %arg2[%c0_83, %c0_84, %c2_85, %c0_86] : memref<1x4x16x18xbf16, #tpu.memory_space<vmem>>, vector<1x4x1x18xbf16>
    %105 = vector.shape_cast %104 : vector<1x4x1x18xbf16> to vector<4x18xbf16>
    %cst_87 = arith.constant dense<0.000000e+00> : vector<4x18xf32>
    %106 = tpu.matmul %49, %20, %cst_87 {dimension_numbers = #tpu.dot_dimension_numbers<[1], [0], [0], [1], [0, 0, 1, 1], [], []>} : vector<4x8xbf16>, vector<8x18xbf16>, vector<4x18xf32> -> vector<4x18xf32>
    %107 = vector.broadcast %53 : vector<4x1xf32> to vector<4x18xf32>
    %108 = arith.addf %106, %107 : vector<4x18xf32>
    %cst_88 = arith.constant dense<0.000000e+00> : vector<4x18xf32>
    %109 = tpu.matmul %50, %105, %cst_88 {dimension_numbers = #tpu.dot_dimension_numbers<[1], [0], [0], [1], [0, 0, 1, 1], [], []>} : vector<4x4xbf16>, vector<4x18xbf16>, vector<4x18xf32> -> vector<4x18xf32>
    %110 = vector.broadcast %54 : vector<4x1xf32> to vector<4x18xf32>
    %111 = arith.addf %109, %110 : vector<4x18xf32>
    %112 = arith.addf %108, %111 : vector<4x18xf32>
    %cst_89 = arith.constant 0.000000e+00 : f32
    %113 = vector.broadcast %cst_89 : f32 to vector<4x18xf32>
    %114 = arith.maximumf %112, %113 : vector<4x18xf32>
    %115 = arith.truncf %114 : vector<4x18xf32> to vector<4x18xbf16>
    %cst_90 = arith.constant dense<0.000000e+00> : vector<4x18xf32>
    %116 = tpu.matmul %51, %115, %cst_90 {dimension_numbers = #tpu.dot_dimension_numbers<[1], [0], [0], [1], [0, 0, 1, 1], [], []>} : vector<4x4xbf16>, vector<4x18xbf16>, vector<4x18xf32> -> vector<4x18xf32>
    %117 = vector.broadcast %55 : vector<4x1xf32> to vector<4x18xf32>
    %118 = arith.addf %116, %117 : vector<4x18xf32>
    %119 = arith.negf %118 : vector<4x18xf32>
    %120 = math.exp %119 : vector<4x18xf32>
    %cst_91 = arith.constant 1.000000e+00 : f32
    %121 = vector.broadcast %cst_91 : f32 to vector<4x18xf32>
    %122 = arith.addf %121, %120 : vector<4x18xf32>
    %123 = arith.divf %121, %122 : vector<4x18xf32>
    %124 = arith.extf %105 : vector<4x18xbf16> to vector<4x18xf32>
    %125 = arith.mulf %123, %124 : vector<4x18xf32>
    %126 = arith.truncf %125 : vector<4x18xf32> to vector<4x18xbf16>
    %c0_92 = arith.constant 0 : index
    %c0_93 = arith.constant 0 : index
    %c3_94 = arith.constant 3 : index
    %c0_95 = arith.constant 0 : index
    %127 = vector.load %arg2[%c0_92, %c0_93, %c3_94, %c0_95] : memref<1x4x16x18xbf16, #tpu.memory_space<vmem>>, vector<1x4x1x18xbf16>
    %128 = vector.shape_cast %127 : vector<1x4x1x18xbf16> to vector<4x18xbf16>
    %cst_96 = arith.constant dense<0.000000e+00> : vector<4x18xf32>
    %129 = tpu.matmul %49, %22, %cst_96 {dimension_numbers = #tpu.dot_dimension_numbers<[1], [0], [0], [1], [0, 0, 1, 1], [], []>} : vector<4x8xbf16>, vector<8x18xbf16>, vector<4x18xf32> -> vector<4x18xf32>
    %130 = vector.broadcast %53 : vector<4x1xf32> to vector<4x18xf32>
    %131 = arith.addf %129, %130 : vector<4x18xf32>
    %cst_97 = arith.constant dense<0.000000e+00> : vector<4x18xf32>
    %132 = tpu.matmul %50, %128, %cst_97 {dimension_numbers = #tpu.dot_dimension_numbers<[1], [0], [0], [1], [0, 0, 1, 1], [], []>} : vector<4x4xbf16>, vector<4x18xbf16>, vector<4x18xf32> -> vector<4x18xf32>
    %133 = vector.broadcast %54 : vector<4x1xf32> to vector<4x18xf32>
    %134 = arith.addf %132, %133 : vector<4x18xf32>
    %135 = arith.addf %131, %134 : vector<4x18xf32>
    %cst_98 = arith.constant 0.000000e+00 : f32
    %136 = vector.broadcast %cst_98 : f32 to vector<4x18xf32>
    %137 = arith.maximumf %135, %136 : vector<4x18xf32>
    %138 = arith.truncf %137 : vector<4x18xf32> to vector<4x18xbf16>
    %cst_99 = arith.constant dense<0.000000e+00> : vector<4x18xf32>
    %139 = tpu.matmul %51, %138, %cst_99 {dimension_numbers = #tpu.dot_dimension_numbers<[1], [0], [0], [1], [0, 0, 1, 1], [], []>} : vector<4x4xbf16>, vector<4x18xbf16>, vector<4x18xf32> -> vector<4x18xf32>
    %140 = vector.broadcast %55 : vector<4x1xf32> to vector<4x18xf32>
    %141 = arith.addf %139, %140 : vector<4x18xf32>
    %142 = arith.negf %141 : vector<4x18xf32>
    %143 = math.exp %142 : vector<4x18xf32>
    %cst_100 = arith.constant 1.000000e+00 : f32
    %144 = vector.broadcast %cst_100 : f32 to vector<4x18xf32>
    %145 = arith.addf %144, %143 : vector<4x18xf32>
    %146 = arith.divf %144, %145 : vector<4x18xf32>
    %147 = arith.extf %128 : vector<4x18xbf16> to vector<4x18xf32>
    %148 = arith.mulf %146, %147 : vector<4x18xf32>
    %149 = arith.truncf %148 : vector<4x18xf32> to vector<4x18xbf16>
    %c0_101 = arith.constant 0 : index
    %c0_102 = arith.constant 0 : index
    %c4_103 = arith.constant 4 : index
    %c0_104 = arith.constant 0 : index
    %150 = vector.load %arg2[%c0_101, %c0_102, %c4_103, %c0_104] : memref<1x4x16x18xbf16, #tpu.memory_space<vmem>>, vector<1x4x1x18xbf16>
    %151 = vector.shape_cast %150 : vector<1x4x1x18xbf16> to vector<4x18xbf16>
    %cst_105 = arith.constant dense<0.000000e+00> : vector<4x18xf32>
    %152 = tpu.matmul %49, %24, %cst_105 {dimension_numbers = #tpu.dot_dimension_numbers<[1], [0], [0], [1], [0, 0, 1, 1], [], []>} : vector<4x8xbf16>, vector<8x18xbf16>, vector<4x18xf32> -> vector<4x18xf32>
    %153 = vector.broadcast %53 : vector<4x1xf32> to vector<4x18xf32>
    %154 = arith.addf %152, %153 : vector<4x18xf32>
    %cst_106 = arith.constant dense<0.000000e+00> : vector<4x18xf32>
    %155 = tpu.matmul %50, %151, %cst_106 {dimension_numbers = #tpu.dot_dimension_numbers<[1], [0], [0], [1], [0, 0, 1, 1], [], []>} : vector<4x4xbf16>, vector<4x18xbf16>, vector<4x18xf32> -> vector<4x18xf32>
    %156 = vector.broadcast %54 : vector<4x1xf32> to vector<4x18xf32>
    %157 = arith.addf %155, %156 : vector<4x18xf32>
    %158 = arith.addf %154, %157 : vector<4x18xf32>
    %cst_107 = arith.constant 0.000000e+00 : f32
    %159 = vector.broadcast %cst_107 : f32 to vector<4x18xf32>
    %160 = arith.maximumf %158, %159 : vector<4x18xf32>
    %161 = arith.truncf %160 : vector<4x18xf32> to vector<4x18xbf16>
    %cst_108 = arith.constant dense<0.000000e+00> : vector<4x18xf32>
    %162 = tpu.matmul %51, %161, %cst_108 {dimension_numbers = #tpu.dot_dimension_numbers<[1], [0], [0], [1], [0, 0, 1, 1], [], []>} : vector<4x4xbf16>, vector<4x18xbf16>, vector<4x18xf32> -> vector<4x18xf32>
    %163 = vector.broadcast %55 : vector<4x1xf32> to vector<4x18xf32>
    %164 = arith.addf %162, %163 : vector<4x18xf32>
    %165 = arith.negf %164 : vector<4x18xf32>
    %166 = math.exp %165 : vector<4x18xf32>
    %cst_109 = arith.constant 1.000000e+00 : f32
    %167 = vector.broadcast %cst_109 : f32 to vector<4x18xf32>
    %168 = arith.addf %167, %166 : vector<4x18xf32>
    %169 = arith.divf %167, %168 : vector<4x18xf32>
    %170 = arith.extf %151 : vector<4x18xbf16> to vector<4x18xf32>
    %171 = arith.mulf %169, %170 : vector<4x18xf32>
    %172 = arith.truncf %171 : vector<4x18xf32> to vector<4x18xbf16>
    %c0_110 = arith.constant 0 : index
    %c0_111 = arith.constant 0 : index
    %c5_112 = arith.constant 5 : index
    %c0_113 = arith.constant 0 : index
    %173 = vector.load %arg2[%c0_110, %c0_111, %c5_112, %c0_113] : memref<1x4x16x18xbf16, #tpu.memory_space<vmem>>, vector<1x4x1x18xbf16>
    %174 = vector.shape_cast %173 : vector<1x4x1x18xbf16> to vector<4x18xbf16>
    %cst_114 = arith.constant dense<0.000000e+00> : vector<4x18xf32>
    %175 = tpu.matmul %49, %26, %cst_114 {dimension_numbers = #tpu.dot_dimension_numbers<[1], [0], [0], [1], [0, 0, 1, 1], [], []>} : vector<4x8xbf16>, vector<8x18xbf16>, vector<4x18xf32> -> vector<4x18xf32>
    %176 = vector.broadcast %53 : vector<4x1xf32> to vector<4x18xf32>
    %177 = arith.addf %175, %176 : vector<4x18xf32>
    %cst_115 = arith.constant dense<0.000000e+00> : vector<4x18xf32>
    %178 = tpu.matmul %50, %174, %cst_115 {dimension_numbers = #tpu.dot_dimension_numbers<[1], [0], [0], [1], [0, 0, 1, 1], [], []>} : vector<4x4xbf16>, vector<4x18xbf16>, vector<4x18xf32> -> vector<4x18xf32>
    %179 = vector.broadcast %54 : vector<4x1xf32> to vector<4x18xf32>
    %180 = arith.addf %178, %179 : vector<4x18xf32>
    %181 = arith.addf %177, %180 : vector<4x18xf32>
    %cst_116 = arith.constant 0.000000e+00 : f32
    %182 = vector.broadcast %cst_116 : f32 to vector<4x18xf32>
    %183 = arith.maximumf %181, %182 : vector<4x18xf32>
    %184 = arith.truncf %183 : vector<4x18xf32> to vector<4x18xbf16>
    %cst_117 = arith.constant dense<0.000000e+00> : vector<4x18xf32>
    %185 = tpu.matmul %51, %184, %cst_117 {dimension_numbers = #tpu.dot_dimension_numbers<[1], [0], [0], [1], [0, 0, 1, 1], [], []>} : vector<4x4xbf16>, vector<4x18xbf16>, vector<4x18xf32> -> vector<4x18xf32>
    %186 = vector.broadcast %55 : vector<4x1xf32> to vector<4x18xf32>
    %187 = arith.addf %185, %186 : vector<4x18xf32>
    %188 = arith.negf %187 : vector<4x18xf32>
    %189 = math.exp %188 : vector<4x18xf32>
    %cst_118 = arith.constant 1.000000e+00 : f32
    %190 = vector.broadcast %cst_118 : f32 to vector<4x18xf32>
    %191 = arith.addf %190, %189 : vector<4x18xf32>
    %192 = arith.divf %190, %191 : vector<4x18xf32>
    %193 = arith.extf %174 : vector<4x18xbf16> to vector<4x18xf32>
    %194 = arith.mulf %192, %193 : vector<4x18xf32>
    %195 = arith.truncf %194 : vector<4x18xf32> to vector<4x18xbf16>
    %c0_119 = arith.constant 0 : index
    %c0_120 = arith.constant 0 : index
    %c6_121 = arith.constant 6 : index
    %c0_122 = arith.constant 0 : index
    %196 = vector.load %arg2[%c0_119, %c0_120, %c6_121, %c0_122] : memref<1x4x16x18xbf16, #tpu.memory_space<vmem>>, vector<1x4x1x18xbf16>
    %197 = vector.shape_cast %196 : vector<1x4x1x18xbf16> to vector<4x18xbf16>
    %cst_123 = arith.constant dense<0.000000e+00> : vector<4x18xf32>
    %198 = tpu.matmul %49, %28, %cst_123 {dimension_numbers = #tpu.dot_dimension_numbers<[1], [0], [0], [1], [0, 0, 1, 1], [], []>} : vector<4x8xbf16>, vector<8x18xbf16>, vector<4x18xf32> -> vector<4x18xf32>
    %199 = vector.broadcast %53 : vector<4x1xf32> to vector<4x18xf32>
    %200 = arith.addf %198, %199 : vector<4x18xf32>
    %cst_124 = arith.constant dense<0.000000e+00> : vector<4x18xf32>
    %201 = tpu.matmul %50, %197, %cst_124 {dimension_numbers = #tpu.dot_dimension_numbers<[1], [0], [0], [1], [0, 0, 1, 1], [], []>} : vector<4x4xbf16>, vector<4x18xbf16>, vector<4x18xf32> -> vector<4x18xf32>
    %202 = vector.broadcast %54 : vector<4x1xf32> to vector<4x18xf32>
    %203 = arith.addf %201, %202 : vector<4x18xf32>
    %204 = arith.addf %200, %203 : vector<4x18xf32>
    %cst_125 = arith.constant 0.000000e+00 : f32
    %205 = vector.broadcast %cst_125 : f32 to vector<4x18xf32>
    %206 = arith.maximumf %204, %205 : vector<4x18xf32>
    %207 = arith.truncf %206 : vector<4x18xf32> to vector<4x18xbf16>
    %cst_126 = arith.constant dense<0.000000e+00> : vector<4x18xf32>
    %208 = tpu.matmul %51, %207, %cst_126 {dimension_numbers = #tpu.dot_dimension_numbers<[1], [0], [0], [1], [0, 0, 1, 1], [], []>} : vector<4x4xbf16>, vector<4x18xbf16>, vector<4x18xf32> -> vector<4x18xf32>
    %209 = vector.broadcast %55 : vector<4x1xf32> to vector<4x18xf32>
    %210 = arith.addf %208, %209 : vector<4x18xf32>
    %211 = arith.negf %210 : vector<4x18xf32>
    %212 = math.exp %211 : vector<4x18xf32>
    %cst_127 = arith.constant 1.000000e+00 : f32
    %213 = vector.broadcast %cst_127 : f32 to vector<4x18xf32>
    %214 = arith.addf %213, %212 : vector<4x18xf32>
    %215 = arith.divf %213, %214 : vector<4x18xf32>
    %216 = arith.extf %197 : vector<4x18xbf16> to vector<4x18xf32>
    %217 = arith.mulf %215, %216 : vector<4x18xf32>
    %218 = arith.truncf %217 : vector<4x18xf32> to vector<4x18xbf16>
    %c0_128 = arith.constant 0 : index
    %c0_129 = arith.constant 0 : index
    %c7_130 = arith.constant 7 : index
    %c0_131 = arith.constant 0 : index
    %219 = vector.load %arg2[%c0_128, %c0_129, %c7_130, %c0_131] : memref<1x4x16x18xbf16, #tpu.memory_space<vmem>>, vector<1x4x1x18xbf16>
    %220 = vector.shape_cast %219 : vector<1x4x1x18xbf16> to vector<4x18xbf16>
    %cst_132 = arith.constant dense<0.000000e+00> : vector<4x18xf32>
    %221 = tpu.matmul %49, %30, %cst_132 {dimension_numbers = #tpu.dot_dimension_numbers<[1], [0], [0], [1], [0, 0, 1, 1], [], []>} : vector<4x8xbf16>, vector<8x18xbf16>, vector<4x18xf32> -> vector<4x18xf32>
    %222 = vector.broadcast %53 : vector<4x1xf32> to vector<4x18xf32>
    %223 = arith.addf %221, %222 : vector<4x18xf32>
    %cst_133 = arith.constant dense<0.000000e+00> : vector<4x18xf32>
    %224 = tpu.matmul %50, %220, %cst_133 {dimension_numbers = #tpu.dot_dimension_numbers<[1], [0], [0], [1], [0, 0, 1, 1], [], []>} : vector<4x4xbf16>, vector<4x18xbf16>, vector<4x18xf32> -> vector<4x18xf32>
    %225 = vector.broadcast %54 : vector<4x1xf32> to vector<4x18xf32>
    %226 = arith.addf %224, %225 : vector<4x18xf32>
    %227 = arith.addf %223, %226 : vector<4x18xf32>
    %cst_134 = arith.constant 0.000000e+00 : f32
    %228 = vector.broadcast %cst_134 : f32 to vector<4x18xf32>
    %229 = arith.maximumf %227, %228 : vector<4x18xf32>
    %230 = arith.truncf %229 : vector<4x18xf32> to vector<4x18xbf16>
    %cst_135 = arith.constant dense<0.000000e+00> : vector<4x18xf32>
    %231 = tpu.matmul %51, %230, %cst_135 {dimension_numbers = #tpu.dot_dimension_numbers<[1], [0], [0], [1], [0, 0, 1, 1], [], []>} : vector<4x4xbf16>, vector<4x18xbf16>, vector<4x18xf32> -> vector<4x18xf32>
    %232 = vector.broadcast %55 : vector<4x1xf32> to vector<4x18xf32>
    %233 = arith.addf %231, %232 : vector<4x18xf32>
    %234 = arith.negf %233 : vector<4x18xf32>
    %235 = math.exp %234 : vector<4x18xf32>
    %cst_136 = arith.constant 1.000000e+00 : f32
    %236 = vector.broadcast %cst_136 : f32 to vector<4x18xf32>
    %237 = arith.addf %236, %235 : vector<4x18xf32>
    %238 = arith.divf %236, %237 : vector<4x18xf32>
    %239 = arith.extf %220 : vector<4x18xbf16> to vector<4x18xf32>
    %240 = arith.mulf %238, %239 : vector<4x18xf32>
    %241 = arith.truncf %240 : vector<4x18xf32> to vector<4x18xbf16>
    %c0_137 = arith.constant 0 : index
    %c0_138 = arith.constant 0 : index
    %c8_139 = arith.constant 8 : index
    %c0_140 = arith.constant 0 : index
    %242 = vector.load %arg2[%c0_137, %c0_138, %c8_139, %c0_140] : memref<1x4x16x18xbf16, #tpu.memory_space<vmem>>, vector<1x4x1x18xbf16>
    %243 = vector.shape_cast %242 : vector<1x4x1x18xbf16> to vector<4x18xbf16>
    %cst_141 = arith.constant dense<0.000000e+00> : vector<4x18xf32>
    %244 = tpu.matmul %49, %32, %cst_141 {dimension_numbers = #tpu.dot_dimension_numbers<[1], [0], [0], [1], [0, 0, 1, 1], [], []>} : vector<4x8xbf16>, vector<8x18xbf16>, vector<4x18xf32> -> vector<4x18xf32>
    %245 = vector.broadcast %53 : vector<4x1xf32> to vector<4x18xf32>
    %246 = arith.addf %244, %245 : vector<4x18xf32>
    %cst_142 = arith.constant dense<0.000000e+00> : vector<4x18xf32>
    %247 = tpu.matmul %50, %243, %cst_142 {dimension_numbers = #tpu.dot_dimension_numbers<[1], [0], [0], [1], [0, 0, 1, 1], [], []>} : vector<4x4xbf16>, vector<4x18xbf16>, vector<4x18xf32> -> vector<4x18xf32>
    %248 = vector.broadcast %54 : vector<4x1xf32> to vector<4x18xf32>
    %249 = arith.addf %247, %248 : vector<4x18xf32>
    %250 = arith.addf %246, %249 : vector<4x18xf32>
    %cst_143 = arith.constant 0.000000e+00 : f32
    %251 = vector.broadcast %cst_143 : f32 to vector<4x18xf32>
    %252 = arith.maximumf %250, %251 : vector<4x18xf32>
    %253 = arith.truncf %252 : vector<4x18xf32> to vector<4x18xbf16>
    %cst_144 = arith.constant dense<0.000000e+00> : vector<4x18xf32>
    %254 = tpu.matmul %51, %253, %cst_144 {dimension_numbers = #tpu.dot_dimension_numbers<[1], [0], [0], [1], [0, 0, 1, 1], [], []>} : vector<4x4xbf16>, vector<4x18xbf16>, vector<4x18xf32> -> vector<4x18xf32>
    %255 = vector.broadcast %55 : vector<4x1xf32> to vector<4x18xf32>
    %256 = arith.addf %254, %255 : vector<4x18xf32>
    %257 = arith.negf %256 : vector<4x18xf32>
    %258 = math.exp %257 : vector<4x18xf32>
    %cst_145 = arith.constant 1.000000e+00 : f32
    %259 = vector.broadcast %cst_145 : f32 to vector<4x18xf32>
    %260 = arith.addf %259, %258 : vector<4x18xf32>
    %261 = arith.divf %259, %260 : vector<4x18xf32>
    %262 = arith.extf %243 : vector<4x18xbf16> to vector<4x18xf32>
    %263 = arith.mulf %261, %262 : vector<4x18xf32>
    %264 = arith.truncf %263 : vector<4x18xf32> to vector<4x18xbf16>
    %c0_146 = arith.constant 0 : index
    %c0_147 = arith.constant 0 : index
    %c9_148 = arith.constant 9 : index
    %c0_149 = arith.constant 0 : index
    %265 = vector.load %arg2[%c0_146, %c0_147, %c9_148, %c0_149] : memref<1x4x16x18xbf16, #tpu.memory_space<vmem>>, vector<1x4x1x18xbf16>
    %266 = vector.shape_cast %265 : vector<1x4x1x18xbf16> to vector<4x18xbf16>
    %cst_150 = arith.constant dense<0.000000e+00> : vector<4x18xf32>
    %267 = tpu.matmul %49, %34, %cst_150 {dimension_numbers = #tpu.dot_dimension_numbers<[1], [0], [0], [1], [0, 0, 1, 1], [], []>} : vector<4x8xbf16>, vector<8x18xbf16>, vector<4x18xf32> -> vector<4x18xf32>
    %268 = vector.broadcast %53 : vector<4x1xf32> to vector<4x18xf32>
    %269 = arith.addf %267, %268 : vector<4x18xf32>
    %cst_151 = arith.constant dense<0.000000e+00> : vector<4x18xf32>
    %270 = tpu.matmul %50, %266, %cst_151 {dimension_numbers = #tpu.dot_dimension_numbers<[1], [0], [0], [1], [0, 0, 1, 1], [], []>} : vector<4x4xbf16>, vector<4x18xbf16>, vector<4x18xf32> -> vector<4x18xf32>
    %271 = vector.broadcast %54 : vector<4x1xf32> to vector<4x18xf32>
    %272 = arith.addf %270, %271 : vector<4x18xf32>
    %273 = arith.addf %269, %272 : vector<4x18xf32>
    %cst_152 = arith.constant 0.000000e+00 : f32
    %274 = vector.broadcast %cst_152 : f32 to vector<4x18xf32>
    %275 = arith.maximumf %273, %274 : vector<4x18xf32>
    %276 = arith.truncf %275 : vector<4x18xf32> to vector<4x18xbf16>
    %cst_153 = arith.constant dense<0.000000e+00> : vector<4x18xf32>
    %277 = tpu.matmul %51, %276, %cst_153 {dimension_numbers = #tpu.dot_dimension_numbers<[1], [0], [0], [1], [0, 0, 1, 1], [], []>} : vector<4x4xbf16>, vector<4x18xbf16>, vector<4x18xf32> -> vector<4x18xf32>
    %278 = vector.broadcast %55 : vector<4x1xf32> to vector<4x18xf32>
    %279 = arith.addf %277, %278 : vector<4x18xf32>
    %280 = arith.negf %279 : vector<4x18xf32>
    %281 = math.exp %280 : vector<4x18xf32>
    %cst_154 = arith.constant 1.000000e+00 : f32
    %282 = vector.broadcast %cst_154 : f32 to vector<4x18xf32>
    %283 = arith.addf %282, %281 : vector<4x18xf32>
    %284 = arith.divf %282, %283 : vector<4x18xf32>
    %285 = arith.extf %266 : vector<4x18xbf16> to vector<4x18xf32>
    %286 = arith.mulf %284, %285 : vector<4x18xf32>
    %287 = arith.truncf %286 : vector<4x18xf32> to vector<4x18xbf16>
    %c0_155 = arith.constant 0 : index
    %c0_156 = arith.constant 0 : index
    %c10_157 = arith.constant 10 : index
    %c0_158 = arith.constant 0 : index
    %288 = vector.load %arg2[%c0_155, %c0_156, %c10_157, %c0_158] : memref<1x4x16x18xbf16, #tpu.memory_space<vmem>>, vector<1x4x1x18xbf16>
    %289 = vector.shape_cast %288 : vector<1x4x1x18xbf16> to vector<4x18xbf16>
    %cst_159 = arith.constant dense<0.000000e+00> : vector<4x18xf32>
    %290 = tpu.matmul %49, %36, %cst_159 {dimension_numbers = #tpu.dot_dimension_numbers<[1], [0], [0], [1], [0, 0, 1, 1], [], []>} : vector<4x8xbf16>, vector<8x18xbf16>, vector<4x18xf32> -> vector<4x18xf32>
    %291 = vector.broadcast %53 : vector<4x1xf32> to vector<4x18xf32>
    %292 = arith.addf %290, %291 : vector<4x18xf32>
    %cst_160 = arith.constant dense<0.000000e+00> : vector<4x18xf32>
    %293 = tpu.matmul %50, %289, %cst_160 {dimension_numbers = #tpu.dot_dimension_numbers<[1], [0], [0], [1], [0, 0, 1, 1], [], []>} : vector<4x4xbf16>, vector<4x18xbf16>, vector<4x18xf32> -> vector<4x18xf32>
    %294 = vector.broadcast %54 : vector<4x1xf32> to vector<4x18xf32>
    %295 = arith.addf %293, %294 : vector<4x18xf32>
    %296 = arith.addf %292, %295 : vector<4x18xf32>
    %cst_161 = arith.constant 0.000000e+00 : f32
    %297 = vector.broadcast %cst_161 : f32 to vector<4x18xf32>
    %298 = arith.maximumf %296, %297 : vector<4x18xf32>
    %299 = arith.truncf %298 : vector<4x18xf32> to vector<4x18xbf16>
    %cst_162 = arith.constant dense<0.000000e+00> : vector<4x18xf32>
    %300 = tpu.matmul %51, %299, %cst_162 {dimension_numbers = #tpu.dot_dimension_numbers<[1], [0], [0], [1], [0, 0, 1, 1], [], []>} : vector<4x4xbf16>, vector<4x18xbf16>, vector<4x18xf32> -> vector<4x18xf32>
    %301 = vector.broadcast %55 : vector<4x1xf32> to vector<4x18xf32>
    %302 = arith.addf %300, %301 : vector<4x18xf32>
    %303 = arith.negf %302 : vector<4x18xf32>
    %304 = math.exp %303 : vector<4x18xf32>
    %cst_163 = arith.constant 1.000000e+00 : f32
    %305 = vector.broadcast %cst_163 : f32 to vector<4x18xf32>
    %306 = arith.addf %305, %304 : vector<4x18xf32>
    %307 = arith.divf %305, %306 : vector<4x18xf32>
    %308 = arith.extf %289 : vector<4x18xbf16> to vector<4x18xf32>
    %309 = arith.mulf %307, %308 : vector<4x18xf32>
    %310 = arith.truncf %309 : vector<4x18xf32> to vector<4x18xbf16>
    %c0_164 = arith.constant 0 : index
    %c0_165 = arith.constant 0 : index
    %c11_166 = arith.constant 11 : index
    %c0_167 = arith.constant 0 : index
    %311 = vector.load %arg2[%c0_164, %c0_165, %c11_166, %c0_167] : memref<1x4x16x18xbf16, #tpu.memory_space<vmem>>, vector<1x4x1x18xbf16>
    %312 = vector.shape_cast %311 : vector<1x4x1x18xbf16> to vector<4x18xbf16>
    %cst_168 = arith.constant dense<0.000000e+00> : vector<4x18xf32>
    %313 = tpu.matmul %49, %38, %cst_168 {dimension_numbers = #tpu.dot_dimension_numbers<[1], [0], [0], [1], [0, 0, 1, 1], [], []>} : vector<4x8xbf16>, vector<8x18xbf16>, vector<4x18xf32> -> vector<4x18xf32>
    %314 = vector.broadcast %53 : vector<4x1xf32> to vector<4x18xf32>
    %315 = arith.addf %313, %314 : vector<4x18xf32>
    %cst_169 = arith.constant dense<0.000000e+00> : vector<4x18xf32>
    %316 = tpu.matmul %50, %312, %cst_169 {dimension_numbers = #tpu.dot_dimension_numbers<[1], [0], [0], [1], [0, 0, 1, 1], [], []>} : vector<4x4xbf16>, vector<4x18xbf16>, vector<4x18xf32> -> vector<4x18xf32>
    %317 = vector.broadcast %54 : vector<4x1xf32> to vector<4x18xf32>
    %318 = arith.addf %316, %317 : vector<4x18xf32>
    %319 = arith.addf %315, %318 : vector<4x18xf32>
    %cst_170 = arith.constant 0.000000e+00 : f32
    %320 = vector.broadcast %cst_170 : f32 to vector<4x18xf32>
    %321 = arith.maximumf %319, %320 : vector<4x18xf32>
    %322 = arith.truncf %321 : vector<4x18xf32> to vector<4x18xbf16>
    %cst_171 = arith.constant dense<0.000000e+00> : vector<4x18xf32>
    %323 = tpu.matmul %51, %322, %cst_171 {dimension_numbers = #tpu.dot_dimension_numbers<[1], [0], [0], [1], [0, 0, 1, 1], [], []>} : vector<4x4xbf16>, vector<4x18xbf16>, vector<4x18xf32> -> vector<4x18xf32>
    %324 = vector.broadcast %55 : vector<4x1xf32> to vector<4x18xf32>
    %325 = arith.addf %323, %324 : vector<4x18xf32>
    %326 = arith.negf %325 : vector<4x18xf32>
    %327 = math.exp %326 : vector<4x18xf32>
    %cst_172 = arith.constant 1.000000e+00 : f32
    %328 = vector.broadcast %cst_172 : f32 to vector<4x18xf32>
    %329 = arith.addf %328, %327 : vector<4x18xf32>
    %330 = arith.divf %328, %329 : vector<4x18xf32>
    %331 = arith.extf %312 : vector<4x18xbf16> to vector<4x18xf32>
    %332 = arith.mulf %330, %331 : vector<4x18xf32>
    %333 = arith.truncf %332 : vector<4x18xf32> to vector<4x18xbf16>
    %c0_173 = arith.constant 0 : index
    %c0_174 = arith.constant 0 : index
    %c12_175 = arith.constant 12 : index
    %c0_176 = arith.constant 0 : index
    %334 = vector.load %arg2[%c0_173, %c0_174, %c12_175, %c0_176] : memref<1x4x16x18xbf16, #tpu.memory_space<vmem>>, vector<1x4x1x18xbf16>
    %335 = vector.shape_cast %334 : vector<1x4x1x18xbf16> to vector<4x18xbf16>
    %cst_177 = arith.constant dense<0.000000e+00> : vector<4x18xf32>
    %336 = tpu.matmul %49, %40, %cst_177 {dimension_numbers = #tpu.dot_dimension_numbers<[1], [0], [0], [1], [0, 0, 1, 1], [], []>} : vector<4x8xbf16>, vector<8x18xbf16>, vector<4x18xf32> -> vector<4x18xf32>
    %337 = vector.broadcast %53 : vector<4x1xf32> to vector<4x18xf32>
    %338 = arith.addf %336, %337 : vector<4x18xf32>
    %cst_178 = arith.constant dense<0.000000e+00> : vector<4x18xf32>
    %339 = tpu.matmul %50, %335, %cst_178 {dimension_numbers = #tpu.dot_dimension_numbers<[1], [0], [0], [1], [0, 0, 1, 1], [], []>} : vector<4x4xbf16>, vector<4x18xbf16>, vector<4x18xf32> -> vector<4x18xf32>
    %340 = vector.broadcast %54 : vector<4x1xf32> to vector<4x18xf32>
    %341 = arith.addf %339, %340 : vector<4x18xf32>
    %342 = arith.addf %338, %341 : vector<4x18xf32>
    %cst_179 = arith.constant 0.000000e+00 : f32
    %343 = vector.broadcast %cst_179 : f32 to vector<4x18xf32>
    %344 = arith.maximumf %342, %343 : vector<4x18xf32>
    %345 = arith.truncf %344 : vector<4x18xf32> to vector<4x18xbf16>
    %cst_180 = arith.constant dense<0.000000e+00> : vector<4x18xf32>
    %346 = tpu.matmul %51, %345, %cst_180 {dimension_numbers = #tpu.dot_dimension_numbers<[1], [0], [0], [1], [0, 0, 1, 1], [], []>} : vector<4x4xbf16>, vector<4x18xbf16>, vector<4x18xf32> -> vector<4x18xf32>
    %347 = vector.broadcast %55 : vector<4x1xf32> to vector<4x18xf32>
    %348 = arith.addf %346, %347 : vector<4x18xf32>
    %349 = arith.negf %348 : vector<4x18xf32>
    %350 = math.exp %349 : vector<4x18xf32>
    %cst_181 = arith.constant 1.000000e+00 : f32
    %351 = vector.broadcast %cst_181 : f32 to vector<4x18xf32>
    %352 = arith.addf %351, %350 : vector<4x18xf32>
    %353 = arith.divf %351, %352 : vector<4x18xf32>
    %354 = arith.extf %335 : vector<4x18xbf16> to vector<4x18xf32>
    %355 = arith.mulf %353, %354 : vector<4x18xf32>
    %356 = arith.truncf %355 : vector<4x18xf32> to vector<4x18xbf16>
    %c0_182 = arith.constant 0 : index
    %c0_183 = arith.constant 0 : index
    %c13_184 = arith.constant 13 : index
    %c0_185 = arith.constant 0 : index
    %357 = vector.load %arg2[%c0_182, %c0_183, %c13_184, %c0_185] : memref<1x4x16x18xbf16, #tpu.memory_space<vmem>>, vector<1x4x1x18xbf16>
    %358 = vector.shape_cast %357 : vector<1x4x1x18xbf16> to vector<4x18xbf16>
    %cst_186 = arith.constant dense<0.000000e+00> : vector<4x18xf32>
    %359 = tpu.matmul %49, %42, %cst_186 {dimension_numbers = #tpu.dot_dimension_numbers<[1], [0], [0], [1], [0, 0, 1, 1], [], []>} : vector<4x8xbf16>, vector<8x18xbf16>, vector<4x18xf32> -> vector<4x18xf32>
    %360 = vector.broadcast %53 : vector<4x1xf32> to vector<4x18xf32>
    %361 = arith.addf %359, %360 : vector<4x18xf32>
    %cst_187 = arith.constant dense<0.000000e+00> : vector<4x18xf32>
    %362 = tpu.matmul %50, %358, %cst_187 {dimension_numbers = #tpu.dot_dimension_numbers<[1], [0], [0], [1], [0, 0, 1, 1], [], []>} : vector<4x4xbf16>, vector<4x18xbf16>, vector<4x18xf32> -> vector<4x18xf32>
    %363 = vector.broadcast %54 : vector<4x1xf32> to vector<4x18xf32>
    %364 = arith.addf %362, %363 : vector<4x18xf32>
    %365 = arith.addf %361, %364 : vector<4x18xf32>
    %cst_188 = arith.constant 0.000000e+00 : f32
    %366 = vector.broadcast %cst_188 : f32 to vector<4x18xf32>
    %367 = arith.maximumf %365, %366 : vector<4x18xf32>
    %368 = arith.truncf %367 : vector<4x18xf32> to vector<4x18xbf16>
    %cst_189 = arith.constant dense<0.000000e+00> : vector<4x18xf32>
    %369 = tpu.matmul %51, %368, %cst_189 {dimension_numbers = #tpu.dot_dimension_numbers<[1], [0], [0], [1], [0, 0, 1, 1], [], []>} : vector<4x4xbf16>, vector<4x18xbf16>, vector<4x18xf32> -> vector<4x18xf32>
    %370 = vector.broadcast %55 : vector<4x1xf32> to vector<4x18xf32>
    %371 = arith.addf %369, %370 : vector<4x18xf32>
    %372 = arith.negf %371 : vector<4x18xf32>
    %373 = math.exp %372 : vector<4x18xf32>
    %cst_190 = arith.constant 1.000000e+00 : f32
    %374 = vector.broadcast %cst_190 : f32 to vector<4x18xf32>
    %375 = arith.addf %374, %373 : vector<4x18xf32>
    %376 = arith.divf %374, %375 : vector<4x18xf32>
    %377 = arith.extf %358 : vector<4x18xbf16> to vector<4x18xf32>
    %378 = arith.mulf %376, %377 : vector<4x18xf32>
    %379 = arith.truncf %378 : vector<4x18xf32> to vector<4x18xbf16>
    %c0_191 = arith.constant 0 : index
    %c0_192 = arith.constant 0 : index
    %c14_193 = arith.constant 14 : index
    %c0_194 = arith.constant 0 : index
    %380 = vector.load %arg2[%c0_191, %c0_192, %c14_193, %c0_194] : memref<1x4x16x18xbf16, #tpu.memory_space<vmem>>, vector<1x4x1x18xbf16>
    %381 = vector.shape_cast %380 : vector<1x4x1x18xbf16> to vector<4x18xbf16>
    %cst_195 = arith.constant dense<0.000000e+00> : vector<4x18xf32>
    %382 = tpu.matmul %49, %44, %cst_195 {dimension_numbers = #tpu.dot_dimension_numbers<[1], [0], [0], [1], [0, 0, 1, 1], [], []>} : vector<4x8xbf16>, vector<8x18xbf16>, vector<4x18xf32> -> vector<4x18xf32>
    %383 = vector.broadcast %53 : vector<4x1xf32> to vector<4x18xf32>
    %384 = arith.addf %382, %383 : vector<4x18xf32>
    %cst_196 = arith.constant dense<0.000000e+00> : vector<4x18xf32>
    %385 = tpu.matmul %50, %381, %cst_196 {dimension_numbers = #tpu.dot_dimension_numbers<[1], [0], [0], [1], [0, 0, 1, 1], [], []>} : vector<4x4xbf16>, vector<4x18xbf16>, vector<4x18xf32> -> vector<4x18xf32>
    %386 = vector.broadcast %54 : vector<4x1xf32> to vector<4x18xf32>
    %387 = arith.addf %385, %386 : vector<4x18xf32>
    %388 = arith.addf %384, %387 : vector<4x18xf32>
    %cst_197 = arith.constant 0.000000e+00 : f32
    %389 = vector.broadcast %cst_197 : f32 to vector<4x18xf32>
    %390 = arith.maximumf %388, %389 : vector<4x18xf32>
    %391 = arith.truncf %390 : vector<4x18xf32> to vector<4x18xbf16>
    %cst_198 = arith.constant dense<0.000000e+00> : vector<4x18xf32>
    %392 = tpu.matmul %51, %391, %cst_198 {dimension_numbers = #tpu.dot_dimension_numbers<[1], [0], [0], [1], [0, 0, 1, 1], [], []>} : vector<4x4xbf16>, vector<4x18xbf16>, vector<4x18xf32> -> vector<4x18xf32>
    %393 = vector.broadcast %55 : vector<4x1xf32> to vector<4x18xf32>
    %394 = arith.addf %392, %393 : vector<4x18xf32>
    %395 = arith.negf %394 : vector<4x18xf32>
    %396 = math.exp %395 : vector<4x18xf32>
    %cst_199 = arith.constant 1.000000e+00 : f32
    %397 = vector.broadcast %cst_199 : f32 to vector<4x18xf32>
    %398 = arith.addf %397, %396 : vector<4x18xf32>
    %399 = arith.divf %397, %398 : vector<4x18xf32>
    %400 = arith.extf %381 : vector<4x18xbf16> to vector<4x18xf32>
    %401 = arith.mulf %399, %400 : vector<4x18xf32>
    %402 = arith.truncf %401 : vector<4x18xf32> to vector<4x18xbf16>
    %c0_200 = arith.constant 0 : index
    %c0_201 = arith.constant 0 : index
    %c15_202 = arith.constant 15 : index
    %c0_203 = arith.constant 0 : index
    %403 = vector.load %arg2[%c0_200, %c0_201, %c15_202, %c0_203] : memref<1x4x16x18xbf16, #tpu.memory_space<vmem>>, vector<1x4x1x18xbf16>
    %404 = vector.shape_cast %403 : vector<1x4x1x18xbf16> to vector<4x18xbf16>
    %cst_204 = arith.constant dense<0.000000e+00> : vector<4x18xf32>
    %405 = tpu.matmul %49, %46, %cst_204 {dimension_numbers = #tpu.dot_dimension_numbers<[1], [0], [0], [1], [0, 0, 1, 1], [], []>} : vector<4x8xbf16>, vector<8x18xbf16>, vector<4x18xf32> -> vector<4x18xf32>
    %406 = vector.broadcast %53 : vector<4x1xf32> to vector<4x18xf32>
    %407 = arith.addf %405, %406 : vector<4x18xf32>
    %cst_205 = arith.constant dense<0.000000e+00> : vector<4x18xf32>
    %408 = tpu.matmul %50, %404, %cst_205 {dimension_numbers = #tpu.dot_dimension_numbers<[1], [0], [0], [1], [0, 0, 1, 1], [], []>} : vector<4x4xbf16>, vector<4x18xbf16>, vector<4x18xf32> -> vector<4x18xf32>
    %409 = vector.broadcast %54 : vector<4x1xf32> to vector<4x18xf32>
    %410 = arith.addf %408, %409 : vector<4x18xf32>
    %411 = arith.addf %407, %410 : vector<4x18xf32>
    %cst_206 = arith.constant 0.000000e+00 : f32
    %412 = vector.broadcast %cst_206 : f32 to vector<4x18xf32>
    %413 = arith.maximumf %411, %412 : vector<4x18xf32>
    %414 = arith.truncf %413 : vector<4x18xf32> to vector<4x18xbf16>
    %cst_207 = arith.constant dense<0.000000e+00> : vector<4x18xf32>
    %415 = tpu.matmul %51, %414, %cst_207 {dimension_numbers = #tpu.dot_dimension_numbers<[1], [0], [0], [1], [0, 0, 1, 1], [], []>} : vector<4x4xbf16>, vector<4x18xbf16>, vector<4x18xf32> -> vector<4x18xf32>
    %416 = vector.broadcast %55 : vector<4x1xf32> to vector<4x18xf32>
    %417 = arith.addf %415, %416 : vector<4x18xf32>
    %418 = arith.negf %417 : vector<4x18xf32>
    %419 = math.exp %418 : vector<4x18xf32>
    %cst_208 = arith.constant 1.000000e+00 : f32
    %420 = vector.broadcast %cst_208 : f32 to vector<4x18xf32>
    %421 = arith.addf %420, %419 : vector<4x18xf32>
    %422 = arith.divf %420, %421 : vector<4x18xf32>
    %423 = arith.extf %404 : vector<4x18xbf16> to vector<4x18xf32>
    %424 = arith.mulf %422, %423 : vector<4x18xf32>
    %425 = arith.truncf %424 : vector<4x18xf32> to vector<4x18xbf16>
    %426 = vector.extract_strided_slice %14 {offsets = [0, 0], sizes = [8, 16], strides = [1, 1]} : vector<8x18xbf16> to vector<8x16xbf16>
    %427 = vector.extract_strided_slice %57 {offsets = [0, 0], sizes = [4, 16], strides = [1, 1]} : vector<4x18xbf16> to vector<4x16xbf16>
    %428 = vector.extract_strided_slice %14 {offsets = [0, 1], sizes = [8, 16], strides = [1, 1]} : vector<8x18xbf16> to vector<8x16xbf16>
    %429 = vector.extract_strided_slice %57 {offsets = [0, 1], sizes = [4, 16], strides = [1, 1]} : vector<4x18xbf16> to vector<4x16xbf16>
    %430 = vector.extract_strided_slice %14 {offsets = [0, 2], sizes = [8, 16], strides = [1, 1]} : vector<8x18xbf16> to vector<8x16xbf16>
    %431 = vector.extract_strided_slice %57 {offsets = [0, 2], sizes = [4, 16], strides = [1, 1]} : vector<4x18xbf16> to vector<4x16xbf16>
    %432 = vector.extract_strided_slice %16 {offsets = [0, 0], sizes = [8, 16], strides = [1, 1]} : vector<8x18xbf16> to vector<8x16xbf16>
    %433 = vector.extract_strided_slice %80 {offsets = [0, 0], sizes = [4, 16], strides = [1, 1]} : vector<4x18xbf16> to vector<4x16xbf16>
    %434 = vector.extract_strided_slice %16 {offsets = [0, 1], sizes = [8, 16], strides = [1, 1]} : vector<8x18xbf16> to vector<8x16xbf16>
    %435 = vector.extract_strided_slice %80 {offsets = [0, 1], sizes = [4, 16], strides = [1, 1]} : vector<4x18xbf16> to vector<4x16xbf16>
    %436 = vector.extract_strided_slice %16 {offsets = [0, 2], sizes = [8, 16], strides = [1, 1]} : vector<8x18xbf16> to vector<8x16xbf16>
    %437 = vector.extract_strided_slice %80 {offsets = [0, 2], sizes = [4, 16], strides = [1, 1]} : vector<4x18xbf16> to vector<4x16xbf16>
    %438 = vector.extract_strided_slice %18 {offsets = [0, 0], sizes = [8, 16], strides = [1, 1]} : vector<8x18xbf16> to vector<8x16xbf16>
    %439 = vector.extract_strided_slice %103 {offsets = [0, 0], sizes = [4, 16], strides = [1, 1]} : vector<4x18xbf16> to vector<4x16xbf16>
    %440 = vector.extract_strided_slice %18 {offsets = [0, 1], sizes = [8, 16], strides = [1, 1]} : vector<8x18xbf16> to vector<8x16xbf16>
    %441 = vector.extract_strided_slice %103 {offsets = [0, 1], sizes = [4, 16], strides = [1, 1]} : vector<4x18xbf16> to vector<4x16xbf16>
    %442 = vector.extract_strided_slice %18 {offsets = [0, 2], sizes = [8, 16], strides = [1, 1]} : vector<8x18xbf16> to vector<8x16xbf16>
    %443 = vector.extract_strided_slice %103 {offsets = [0, 2], sizes = [4, 16], strides = [1, 1]} : vector<4x18xbf16> to vector<4x16xbf16>
    %444 = tpu.concatenate %426, %427, %428, %429, %430, %431, %432, %433, %434, %435, %436, %437, %438, %439, %440, %441 in 0 : vector<8x16xbf16>, vector<4x16xbf16>, vector<8x16xbf16>, vector<4x16xbf16>, vector<8x16xbf16>, vector<4x16xbf16>, vector<8x16xbf16>, vector<4x16xbf16>, vector<8x16xbf16>, vector<4x16xbf16>, vector<8x16xbf16>, vector<4x16xbf16>, vector<8x16xbf16>, vector<4x16xbf16>, vector<8x16xbf16>, vector<4x16xbf16> -> vector<96x16xbf16>
    %445 = tpu.concatenate %442, %443 in 0 : vector<8x16xbf16>, vector<4x16xbf16> -> vector<12x16xbf16>
    %446 = tpu.concatenate %444, %445 in 0 : vector<96x16xbf16>, vector<12x16xbf16> -> vector<108x16xbf16>
    %cst_209 = arith.constant dense<0.000000e+00> : vector<4x16xf32>
    %447 = tpu.matmul %52, %446, %cst_209 {dimension_numbers = #tpu.dot_dimension_numbers<[1], [0], [0], [1], [0, 0, 1, 1], [], []>} : vector<4x108xbf16>, vector<108x16xbf16>, vector<4x16xf32> -> vector<4x16xf32>
    %448 = vector.broadcast %56 : vector<4x1xf32> to vector<4x16xf32>
    %449 = arith.addf %447, %448 : vector<4x16xf32>
    %cst_210 = arith.constant 0.000000e+00 : f32
    %450 = vector.broadcast %cst_210 : f32 to vector<4x16xf32>
    %451 = arith.maximumf %449, %450 : vector<4x16xf32>
    %c0_211 = arith.constant 0 : index
    %c0_212 = arith.constant 0 : index
    %c0_213 = arith.constant 0 : index
    %c0_214 = arith.constant 0 : index
    %452 = vector.load %arg13[%c0_211, %c0_212, %c0_213, %c0_214] : memref<1x16x4x16xf32, #tpu.memory_space<vmem>>, vector<1x1x4x16xf32>
    %453 = vector.shape_cast %452 : vector<1x1x4x16xf32> to vector<4x16xf32>
    %454 = vector.shape_cast %451 : vector<4x16xf32> to vector<1x1x4x16xf32>
    tpu.vector_store %arg13[%c0_211, %c0_212, %c0_213, %c0_214], %454 {strides = array<i32>} : memref<1x16x4x16xf32, #tpu.memory_space<vmem>>, vector<1x1x4x16xf32>,
    %455 = vector.extract_strided_slice %16 {offsets = [0, 0], sizes = [8, 16], strides = [1, 1]} : vector<8x18xbf16> to vector<8x16xbf16>
    %456 = vector.extract_strided_slice %80 {offsets = [0, 0], sizes = [4, 16], strides = [1, 1]} : vector<4x18xbf16> to vector<4x16xbf16>
    %457 = vector.extract_strided_slice %16 {offsets = [0, 1], sizes = [8, 16], strides = [1, 1]} : vector<8x18xbf16> to vector<8x16xbf16>
    %458 = vector.extract_strided_slice %80 {offsets = [0, 1], sizes = [4, 16], strides = [1, 1]} : vector<4x18xbf16> to vector<4x16xbf16>
    %459 = vector.extract_strided_slice %16 {offsets = [0, 2], sizes = [8, 16], strides = [1, 1]} : vector<8x18xbf16> to vector<8x16xbf16>
    %460 = vector.extract_strided_slice %80 {offsets = [0, 2], sizes = [4, 16], strides = [1, 1]} : vector<4x18xbf16> to vector<4x16xbf16>
    %461 = vector.extract_strided_slice %18 {offsets = [0, 0], sizes = [8, 16], strides = [1, 1]} : vector<8x18xbf16> to vector<8x16xbf16>
    %462 = vector.extract_strided_slice %103 {offsets = [0, 0], sizes = [4, 16], strides = [1, 1]} : vector<4x18xbf16> to vector<4x16xbf16>
    %463 = vector.extract_strided_slice %18 {offsets = [0, 1], sizes = [8, 16], strides = [1, 1]} : vector<8x18xbf16> to vector<8x16xbf16>
    %464 = vector.extract_strided_slice %103 {offsets = [0, 1], sizes = [4, 16], strides = [1, 1]} : vector<4x18xbf16> to vector<4x16xbf16>
    %465 = vector.extract_strided_slice %18 {offsets = [0, 2], sizes = [8, 16], strides = [1, 1]} : vector<8x18xbf16> to vector<8x16xbf16>
    %466 = vector.extract_strided_slice %103 {offsets = [0, 2], sizes = [4, 16], strides = [1, 1]} : vector<4x18xbf16> to vector<4x16xbf16>
    %467 = vector.extract_strided_slice %20 {offsets = [0, 0], sizes = [8, 16], strides = [1, 1]} : vector<8x18xbf16> to vector<8x16xbf16>
    %468 = vector.extract_strided_slice %126 {offsets = [0, 0], sizes = [4, 16], strides = [1, 1]} : vector<4x18xbf16> to vector<4x16xbf16>
    %469 = vector.extract_strided_slice %20 {offsets = [0, 1], sizes = [8, 16], strides = [1, 1]} : vector<8x18xbf16> to vector<8x16xbf16>
    %470 = vector.extract_strided_slice %126 {offsets = [0, 1], sizes = [4, 16], strides = [1, 1]} : vector<4x18xbf16> to vector<4x16xbf16>
    %471 = vector.extract_strided_slice %20 {offsets = [0, 2], sizes = [8, 16], strides = [1, 1]} : vector<8x18xbf16> to vector<8x16xbf16>
    %472 = vector.extract_strided_slice %126 {offsets = [0, 2], sizes = [4, 16], strides = [1, 1]} : vector<4x18xbf16> to vector<4x16xbf16>
    %473 = tpu.concatenate %455, %456, %457, %458, %459, %460, %461, %462, %463, %464, %465, %466, %467, %468, %469, %470 in 0 : vector<8x16xbf16>, vector<4x16xbf16>, vector<8x16xbf16>, vector<4x16xbf16>, vector<8x16xbf16>, vector<4x16xbf16>, vector<8x16xbf16>, vector<4x16xbf16>, vector<8x16xbf16>, vector<4x16xbf16>, vector<8x16xbf16>, vector<4x16xbf16>, vector<8x16xbf16>, vector<4x16xbf16>, vector<8x16xbf16>, vector<4x16xbf16> -> vector<96x16xbf16>
    %474 = tpu.concatenate %471, %472 in 0 : vector<8x16xbf16>, vector<4x16xbf16> -> vector<12x16xbf16>
    %475 = tpu.concatenate %473, %474 in 0 : vector<96x16xbf16>, vector<12x16xbf16> -> vector<108x16xbf16>
    %cst_215 = arith.constant dense<0.000000e+00> : vector<4x16xf32>
    %476 = tpu.matmul %52, %475, %cst_215 {dimension_numbers = #tpu.dot_dimension_numbers<[1], [0], [0], [1], [0, 0, 1, 1], [], []>} : vector<4x108xbf16>, vector<108x16xbf16>, vector<4x16xf32> -> vector<4x16xf32>
    %477 = vector.broadcast %56 : vector<4x1xf32> to vector<4x16xf32>
    %478 = arith.addf %476, %477 : vector<4x16xf32>
    %cst_216 = arith.constant 0.000000e+00 : f32
    %479 = vector.broadcast %cst_216 : f32 to vector<4x16xf32>
    %480 = arith.maximumf %478, %479 : vector<4x16xf32>
    %c0_217 = arith.constant 0 : index
    %c1_218 = arith.constant 1 : index
    %c0_219 = arith.constant 0 : index
    %c0_220 = arith.constant 0 : index
    %481 = vector.load %arg13[%c0_217, %c1_218, %c0_219, %c0_220] : memref<1x16x4x16xf32, #tpu.memory_space<vmem>>, vector<1x1x4x16xf32>
    %482 = vector.shape_cast %481 : vector<1x1x4x16xf32> to vector<4x16xf32>
    %483 = vector.shape_cast %480 : vector<4x16xf32> to vector<1x1x4x16xf32>
    tpu.vector_store %arg13[%c0_217, %c1_218, %c0_219, %c0_220], %483 {strides = array<i32>} : memref<1x16x4x16xf32, #tpu.memory_space<vmem>>, vector<1x1x4x16xf32>,
    %484 = vector.extract_strided_slice %18 {offsets = [0, 0], sizes = [8, 16], strides = [1, 1]} : vector<8x18xbf16> to vector<8x16xbf16>
    %485 = vector.extract_strided_slice %103 {offsets = [0, 0], sizes = [4, 16], strides = [1, 1]} : vector<4x18xbf16> to vector<4x16xbf16>
    %486 = vector.extract_strided_slice %18 {offsets = [0, 1], sizes = [8, 16], strides = [1, 1]} : vector<8x18xbf16> to vector<8x16xbf16>
    %487 = vector.extract_strided_slice %103 {offsets = [0, 1], sizes = [4, 16], strides = [1, 1]} : vector<4x18xbf16> to vector<4x16xbf16>
    %488 = vector.extract_strided_slice %18 {offsets = [0, 2], sizes = [8, 16], strides = [1, 1]} : vector<8x18xbf16> to vector<8x16xbf16>
    %489 = vector.extract_strided_slice %103 {offsets = [0, 2], sizes = [4, 16], strides = [1, 1]} : vector<4x18xbf16> to vector<4x16xbf16>
    %490 = vector.extract_strided_slice %20 {offsets = [0, 0], sizes = [8, 16], strides = [1, 1]} : vector<8x18xbf16> to vector<8x16xbf16>
    %491 = vector.extract_strided_slice %126 {offsets = [0, 0], sizes = [4, 16], strides = [1, 1]} : vector<4x18xbf16> to vector<4x16xbf16>
    %492 = vector.extract_strided_slice %20 {offsets = [0, 1], sizes = [8, 16], strides = [1, 1]} : vector<8x18xbf16> to vector<8x16xbf16>
    %493 = vector.extract_strided_slice %126 {offsets = [0, 1], sizes = [4, 16], strides = [1, 1]} : vector<4x18xbf16> to vector<4x16xbf16>
    %494 = vector.extract_strided_slice %20 {offsets = [0, 2], sizes = [8, 16], strides = [1, 1]} : vector<8x18xbf16> to vector<8x16xbf16>
    %495 = vector.extract_strided_slice %126 {offsets = [0, 2], sizes = [4, 16], strides = [1, 1]} : vector<4x18xbf16> to vector<4x16xbf16>
    %496 = vector.extract_strided_slice %22 {offsets = [0, 0], sizes = [8, 16], strides = [1, 1]} : vector<8x18xbf16> to vector<8x16xbf16>
    %497 = vector.extract_strided_slice %149 {offsets = [0, 0], sizes = [4, 16], strides = [1, 1]} : vector<4x18xbf16> to vector<4x16xbf16>
    %498 = vector.extract_strided_slice %22 {offsets = [0, 1], sizes = [8, 16], strides = [1, 1]} : vector<8x18xbf16> to vector<8x16xbf16>
    %499 = vector.extract_strided_slice %149 {offsets = [0, 1], sizes = [4, 16], strides = [1, 1]} : vector<4x18xbf16> to vector<4x16xbf16>
    %500 = vector.extract_strided_slice %22 {offsets = [0, 2], sizes = [8, 16], strides = [1, 1]} : vector<8x18xbf16> to vector<8x16xbf16>
    %501 = vector.extract_strided_slice %149 {offsets = [0, 2], sizes = [4, 16], strides = [1, 1]} : vector<4x18xbf16> to vector<4x16xbf16>
    %502 = tpu.concatenate %484, %485, %486, %487, %488, %489, %490, %491, %492, %493, %494, %495, %496, %497, %498, %499 in 0 : vector<8x16xbf16>, vector<4x16xbf16>, vector<8x16xbf16>, vector<4x16xbf16>, vector<8x16xbf16>, vector<4x16xbf16>, vector<8x16xbf16>, vector<4x16xbf16>, vector<8x16xbf16>, vector<4x16xbf16>, vector<8x16xbf16>, vector<4x16xbf16>, vector<8x16xbf16>, vector<4x16xbf16>, vector<8x16xbf16>, vector<4x16xbf16> -> vector<96x16xbf16>
    %503 = tpu.concatenate %500, %501 in 0 : vector<8x16xbf16>, vector<4x16xbf16> -> vector<12x16xbf16>
    %504 = tpu.concatenate %502, %503 in 0 : vector<96x16xbf16>, vector<12x16xbf16> -> vector<108x16xbf16>
    %cst_221 = arith.constant dense<0.000000e+00> : vector<4x16xf32>
    %505 = tpu.matmul %52, %504, %cst_221 {dimension_numbers = #tpu.dot_dimension_numbers<[1], [0], [0], [1], [0, 0, 1, 1], [], []>} : vector<4x108xbf16>, vector<108x16xbf16>, vector<4x16xf32> -> vector<4x16xf32>
    %506 = vector.broadcast %56 : vector<4x1xf32> to vector<4x16xf32>
    %507 = arith.addf %505, %506 : vector<4x16xf32>
    %cst_222 = arith.constant 0.000000e+00 : f32
    %508 = vector.broadcast %cst_222 : f32 to vector<4x16xf32>
    %509 = arith.maximumf %507, %508 : vector<4x16xf32>
    %c0_223 = arith.constant 0 : index
    %c2_224 = arith.constant 2 : index
    %c0_225 = arith.constant 0 : index
    %c0_226 = arith.constant 0 : index
    %510 = vector.load %arg13[%c0_223, %c2_224, %c0_225, %c0_226] : memref<1x16x4x16xf32, #tpu.memory_space<vmem>>, vector<1x1x4x16xf32>
    %511 = vector.shape_cast %510 : vector<1x1x4x16xf32> to vector<4x16xf32>
    %512 = vector.shape_cast %509 : vector<4x16xf32> to vector<1x1x4x16xf32>
    tpu.vector_store %arg13[%c0_223, %c2_224, %c0_225, %c0_226], %512 {strides = array<i32>} : memref<1x16x4x16xf32, #tpu.memory_space<vmem>>, vector<1x1x4x16xf32>,
    %513 = vector.extract_strided_slice %20 {offsets = [0, 0], sizes = [8, 16], strides = [1, 1]} : vector<8x18xbf16> to vector<8x16xbf16>
    %514 = vector.extract_strided_slice %126 {offsets = [0, 0], sizes = [4, 16], strides = [1, 1]} : vector<4x18xbf16> to vector<4x16xbf16>
    %515 = vector.extract_strided_slice %20 {offsets = [0, 1], sizes = [8, 16], strides = [1, 1]} : vector<8x18xbf16> to vector<8x16xbf16>
    %516 = vector.extract_strided_slice %126 {offsets = [0, 1], sizes = [4, 16], strides = [1, 1]} : vector<4x18xbf16> to vector<4x16xbf16>
    %517 = vector.extract_strided_slice %20 {offsets = [0, 2], sizes = [8, 16], strides = [1, 1]} : vector<8x18xbf16> to vector<8x16xbf16>
    %518 = vector.extract_strided_slice %126 {offsets = [0, 2], sizes = [4, 16], strides = [1, 1]} : vector<4x18xbf16> to vector<4x16xbf16>
    %519 = vector.extract_strided_slice %22 {offsets = [0, 0], sizes = [8, 16], strides = [1, 1]} : vector<8x18xbf16> to vector<8x16xbf16>
    %520 = vector.extract_strided_slice %149 {offsets = [0, 0], sizes = [4, 16], strides = [1, 1]} : vector<4x18xbf16> to vector<4x16xbf16>
    %521 = vector.extract_strided_slice %22 {offsets = [0, 1], sizes = [8, 16], strides = [1, 1]} : vector<8x18xbf16> to vector<8x16xbf16>
    %522 = vector.extract_strided_slice %149 {offsets = [0, 1], sizes = [4, 16], strides = [1, 1]} : vector<4x18xbf16> to vector<4x16xbf16>
    %523 = vector.extract_strided_slice %22 {offsets = [0, 2], sizes = [8, 16], strides = [1, 1]} : vector<8x18xbf16> to vector<8x16xbf16>
    %524 = vector.extract_strided_slice %149 {offsets = [0, 2], sizes = [4, 16], strides = [1, 1]} : vector<4x18xbf16> to vector<4x16xbf16>
    %525 = vector.extract_strided_slice %24 {offsets = [0, 0], sizes = [8, 16], strides = [1, 1]} : vector<8x18xbf16> to vector<8x16xbf16>
    %526 = vector.extract_strided_slice %172 {offsets = [0, 0], sizes = [4, 16], strides = [1, 1]} : vector<4x18xbf16> to vector<4x16xbf16>
    %527 = vector.extract_strided_slice %24 {offsets = [0, 1], sizes = [8, 16], strides = [1, 1]} : vector<8x18xbf16> to vector<8x16xbf16>
    %528 = vector.extract_strided_slice %172 {offsets = [0, 1], sizes = [4, 16], strides = [1, 1]} : vector<4x18xbf16> to vector<4x16xbf16>
    %529 = vector.extract_strided_slice %24 {offsets = [0, 2], sizes = [8, 16], strides = [1, 1]} : vector<8x18xbf16> to vector<8x16xbf16>
    %530 = vector.extract_strided_slice %172 {offsets = [0, 2], sizes = [4, 16], strides = [1, 1]} : vector<4x18xbf16> to vector<4x16xbf16>
    %531 = tpu.concatenate %513, %514, %515, %516, %517, %518, %519, %520, %521, %522, %523, %524, %525, %526, %527, %528 in 0 : vector<8x16xbf16>, vector<4x16xbf16>, vector<8x16xbf16>, vector<4x16xbf16>, vector<8x16xbf16>, vector<4x16xbf16>, vector<8x16xbf16>, vector<4x16xbf16>, vector<8x16xbf16>, vector<4x16xbf16>, vector<8x16xbf16>, vector<4x16xbf16>, vector<8x16xbf16>, vector<4x16xbf16>, vector<8x16xbf16>, vector<4x16xbf16> -> vector<96x16xbf16>
    %532 = tpu.concatenate %529, %530 in 0 : vector<8x16xbf16>, vector<4x16xbf16> -> vector<12x16xbf16>
    %533 = tpu.concatenate %531, %532 in 0 : vector<96x16xbf16>, vector<12x16xbf16> -> vector<108x16xbf16>
    %cst_227 = arith.constant dense<0.000000e+00> : vector<4x16xf32>
    %534 = tpu.matmul %52, %533, %cst_227 {dimension_numbers = #tpu.dot_dimension_numbers<[1], [0], [0], [1], [0, 0, 1, 1], [], []>} : vector<4x108xbf16>, vector<108x16xbf16>, vector<4x16xf32> -> vector<4x16xf32>
    %535 = vector.broadcast %56 : vector<4x1xf32> to vector<4x16xf32>
    %536 = arith.addf %534, %535 : vector<4x16xf32>
    %cst_228 = arith.constant 0.000000e+00 : f32
    %537 = vector.broadcast %cst_228 : f32 to vector<4x16xf32>
    %538 = arith.maximumf %536, %537 : vector<4x16xf32>
    %c0_229 = arith.constant 0 : index
    %c3_230 = arith.constant 3 : index
    %c0_231 = arith.constant 0 : index
    %c0_232 = arith.constant 0 : index
    %539 = vector.load %arg13[%c0_229, %c3_230, %c0_231, %c0_232] : memref<1x16x4x16xf32, #tpu.memory_space<vmem>>, vector<1x1x4x16xf32>
    %540 = vector.shape_cast %539 : vector<1x1x4x16xf32> to vector<4x16xf32>
    %541 = vector.shape_cast %538 : vector<4x16xf32> to vector<1x1x4x16xf32>
    tpu.vector_store %arg13[%c0_229, %c3_230, %c0_231, %c0_232], %541 {strides = array<i32>} : memref<1x16x4x16xf32, #tpu.memory_space<vmem>>, vector<1x1x4x16xf32>,
    %542 = vector.extract_strided_slice %22 {offsets = [0, 0], sizes = [8, 16], strides = [1, 1]} : vector<8x18xbf16> to vector<8x16xbf16>
    %543 = vector.extract_strided_slice %149 {offsets = [0, 0], sizes = [4, 16], strides = [1, 1]} : vector<4x18xbf16> to vector<4x16xbf16>
    %544 = vector.extract_strided_slice %22 {offsets = [0, 1], sizes = [8, 16], strides = [1, 1]} : vector<8x18xbf16> to vector<8x16xbf16>
    %545 = vector.extract_strided_slice %149 {offsets = [0, 1], sizes = [4, 16], strides = [1, 1]} : vector<4x18xbf16> to vector<4x16xbf16>
    %546 = vector.extract_strided_slice %22 {offsets = [0, 2], sizes = [8, 16], strides = [1, 1]} : vector<8x18xbf16> to vector<8x16xbf16>
    %547 = vector.extract_strided_slice %149 {offsets = [0, 2], sizes = [4, 16], strides = [1, 1]} : vector<4x18xbf16> to vector<4x16xbf16>
    %548 = vector.extract_strided_slice %24 {offsets = [0, 0], sizes = [8, 16], strides = [1, 1]} : vector<8x18xbf16> to vector<8x16xbf16>
    %549 = vector.extract_strided_slice %172 {offsets = [0, 0], sizes = [4, 16], strides = [1, 1]} : vector<4x18xbf16> to vector<4x16xbf16>
    %550 = vector.extract_strided_slice %24 {offsets = [0, 1], sizes = [8, 16], strides = [1, 1]} : vector<8x18xbf16> to vector<8x16xbf16>
    %551 = vector.extract_strided_slice %172 {offsets = [0, 1], sizes = [4, 16], strides = [1, 1]} : vector<4x18xbf16> to vector<4x16xbf16>
    %552 = vector.extract_strided_slice %24 {offsets = [0, 2], sizes = [8, 16], strides = [1, 1]} : vector<8x18xbf16> to vector<8x16xbf16>
    %553 = vector.extract_strided_slice %172 {offsets = [0, 2], sizes = [4, 16], strides = [1, 1]} : vector<4x18xbf16> to vector<4x16xbf16>
    %554 = vector.extract_strided_slice %26 {offsets = [0, 0], sizes = [8, 16], strides = [1, 1]} : vector<8x18xbf16> to vector<8x16xbf16>
    %555 = vector.extract_strided_slice %195 {offsets = [0, 0], sizes = [4, 16], strides = [1, 1]} : vector<4x18xbf16> to vector<4x16xbf16>
    %556 = vector.extract_strided_slice %26 {offsets = [0, 1], sizes = [8, 16], strides = [1, 1]} : vector<8x18xbf16> to vector<8x16xbf16>
    %557 = vector.extract_strided_slice %195 {offsets = [0, 1], sizes = [4, 16], strides = [1, 1]} : vector<4x18xbf16> to vector<4x16xbf16>
    %558 = vector.extract_strided_slice %26 {offsets = [0, 2], sizes = [8, 16], strides = [1, 1]} : vector<8x18xbf16> to vector<8x16xbf16>
    %559 = vector.extract_strided_slice %195 {offsets = [0, 2], sizes = [4, 16], strides = [1, 1]} : vector<4x18xbf16> to vector<4x16xbf16>
    %560 = tpu.concatenate %542, %543, %544, %545, %546, %547, %548, %549, %550, %551, %552, %553, %554, %555, %556, %557 in 0 : vector<8x16xbf16>, vector<4x16xbf16>, vector<8x16xbf16>, vector<4x16xbf16>, vector<8x16xbf16>, vector<4x16xbf16>, vector<8x16xbf16>, vector<4x16xbf16>, vector<8x16xbf16>, vector<4x16xbf16>, vector<8x16xbf16>, vector<4x16xbf16>, vector<8x16xbf16>, vector<4x16xbf16>, vector<8x16xbf16>, vector<4x16xbf16> -> vector<96x16xbf16>
    %561 = tpu.concatenate %558, %559 in 0 : vector<8x16xbf16>, vector<4x16xbf16> -> vector<12x16xbf16>
    %562 = tpu.concatenate %560, %561 in 0 : vector<96x16xbf16>, vector<12x16xbf16> -> vector<108x16xbf16>
    %cst_233 = arith.constant dense<0.000000e+00> : vector<4x16xf32>
    %563 = tpu.matmul %52, %562, %cst_233 {dimension_numbers = #tpu.dot_dimension_numbers<[1], [0], [0], [1], [0, 0, 1, 1], [], []>} : vector<4x108xbf16>, vector<108x16xbf16>, vector<4x16xf32> -> vector<4x16xf32>
    %564 = vector.broadcast %56 : vector<4x1xf32> to vector<4x16xf32>
    %565 = arith.addf %563, %564 : vector<4x16xf32>
    %cst_234 = arith.constant 0.000000e+00 : f32
    %566 = vector.broadcast %cst_234 : f32 to vector<4x16xf32>
    %567 = arith.maximumf %565, %566 : vector<4x16xf32>
    %c0_235 = arith.constant 0 : index
    %c4_236 = arith.constant 4 : index
    %c0_237 = arith.constant 0 : index
    %c0_238 = arith.constant 0 : index
    %568 = vector.load %arg13[%c0_235, %c4_236, %c0_237, %c0_238] : memref<1x16x4x16xf32, #tpu.memory_space<vmem>>, vector<1x1x4x16xf32>
    %569 = vector.shape_cast %568 : vector<1x1x4x16xf32> to vector<4x16xf32>
    %570 = vector.shape_cast %567 : vector<4x16xf32> to vector<1x1x4x16xf32>
    tpu.vector_store %arg13[%c0_235, %c4_236, %c0_237, %c0_238], %570 {strides = array<i32>} : memref<1x16x4x16xf32, #tpu.memory_space<vmem>>, vector<1x1x4x16xf32>,
    %571 = vector.extract_strided_slice %24 {offsets = [0, 0], sizes = [8, 16], strides = [1, 1]} : vector<8x18xbf16> to vector<8x16xbf16>
    %572 = vector.extract_strided_slice %172 {offsets = [0, 0], sizes = [4, 16], strides = [1, 1]} : vector<4x18xbf16> to vector<4x16xbf16>
    %573 = vector.extract_strided_slice %24 {offsets = [0, 1], sizes = [8, 16], strides = [1, 1]} : vector<8x18xbf16> to vector<8x16xbf16>
    %574 = vector.extract_strided_slice %172 {offsets = [0, 1], sizes = [4, 16], strides = [1, 1]} : vector<4x18xbf16> to vector<4x16xbf16>
    %575 = vector.extract_strided_slice %24 {offsets = [0, 2], sizes = [8, 16], strides = [1, 1]} : vector<8x18xbf16> to vector<8x16xbf16>
    %576 = vector.extract_strided_slice %172 {offsets = [0, 2], sizes = [4, 16], strides = [1, 1]} : vector<4x18xbf16> to vector<4x16xbf16>
    %577 = vector.extract_strided_slice %26 {offsets = [0, 0], sizes = [8, 16], strides = [1, 1]} : vector<8x18xbf16> to vector<8x16xbf16>
    %578 = vector.extract_strided_slice %195 {offsets = [0, 0], sizes = [4, 16], strides = [1, 1]} : vector<4x18xbf16> to vector<4x16xbf16>
    %579 = vector.extract_strided_slice %26 {offsets = [0, 1], sizes = [8, 16], strides = [1, 1]} : vector<8x18xbf16> to vector<8x16xbf16>
    %580 = vector.extract_strided_slice %195 {offsets = [0, 1], sizes = [4, 16], strides = [1, 1]} : vector<4x18xbf16> to vector<4x16xbf16>
    %581 = vector.extract_strided_slice %26 {offsets = [0, 2], sizes = [8, 16], strides = [1, 1]} : vector<8x18xbf16> to vector<8x16xbf16>
    %582 = vector.extract_strided_slice %195 {offsets = [0, 2], sizes = [4, 16], strides = [1, 1]} : vector<4x18xbf16> to vector<4x16xbf16>
    %583 = vector.extract_strided_slice %28 {offsets = [0, 0], sizes = [8, 16], strides = [1, 1]} : vector<8x18xbf16> to vector<8x16xbf16>
    %584 = vector.extract_strided_slice %218 {offsets = [0, 0], sizes = [4, 16], strides = [1, 1]} : vector<4x18xbf16> to vector<4x16xbf16>
    %585 = vector.extract_strided_slice %28 {offsets = [0, 1], sizes = [8, 16], strides = [1, 1]} : vector<8x18xbf16> to vector<8x16xbf16>
    %586 = vector.extract_strided_slice %218 {offsets = [0, 1], sizes = [4, 16], strides = [1, 1]} : vector<4x18xbf16> to vector<4x16xbf16>
    %587 = vector.extract_strided_slice %28 {offsets = [0, 2], sizes = [8, 16], strides = [1, 1]} : vector<8x18xbf16> to vector<8x16xbf16>
    %588 = vector.extract_strided_slice %218 {offsets = [0, 2], sizes = [4, 16], strides = [1, 1]} : vector<4x18xbf16> to vector<4x16xbf16>
    %589 = tpu.concatenate %571, %572, %573, %574, %575, %576, %577, %578, %579, %580, %581, %582, %583, %584, %585, %586 in 0 : vector<8x16xbf16>, vector<4x16xbf16>, vector<8x16xbf16>, vector<4x16xbf16>, vector<8x16xbf16>, vector<4x16xbf16>, vector<8x16xbf16>, vector<4x16xbf16>, vector<8x16xbf16>, vector<4x16xbf16>, vector<8x16xbf16>, vector<4x16xbf16>, vector<8x16xbf16>, vector<4x16xbf16>, vector<8x16xbf16>, vector<4x16xbf16> -> vector<96x16xbf16>
    %590 = tpu.concatenate %587, %588 in 0 : vector<8x16xbf16>, vector<4x16xbf16> -> vector<12x16xbf16>
    %591 = tpu.concatenate %589, %590 in 0 : vector<96x16xbf16>, vector<12x16xbf16> -> vector<108x16xbf16>
    %cst_239 = arith.constant dense<0.000000e+00> : vector<4x16xf32>
    %592 = tpu.matmul %52, %591, %cst_239 {dimension_numbers = #tpu.dot_dimension_numbers<[1], [0], [0], [1], [0, 0, 1, 1], [], []>} : vector<4x108xbf16>, vector<108x16xbf16>, vector<4x16xf32> -> vector<4x16xf32>
    %593 = vector.broadcast %56 : vector<4x1xf32> to vector<4x16xf32>
    %594 = arith.addf %592, %593 : vector<4x16xf32>
    %cst_240 = arith.constant 0.000000e+00 : f32
    %595 = vector.broadcast %cst_240 : f32 to vector<4x16xf32>
    %596 = arith.maximumf %594, %595 : vector<4x16xf32>
    %c0_241 = arith.constant 0 : index
    %c5_242 = arith.constant 5 : index
    %c0_243 = arith.constant 0 : index
    %c0_244 = arith.constant 0 : index
    %597 = vector.load %arg13[%c0_241, %c5_242, %c0_243, %c0_244] : memref<1x16x4x16xf32, #tpu.memory_space<vmem>>, vector<1x1x4x16xf32>
    %598 = vector.shape_cast %597 : vector<1x1x4x16xf32> to vector<4x16xf32>
    %599 = vector.shape_cast %596 : vector<4x16xf32> to vector<1x1x4x16xf32>
    tpu.vector_store %arg13[%c0_241, %c5_242, %c0_243, %c0_244], %599 {strides = array<i32>} : memref<1x16x4x16xf32, #tpu.memory_space<vmem>>, vector<1x1x4x16xf32>,
    %600 = vector.extract_strided_slice %26 {offsets = [0, 0], sizes = [8, 16], strides = [1, 1]} : vector<8x18xbf16> to vector<8x16xbf16>
    %601 = vector.extract_strided_slice %195 {offsets = [0, 0], sizes = [4, 16], strides = [1, 1]} : vector<4x18xbf16> to vector<4x16xbf16>
    %602 = vector.extract_strided_slice %26 {offsets = [0, 1], sizes = [8, 16], strides = [1, 1]} : vector<8x18xbf16> to vector<8x16xbf16>
    %603 = vector.extract_strided_slice %195 {offsets = [0, 1], sizes = [4, 16], strides = [1, 1]} : vector<4x18xbf16> to vector<4x16xbf16>
    %604 = vector.extract_strided_slice %26 {offsets = [0, 2], sizes = [8, 16], strides = [1, 1]} : vector<8x18xbf16> to vector<8x16xbf16>
    %605 = vector.extract_strided_slice %195 {offsets = [0, 2], sizes = [4, 16], strides = [1, 1]} : vector<4x18xbf16> to vector<4x16xbf16>
    %606 = vector.extract_strided_slice %28 {offsets = [0, 0], sizes = [8, 16], strides = [1, 1]} : vector<8x18xbf16> to vector<8x16xbf16>
    %607 = vector.extract_strided_slice %218 {offsets = [0, 0], sizes = [4, 16], strides = [1, 1]} : vector<4x18xbf16> to vector<4x16xbf16>
    %608 = vector.extract_strided_slice %28 {offsets = [0, 1], sizes = [8, 16], strides = [1, 1]} : vector<8x18xbf16> to vector<8x16xbf16>
    %609 = vector.extract_strided_slice %218 {offsets = [0, 1], sizes = [4, 16], strides = [1, 1]} : vector<4x18xbf16> to vector<4x16xbf16>
    %610 = vector.extract_strided_slice %28 {offsets = [0, 2], sizes = [8, 16], strides = [1, 1]} : vector<8x18xbf16> to vector<8x16xbf16>
    %611 = vector.extract_strided_slice %218 {offsets = [0, 2], sizes = [4, 16], strides = [1, 1]} : vector<4x18xbf16> to vector<4x16xbf16>
    %612 = vector.extract_strided_slice %30 {offsets = [0, 0], sizes = [8, 16], strides = [1, 1]} : vector<8x18xbf16> to vector<8x16xbf16>
    %613 = vector.extract_strided_slice %241 {offsets = [0, 0], sizes = [4, 16], strides = [1, 1]} : vector<4x18xbf16> to vector<4x16xbf16>
    %614 = vector.extract_strided_slice %30 {offsets = [0, 1], sizes = [8, 16], strides = [1, 1]} : vector<8x18xbf16> to vector<8x16xbf16>
    %615 = vector.extract_strided_slice %241 {offsets = [0, 1], sizes = [4, 16], strides = [1, 1]} : vector<4x18xbf16> to vector<4x16xbf16>
    %616 = vector.extract_strided_slice %30 {offsets = [0, 2], sizes = [8, 16], strides = [1, 1]} : vector<8x18xbf16> to vector<8x16xbf16>
    %617 = vector.extract_strided_slice %241 {offsets = [0, 2], sizes = [4, 16], strides = [1, 1]} : vector<4x18xbf16> to vector<4x16xbf16>
    %618 = tpu.concatenate %600, %601, %602, %603, %604, %605, %606, %607, %608, %609, %610, %611, %612, %613, %614, %615 in 0 : vector<8x16xbf16>, vector<4x16xbf16>, vector<8x16xbf16>, vector<4x16xbf16>, vector<8x16xbf16>, vector<4x16xbf16>, vector<8x16xbf16>, vector<4x16xbf16>, vector<8x16xbf16>, vector<4x16xbf16>, vector<8x16xbf16>, vector<4x16xbf16>, vector<8x16xbf16>, vector<4x16xbf16>, vector<8x16xbf16>, vector<4x16xbf16> -> vector<96x16xbf16>
    %619 = tpu.concatenate %616, %617 in 0 : vector<8x16xbf16>, vector<4x16xbf16> -> vector<12x16xbf16>
    %620 = tpu.concatenate %618, %619 in 0 : vector<96x16xbf16>, vector<12x16xbf16> -> vector<108x16xbf16>
    %cst_245 = arith.constant dense<0.000000e+00> : vector<4x16xf32>
    %621 = tpu.matmul %52, %620, %cst_245 {dimension_numbers = #tpu.dot_dimension_numbers<[1], [0], [0], [1], [0, 0, 1, 1], [], []>} : vector<4x108xbf16>, vector<108x16xbf16>, vector<4x16xf32> -> vector<4x16xf32>
    %622 = vector.broadcast %56 : vector<4x1xf32> to vector<4x16xf32>
    %623 = arith.addf %621, %622 : vector<4x16xf32>
    %cst_246 = arith.constant 0.000000e+00 : f32
    %624 = vector.broadcast %cst_246 : f32 to vector<4x16xf32>
    %625 = arith.maximumf %623, %624 : vector<4x16xf32>
    %c0_247 = arith.constant 0 : index
    %c6_248 = arith.constant 6 : index
    %c0_249 = arith.constant 0 : index
    %c0_250 = arith.constant 0 : index
    %626 = vector.load %arg13[%c0_247, %c6_248, %c0_249, %c0_250] : memref<1x16x4x16xf32, #tpu.memory_space<vmem>>, vector<1x1x4x16xf32>
    %627 = vector.shape_cast %626 : vector<1x1x4x16xf32> to vector<4x16xf32>
    %628 = vector.shape_cast %625 : vector<4x16xf32> to vector<1x1x4x16xf32>
    tpu.vector_store %arg13[%c0_247, %c6_248, %c0_249, %c0_250], %628 {strides = array<i32>} : memref<1x16x4x16xf32, #tpu.memory_space<vmem>>, vector<1x1x4x16xf32>,
    %629 = vector.extract_strided_slice %28 {offsets = [0, 0], sizes = [8, 16], strides = [1, 1]} : vector<8x18xbf16> to vector<8x16xbf16>
    %630 = vector.extract_strided_slice %218 {offsets = [0, 0], sizes = [4, 16], strides = [1, 1]} : vector<4x18xbf16> to vector<4x16xbf16>
    %631 = vector.extract_strided_slice %28 {offsets = [0, 1], sizes = [8, 16], strides = [1, 1]} : vector<8x18xbf16> to vector<8x16xbf16>
    %632 = vector.extract_strided_slice %218 {offsets = [0, 1], sizes = [4, 16], strides = [1, 1]} : vector<4x18xbf16> to vector<4x16xbf16>
    %633 = vector.extract_strided_slice %28 {offsets = [0, 2], sizes = [8, 16], strides = [1, 1]} : vector<8x18xbf16> to vector<8x16xbf16>
    %634 = vector.extract_strided_slice %218 {offsets = [0, 2], sizes = [4, 16], strides = [1, 1]} : vector<4x18xbf16> to vector<4x16xbf16>
    %635 = vector.extract_strided_slice %30 {offsets = [0, 0], sizes = [8, 16], strides = [1, 1]} : vector<8x18xbf16> to vector<8x16xbf16>
    %636 = vector.extract_strided_slice %241 {offsets = [0, 0], sizes = [4, 16], strides = [1, 1]} : vector<4x18xbf16> to vector<4x16xbf16>
    %637 = vector.extract_strided_slice %30 {offsets = [0, 1], sizes = [8, 16], strides = [1, 1]} : vector<8x18xbf16> to vector<8x16xbf16>
    %638 = vector.extract_strided_slice %241 {offsets = [0, 1], sizes = [4, 16], strides = [1, 1]} : vector<4x18xbf16> to vector<4x16xbf16>
    %639 = vector.extract_strided_slice %30 {offsets = [0, 2], sizes = [8, 16], strides = [1, 1]} : vector<8x18xbf16> to vector<8x16xbf16>
    %640 = vector.extract_strided_slice %241 {offsets = [0, 2], sizes = [4, 16], strides = [1, 1]} : vector<4x18xbf16> to vector<4x16xbf16>
    %641 = vector.extract_strided_slice %32 {offsets = [0, 0], sizes = [8, 16], strides = [1, 1]} : vector<8x18xbf16> to vector<8x16xbf16>
    %642 = vector.extract_strided_slice %264 {offsets = [0, 0], sizes = [4, 16], strides = [1, 1]} : vector<4x18xbf16> to vector<4x16xbf16>
    %643 = vector.extract_strided_slice %32 {offsets = [0, 1], sizes = [8, 16], strides = [1, 1]} : vector<8x18xbf16> to vector<8x16xbf16>
    %644 = vector.extract_strided_slice %264 {offsets = [0, 1], sizes = [4, 16], strides = [1, 1]} : vector<4x18xbf16> to vector<4x16xbf16>
    %645 = vector.extract_strided_slice %32 {offsets = [0, 2], sizes = [8, 16], strides = [1, 1]} : vector<8x18xbf16> to vector<8x16xbf16>
    %646 = vector.extract_strided_slice %264 {offsets = [0, 2], sizes = [4, 16], strides = [1, 1]} : vector<4x18xbf16> to vector<4x16xbf16>
    %647 = tpu.concatenate %629, %630, %631, %632, %633, %634, %635, %636, %637, %638, %639, %640, %641, %642, %643, %644 in 0 : vector<8x16xbf16>, vector<4x16xbf16>, vector<8x16xbf16>, vector<4x16xbf16>, vector<8x16xbf16>, vector<4x16xbf16>, vector<8x16xbf16>, vector<4x16xbf16>, vector<8x16xbf16>, vector<4x16xbf16>, vector<8x16xbf16>, vector<4x16xbf16>, vector<8x16xbf16>, vector<4x16xbf16>, vector<8x16xbf16>, vector<4x16xbf16> -> vector<96x16xbf16>
    %648 = tpu.concatenate %645, %646 in 0 : vector<8x16xbf16>, vector<4x16xbf16> -> vector<12x16xbf16>
    %649 = tpu.concatenate %647, %648 in 0 : vector<96x16xbf16>, vector<12x16xbf16> -> vector<108x16xbf16>
    %cst_251 = arith.constant dense<0.000000e+00> : vector<4x16xf32>
    %650 = tpu.matmul %52, %649, %cst_251 {dimension_numbers = #tpu.dot_dimension_numbers<[1], [0], [0], [1], [0, 0, 1, 1], [], []>} : vector<4x108xbf16>, vector<108x16xbf16>, vector<4x16xf32> -> vector<4x16xf32>
    %651 = vector.broadcast %56 : vector<4x1xf32> to vector<4x16xf32>
    %652 = arith.addf %650, %651 : vector<4x16xf32>
    %cst_252 = arith.constant 0.000000e+00 : f32
    %653 = vector.broadcast %cst_252 : f32 to vector<4x16xf32>
    %654 = arith.maximumf %652, %653 : vector<4x16xf32>
    %c0_253 = arith.constant 0 : index
    %c7_254 = arith.constant 7 : index
    %c0_255 = arith.constant 0 : index
    %c0_256 = arith.constant 0 : index
    %655 = vector.load %arg13[%c0_253, %c7_254, %c0_255, %c0_256] : memref<1x16x4x16xf32, #tpu.memory_space<vmem>>, vector<1x1x4x16xf32>
    %656 = vector.shape_cast %655 : vector<1x1x4x16xf32> to vector<4x16xf32>
    %657 = vector.shape_cast %654 : vector<4x16xf32> to vector<1x1x4x16xf32>
    tpu.vector_store %arg13[%c0_253, %c7_254, %c0_255, %c0_256], %657 {strides = array<i32>} : memref<1x16x4x16xf32, #tpu.memory_space<vmem>>, vector<1x1x4x16xf32>,
    %658 = vector.extract_strided_slice %30 {offsets = [0, 0], sizes = [8, 16], strides = [1, 1]} : vector<8x18xbf16> to vector<8x16xbf16>
    %659 = vector.extract_strided_slice %241 {offsets = [0, 0], sizes = [4, 16], strides = [1, 1]} : vector<4x18xbf16> to vector<4x16xbf16>
    %660 = vector.extract_strided_slice %30 {offsets = [0, 1], sizes = [8, 16], strides = [1, 1]} : vector<8x18xbf16> to vector<8x16xbf16>
    %661 = vector.extract_strided_slice %241 {offsets = [0, 1], sizes = [4, 16], strides = [1, 1]} : vector<4x18xbf16> to vector<4x16xbf16>
    %662 = vector.extract_strided_slice %30 {offsets = [0, 2], sizes = [8, 16], strides = [1, 1]} : vector<8x18xbf16> to vector<8x16xbf16>
    %663 = vector.extract_strided_slice %241 {offsets = [0, 2], sizes = [4, 16], strides = [1, 1]} : vector<4x18xbf16> to vector<4x16xbf16>
    %664 = vector.extract_strided_slice %32 {offsets = [0, 0], sizes = [8, 16], strides = [1, 1]} : vector<8x18xbf16> to vector<8x16xbf16>
    %665 = vector.extract_strided_slice %264 {offsets = [0, 0], sizes = [4, 16], strides = [1, 1]} : vector<4x18xbf16> to vector<4x16xbf16>
    %666 = vector.extract_strided_slice %32 {offsets = [0, 1], sizes = [8, 16], strides = [1, 1]} : vector<8x18xbf16> to vector<8x16xbf16>
    %667 = vector.extract_strided_slice %264 {offsets = [0, 1], sizes = [4, 16], strides = [1, 1]} : vector<4x18xbf16> to vector<4x16xbf16>
    %668 = vector.extract_strided_slice %32 {offsets = [0, 2], sizes = [8, 16], strides = [1, 1]} : vector<8x18xbf16> to vector<8x16xbf16>
    %669 = vector.extract_strided_slice %264 {offsets = [0, 2], sizes = [4, 16], strides = [1, 1]} : vector<4x18xbf16> to vector<4x16xbf16>
    %670 = vector.extract_strided_slice %34 {offsets = [0, 0], sizes = [8, 16], strides = [1, 1]} : vector<8x18xbf16> to vector<8x16xbf16>
    %671 = vector.extract_strided_slice %287 {offsets = [0, 0], sizes = [4, 16], strides = [1, 1]} : vector<4x18xbf16> to vector<4x16xbf16>
    %672 = vector.extract_strided_slice %34 {offsets = [0, 1], sizes = [8, 16], strides = [1, 1]} : vector<8x18xbf16> to vector<8x16xbf16>
    %673 = vector.extract_strided_slice %287 {offsets = [0, 1], sizes = [4, 16], strides = [1, 1]} : vector<4x18xbf16> to vector<4x16xbf16>
    %674 = vector.extract_strided_slice %34 {offsets = [0, 2], sizes = [8, 16], strides = [1, 1]} : vector<8x18xbf16> to vector<8x16xbf16>
    %675 = vector.extract_strided_slice %287 {offsets = [0, 2], sizes = [4, 16], strides = [1, 1]} : vector<4x18xbf16> to vector<4x16xbf16>
    %676 = tpu.concatenate %658, %659, %660, %661, %662, %663, %664, %665, %666, %667, %668, %669, %670, %671, %672, %673 in 0 : vector<8x16xbf16>, vector<4x16xbf16>, vector<8x16xbf16>, vector<4x16xbf16>, vector<8x16xbf16>, vector<4x16xbf16>, vector<8x16xbf16>, vector<4x16xbf16>, vector<8x16xbf16>, vector<4x16xbf16>, vector<8x16xbf16>, vector<4x16xbf16>, vector<8x16xbf16>, vector<4x16xbf16>, vector<8x16xbf16>, vector<4x16xbf16> -> vector<96x16xbf16>
    %677 = tpu.concatenate %674, %675 in 0 : vector<8x16xbf16>, vector<4x16xbf16> -> vector<12x16xbf16>
    %678 = tpu.concatenate %676, %677 in 0 : vector<96x16xbf16>, vector<12x16xbf16> -> vector<108x16xbf16>
    %cst_257 = arith.constant dense<0.000000e+00> : vector<4x16xf32>
    %679 = tpu.matmul %52, %678, %cst_257 {dimension_numbers = #tpu.dot_dimension_numbers<[1], [0], [0], [1], [0, 0, 1, 1], [], []>} : vector<4x108xbf16>, vector<108x16xbf16>, vector<4x16xf32> -> vector<4x16xf32>
    %680 = vector.broadcast %56 : vector<4x1xf32> to vector<4x16xf32>
    %681 = arith.addf %679, %680 : vector<4x16xf32>
    %cst_258 = arith.constant 0.000000e+00 : f32
    %682 = vector.broadcast %cst_258 : f32 to vector<4x16xf32>
    %683 = arith.maximumf %681, %682 : vector<4x16xf32>
    %c0_259 = arith.constant 0 : index
    %c8_260 = arith.constant 8 : index
    %c0_261 = arith.constant 0 : index
    %c0_262 = arith.constant 0 : index
    %684 = vector.load %arg13[%c0_259, %c8_260, %c0_261, %c0_262] : memref<1x16x4x16xf32, #tpu.memory_space<vmem>>, vector<1x1x4x16xf32>
    %685 = vector.shape_cast %684 : vector<1x1x4x16xf32> to vector<4x16xf32>
    %686 = vector.shape_cast %683 : vector<4x16xf32> to vector<1x1x4x16xf32>
    tpu.vector_store %arg13[%c0_259, %c8_260, %c0_261, %c0_262], %686 {strides = array<i32>} : memref<1x16x4x16xf32, #tpu.memory_space<vmem>>, vector<1x1x4x16xf32>,
    %687 = vector.extract_strided_slice %32 {offsets = [0, 0], sizes = [8, 16], strides = [1, 1]} : vector<8x18xbf16> to vector<8x16xbf16>
    %688 = vector.extract_strided_slice %264 {offsets = [0, 0], sizes = [4, 16], strides = [1, 1]} : vector<4x18xbf16> to vector<4x16xbf16>
    %689 = vector.extract_strided_slice %32 {offsets = [0, 1], sizes = [8, 16], strides = [1, 1]} : vector<8x18xbf16> to vector<8x16xbf16>
    %690 = vector.extract_strided_slice %264 {offsets = [0, 1], sizes = [4, 16], strides = [1, 1]} : vector<4x18xbf16> to vector<4x16xbf16>
    %691 = vector.extract_strided_slice %32 {offsets = [0, 2], sizes = [8, 16], strides = [1, 1]} : vector<8x18xbf16> to vector<8x16xbf16>
    %692 = vector.extract_strided_slice %264 {offsets = [0, 2], sizes = [4, 16], strides = [1, 1]} : vector<4x18xbf16> to vector<4x16xbf16>
    %693 = vector.extract_strided_slice %34 {offsets = [0, 0], sizes = [8, 16], strides = [1, 1]} : vector<8x18xbf16> to vector<8x16xbf16>
    %694 = vector.extract_strided_slice %287 {offsets = [0, 0], sizes = [4, 16], strides = [1, 1]} : vector<4x18xbf16> to vector<4x16xbf16>
    %695 = vector.extract_strided_slice %34 {offsets = [0, 1], sizes = [8, 16], strides = [1, 1]} : vector<8x18xbf16> to vector<8x16xbf16>
    %696 = vector.extract_strided_slice %287 {offsets = [0, 1], sizes = [4, 16], strides = [1, 1]} : vector<4x18xbf16> to vector<4x16xbf16>
    %697 = vector.extract_strided_slice %34 {offsets = [0, 2], sizes = [8, 16], strides = [1, 1]} : vector<8x18xbf16> to vector<8x16xbf16>
    %698 = vector.extract_strided_slice %287 {offsets = [0, 2], sizes = [4, 16], strides = [1, 1]} : vector<4x18xbf16> to vector<4x16xbf16>
    %699 = vector.extract_strided_slice %36 {offsets = [0, 0], sizes = [8, 16], strides = [1, 1]} : vector<8x18xbf16> to vector<8x16xbf16>
    %700 = vector.extract_strided_slice %310 {offsets = [0, 0], sizes = [4, 16], strides = [1, 1]} : vector<4x18xbf16> to vector<4x16xbf16>
    %701 = vector.extract_strided_slice %36 {offsets = [0, 1], sizes = [8, 16], strides = [1, 1]} : vector<8x18xbf16> to vector<8x16xbf16>
    %702 = vector.extract_strided_slice %310 {offsets = [0, 1], sizes = [4, 16], strides = [1, 1]} : vector<4x18xbf16> to vector<4x16xbf16>
    %703 = vector.extract_strided_slice %36 {offsets = [0, 2], sizes = [8, 16], strides = [1, 1]} : vector<8x18xbf16> to vector<8x16xbf16>
    %704 = vector.extract_strided_slice %310 {offsets = [0, 2], sizes = [4, 16], strides = [1, 1]} : vector<4x18xbf16> to vector<4x16xbf16>
    %705 = tpu.concatenate %687, %688, %689, %690, %691, %692, %693, %694, %695, %696, %697, %698, %699, %700, %701, %702 in 0 : vector<8x16xbf16>, vector<4x16xbf16>, vector<8x16xbf16>, vector<4x16xbf16>, vector<8x16xbf16>, vector<4x16xbf16>, vector<8x16xbf16>, vector<4x16xbf16>, vector<8x16xbf16>, vector<4x16xbf16>, vector<8x16xbf16>, vector<4x16xbf16>, vector<8x16xbf16>, vector<4x16xbf16>, vector<8x16xbf16>, vector<4x16xbf16> -> vector<96x16xbf16>
    %706 = tpu.concatenate %703, %704 in 0 : vector<8x16xbf16>, vector<4x16xbf16> -> vector<12x16xbf16>
    %707 = tpu.concatenate %705, %706 in 0 : vector<96x16xbf16>, vector<12x16xbf16> -> vector<108x16xbf16>
    %cst_263 = arith.constant dense<0.000000e+00> : vector<4x16xf32>
    %708 = tpu.matmul %52, %707, %cst_263 {dimension_numbers = #tpu.dot_dimension_numbers<[1], [0], [0], [1], [0, 0, 1, 1], [], []>} : vector<4x108xbf16>, vector<108x16xbf16>, vector<4x16xf32> -> vector<4x16xf32>
    %709 = vector.broadcast %56 : vector<4x1xf32> to vector<4x16xf32>
    %710 = arith.addf %708, %709 : vector<4x16xf32>
    %cst_264 = arith.constant 0.000000e+00 : f32
    %711 = vector.broadcast %cst_264 : f32 to vector<4x16xf32>
    %712 = arith.maximumf %710, %711 : vector<4x16xf32>
    %c0_265 = arith.constant 0 : index
    %c9_266 = arith.constant 9 : index
    %c0_267 = arith.constant 0 : index
    %c0_268 = arith.constant 0 : index
    %713 = vector.load %arg13[%c0_265, %c9_266, %c0_267, %c0_268] : memref<1x16x4x16xf32, #tpu.memory_space<vmem>>, vector<1x1x4x16xf32>
    %714 = vector.shape_cast %713 : vector<1x1x4x16xf32> to vector<4x16xf32>
    %715 = vector.shape_cast %712 : vector<4x16xf32> to vector<1x1x4x16xf32>
    tpu.vector_store %arg13[%c0_265, %c9_266, %c0_267, %c0_268], %715 {strides = array<i32>} : memref<1x16x4x16xf32, #tpu.memory_space<vmem>>, vector<1x1x4x16xf32>,
    %716 = vector.extract_strided_slice %34 {offsets = [0, 0], sizes = [8, 16], strides = [1, 1]} : vector<8x18xbf16> to vector<8x16xbf16>
    %717 = vector.extract_strided_slice %287 {offsets = [0, 0], sizes = [4, 16], strides = [1, 1]} : vector<4x18xbf16> to vector<4x16xbf16>
    %718 = vector.extract_strided_slice %34 {offsets = [0, 1], sizes = [8, 16], strides = [1, 1]} : vector<8x18xbf16> to vector<8x16xbf16>
    %719 = vector.extract_strided_slice %287 {offsets = [0, 1], sizes = [4, 16], strides = [1, 1]} : vector<4x18xbf16> to vector<4x16xbf16>
    %720 = vector.extract_strided_slice %34 {offsets = [0, 2], sizes = [8, 16], strides = [1, 1]} : vector<8x18xbf16> to vector<8x16xbf16>
    %721 = vector.extract_strided_slice %287 {offsets = [0, 2], sizes = [4, 16], strides = [1, 1]} : vector<4x18xbf16> to vector<4x16xbf16>
    %722 = vector.extract_strided_slice %36 {offsets = [0, 0], sizes = [8, 16], strides = [1, 1]} : vector<8x18xbf16> to vector<8x16xbf16>
    %723 = vector.extract_strided_slice %310 {offsets = [0, 0], sizes = [4, 16], strides = [1, 1]} : vector<4x18xbf16> to vector<4x16xbf16>
    %724 = vector.extract_strided_slice %36 {offsets = [0, 1], sizes = [8, 16], strides = [1, 1]} : vector<8x18xbf16> to vector<8x16xbf16>
    %725 = vector.extract_strided_slice %310 {offsets = [0, 1], sizes = [4, 16], strides = [1, 1]} : vector<4x18xbf16> to vector<4x16xbf16>
    %726 = vector.extract_strided_slice %36 {offsets = [0, 2], sizes = [8, 16], strides = [1, 1]} : vector<8x18xbf16> to vector<8x16xbf16>
    %727 = vector.extract_strided_slice %310 {offsets = [0, 2], sizes = [4, 16], strides = [1, 1]} : vector<4x18xbf16> to vector<4x16xbf16>
    %728 = vector.extract_strided_slice %38 {offsets = [0, 0], sizes = [8, 16], strides = [1, 1]} : vector<8x18xbf16> to vector<8x16xbf16>
    %729 = vector.extract_strided_slice %333 {offsets = [0, 0], sizes = [4, 16], strides = [1, 1]} : vector<4x18xbf16> to vector<4x16xbf16>
    %730 = vector.extract_strided_slice %38 {offsets = [0, 1], sizes = [8, 16], strides = [1, 1]} : vector<8x18xbf16> to vector<8x16xbf16>
    %731 = vector.extract_strided_slice %333 {offsets = [0, 1], sizes = [4, 16], strides = [1, 1]} : vector<4x18xbf16> to vector<4x16xbf16>
    %732 = vector.extract_strided_slice %38 {offsets = [0, 2], sizes = [8, 16], strides = [1, 1]} : vector<8x18xbf16> to vector<8x16xbf16>
    %733 = vector.extract_strided_slice %333 {offsets = [0, 2], sizes = [4, 16], strides = [1, 1]} : vector<4x18xbf16> to vector<4x16xbf16>
    %734 = tpu.concatenate %716, %717, %718, %719, %720, %721, %722, %723, %724, %725, %726, %727, %728, %729, %730, %731 in 0 : vector<8x16xbf16>, vector<4x16xbf16>, vector<8x16xbf16>, vector<4x16xbf16>, vector<8x16xbf16>, vector<4x16xbf16>, vector<8x16xbf16>, vector<4x16xbf16>, vector<8x16xbf16>, vector<4x16xbf16>, vector<8x16xbf16>, vector<4x16xbf16>, vector<8x16xbf16>, vector<4x16xbf16>, vector<8x16xbf16>, vector<4x16xbf16> -> vector<96x16xbf16>
    %735 = tpu.concatenate %732, %733 in 0 : vector<8x16xbf16>, vector<4x16xbf16> -> vector<12x16xbf16>
    %736 = tpu.concatenate %734, %735 in 0 : vector<96x16xbf16>, vector<12x16xbf16> -> vector<108x16xbf16>
    %cst_269 = arith.constant dense<0.000000e+00> : vector<4x16xf32>
    %737 = tpu.matmul %52, %736, %cst_269 {dimension_numbers = #tpu.dot_dimension_numbers<[1], [0], [0], [1], [0, 0, 1, 1], [], []>} : vector<4x108xbf16>, vector<108x16xbf16>, vector<4x16xf32> -> vector<4x16xf32>
    %738 = vector.broadcast %56 : vector<4x1xf32> to vector<4x16xf32>
    %739 = arith.addf %737, %738 : vector<4x16xf32>
    %cst_270 = arith.constant 0.000000e+00 : f32
    %740 = vector.broadcast %cst_270 : f32 to vector<4x16xf32>
    %741 = arith.maximumf %739, %740 : vector<4x16xf32>
    %c0_271 = arith.constant 0 : index
    %c10_272 = arith.constant 10 : index
    %c0_273 = arith.constant 0 : index
    %c0_274 = arith.constant 0 : index
    %742 = vector.load %arg13[%c0_271, %c10_272, %c0_273, %c0_274] : memref<1x16x4x16xf32, #tpu.memory_space<vmem>>, vector<1x1x4x16xf32>
    %743 = vector.shape_cast %742 : vector<1x1x4x16xf32> to vector<4x16xf32>
    %744 = vector.shape_cast %741 : vector<4x16xf32> to vector<1x1x4x16xf32>
    tpu.vector_store %arg13[%c0_271, %c10_272, %c0_273, %c0_274], %744 {strides = array<i32>} : memref<1x16x4x16xf32, #tpu.memory_space<vmem>>, vector<1x1x4x16xf32>,
    %745 = vector.extract_strided_slice %36 {offsets = [0, 0], sizes = [8, 16], strides = [1, 1]} : vector<8x18xbf16> to vector<8x16xbf16>
    %746 = vector.extract_strided_slice %310 {offsets = [0, 0], sizes = [4, 16], strides = [1, 1]} : vector<4x18xbf16> to vector<4x16xbf16>
    %747 = vector.extract_strided_slice %36 {offsets = [0, 1], sizes = [8, 16], strides = [1, 1]} : vector<8x18xbf16> to vector<8x16xbf16>
    %748 = vector.extract_strided_slice %310 {offsets = [0, 1], sizes = [4, 16], strides = [1, 1]} : vector<4x18xbf16> to vector<4x16xbf16>
    %749 = vector.extract_strided_slice %36 {offsets = [0, 2], sizes = [8, 16], strides = [1, 1]} : vector<8x18xbf16> to vector<8x16xbf16>
    %750 = vector.extract_strided_slice %310 {offsets = [0, 2], sizes = [4, 16], strides = [1, 1]} : vector<4x18xbf16> to vector<4x16xbf16>
    %751 = vector.extract_strided_slice %38 {offsets = [0, 0], sizes = [8, 16], strides = [1, 1]} : vector<8x18xbf16> to vector<8x16xbf16>
    %752 = vector.extract_strided_slice %333 {offsets = [0, 0], sizes = [4, 16], strides = [1, 1]} : vector<4x18xbf16> to vector<4x16xbf16>
    %753 = vector.extract_strided_slice %38 {offsets = [0, 1], sizes = [8, 16], strides = [1, 1]} : vector<8x18xbf16> to vector<8x16xbf16>
    %754 = vector.extract_strided_slice %333 {offsets = [0, 1], sizes = [4, 16], strides = [1, 1]} : vector<4x18xbf16> to vector<4x16xbf16>
    %755 = vector.extract_strided_slice %38 {offsets = [0, 2], sizes = [8, 16], strides = [1, 1]} : vector<8x18xbf16> to vector<8x16xbf16>
    %756 = vector.extract_strided_slice %333 {offsets = [0, 2], sizes = [4, 16], strides = [1, 1]} : vector<4x18xbf16> to vector<4x16xbf16>
    %757 = vector.extract_strided_slice %40 {offsets = [0, 0], sizes = [8, 16], strides = [1, 1]} : vector<8x18xbf16> to vector<8x16xbf16>
    %758 = vector.extract_strided_slice %356 {offsets = [0, 0], sizes = [4, 16], strides = [1, 1]} : vector<4x18xbf16> to vector<4x16xbf16>
    %759 = vector.extract_strided_slice %40 {offsets = [0, 1], sizes = [8, 16], strides = [1, 1]} : vector<8x18xbf16> to vector<8x16xbf16>
    %760 = vector.extract_strided_slice %356 {offsets = [0, 1], sizes = [4, 16], strides = [1, 1]} : vector<4x18xbf16> to vector<4x16xbf16>
    %761 = vector.extract_strided_slice %40 {offsets = [0, 2], sizes = [8, 16], strides = [1, 1]} : vector<8x18xbf16> to vector<8x16xbf16>
    %762 = vector.extract_strided_slice %356 {offsets = [0, 2], sizes = [4, 16], strides = [1, 1]} : vector<4x18xbf16> to vector<4x16xbf16>
    %763 = tpu.concatenate %745, %746, %747, %748, %749, %750, %751, %752, %753, %754, %755, %756, %757, %758, %759, %760 in 0 : vector<8x16xbf16>, vector<4x16xbf16>, vector<8x16xbf16>, vector<4x16xbf16>, vector<8x16xbf16>, vector<4x16xbf16>, vector<8x16xbf16>, vector<4x16xbf16>, vector<8x16xbf16>, vector<4x16xbf16>, vector<8x16xbf16>, vector<4x16xbf16>, vector<8x16xbf16>, vector<4x16xbf16>, vector<8x16xbf16>, vector<4x16xbf16> -> vector<96x16xbf16>
    %764 = tpu.concatenate %761, %762 in 0 : vector<8x16xbf16>, vector<4x16xbf16> -> vector<12x16xbf16>
    %765 = tpu.concatenate %763, %764 in 0 : vector<96x16xbf16>, vector<12x16xbf16> -> vector<108x16xbf16>
    %cst_275 = arith.constant dense<0.000000e+00> : vector<4x16xf32>
    %766 = tpu.matmul %52, %765, %cst_275 {dimension_numbers = #tpu.dot_dimension_numbers<[1], [0], [0], [1], [0, 0, 1, 1], [], []>} : vector<4x108xbf16>, vector<108x16xbf16>, vector<4x16xf32> -> vector<4x16xf32>
    %767 = vector.broadcast %56 : vector<4x1xf32> to vector<4x16xf32>
    %768 = arith.addf %766, %767 : vector<4x16xf32>
    %cst_276 = arith.constant 0.000000e+00 : f32
    %769 = vector.broadcast %cst_276 : f32 to vector<4x16xf32>
    %770 = arith.maximumf %768, %769 : vector<4x16xf32>
    %c0_277 = arith.constant 0 : index
    %c11_278 = arith.constant 11 : index
    %c0_279 = arith.constant 0 : index
    %c0_280 = arith.constant 0 : index
    %771 = vector.load %arg13[%c0_277, %c11_278, %c0_279, %c0_280] : memref<1x16x4x16xf32, #tpu.memory_space<vmem>>, vector<1x1x4x16xf32>
    %772 = vector.shape_cast %771 : vector<1x1x4x16xf32> to vector<4x16xf32>
    %773 = vector.shape_cast %770 : vector<4x16xf32> to vector<1x1x4x16xf32>
    tpu.vector_store %arg13[%c0_277, %c11_278, %c0_279, %c0_280], %773 {strides = array<i32>} : memref<1x16x4x16xf32, #tpu.memory_space<vmem>>, vector<1x1x4x16xf32>,
    %774 = vector.extract_strided_slice %38 {offsets = [0, 0], sizes = [8, 16], strides = [1, 1]} : vector<8x18xbf16> to vector<8x16xbf16>
    %775 = vector.extract_strided_slice %333 {offsets = [0, 0], sizes = [4, 16], strides = [1, 1]} : vector<4x18xbf16> to vector<4x16xbf16>
    %776 = vector.extract_strided_slice %38 {offsets = [0, 1], sizes = [8, 16], strides = [1, 1]} : vector<8x18xbf16> to vector<8x16xbf16>
    %777 = vector.extract_strided_slice %333 {offsets = [0, 1], sizes = [4, 16], strides = [1, 1]} : vector<4x18xbf16> to vector<4x16xbf16>
    %778 = vector.extract_strided_slice %38 {offsets = [0, 2], sizes = [8, 16], strides = [1, 1]} : vector<8x18xbf16> to vector<8x16xbf16>
    %779 = vector.extract_strided_slice %333 {offsets = [0, 2], sizes = [4, 16], strides = [1, 1]} : vector<4x18xbf16> to vector<4x16xbf16>
    %780 = vector.extract_strided_slice %40 {offsets = [0, 0], sizes = [8, 16], strides = [1, 1]} : vector<8x18xbf16> to vector<8x16xbf16>
    %781 = vector.extract_strided_slice %356 {offsets = [0, 0], sizes = [4, 16], strides = [1, 1]} : vector<4x18xbf16> to vector<4x16xbf16>
    %782 = vector.extract_strided_slice %40 {offsets = [0, 1], sizes = [8, 16], strides = [1, 1]} : vector<8x18xbf16> to vector<8x16xbf16>
    %783 = vector.extract_strided_slice %356 {offsets = [0, 1], sizes = [4, 16], strides = [1, 1]} : vector<4x18xbf16> to vector<4x16xbf16>
    %784 = vector.extract_strided_slice %40 {offsets = [0, 2], sizes = [8, 16], strides = [1, 1]} : vector<8x18xbf16> to vector<8x16xbf16>
    %785 = vector.extract_strided_slice %356 {offsets = [0, 2], sizes = [4, 16], strides = [1, 1]} : vector<4x18xbf16> to vector<4x16xbf16>
    %786 = vector.extract_strided_slice %42 {offsets = [0, 0], sizes = [8, 16], strides = [1, 1]} : vector<8x18xbf16> to vector<8x16xbf16>
    %787 = vector.extract_strided_slice %379 {offsets = [0, 0], sizes = [4, 16], strides = [1, 1]} : vector<4x18xbf16> to vector<4x16xbf16>
    %788 = vector.extract_strided_slice %42 {offsets = [0, 1], sizes = [8, 16], strides = [1, 1]} : vector<8x18xbf16> to vector<8x16xbf16>
    %789 = vector.extract_strided_slice %379 {offsets = [0, 1], sizes = [4, 16], strides = [1, 1]} : vector<4x18xbf16> to vector<4x16xbf16>
    %790 = vector.extract_strided_slice %42 {offsets = [0, 2], sizes = [8, 16], strides = [1, 1]} : vector<8x18xbf16> to vector<8x16xbf16>
    %791 = vector.extract_strided_slice %379 {offsets = [0, 2], sizes = [4, 16], strides = [1, 1]} : vector<4x18xbf16> to vector<4x16xbf16>
    %792 = tpu.concatenate %774, %775, %776, %777, %778, %779, %780, %781, %782, %783, %784, %785, %786, %787, %788, %789 in 0 : vector<8x16xbf16>, vector<4x16xbf16>, vector<8x16xbf16>, vector<4x16xbf16>, vector<8x16xbf16>, vector<4x16xbf16>, vector<8x16xbf16>, vector<4x16xbf16>, vector<8x16xbf16>, vector<4x16xbf16>, vector<8x16xbf16>, vector<4x16xbf16>, vector<8x16xbf16>, vector<4x16xbf16>, vector<8x16xbf16>, vector<4x16xbf16> -> vector<96x16xbf16>
    %793 = tpu.concatenate %790, %791 in 0 : vector<8x16xbf16>, vector<4x16xbf16> -> vector<12x16xbf16>
    %794 = tpu.concatenate %792, %793 in 0 : vector<96x16xbf16>, vector<12x16xbf16> -> vector<108x16xbf16>
    %cst_281 = arith.constant dense<0.000000e+00> : vector<4x16xf32>
    %795 = tpu.matmul %52, %794, %cst_281 {dimension_numbers = #tpu.dot_dimension_numbers<[1], [0], [0], [1], [0, 0, 1, 1], [], []>} : vector<4x108xbf16>, vector<108x16xbf16>, vector<4x16xf32> -> vector<4x16xf32>
    %796 = vector.broadcast %56 : vector<4x1xf32> to vector<4x16xf32>
    %797 = arith.addf %795, %796 : vector<4x16xf32>
    %cst_282 = arith.constant 0.000000e+00 : f32
    %798 = vector.broadcast %cst_282 : f32 to vector<4x16xf32>
    %799 = arith.maximumf %797, %798 : vector<4x16xf32>
    %c0_283 = arith.constant 0 : index
    %c12_284 = arith.constant 12 : index
    %c0_285 = arith.constant 0 : index
    %c0_286 = arith.constant 0 : index
    %800 = vector.load %arg13[%c0_283, %c12_284, %c0_285, %c0_286] : memref<1x16x4x16xf32, #tpu.memory_space<vmem>>, vector<1x1x4x16xf32>
    %801 = vector.shape_cast %800 : vector<1x1x4x16xf32> to vector<4x16xf32>
    %802 = vector.shape_cast %799 : vector<4x16xf32> to vector<1x1x4x16xf32>
    tpu.vector_store %arg13[%c0_283, %c12_284, %c0_285, %c0_286], %802 {strides = array<i32>} : memref<1x16x4x16xf32, #tpu.memory_space<vmem>>, vector<1x1x4x16xf32>,
    %803 = vector.extract_strided_slice %40 {offsets = [0, 0], sizes = [8, 16], strides = [1, 1]} : vector<8x18xbf16> to vector<8x16xbf16>
    %804 = vector.extract_strided_slice %356 {offsets = [0, 0], sizes = [4, 16], strides = [1, 1]} : vector<4x18xbf16> to vector<4x16xbf16>
    %805 = vector.extract_strided_slice %40 {offsets = [0, 1], sizes = [8, 16], strides = [1, 1]} : vector<8x18xbf16> to vector<8x16xbf16>
    %806 = vector.extract_strided_slice %356 {offsets = [0, 1], sizes = [4, 16], strides = [1, 1]} : vector<4x18xbf16> to vector<4x16xbf16>
    %807 = vector.extract_strided_slice %40 {offsets = [0, 2], sizes = [8, 16], strides = [1, 1]} : vector<8x18xbf16> to vector<8x16xbf16>
    %808 = vector.extract_strided_slice %356 {offsets = [0, 2], sizes = [4, 16], strides = [1, 1]} : vector<4x18xbf16> to vector<4x16xbf16>
    %809 = vector.extract_strided_slice %42 {offsets = [0, 0], sizes = [8, 16], strides = [1, 1]} : vector<8x18xbf16> to vector<8x16xbf16>
    %810 = vector.extract_strided_slice %379 {offsets = [0, 0], sizes = [4, 16], strides = [1, 1]} : vector<4x18xbf16> to vector<4x16xbf16>
    %811 = vector.extract_strided_slice %42 {offsets = [0, 1], sizes = [8, 16], strides = [1, 1]} : vector<8x18xbf16> to vector<8x16xbf16>
    %812 = vector.extract_strided_slice %379 {offsets = [0, 1], sizes = [4, 16], strides = [1, 1]} : vector<4x18xbf16> to vector<4x16xbf16>
    %813 = vector.extract_strided_slice %42 {offsets = [0, 2], sizes = [8, 16], strides = [1, 1]} : vector<8x18xbf16> to vector<8x16xbf16>
    %814 = vector.extract_strided_slice %379 {offsets = [0, 2], sizes = [4, 16], strides = [1, 1]} : vector<4x18xbf16> to vector<4x16xbf16>
    %815 = vector.extract_strided_slice %44 {offsets = [0, 0], sizes = [8, 16], strides = [1, 1]} : vector<8x18xbf16> to vector<8x16xbf16>
    %816 = vector.extract_strided_slice %402 {offsets = [0, 0], sizes = [4, 16], strides = [1, 1]} : vector<4x18xbf16> to vector<4x16xbf16>
    %817 = vector.extract_strided_slice %44 {offsets = [0, 1], sizes = [8, 16], strides = [1, 1]} : vector<8x18xbf16> to vector<8x16xbf16>
    %818 = vector.extract_strided_slice %402 {offsets = [0, 1], sizes = [4, 16], strides = [1, 1]} : vector<4x18xbf16> to vector<4x16xbf16>
    %819 = vector.extract_strided_slice %44 {offsets = [0, 2], sizes = [8, 16], strides = [1, 1]} : vector<8x18xbf16> to vector<8x16xbf16>
    %820 = vector.extract_strided_slice %402 {offsets = [0, 2], sizes = [4, 16], strides = [1, 1]} : vector<4x18xbf16> to vector<4x16xbf16>
    %821 = tpu.concatenate %803, %804, %805, %806, %807, %808, %809, %810, %811, %812, %813, %814, %815, %816, %817, %818 in 0 : vector<8x16xbf16>, vector<4x16xbf16>, vector<8x16xbf16>, vector<4x16xbf16>, vector<8x16xbf16>, vector<4x16xbf16>, vector<8x16xbf16>, vector<4x16xbf16>, vector<8x16xbf16>, vector<4x16xbf16>, vector<8x16xbf16>, vector<4x16xbf16>, vector<8x16xbf16>, vector<4x16xbf16>, vector<8x16xbf16>, vector<4x16xbf16> -> vector<96x16xbf16>
    %822 = tpu.concatenate %819, %820 in 0 : vector<8x16xbf16>, vector<4x16xbf16> -> vector<12x16xbf16>
    %823 = tpu.concatenate %821, %822 in 0 : vector<96x16xbf16>, vector<12x16xbf16> -> vector<108x16xbf16>
    %cst_287 = arith.constant dense<0.000000e+00> : vector<4x16xf32>
    %824 = tpu.matmul %52, %823, %cst_287 {dimension_numbers = #tpu.dot_dimension_numbers<[1], [0], [0], [1], [0, 0, 1, 1], [], []>} : vector<4x108xbf16>, vector<108x16xbf16>, vector<4x16xf32> -> vector<4x16xf32>
    %825 = vector.broadcast %56 : vector<4x1xf32> to vector<4x16xf32>
    %826 = arith.addf %824, %825 : vector<4x16xf32>
    %cst_288 = arith.constant 0.000000e+00 : f32
    %827 = vector.broadcast %cst_288 : f32 to vector<4x16xf32>
    %828 = arith.maximumf %826, %827 : vector<4x16xf32>
    %c0_289 = arith.constant 0 : index
    %c13_290 = arith.constant 13 : index
    %c0_291 = arith.constant 0 : index
    %c0_292 = arith.constant 0 : index
    %829 = vector.load %arg13[%c0_289, %c13_290, %c0_291, %c0_292] : memref<1x16x4x16xf32, #tpu.memory_space<vmem>>, vector<1x1x4x16xf32>
    %830 = vector.shape_cast %829 : vector<1x1x4x16xf32> to vector<4x16xf32>
    %831 = vector.shape_cast %828 : vector<4x16xf32> to vector<1x1x4x16xf32>
    tpu.vector_store %arg13[%c0_289, %c13_290, %c0_291, %c0_292], %831 {strides = array<i32>} : memref<1x16x4x16xf32, #tpu.memory_space<vmem>>, vector<1x1x4x16xf32>,
    %832 = vector.extract_strided_slice %42 {offsets = [0, 0], sizes = [8, 16], strides = [1, 1]} : vector<8x18xbf16> to vector<8x16xbf16>
    %833 = vector.extract_strided_slice %379 {offsets = [0, 0], sizes = [4, 16], strides = [1, 1]} : vector<4x18xbf16> to vector<4x16xbf16>
    %834 = vector.extract_strided_slice %42 {offsets = [0, 1], sizes = [8, 16], strides = [1, 1]} : vector<8x18xbf16> to vector<8x16xbf16>
    %835 = vector.extract_strided_slice %379 {offsets = [0, 1], sizes = [4, 16], strides = [1, 1]} : vector<4x18xbf16> to vector<4x16xbf16>
    %836 = vector.extract_strided_slice %42 {offsets = [0, 2], sizes = [8, 16], strides = [1, 1]} : vector<8x18xbf16> to vector<8x16xbf16>
    %837 = vector.extract_strided_slice %379 {offsets = [0, 2], sizes = [4, 16], strides = [1, 1]} : vector<4x18xbf16> to vector<4x16xbf16>
    %838 = vector.extract_strided_slice %44 {offsets = [0, 0], sizes = [8, 16], strides = [1, 1]} : vector<8x18xbf16> to vector<8x16xbf16>
    %839 = vector.extract_strided_slice %402 {offsets = [0, 0], sizes = [4, 16], strides = [1, 1]} : vector<4x18xbf16> to vector<4x16xbf16>
    %840 = vector.extract_strided_slice %44 {offsets = [0, 1], sizes = [8, 16], strides = [1, 1]} : vector<8x18xbf16> to vector<8x16xbf16>
    %841 = vector.extract_strided_slice %402 {offsets = [0, 1], sizes = [4, 16], strides = [1, 1]} : vector<4x18xbf16> to vector<4x16xbf16>
    %842 = vector.extract_strided_slice %44 {offsets = [0, 2], sizes = [8, 16], strides = [1, 1]} : vector<8x18xbf16> to vector<8x16xbf16>
    %843 = vector.extract_strided_slice %402 {offsets = [0, 2], sizes = [4, 16], strides = [1, 1]} : vector<4x18xbf16> to vector<4x16xbf16>
    %844 = vector.extract_strided_slice %46 {offsets = [0, 0], sizes = [8, 16], strides = [1, 1]} : vector<8x18xbf16> to vector<8x16xbf16>
    %845 = vector.extract_strided_slice %425 {offsets = [0, 0], sizes = [4, 16], strides = [1, 1]} : vector<4x18xbf16> to vector<4x16xbf16>
    %846 = vector.extract_strided_slice %46 {offsets = [0, 1], sizes = [8, 16], strides = [1, 1]} : vector<8x18xbf16> to vector<8x16xbf16>
    %847 = vector.extract_strided_slice %425 {offsets = [0, 1], sizes = [4, 16], strides = [1, 1]} : vector<4x18xbf16> to vector<4x16xbf16>
    %848 = vector.extract_strided_slice %46 {offsets = [0, 2], sizes = [8, 16], strides = [1, 1]} : vector<8x18xbf16> to vector<8x16xbf16>
    %849 = vector.extract_strided_slice %425 {offsets = [0, 2], sizes = [4, 16], strides = [1, 1]} : vector<4x18xbf16> to vector<4x16xbf16>
    %850 = tpu.concatenate %832, %833, %834, %835, %836, %837, %838, %839, %840, %841, %842, %843, %844, %845, %846, %847 in 0 : vector<8x16xbf16>, vector<4x16xbf16>, vector<8x16xbf16>, vector<4x16xbf16>, vector<8x16xbf16>, vector<4x16xbf16>, vector<8x16xbf16>, vector<4x16xbf16>, vector<8x16xbf16>, vector<4x16xbf16>, vector<8x16xbf16>, vector<4x16xbf16>, vector<8x16xbf16>, vector<4x16xbf16>, vector<8x16xbf16>, vector<4x16xbf16> -> vector<96x16xbf16>
    %851 = tpu.concatenate %848, %849 in 0 : vector<8x16xbf16>, vector<4x16xbf16> -> vector<12x16xbf16>
    %852 = tpu.concatenate %850, %851 in 0 : vector<96x16xbf16>, vector<12x16xbf16> -> vector<108x16xbf16>
    %cst_293 = arith.constant dense<0.000000e+00> : vector<4x16xf32>
    %853 = tpu.matmul %52, %852, %cst_293 {dimension_numbers = #tpu.dot_dimension_numbers<[1], [0], [0], [1], [0, 0, 1, 1], [], []>} : vector<4x108xbf16>, vector<108x16xbf16>, vector<4x16xf32> -> vector<4x16xf32>
    %854 = vector.broadcast %56 : vector<4x1xf32> to vector<4x16xf32>
    %855 = arith.addf %853, %854 : vector<4x16xf32>
    %cst_294 = arith.constant 0.000000e+00 : f32
    %856 = vector.broadcast %cst_294 : f32 to vector<4x16xf32>
    %857 = arith.maximumf %855, %856 : vector<4x16xf32>
    %c0_295 = arith.constant 0 : index
    %c14_296 = arith.constant 14 : index
    %c0_297 = arith.constant 0 : index
    %c0_298 = arith.constant 0 : index
    %858 = vector.load %arg13[%c0_295, %c14_296, %c0_297, %c0_298] : memref<1x16x4x16xf32, #tpu.memory_space<vmem>>, vector<1x1x4x16xf32>
    %859 = vector.shape_cast %858 : vector<1x1x4x16xf32> to vector<4x16xf32>
    %860 = vector.shape_cast %857 : vector<4x16xf32> to vector<1x1x4x16xf32>
    tpu.vector_store %arg13[%c0_295, %c14_296, %c0_297, %c0_298], %860 {strides = array<i32>} : memref<1x16x4x16xf32, #tpu.memory_space<vmem>>, vector<1x1x4x16xf32>,
    %861 = vector.extract_strided_slice %44 {offsets = [0, 0], sizes = [8, 16], strides = [1, 1]} : vector<8x18xbf16> to vector<8x16xbf16>
    %862 = vector.extract_strided_slice %402 {offsets = [0, 0], sizes = [4, 16], strides = [1, 1]} : vector<4x18xbf16> to vector<4x16xbf16>
    %863 = vector.extract_strided_slice %44 {offsets = [0, 1], sizes = [8, 16], strides = [1, 1]} : vector<8x18xbf16> to vector<8x16xbf16>
    %864 = vector.extract_strided_slice %402 {offsets = [0, 1], sizes = [4, 16], strides = [1, 1]} : vector<4x18xbf16> to vector<4x16xbf16>
    %865 = vector.extract_strided_slice %44 {offsets = [0, 2], sizes = [8, 16], strides = [1, 1]} : vector<8x18xbf16> to vector<8x16xbf16>
    %866 = vector.extract_strided_slice %402 {offsets = [0, 2], sizes = [4, 16], strides = [1, 1]} : vector<4x18xbf16> to vector<4x16xbf16>
    %867 = vector.extract_strided_slice %46 {offsets = [0, 0], sizes = [8, 16], strides = [1, 1]} : vector<8x18xbf16> to vector<8x16xbf16>
    %868 = vector.extract_strided_slice %425 {offsets = [0, 0], sizes = [4, 16], strides = [1, 1]} : vector<4x18xbf16> to vector<4x16xbf16>
    %869 = vector.extract_strided_slice %46 {offsets = [0, 1], sizes = [8, 16], strides = [1, 1]} : vector<8x18xbf16> to vector<8x16xbf16>
    %870 = vector.extract_strided_slice %425 {offsets = [0, 1], sizes = [4, 16], strides = [1, 1]} : vector<4x18xbf16> to vector<4x16xbf16>
    %871 = vector.extract_strided_slice %46 {offsets = [0, 2], sizes = [8, 16], strides = [1, 1]} : vector<8x18xbf16> to vector<8x16xbf16>
    %872 = vector.extract_strided_slice %425 {offsets = [0, 2], sizes = [4, 16], strides = [1, 1]} : vector<4x18xbf16> to vector<4x16xbf16>
    %873 = vector.extract_strided_slice %48 {offsets = [0, 0], sizes = [8, 16], strides = [1, 1]} : vector<8x18xbf16> to vector<8x16xbf16>
    %874 = vector.extract_strided_slice %57 {offsets = [0, 0], sizes = [4, 16], strides = [1, 1]} : vector<4x18xbf16> to vector<4x16xbf16>
    %875 = vector.extract_strided_slice %48 {offsets = [0, 1], sizes = [8, 16], strides = [1, 1]} : vector<8x18xbf16> to vector<8x16xbf16>
    %876 = vector.extract_strided_slice %57 {offsets = [0, 1], sizes = [4, 16], strides = [1, 1]} : vector<4x18xbf16> to vector<4x16xbf16>
    %877 = vector.extract_strided_slice %48 {offsets = [0, 2], sizes = [8, 16], strides = [1, 1]} : vector<8x18xbf16> to vector<8x16xbf16>
    %878 = vector.extract_strided_slice %57 {offsets = [0, 2], sizes = [4, 16], strides = [1, 1]} : vector<4x18xbf16> to vector<4x16xbf16>
    %879 = tpu.concatenate %861, %862, %863, %864, %865, %866, %867, %868, %869, %870, %871, %872, %873, %874, %875, %876 in 0 : vector<8x16xbf16>, vector<4x16xbf16>, vector<8x16xbf16>, vector<4x16xbf16>, vector<8x16xbf16>, vector<4x16xbf16>, vector<8x16xbf16>, vector<4x16xbf16>, vector<8x16xbf16>, vector<4x16xbf16>, vector<8x16xbf16>, vector<4x16xbf16>, vector<8x16xbf16>, vector<4x16xbf16>, vector<8x16xbf16>, vector<4x16xbf16> -> vector<96x16xbf16>
    %880 = tpu.concatenate %877, %878 in 0 : vector<8x16xbf16>, vector<4x16xbf16> -> vector<12x16xbf16>
    %881 = tpu.concatenate %879, %880 in 0 : vector<96x16xbf16>, vector<12x16xbf16> -> vector<108x16xbf16>
    %cst_299 = arith.constant dense<0.000000e+00> : vector<4x16xf32>
    %882 = tpu.matmul %52, %881, %cst_299 {dimension_numbers = #tpu.dot_dimension_numbers<[1], [0], [0], [1], [0, 0, 1, 1], [], []>} : vector<4x108xbf16>, vector<108x16xbf16>, vector<4x16xf32> -> vector<4x16xf32>
    %883 = vector.broadcast %56 : vector<4x1xf32> to vector<4x16xf32>
    %884 = arith.addf %882, %883 : vector<4x16xf32>
    %cst_300 = arith.constant 0.000000e+00 : f32
    %885 = vector.broadcast %cst_300 : f32 to vector<4x16xf32>
    %886 = arith.maximumf %884, %885 : vector<4x16xf32>
    %c0_301 = arith.constant 0 : index
    %c15_302 = arith.constant 15 : index
    %c0_303 = arith.constant 0 : index
    %c0_304 = arith.constant 0 : index
    %887 = vector.load %arg13[%c0_301, %c15_302, %c0_303, %c0_304] : memref<1x16x4x16xf32, #tpu.memory_space<vmem>>, vector<1x1x4x16xf32>
    %888 = vector.shape_cast %887 : vector<1x1x4x16xf32> to vector<4x16xf32>
    %889 = vector.shape_cast %886 : vector<4x16xf32> to vector<1x1x4x16xf32>
    tpu.vector_store %arg13[%c0_301, %c15_302, %c0_303, %c0_304], %889 {strides = array<i32>} : memref<1x16x4x16xf32, #tpu.memory_space<vmem>>, vector<1x1x4x16xf32>,
    return
  }
  func.func @transform_0(%arg0: i32) -> (i32, i32, i32, i32) {
    %c0_i32 = arith.constant 0 : i32
    %c0_i32_0 = arith.constant 0 : i32
    %c0_i32_1 = arith.constant 0 : i32
    %c0_i32_2 = arith.constant 0 : i32
    return %arg0, %c0_i32, %c0_i32_0, %c0_i32_1 : i32, i32, i32, i32
  }
  func.func @transform_1(%arg0: i32) -> (i32, i32, i32, i32) {
    %c0_i32 = arith.constant 0 : i32
    %c0_i32_0 = arith.constant 0 : i32
    %c0_i32_1 = arith.constant 0 : i32
    %c0_i32_2 = arith.constant 0 : i32
    return %arg0, %c0_i32, %c0_i32_0, %c0_i32_1 : i32, i32, i32, i32
  }
  func.func @transform_2(%arg0: i32) -> (i32, i32) {
    %c0_i32 = arith.constant 0 : i32
    %c0_i32_0 = arith.constant 0 : i32
    %c0_i32_1 = arith.constant 0 : i32
    return %c0_i32, %c0_i32_0 : i32, i32
  }
  func.func @transform_3(%arg0: i32) -> (i32, i32) {
    %c0_i32 = arith.constant 0 : i32
    %c0_i32_0 = arith.constant 0 : i32
    %c0_i32_1 = arith.constant 0 : i32
    return %c0_i32, %c0_i32_0 : i32, i32
  }
  func.func @transform_4(%arg0: i32) -> (i32, i32) {
    %c0_i32 = arith.constant 0 : i32
    %c0_i32_0 = arith.constant 0 : i32
    %c0_i32_1 = arith.constant 0 : i32
    return %c0_i32, %c0_i32_0 : i32, i32
  }
  func.func @transform_5(%arg0: i32) -> (i32, i32) {
    %c0_i32 = arith.constant 0 : i32
    %c0_i32_0 = arith.constant 0 : i32
    %c0_i32_1 = arith.constant 0 : i32
    return %c0_i32, %c0_i32_0 : i32, i32
  }
  func.func @transform_6(%arg0: i32) -> (i32, i32) {
    %c0_i32 = arith.constant 0 : i32
    %c0_i32_0 = arith.constant 0 : i32
    %c0_i32_1 = arith.constant 0 : i32
    return %c0_i32, %c0_i32_0 : i32, i32
  }
  func.func @transform_7(%arg0: i32) -> (i32, i32) {
    %c0_i32 = arith.constant 0 : i32
    %c0_i32_0 = arith.constant 0 : i32
    %c0_i32_1 = arith.constant 0 : i32
    return %c0_i32, %c0_i32_0 : i32, i32
  }
  func.func @transform_8(%arg0: i32) -> (i32, i32) {
    %c0_i32 = arith.constant 0 : i32
    %c0_i32_0 = arith.constant 0 : i32
    %c0_i32_1 = arith.constant 0 : i32
    return %c0_i32, %c0_i32_0 : i32, i32
  }
  func.func @transform_9(%arg0: i32) -> (i32, i32) {
    %c0_i32 = arith.constant 0 : i32
    %c0_i32_0 = arith.constant 0 : i32
    %c0_i32_1 = arith.constant 0 : i32
    return %c0_i32, %c0_i32_0 : i32, i32
  }
  func.func @transform_10(%arg0: i32) -> (i32, i32) {
    %c0_i32 = arith.constant 0 : i32
    %c0_i32_0 = arith.constant 0 : i32
    %c0_i32_1 = arith.constant 0 : i32
    return %c0_i32, %c0_i32_0 : i32, i32
  }
  func.func @transform_11(%arg0: i32) -> (i32, i32) {
    %c0_i32 = arith.constant 0 : i32
    %c0_i32_0 = arith.constant 0 : i32
    %c0_i32_1 = arith.constant 0 : i32
    return %c0_i32, %c0_i32_0 : i32, i32
  }
  func.func @transform_12(%arg0: i32) -> (i32, i32, i32, i32) {
    %c0_i32 = arith.constant 0 : i32
    %c0_i32_0 = arith.constant 0 : i32
    %c0_i32_1 = arith.constant 0 : i32
    %c0_i32_2 = arith.constant 0 : i32
    return %arg0, %c0_i32, %c0_i32_0, %c0_i32_1 : i32, i32, i32, i32
  }
}

</mosaic_0001>

<bundles_post_ra>
// kernel: decoder_block_forward.1
= control target key start
LH: loop header
LB: loop body
LE: loop exit
PB: predicated region body
PF: predicated region fallthrough
CT: control target
= control target key end

     0   :  { %s8610_s21 = smov 0   ;;  %s12495_s0 = inlined_call_operand.vmem [shape: bf16[2,8,8,8], index: 0, kind: input, shape index: {}]   ;;  %s12496_s1 = inlined_call_operand.vmem [shape: bf16[2,4,16,18], index: 1, kind: input, shape index: {}]   ;;  %s12497_s2 = inlined_call_operand.vmem [shape: bf16[18,8], index: 2, kind: input, shape index: {}]   ;;  %s12498_s3 = inlined_call_operand.vmem [shape: bf16[8,18], index: 3, kind: input, shape index: {}]   ;;  %s12499_s4 = inlined_call_operand.vmem [shape: bf16[4,8], index: 4, kind: input, shape index: {}]   ;;  %s12500_s5 = inlined_call_operand.vmem [shape: f32[4,1], index: 5, kind: input, shape index: {}]   ;;  %s12501_s6 = inlined_call_operand.vmem [shape: bf16[4,4], index: 6, kind: input, shape index: {}]   ;;  %s12502_s7 = inlined_call_operand.vmem [shape: f32[4,1], index: 7, kind: input, shape index: {}]   ;;  %s12503_s8 = inlined_call_operand.vmem [shape: bf16[4,4], index: 8, kind: input, shape index: {}]   ;;  %s12504_s9 = inlined_call_operand.vmem [shape: f32[4,1], index: 9, kind: input, shape index: {}]   ;;  %s12505_s10 = inlined_call_operand.vmem [shape: bf16[4,108], index: 10, kind: input, shape index: {}]   ;;  %s12506_s11 = inlined_call_operand.vmem [shape: f32[4,1], index: 11, kind: input, shape index: {}]   ;;  %s12507_s12 = inlined_call_operand.vmem [shape: f32[2,16,4,16], index: 12, kind: output, shape index: {}]  }
   0x1 LB: > { %s7073_s22 = sadd.s32 4294967295, %s8538_s21   ;;  %p7077_p0 = scmp.ge.s32.totalorder %s8538_s21, 1  ;;  %s8538_s21 = sphi %s8610_s21, %s22_s21  }
   0x2   : > { %p372_p1 = scmp.lt.s32.totalorder %s8538_s21, 3 }
   0x4   : > { %p373_p2 = pnand %p7077_p0, %p372_p1 }
   0x6   : > { %376 = sbr.rel (%p373_p2) target bundleno = 4455 (0x1167), region = 68 }
   0xb   : > { %p419_p3 = scmp.lt.s32.totalorder %s7073_s22, 1  ;;  %v8345_v0 = vld [vmem:[%s12497_s2] sm:$0xff]   ;;  %vm455_vm0 = vcmask 64512   ;;  %vm462_vm1 = vcmask 1043456   ;;  %vm8542_vm2 = vmmov 0   ;;  %vm1574_vm3 = vcmask 1041409  }
   0xc   : > { %7644 = vmatprep.mubr.msk.bf16.mxu0 %vm455_vm0, %v8345_v0  ;;  %7650 = vmatprep.mubr.msk.bf16.mxu1 %vm455_vm0, %v8345_v0  ;;  %v8346_v1 = vld [vmem:[%s12497_s2 + $0x8] ss:$0 sps:$4 sm:$0x11]   ;;  %v446_v18 = vld [vmem:[%s12498_s3] sm:$0xf]  ;;  %vm1577_vm4 = vcmask 1042434  }
   0xd   : > { %s13151_s22 = smov (!%p419_p3, %s7073_s22), 1  ;;  %v8680_v19 = vsel %vm462_vm1, %v446_v18, 0  ;;  %vm1580_vm5 = vcmask 1043459   ;;  %vm1673_vm6 = vcmask 1041408   ;;  %vm1669_vm7 = vcmask 31744   ;;  %s8544_s29 = smov 126  }
   0xe   : > { %s7343_s25 = sshll.u32 %s13151_s22, 5  ;;  %vm1429_vm8 = vcmask 139264   ;;  %vm1426_vm9 = vcmask 142336   ;;  %vm1586_vm10 = vcmask 1045509   ;;  %vm1589_vm11 = vcmask 1046534   ;;  %s7345_s27 = sshll.u32 %s13151_s22, 6 }
   0xf   : > { %s8631_s28 = scalar_lea.vmem %s12495_s0, %s7343_s25  ;;  %s8726_s26 = scalar_lea.vmem %s12496_s1, %s7343_s25  ;;  %vm1592_vm12 = vcmask 1047559   ;;  %vm1583_vm13 = vcmask 1044484   ;;  %vm4909_vm14 = vcmask 1045504   ;;  %vm4951_vm15 = vcmask 883712  }
  0x10   : > { %v435_v2 = vld [vmem:[%s8631_s28] sm:$0xf]  ;;  %v436_v3 = vld [vmem:[%s8631_s28 + $0x4] sm:$0xf]  ;;  %v437_v4 = vld [vmem:[%s8631_s28 + $0x8] sm:$0xf]  ;;  %s12356_s22 = scalar_lea.vmem %s12507_s12, %s7345_s27 }
  0x11   : > { %8314 = vmatprep.subr.msk.bf16.mxu0 %vm462_vm1, %v435_v2  ;;  %8315 = vmatprep.subr.msk.bf16.mxu1 %vm462_vm1, %v436_v3  ;;  %v464_v5 = vsel %vm462_vm1, %v435_v2, 0  ;;  %v515_v6 = vsel %vm462_vm1, %v436_v3, 0  ;;  %v438_v7 = vld [vmem:[%s8631_s28 + $0xc] sm:$0xf]  ;;  %v566_v8 = vsel %vm462_vm1, %v437_v4, 0 }
  0x12   : > { %7643 = vmatpush3.bf16.msra.mxu0 %v464_v5  ;;  %7649 = vmatpush3.bf16.msra.mxu1 %v515_v6  ;;  %v617_v9 = vsel %vm462_vm1, %v438_v7, 0  ;;  %v439_v10 = vld [vmem:[%s8631_s28 + $0x10] sm:$0xf]  ;;  %v440_v11 = vld [vmem:[%s8631_s28 + $0x14] sm:$0xf] }
  0x13   : > { %8316 = vmatprep.subr.msk.bf16.mxu0 %vm462_vm1, %v437_v4  ;;  %8317 = vmatprep.subr.msk.bf16.mxu1 %vm462_vm1, %v438_v7  ;;  %v668_v12 = vsel %vm462_vm1, %v439_v10, 0  ;;  %v719_v13 = vsel %vm462_vm1, %v440_v11, 0  ;;  %v441_v14 = vld [vmem:[%s8631_s28 + $0x18] sm:$0xf]  ;;  %v442_v15 = vld [vmem:[%s8631_s28 + $0x1c] sm:$0xf] }
  0x14   : > { %v770_v16 = vsel %vm462_vm1, %v441_v14, 0  ;;  %v821_v17 = vsel %vm462_vm1, %v442_v15, 0  ;;  %v8540_v4 = vmov 0   ;;  %v1528_v5 = vld [vmem:[%s12500_s5] sm:$0xf]  ;;  %s8543_s28 = smov 127  }
  0x15   : > { %7645 = vmatmul.mubr.msk.bf16.vlgmr.msra.gmra.mxu0 %vm455_vm0, %v8346_v1  ;;  %7651 = vmatmul.mubr.msk.bf16.vlgmr.msra.gmra.mxu1 %vm455_vm0, %v8346_v1  ;;  %v1530_v6 = vld [vmem:[%s12504_s9] sm:$0xf] }
  0x16   : > { %7655 = vmatpush3.bf16.msra.mxu0 %v566_v8  ;;  %7661 = vmatpush3.bf16.msra.mxu1 %v617_v9  ;;  %v1529_v7 = vld [vmem:[%s12502_s7] sm:$0xf]  ;;  %v1533_v9 = vld [vmem:[%s8726_s26 + $0x8] sm:$0x1] }
  0x17   : > { %7656 = vmatprep.mubr.msk.bf16.mxu0 %vm455_vm0, %v8345_v0  ;;  %7662 = vmatprep.mubr.msk.bf16.mxu1 %vm455_vm0, %v8345_v0  ;;  %v1532_v8 = vld [vmem:[%s8726_s26] sm:$0x1] }
  0x18   : > { %8318 = vmatprep.subr.msk.bf16.mxu0 %vm462_vm1, %v439_v10  ;;  %8319 = vmatprep.subr.msk.bf16.mxu1 %vm462_vm1, %v440_v11  ;;  %v12513_v10 = vmov 0.0   ;;  %v1534_v11 = vld [vmem:[%s8726_s26 + $0x10] sm:$0x1] }
  0x19   : > { %8343 = vset.pattern.permute.xlu0 %v8540_v4  ;;  %8344 = vset.pattern.permute.xlu1 %v8540_v4 }
  0x1a   : > { %1538 = vperm.xlu0 %8343, %v1528_v5   ;;  %1722 = vperm.xlu1 %8344, %v1530_v6  }
  0x1d   : > { %7657 = vmatmul.mubr.msk.bf16.vlgmr.msra.gmra.mxu0 %vm455_vm0, %v8346_v1  ;;  %7663 = vmatmul.mubr.msk.bf16.vlgmr.msra.gmra.mxu1 %vm455_vm0, %v8346_v1 }
  0x1e   : > { %7667 = vmatpush3.bf16.msra.mxu0 %v668_v12  ;;  %7673 = vmatpush3.bf16.msra.mxu1 %v719_v13  ;;  %v1535_v12 = vld [vmem:[%s8726_s26 + $0x18] sm:$0x1]  ;;  %v7151_v13 = vcombine.low %v1532_v8, %v1532_v8 }
  0x1f   : > { %7668 = vmatprep.mubr.msk.bf16.mxu0 %vm455_vm0, %v8345_v0  ;;  %7674 = vmatprep.mubr.msk.bf16.mxu1 %vm455_vm0, %v8345_v0 }
  0x20   : > { %8320 = vmatprep.subr.msk.bf16.mxu0 %vm462_vm1, %v441_v14  ;;  %8321 = vmatprep.subr.msk.bf16.mxu1 %vm462_vm1, %v442_v15  ;;  %v7152_v14 = vcombine.low %v1533_v9, %v1533_v9  ;;  %v7153_v15 = vcombine.low %v1534_v11, %v1534_v11 }
  0x21   : > { %1643 = vperm.xlu0 %8343, %v1529_v7  }
  0x25   : > { %7669 = vmatmul.mubr.msk.bf16.vlgmr.msra.gmra.mxu0 %vm455_vm0, %v8346_v1  ;;  %7675 = vmatmul.mubr.msk.bf16.vlgmr.msra.gmra.mxu1 %vm455_vm0, %v8346_v1 }
  0x26   : > { %7679 = vmatpush3.bf16.msra.mxu0 %v770_v16  ;;  %7685 = vmatpush3.bf16.msra.mxu1 %v821_v17  ;;  %v7154_v16 = vcombine.low %v1535_v12, %v1535_v12  ;;  %v8734_v17 = vunpack.c.l.b16 %v7151_v13 }
  0x27   : > { %7680 = vmatprep.mubr.msk.bf16.mxu0 %vm455_vm0, %v8345_v0  ;;  %7686 = vmatprep.mubr.msk.bf16.mxu1 %vm455_vm0, %v8345_v0 }
  0x28   : > { %8322 = vmatprep.subr.msk.bf16.mxu0 %vm462_vm1, %v446_v18  ;;  %8323 = vmatprep.subr.msk.bf16.mxu1 %vm462_vm1, %v446_v18  ;;  %12672 = vst [vmem:[#allocation3_spill] sm:$0xff] %v8734_v17 }
  0x2d   : > { %7681 = vmatmul.mubr.msk.bf16.vlgmr.msra.gmra.mxu0 %vm455_vm0, %v8346_v1  ;;  %7687 = vmatmul.mubr.msk.bf16.vlgmr.msra.gmra.mxu1 %vm455_vm0, %v8346_v1 }
  0x2e   : > { %7691 = vmatpush3.bf16.msra.mxu0 %v8680_v19  ;;  %7697 = vmatpush3.bf16.msra.mxu1 %v8680_v19 }
  0x2f   : > { %8324 = vmatprep.subr.msk.bf16.mxu0 %vm462_vm1, %v446_v18  ;;  %8325 = vmatprep.subr.msk.bf16.mxu1 %vm462_vm1, %v446_v18 }
  0xd5   : > { %v7646_v20 = vpop.f32.mrf.mxu0  ;;  %v7652_v21 = vpop.f32.mrf.mxu1 }
  0xd6   : > { %v872_v30 = vpack.c.bf16 %v7646_v20, %v7646_v20  ;;  %v874_v31 = vpack.c.bf16 %v7652_v21, %v7652_v21  ;;  %v8740_v20 = vunpack.c.l.b16 %v7154_v16 }
  0xd7   : > { %v500_v22 = vpop.f32.mrf.mxu0  ;;  %v551_v23 = vpop.f32.mrf.mxu1 }
  0xd8   : > { %12675 = vst [vmem:[#allocation6_spill] sm:$0xff] %v8740_v20 }
  0xd9   : > { %v7647_v24 = vpop.f32.mrf.mxu0  ;;  %v7653_v25 = vpop.f32.mrf.mxu1 }
  0xdb   : > { %v503_v26 = vpop.f32.mrf.mxu0  ;;  %v554_v27 = vpop.f32.mrf.mxu1 }
  0xdc   : > { %v871_v28 = vpack.c.bf16 %v503_v26, %v500_v22  ;;  %v873_v29 = vpack.c.bf16 %v554_v27, %v551_v23  ;;  %v1666_v23 = vrot.slane %v8740_v20, 5 }
  0xdd   : > { %v7658_v32 = vpop.f32.mrf.mxu0  ;;  %v7664_v33 = vpop.f32.mrf.mxu1 }
  0xde   : > { %7692 = vmatprep.mubr.msk.bf16.mxu0 %vm455_vm0, %v871_v28  ;;  %7698 = vmatprep.mubr.msk.bf16.mxu1 %vm455_vm0, %v873_v29  ;;  %v876_v42 = vpack.c.bf16 %v7658_v32, %v7658_v32  ;;  %v878_v43 = vpack.c.bf16 %v7664_v33, %v7664_v33  ;;  %v1525_v29 = vld [vmem:[%s12501_s6] sm:$0x3] }
  0xdf   : > { %v602_v34 = vpop.f32.mrf.mxu0  ;;  %v653_v35 = vpop.f32.mrf.mxu1  ;;  %7693 = vmatmul.mubr.msk.bf16.vlgmr.msra.gmra.mxu0 %vm455_vm0, %v872_v30  ;;  %7699 = vmatmul.mubr.msk.bf16.vlgmr.msra.gmra.mxu1 %vm455_vm0, %v874_v31 }
  0xe0   : > { %7703 = vmatpush3.bf16.msra.mxu0 %v8680_v19  ;;  %7709 = vmatpush3.bf16.msra.mxu1 %v8680_v19 }
  0xe1   : > { %v7659_v36 = vpop.f32.mrf.mxu0  ;;  %v7665_v37 = vpop.f32.mrf.mxu1  ;;  %8326 = vmatprep.subr.msk.bf16.mxu0 %vm462_vm1, %v446_v18  ;;  %8327 = vmatprep.subr.msk.bf16.mxu1 %vm462_vm1, %v446_v18 }
  0xe3   : > { %v605_v38 = vpop.f32.mrf.mxu0  ;;  %v656_v39 = vpop.f32.mrf.mxu1 }
  0xe4   : > { %v875_v40 = vpack.c.bf16 %v605_v38, %v602_v34  ;;  %v877_v41 = vpack.c.bf16 %v656_v39, %v653_v35 }
  0xe5   : > { %v7670_v44 = vpop.f32.mrf.mxu0  ;;  %v7676_v45 = vpop.f32.mrf.mxu1 }
  0xe6   : > { %7704 = vmatprep.mubr.msk.bf16.mxu0 %vm455_vm0, %v875_v40  ;;  %7710 = vmatprep.mubr.msk.bf16.mxu1 %vm455_vm0, %v877_v41  ;;  %v880_v54 = vpack.c.bf16 %v7670_v44, %v7670_v44  ;;  %v882_v55 = vpack.c.bf16 %v7676_v45, %v7676_v45 }
  0xe7   : > { %v704_v46 = vpop.f32.mrf.mxu0  ;;  %v755_v47 = vpop.f32.mrf.mxu1  ;;  %7705 = vmatmul.mubr.msk.bf16.vlgmr.msra.gmra.mxu0 %vm455_vm0, %v876_v42  ;;  %7711 = vmatmul.mubr.msk.bf16.vlgmr.msra.gmra.mxu1 %vm455_vm0, %v878_v43 }
  0xe8   : > { %7715 = vmatpush3.bf16.msra.mxu0 %v8680_v19  ;;  %7721 = vmatpush3.bf16.msra.mxu1 %v8680_v19 }
  0xe9   : > { %v7671_v48 = vpop.f32.mrf.mxu0  ;;  %v7677_v49 = vpop.f32.mrf.mxu1  ;;  %8328 = vmatprep.subr.msk.bf16.mxu0 %vm462_vm1, %v446_v18  ;;  %8329 = vmatprep.subr.msk.bf16.mxu1 %vm462_vm1, %v446_v18  ;;  %v8736_v18 = vunpack.c.l.b16 %v7152_v14 }
  0xeb   : > { %v707_v50 = vpop.f32.mrf.mxu0  ;;  %v758_v51 = vpop.f32.mrf.mxu1  ;;  %12673 = vst [vmem:[#allocation4_spill] sm:$0xff] %v8736_v18  ;;  %v1662_v21 = vrot.slane %v8736_v18, 7 }
  0xec   : > { %v879_v52 = vpack.c.bf16 %v707_v50, %v704_v46  ;;  %v881_v53 = vpack.c.bf16 %v758_v51, %v755_v47 }
  0xed   : > { %v7682_v56 = vpop.f32.mrf.mxu0  ;;  %v7688_v57 = vpop.f32.mrf.mxu1  ;;  %v1663_v24 = vsel %vm1574_vm3, %v1662_v21, %v8734_v17 }
  0xee   : > { %7716 = vmatprep.mubr.msk.bf16.mxu0 %vm455_vm0, %v879_v52  ;;  %7722 = vmatprep.mubr.msk.bf16.mxu1 %vm455_vm0, %v881_v53  ;;  %v884_v2 = vpack.c.bf16 %v7682_v56, %v7682_v56  ;;  %v886_v3 = vpack.c.bf16 %v7688_v57, %v7688_v57 }
  0xef   : > { %v806_v58 = vpop.f32.mrf.mxu0  ;;  %v857_v59 = vpop.f32.mrf.mxu1  ;;  %7717 = vmatmul.mubr.msk.bf16.vlgmr.msra.gmra.mxu0 %vm455_vm0, %v880_v54  ;;  %7723 = vmatmul.mubr.msk.bf16.vlgmr.msra.gmra.mxu1 %vm455_vm0, %v882_v55 }
  0xf0   : > { %7727 = vmatpush3.bf16.msra.mxu0 %v8680_v19  ;;  %7733 = vmatpush3.bf16.msra.mxu1 %v8680_v19  ;;  %v8738_v19 = vunpack.c.l.b16 %v7153_v15 }
  0xf1   : > { %v7683_v60 = vpop.f32.mrf.mxu0  ;;  %v7689_v61 = vpop.f32.mrf.mxu1  ;;  %7744 = vmatprep.subr.bf16.mxu1 %v12513_v10  ;;  %7738 = vmatprep.subr.bf16.mxu0 %v12513_v10 }
  0xf2   : > { %12674 = vst [vmem:[#allocation5_spill] sm:$0xff] %v8738_v19  ;;  %v1664_v22 = vrot.slane %v8738_v19, 6  ;;  %v12692_v19 = vmov 0.0  }
  0xf3   : > { %v809_v62 = vpop.f32.mrf.mxu0  ;;  %v860_v63 = vpop.f32.mrf.mxu1 }
  0xf4   : > { %v883_v0 = vpack.c.bf16 %v809_v62, %v806_v58  ;;  %v885_v1 = vpack.c.bf16 %v860_v63, %v857_v59  ;;  %v1665_v25 = vsel %vm1577_vm4, %v1664_v22, %v1663_v24 }
  0xf5   : > { %v1667_v26 = vsel %vm1580_vm5, %v1666_v23, %v1665_v25 }
  0xf6   : > { %7728 = vmatprep.mubr.msk.bf16.mxu0 %vm455_vm0, %v883_v0  ;;  %7734 = vmatprep.mubr.msk.bf16.mxu1 %vm455_vm0, %v885_v1  ;;  %v1668_v27 = vpack.c.b16 %v1667_v26, %v1667_v26 }
  0xf7   : > { %7729 = vmatmul.mubr.msk.bf16.vlgmr.msra.gmra.mxu0 %vm455_vm0, %v884_v2  ;;  %7735 = vmatmul.mubr.msk.bf16.vlgmr.msra.gmra.mxu1 %vm455_vm0, %v886_v3 }
  0xf8   : > { %7746 = vmatprep.mubr.msk.bf16.mxu1 %vm8542_vm2, %v12513_v10  ;;  %7740 = vmatprep.mubr.msk.bf16.mxu0 %vm8542_vm2, %v12513_v10  ;;  %v1675_v28 = vsel %vm1673_vm6, %v1668_v27, 0 }
  0xf9   : > { %7745 = vmatpush3.bf16.msra.mxu1 %v1675_v28 }
  0xfa   : > { %7756 = vmatprep.subr.bf16.mxu1 %v12513_v10 }
  0xff   : > { %7747 = vmatmul.mubr.msk.bf16.vlgmr.msra.gmra.mxu1 %vm1669_vm7, %v1525_v29 }
 0x100   : > { %7758 = vmatprep.mubr.msk.bf16.mxu1 %vm8542_vm2, %v12513_v10 }
 0x19f   : > { %v7694_v30 = vpop.f32.mrf.mxu0  ;;  %v7700_v31 = vpop.f32.mrf.mxu1 }
 0x1a0   : > { %v7348_v32 = vpack.c.bf16 %v7694_v30, %v7694_v30  ;;  %v7351_v33 = vpack.c.bf16 %v7700_v31, %v7700_v31 }
 0x1a1   : > { %v930_v34 = vpop.f32.mrf.mxu0  ;;  %v984_v35 = vpop.f32.mrf.mxu1 }
 0x1a2   : > { %1430 = vst.msk [vmem:[#allocation2 + $0x8] sm:$0x1] %vm1429_vm8, %v7348_v32  ;;  %1433 = vst.msk [vmem:[#allocation2 + $0x14] sm:$0x1] %vm1429_vm8, %v7351_v33  ;;  %v7346_v36 = vpack.c.bf16 %v930_v34, %v930_v34  ;;  %v7349_v37 = vpack.c.bf16 %v984_v35, %v984_v35 }
 0x1a3   : > { %v7695_v38 = vpop.f32.mrf.mxu0  ;;  %v7701_v39 = vpop.f32.mrf.mxu1 }
 0x1a4   : > { %1427 = vst.msk [vmem:[#allocation2] sm:$0xf] %vm1426_vm9, %v7346_v36  ;;  %1431 = vst.msk [vmem:[#allocation2 + $0xc] sm:$0xf] %vm1426_vm9, %v7349_v37 }
 0x1a5   : > { %v933_v40 = vpop.f32.mrf.mxu0  ;;  %v987_v41 = vpop.f32.mrf.mxu1 }
 0x1a6   : > { %v7347_v42 = vpack.c.bf16 %v933_v40, %v933_v40  ;;  %v7350_v43 = vpack.c.bf16 %v987_v41, %v987_v41 }
 0x1a7   : > { %v7706_v44 = vpop.f32.mrf.mxu0  ;;  %v7712_v45 = vpop.f32.mrf.mxu1 }
 0x1a8   : > { %1428 = vst.msk [vmem:[#allocation2 + $0x4] sm:$0xf] %vm1426_vm9, %v7347_v42  ;;  %1432 = vst.msk [vmem:[#allocation2 + $0x10] sm:$0xf] %vm1426_vm9, %v7350_v43  ;;  %v7354_v46 = vpack.c.bf16 %v7706_v44, %v7706_v44  ;;  %v7357_v47 = vpack.c.bf16 %v7712_v45, %v7712_v45 }
 0x1a9   : > { %v1038_v48 = vpop.f32.mrf.mxu0  ;;  %v1092_v49 = vpop.f32.mrf.mxu1 }
 0x1aa   : > { %1436 = vst.msk [vmem:[#allocation2 + $0x20] sm:$0x1] %vm1429_vm8, %v7354_v46  ;;  %1439 = vst.msk [vmem:[#allocation2 + $0x2c] sm:$0x1] %vm1429_vm8, %v7357_v47  ;;  %v7352_v50 = vpack.c.bf16 %v1038_v48, %v1038_v48  ;;  %v7355_v51 = vpack.c.bf16 %v1092_v49, %v1092_v49 }
 0x1ab   : > { %v7707_v52 = vpop.f32.mrf.mxu0  ;;  %v7713_v53 = vpop.f32.mrf.mxu1  ;;  %v8349_v54 = vld [vmem:[#allocation2] ss:$0 sps:$4 sm:$0x88]   ;;  %v8350_v55 = vld [vmem:[#allocation2 + $0xc] ss:$0 sps:$4 sm:$0x88]  }
 0x1ac   : > { %1434 = vst.msk [vmem:[#allocation2 + $0x18] sm:$0xf] %vm1426_vm9, %v7352_v50  ;;  %1437 = vst.msk [vmem:[#allocation2 + $0x24] sm:$0xf] %vm1426_vm9, %v7355_v51  ;;  %v8771_v60 = vunpack.c.l.b16 %v8349_v54  ;;  %v8773_v61 = vunpack.c.l.b16 %v8350_v55 }
 0x1ad   : > { %v1041_v56 = vpop.f32.mrf.mxu0  ;;  %v1095_v57 = vpop.f32.mrf.mxu1  ;;  %v8353_v0 = vld [vmem:[#allocation2] ss:$0 sps:$4 sm:$0x22]   ;;  %v8354_v3 = vld [vmem:[#allocation2 + $0xc] ss:$0 sps:$4 sm:$0x22]  }
 0x1ae   : > { %v7353_v58 = vpack.c.bf16 %v1041_v56, %v1041_v56  ;;  %v7356_v59 = vpack.c.bf16 %v1095_v57, %v1095_v57  ;;  %v8780_v9 = vld [vmem:[#allocation2] ss:$0 sps:$4 sm:$0x11]   ;;  %v5428_v13 = vrot.slane %v8771_v60, 2  ;;  %v5429_v14 = vrot.slane %v8773_v61, 1 }
 0x1af   : > { %v7718_v62 = vpop.f32.mrf.mxu0  ;;  %v7724_v63 = vpop.f32.mrf.mxu1  ;;  %v8786_v15 = vld [vmem:[#allocation2 + $0xc] ss:$0 sps:$4 sm:$0x11]   ;;  %v8788_v22 = vunpack.c.l.b16 %v8353_v0  ;;  %v8793_v29 = vunpack.c.l.b16 %v8354_v3  ;;  %v8804_v40 = vunpack.c.l.b16 %v8780_v9 }
 0x1b0   : > { %1435 = vst.msk [vmem:[#allocation2 + $0x1c] sm:$0xf] %vm1426_vm9, %v7353_v58  ;;  %1438 = vst.msk [vmem:[#allocation2 + $0x28] sm:$0xf] %vm1426_vm9, %v7356_v59  ;;  %v7360_v1 = vpack.c.bf16 %v7718_v62, %v7718_v62  ;;  %v7363_v2 = vpack.c.bf16 %v7724_v63, %v7724_v63  ;;  %v5430_v37 = vsel %vm1586_vm10, %v5429_v14, %v5428_v13  ;;  %v8812_v45 = vunpack.c.l.b16 %v8786_v15 }
 0x1b1   : > { %v1146_v4 = vpop.f32.mrf.mxu0  ;;  %v1200_v5 = vpop.f32.mrf.mxu1  ;;  %v1826_v39 = vrot.slane %v8788_v22, 2  ;;  %12676 = vst [vmem:[#allocation7_spill] sm:$0xff] %v8804_v40  ;;  %v4886_v43 = vrot.slane %v8788_v22, 6  ;;  %v1827_v50 = vrot.slane %v8793_v29, 1  ;;  %v4887_v56 = vrot.slane %v8793_v29, 5 }
 0x1b2   : > { %1442 = vst.msk [vmem:[#allocation2 + $0x38] sm:$0x1] %vm1429_vm8, %v7360_v1  ;;  %1445 = vst.msk [vmem:[#allocation2 + $0x44] sm:$0x1] %vm1429_vm8, %v7363_v2  ;;  %v7358_v11 = vpack.c.bf16 %v1146_v4, %v1146_v4  ;;  %v7361_v12 = vpack.c.bf16 %v1200_v5, %v1200_v5 }
 0x1b3   : > { %v7719_v16 = vpop.f32.mrf.mxu0  ;;  %v7725_v21 = vpop.f32.mrf.mxu1  ;;  %v8351_v23 = vld [vmem:[#allocation2 + $0x18] ss:$0 sps:$4 sm:$0x88]   ;;  %v8352_v24 = vld [vmem:[#allocation2 + $0x24] ss:$0 sps:$4 sm:$0x88]   ;;  %v4888_v3 = vsel %vm1586_vm10, %v4887_v56, %v4886_v43 }
 0x1b4   : > { %1440 = vst.msk [vmem:[#allocation2 + $0x30] sm:$0xf] %vm1426_vm9, %v7358_v11  ;;  %1443 = vst.msk [vmem:[#allocation2 + $0x3c] sm:$0xf] %vm1426_vm9, %v7361_v12  ;;  %v8795_v32 = vunpack.c.l.b16 %v8351_v23  ;;  %v8797_v33 = vunpack.c.l.b16 %v8352_v24  ;;  %v4856_v23 = vrot.slane %v8804_v40, 5 }
 0x1b5   : > { %v1149_v25 = vpop.f32.mrf.mxu0  ;;  %v1203_v26 = vpop.f32.mrf.mxu1  ;;  %v8355_v28 = vld [vmem:[#allocation2 + $0x18] ss:$0 sps:$4 sm:$0x22]   ;;  %v8356_v34 = vld [vmem:[#allocation2 + $0x24] ss:$0 sps:$4 sm:$0x22]  }
 0x1b6   : > { %v7359_v30 = vpack.c.bf16 %v1149_v25, %v1149_v25  ;;  %v7362_v31 = vpack.c.bf16 %v1203_v26, %v1203_v26  ;;  %v8800_v38 = vunpack.c.l.b16 %v8355_v28  ;;  %v8809_v44 = vld [vmem:[#allocation2 + $0x18] ss:$0 sps:$4 sm:$0x11]   ;;  %12677 = vst [vmem:[#allocation8_spill] sm:$0xff] %v8812_v45  ;;  %v5431_v48 = vsel %vm1589_vm11, %v8795_v32, %v5430_v37 }
 0x1b7   : > { %v7730_v35 = vpop.f32.mrf.mxu0  ;;  %v7736_v36 = vpop.f32.mrf.mxu1  ;;  %v5432_v49 = vrot.slane %v8797_v33, 7  ;;  %v8819_v52 = vld [vmem:[#allocation2 + $0x24] ss:$0 sps:$4 sm:$0x11]   ;;  %v8823_v55 = vunpack.c.l.b16 %v8356_v34  ;;  %v8831_v63 = vunpack.c.l.b16 %v8809_v44  ;;  %v4812_v37 = vrot.slane %v8804_v40, 4 }
 0x1b8   : > { %1441 = vst.msk [vmem:[#allocation2 + $0x34] sm:$0xf] %vm1426_vm9, %v7359_v30  ;;  %1444 = vst.msk [vmem:[#allocation2 + $0x40] sm:$0xf] %vm1426_vm9, %v7362_v31  ;;  %v7366_v41 = vpack.c.bf16 %v7730_v35, %v7730_v35  ;;  %v7369_v42 = vpack.c.bf16 %v7736_v36, %v7736_v36  ;;  %v4889_v62 = vrot.slane %v8800_v38, 4  ;;  %v8834_v0 = vunpack.c.l.b16 %v8819_v52 }
 0x1b9   : > { %v1254_v46 = vpop.f32.mrf.mxu0  ;;  %v1308_v47 = vpop.f32.mrf.mxu1  ;;  %v8827_v59 = vsel %vm1592_vm12, %v5432_v49, %v5431_v48  ;;  %12679 = vst [vmem:[#allocation10_spill] sm:$0xff] %v8831_v63  ;;  %v4891_v4 = vrot.slane %v8823_v55, 3  ;;  %v8843_v5 = vld [vmem:[#allocation2] ss:$0 sps:$4 sm:$0x44]   ;;  %v4857_v30 = vrot.slane %v8812_v45, 4  ;;  %v1828_v48 = vsel %vm1574_vm3, %v1827_v50, %v1826_v39 }
 0x1ba   : > { %1448 = vst.msk [vmem:[#allocation2 + $0x50] sm:$0x1] %vm1429_vm8, %v7366_v41  ;;  %1451 = vst.msk [vmem:[#allocation2 + $0x5c] sm:$0x1] %vm1429_vm8, %v7369_v42  ;;  %v7364_v53 = vpack.c.bf16 %v1254_v46, %v1254_v46  ;;  %v7367_v54 = vpack.c.bf16 %v1308_v47, %v1308_v47  ;;  %v5546_v1 = vpack.c.b16 %v8827_v59, %v8827_v59  ;;  %v4859_v35 = vrot.slane %v8831_v63, 3 }
 0x1bb   : > { %v7731_v57 = vpop.f32.mrf.mxu0  ;;  %v7737_v58 = vpop.f32.mrf.mxu1  ;;  %12678 = vst [vmem:[#allocation9_spill] sm:$0xff] %v8827_v59  ;;  %12680 = vst [vmem:[#allocation11_spill] sm:$0xff] %v8834_v0  ;;  %v8348_v11 = vld [vmem:[#allocation2 + $0x30] ss:$0 sps:$4 sm:$0x22]   ;;  %v4890_v21 = vsel %vm1589_vm11, %v4889_v62, %v4888_v3  ;;  %v4861_v36 = vrot.slane %v8834_v0, 2  ;;  %v4858_v41 = vsel %vm1586_vm10, %v4857_v30, %v4856_v23 }
 0x1bc   : > { %1446 = vst.msk [vmem:[#allocation2 + $0x48] sm:$0xf] %vm1426_vm9, %v7364_v53  ;;  %1449 = vst.msk [vmem:[#allocation2 + $0x54] sm:$0xf] %vm1426_vm9, %v7367_v54  ;;  %5659 = vrot.lane.b32.xlu1 %v5546_v1, %s8543_s28  ;;  %5548 = vrot.lane.b32.xlu0 %v5546_v1, %s8544_s29  ;;  %v8854_v28 = vsel %vm1592_vm12, %v4891_v4, %v4890_v21  ;;  %v4813_v42 = vrot.slane %v8812_v45, 3  ;;  %v4815_v43 = vrot.slane %v8831_v63, 2  ;;  %v8873_v53 = vunpack.c.l.b16 %v8843_v5 }
 0x1bd   : > { %v1311_v12 = vpop.f32.mrf.mxu1  ;;  %v1257_v16 = vpop.f32.mrf.mxu0  ;;  %v8849_v24 = vld [vmem:[#allocation2 + $0xc] ss:$0 sps:$4 sm:$0x44]   ;;  %v8367_v31 = vld [vmem:[#allocation2 + $0x18] ss:$0 sps:$4 sm:$0x44]   ;;  %v8859_v34 = vpack.c.b16 %v8854_v28, %v8854_v28  ;;  %v4860_v49 = vsel %vm1589_vm11, %v4859_v35, %v4858_v41  ;;  %v5271_v54 = vunpack.c.h.b16 %v8843_v5  ;;  %v8888_v4 = vunpack.c.l.b16 %v8348_v11 }
 0x1be   : > { %v7368_v25 = vpack.c.bf16 %v1311_v12, %v1311_v12  ;;  %v7365_v26 = vpack.c.bf16 %v1257_v16, %v1257_v16  ;;  %v4817_v46 = vrot.slane %v8834_v0, 1  ;;  %v8368_v47 = vld [vmem:[#allocation2 + $0x24] ss:$0 sps:$4 sm:$0x44]   ;;  %v8882_v58 = vsel %vm1592_vm12, %v4861_v36, %v4860_v49 }
 0x1bf   : > { %v8876_v56 = vld [vmem:[#allocation2 + $0x30] ss:$0 sps:$4 sm:$0x11]   ;;  %12681 = vst [vmem:[#allocation12_spill] sm:$0xff] %v8882_v58  ;;  %v4814_v62 = vsel %vm1586_vm10, %v4813_v42, %v4812_v37  ;;  %v5272_v1 = vunpack.c.h.b16 %v8849_v24  ;;  %v1830_v5 = vrot.slane %v8823_v55, 7  ;;  %v4877_v12 = vpack.c.b16 %v8882_v58, %v8882_v58 }
 0x1c0   : > { %1450 = vst.msk [vmem:[#allocation2 + $0x58] sm:$0xf] %vm1426_vm9, %v7368_v25  ;;  %1447 = vst.msk [vmem:[#allocation2 + $0x4c] sm:$0xf] %vm1426_vm9, %v7365_v26  ;;  %5017 = vrot.lane.b32.xlu0 %v8859_v34, %s8544_s29  ;;  %v4816_v16 = vsel %vm1589_vm11, %v4815_v43, %v4814_v62  ;;  %v8895_v23 = vunpack.c.l.b16 %v8367_v31  ;;  %v8897_v25 = vunpack.c.l.b16 %v8368_v47  ;;  %v5273_v26 = vunpack.c.h.b16 %v8367_v31 }
 0x1c1   : > { %v8886_v3 = vld [vmem:[#allocation2 + $0x3c] ss:$0 sps:$4 sm:$0x11]   ;;  %v4818_v21 = vsel %vm1592_vm12, %v4817_v46, %v4816_v16  ;;  %4879 = vrot.lane.b32.xlu1 %v4877_v12, %s8544_s29  ;;  %v5274_v35 = vunpack.c.h.b16 %v8368_v47  ;;  %v5279_v36 = vrot.slane %v5272_v1, 7  ;;  %v5024_v37 = vrot.slane %v8788_v22, 7 }
 0x1c2   : > { %v4825_v11 = vpack.c.b16 %v4818_v21, %v4818_v21  ;;  %v5281_v42 = vrot.slane %v5273_v26, 6  ;;  %v5025_v43 = vrot.slane %v8793_v29, 6  ;;  %v5027_v46 = vrot.slane %v8800_v38, 5  ;;  %v8373_v49 = vld [vmem:[#allocation2 + $0x3c] ss:$0 sps:$4 sm:$0x22]  }
 0x1c3   : > { %v8899_v30 = vld [vmem:[#allocation2 + $0x48] ss:$0 sps:$4 sm:$0x11]   ;;  %v8903_v41 = vld [vmem:[#allocation2 + $0x54] ss:$0 sps:$4 sm:$0x11]   ;;  %v5280_v62 = vsel %vm1586_vm10, %v5279_v36, %v5271_v54  ;;  %v8911_v47 = vunpack.c.l.b16 %v8876_v56  ;;  %v8914_v1 = vunpack.c.l.b16 %v8886_v3  ;;  %v8969_v8 = vunpack.c.l.b16 %v8849_v24 }
 0x1c4   : > { %5001 = vrot.lane.b32.xlu0 %v4877_v12, %s8543_s28  ;;  %v5029_v31 = vrot.slane %v8823_v55, 4  ;;  %v5283_v16 = vrot.slane %v5274_v35, 5  ;;  %v8374_v21 = vld [vmem:[#allocation2 + $0x48] ss:$0 sps:$4 sm:$0x22]   ;;  %v5282_v12 = vsel %vm1589_vm11, %v5281_v42, %v5280_v62  ;;  %v5026_v26 = vsel %vm1586_vm10, %v5025_v43, %v5024_v37 }
 0x1c5   : > { %12682 = vst [vmem:[#allocation13_spill] sm:$0xff] %v8911_v47  ;;  %12683 = vst [vmem:[#allocation14_spill] sm:$0xff] %v8914_v1  ;;  %v8919_v14 = vunpack.c.l.b16 %v8899_v30  ;;  %v8922_v57 = vunpack.c.l.b16 %v8903_v41  ;;  %v8375_v2 = vld [vmem:[#allocation2 + $0x54] ss:$0 sps:$4 sm:$0x22]   ;;  %4827 = vrot.lane.b32.xlu1 %v4825_v11, %s8543_s28  ;;  %v5028_v35 = vsel %vm1589_vm11, %v5027_v46, %v5026_v26  ;;  %v1573_v36 = vrot.slane %v8804_v40, 1 }
 0x1c6   : > { %v5284_v54 = vsel %vm1592_vm12, %v5283_v16, %v5282_v12  ;;  %v1576_v51 = vrot.slane %v8831_v63, 7  ;;  %v8932_v37 = vsel %vm1592_vm12, %v5029_v31, %v5028_v35  ;;  %v1579_v43 = vrot.slane %v8834_v0, 6  ;;  %v8380_v6 = vld [vmem:[#allocation2 + $0x30] ss:$0 sps:$4 sm:$0x88]  }
 0x1c7   : > { %12684 = vst [vmem:[#allocation15_spill] sm:$0xff] %v8919_v14  ;;  %12685 = vst [vmem:[#allocation16_spill] sm:$0xff] %v8922_v57  ;;  %v8929_v42 = vpack.c.b16 %v5284_v54, %v5284_v54  ;;  %v1582_v62 = vrot.slane %v8911_v47, 5  ;;  %v5144_v11 = vpack.c.b16 %v8932_v37, %v8932_v37  ;;  %v1575_v16 = vsel %vm1574_vm3, %v8812_v45, %v1573_v36  ;;  %v8381_v40 = vld [vmem:[#allocation2 + $0x3c] ss:$0 sps:$4 sm:$0x88]  }
 0x1c8   : > { %v1585_v46 = vrot.slane %v8914_v1, 4  ;;  %v1588_v12 = vrot.slane %v8919_v14, 3  ;;  %v1578_v31 = vsel %vm1577_vm4, %v1576_v51, %v1575_v16  ;;  %v1591_v26 = vrot.slane %v8922_v57, 2  ;;  %v8383_v18 = vld [vmem:[#allocation2 + $0x54] ss:$0 sps:$4 sm:$0x88]  }
 0x1c9   : > { %5294 = vrot.lane.b32.xlu0 %v8929_v42, %s8544_s29  ;;  %v8946_v54 = vunpack.c.l.b16 %v8373_v49  ;;  %v8948_v35 = vunpack.c.l.b16 %v8374_v21  ;;  %5146 = vrot.lane.b32.xlu1 %v5144_v11, %s8544_s29  ;;  %v1581_v13 = vsel %vm1580_vm5, %v1579_v43, %v1578_v31  ;;  %v8952_v36 = vunpack.c.l.b16 %v8375_v2  ;;  %v9065_v59 = vld [vmem:[#allocation2 + $0x30] ss:$0 sps:$4 sm:$0x44]  }
 0x1ca   : > { %v1832_v51 = vrot.slane %v8888_v4, 6  ;;  %v1584_v16 = vsel %vm1583_vm13, %v1582_v62, %v1581_v13  ;;  %v1829_v49 = vsel %vm1577_vm4, %v8800_v38, %v1828_v48  ;;  %v5301_v13 = vrot.slane %v8873_v53, 1  ;;  %v8976_v62 = vld [vmem:[#allocation2 + $0x4] ss:$0 sps:$4 sm:$0x11]  }
 0x1cb   : > { %v1834_v21 = vrot.slane %v8946_v54, 5  ;;  %v1836_v27 = vrot.slane %v8948_v35, 4  ;;  %v1587_v2 = vsel %vm1586_vm10, %v1585_v46, %v1584_v16  ;;  %v1831_v43 = vsel %vm1580_vm5, %v1830_v5, %v1829_v49  ;;  %12686 = vst [vmem:[#allocation17_spill] sm:$0xff] %v8976_v62  ;;  %v8982_v46 = vld [vmem:[#allocation2 + $0x10] ss:$0 sps:$4 sm:$0x11]  }
 0x1cc   : > { %v1838_v31 = vrot.slane %v8952_v36, 3  ;;  %v1590_v39 = vsel %vm1589_vm11, %v1588_v12, %v1587_v2  ;;  %v1833_v50 = vsel %vm1583_vm13, %v1832_v51, %v1831_v43  ;;  %v5303_v48 = vrot.slane %v8895_v23, 7  ;;  %12687 = vst [vmem:[#allocation18_spill] sm:$0xff] %v8982_v46  ;;  %v8992_v2 = vld [vmem:[#allocation2 + $0x28] ss:$0 sps:$4 sm:$0x11]  }
 0x1cd   : > { %5257 = vrot.lane.b32.xlu0 %v5144_v11, %s8543_s28  ;;  %5130 = vrot.lane.b32.xlu1 %v8859_v34, %s8543_s28  ;;  %v1593_v5 = vsel %vm1592_vm12, %v1591_v26, %v1590_v39  ;;  %v1835_v24 = vsel %vm1586_vm10, %v1834_v21, %v1833_v50  ;;  %v8984_v11 = vld [vmem:[#allocation2 + $0x1c] ss:$0 sps:$4 sm:$0x11]   ;;  %v5302_v16 = vsel %vm1586_vm10, %v8969_v8, %v5301_v13  ;;  %v5305_v49 = vrot.slane %v8897_v25, 6 }
 0x1ce   : > { %12688 = vst [vmem:[#allocation19_spill] sm:$0xff] %v8984_v11  ;;  %v8986_v12 = vpack.c.b16 %v1593_v5, %v1593_v5  ;;  %v1837_v51 = vsel %vm1589_vm11, %v1836_v27, %v1835_v24  ;;  %12690 = vst [vmem:[#allocation21_spill] sm:$0xff] %v8992_v2  ;;  %v5304_v26 = vsel %vm1589_vm11, %v5303_v48, %v5302_v16  ;;  %v5555_v21 = vrot.slane %v8771_v60, 3  ;;  %v1524_v48 = vld [vmem:[%s12499_s4] sm:$0x3] }
 0x1cf   : > { %v1839_v34 = vsel %vm1592_vm12, %v1838_v31, %v1837_v51  ;;  %v5556_v43 = vrot.slane %v8773_v61, 2  ;;  %v9003_v27 = vsel %vm1592_vm12, %v5305_v49, %v5304_v26  ;;  %v5558_v13 = vrot.slane %v8795_v32, 1 }
 0x1d0   : > { %12689 = vst [vmem:[#allocation20_spill] sm:$0xff] %v8986_v12  ;;  %v1599_v39 = vsel %vm462_vm1, %v8986_v12, 0  ;;  %v9000_v50 = vpack.c.b16 %v1839_v34, %v1839_v34  ;;  %v5419_v31 = vpack.c.b16 %v9003_v27, %v9003_v27  ;;  %v9013_v24 = vunpack.c.l.b16 %v8976_v62 }
 0x1d1   : > { %7739 = vmatpush3.bf16.msra.mxu0 %v1599_v39  ;;  %v5557_v5 = vsel %vm1586_vm10, %v5556_v43, %v5555_v21  ;;  %v9016_v51 = vunpack.c.l.b16 %v8982_v46  ;;  %v9022_v34 = vunpack.c.l.b16 %v8984_v11  ;;  %v9025_v26 = vunpack.c.l.b16 %v8992_v2  ;;  %v9067_v2 = vld [vmem:[#allocation2 + $0x3c] ss:$0 sps:$4 sm:$0x44]  }
 0x1d2   : > { %12691 = vst [vmem:[#allocation22_spill] sm:$0xff] %v9000_v50  ;;  %v1842_v16 = vsel %vm462_vm1, %v9000_v50, 0  ;;  %v5559_v49 = vsel %vm1589_vm11, %v5558_v13, %v5557_v5  ;;  %7750 = vmatprep.subr.bf16.mxu0 %v12513_v10  ;;  %5532 = vrot.lane.b32.xlu0 %v5419_v31, %s8543_s28  ;;  %v5705_v5 = vrot.slane %v9013_v24, 4  ;;  %v5034_v13 = vrot.slane %v8948_v35, 1 }
 0x1d3   : > { %7757 = vmatpush3.bf16.msra.mxu1 %v1842_v16  ;;  %v9033_v39 = vsel %vm1592_vm12, %v8797_v33, %v5559_v49  ;;  %5421 = vrot.lane.b32.xlu1 %v5419_v31, %s8544_s29  ;;  %v5706_v43 = vrot.slane %v9016_v51, 3  ;;  %v5708_v16 = vrot.slane %v9022_v34, 2  ;;  %v5710_v7 = vrot.slane %v9025_v26, 1 }
 0x1d4   : > { %7741 = vmatmul.mubr.msk.bf16.vlgmr.msra.gmra.mxu0 %vm455_vm0, %v1524_v48  ;;  %v5673_v21 = vpack.c.b16 %v9033_v39, %v9033_v39  ;;  %7768 = vmatprep.subr.bf16.mxu1 %v12513_v10  ;;  %v5031_v31 = vrot.slane %v8888_v4, 3  ;;  %v5032_v49 = vrot.slane %v8946_v54, 2  ;;  %v4893_v0 = vrot.slane %v8888_v4, 2 }
 0x1d5   : > { %7752 = vmatprep.mubr.msk.bf16.mxu0 %vm8542_vm2, %v12513_v10  ;;  %v5707_v63 = vsel %vm1586_vm10, %v5706_v43, %v5705_v5  ;;  %v4894_v45 = vrot.slane %v8946_v54, 1  ;;  %v4897_v20 = vrot.slane %v8952_v36, 7  ;;  %v4819_v10 = vrot.slane %v8914_v1, 7 }
 0x1d6   : > { %7759 = vmatmul.mubr.msk.bf16.vlgmr.msra.gmra.mxu1 %vm455_vm0, %v1524_v48  ;;  %5810 = vrot.lane.b32.xlu0 %v5673_v21, %s8543_s28  ;;  %v8382_v48 = vld [vmem:[#allocation2 + $0x48] ss:$0 sps:$4 sm:$0x88]   ;;  %v5709_v17 = vsel %vm1589_vm11, %v5708_v16, %v5707_v63  ;;  %v5033_v62 = vsel %vm1574_vm3, %v5032_v49, %v5031_v31  ;;  %v4821_v43 = vrot.slane %v8919_v14, 6  ;;  %v4823_v5 = vrot.slane %v8922_v57, 5 }
 0x1d7   : > { %7770 = vmatprep.mubr.msk.bf16.mxu1 %vm8542_vm2, %v12692_v19  ;;  %5405 = vrot.lane.b32.xlu1 %v8929_v42, %s8543_s28  ;;  %v9070_v11 = vsel %vm1592_vm12, %v5710_v7, %v5709_v17  ;;  %v5035_v19 = vsel %vm1577_vm4, %v5034_v13, %v5033_v62  ;;  %v4895_v46 = vsel %vm1574_vm3, %v4894_v45, %v4893_v0  ;;  %v9076_v42 = vld [vmem:[#allocation2 + $0x48] ss:$0 sps:$4 sm:$0x44]   ;;  %v9078_v16 = vld [vmem:[#allocation2 + $0x54] ss:$0 sps:$4 sm:$0x44]  }
 0x1d8   : > { %12693 = vst [vmem:[#allocation23_spill] sm:$0xff] %v9070_v11  ;;  %v4820_v63 = vsel %vm1574_vm3, %v4819_v10, %v8911_v47  ;;  %12694 = vst [vmem:[#allocation24_spill] sm:$0xff] %v9078_v16  ;;  %v9082_v31 = vpack.c.b16 %v9070_v11, %v9070_v11  ;;  %v9086_v49 = vsel %vm1580_vm5, %v8952_v36, %v5035_v19  ;;  %v9092_v10 = vunpack.c.l.b16 %v8380_v6 }
 0x1d9   : > { %12696 = vst [vmem:[#allocation26_spill] sm:$0xff] %v9086_v49  ;;  %v4896_v17 = vsel %vm1577_vm4, %v8948_v35, %v4895_v46  ;;  %v4822_v7 = vsel %vm1577_vm4, %v4821_v43, %v4820_v63  ;;  %v12697_v0 = vrot.slane %v8771_v60, 6  ;;  %v12698_v62 = vrot.slane %v8773_v61, 5 }
 0x1da   : > { %12695 = vst [vmem:[#allocation25_spill] sm:$0xff] %v9082_v31  ;;  %v4898_v45 = vsel %vm1580_vm5, %v4897_v20, %v4896_v17  ;;  %v12699_v11 = vrot.slane %v8771_v60, 7  ;;  %v12700_v19 = vrot.slane %v8773_v61, 6  ;;  %5826 = vrot.lane.b32.xlu0 %v9082_v31, %s8544_s29  ;;  %v9111_v20 = vpack.c.b16 %v9086_v49, %v8932_v37 }
 0x1db   : > { %v2626_v13 = vsel %vm1574_vm3, %v12698_v62, %v12697_v0  ;;  %5675 = vrot.lane.b32.xlu1 %v5673_v21, %s8544_s29  ;;  %v9114_v6 = vpack.c.b16 %v4898_v45, %v8854_v28  ;;  %v4824_v46 = vsel %vm1580_vm5, %v4823_v5, %v4822_v7  ;;  %v9117_v60 = vunpack.c.l.b16 %v8381_v40 }
 0x1dc   : > { %v9104_v50 = vsel %vm1574_vm3, %v12700_v19, %v12699_v11  ;;  %12701 = vst [vmem:[#allocation27_spill] sm:$0xff] %v9111_v20  ;;  %v9119_v61 = vunpack.c.l.b16 %v8382_v48  ;;  %v9121_v11 = vunpack.c.l.b16 %v8383_v18  ;;  %v12703_v21 = vrot.slane %v8795_v32, 4 }
 0x1dd   : > { %12702 = vst [vmem:[#allocation28_spill] sm:$0xff] %v9114_v6  ;;  %v2631_v63 = vrot.slane %v9092_v10, 2  ;;  %v12704_v37 = vrot.slane %v8797_v33, 3  ;;  %v2633_v28 = vrot.slane %v9117_v60, 1  ;;  %v9132_v5 = vunpack.c.l.b16 %v9065_v59 }
 0x1de   : > { %v2628_v43 = vsel %vm1577_vm4, %v12703_v21, %v2626_v13  ;;  %v9135_v40 = vunpack.c.l.b16 %v9067_v2  ;;  %v2636_v48 = vrot.slane %v9121_v11, 7  ;;  %v9140_v7 = vunpack.c.l.b16 %v9076_v42  ;;  %5038 = vrot.lane.b32.xlu0 %v9111_v20, %s8543_s28 }
 0x1df   : > { %v2630_v17 = vsel %vm1580_vm5, %v12704_v37, %v2628_v43  ;;  %v9143_v0 = vunpack.c.l.b16 %v9078_v16  ;;  %4900 = vrot.lane.b32.xlu1 %v9114_v6, %s8543_s28  ;;  %v5307_v13 = vrot.slane %v9132_v5, 5  ;;  %v12705_v21 = vrot.slane %v8788_v22, 3 }
 0x1e0   : > { %v2632_v18 = vsel %vm1583_vm13, %v2631_v63, %v2630_v17  ;;  %v5308_v19 = vrot.slane %v9135_v40, 4  ;;  %v12706_v43 = vrot.slane %v8793_v29, 2  ;;  %v5310_v17 = vrot.slane %v9140_v7, 3 }
 0x1e1   : > { %v2634_v62 = vsel %vm1586_vm10, %v2633_v28, %v2632_v18  ;;  %v5312_v20 = vrot.slane %v9143_v0, 2  ;;  %v12707_v6 = vrot.slane %v8800_v38, 1  ;;  %v5016_v18 = vpack.c.b16 %v4898_v45, %v4898_v45 }
 0x1e2   : > { %v2001_v63 = vsel %vm1574_vm3, %v12706_v43, %v12705_v21  ;;  %v2635_v37 = vsel %vm1589_vm11, %v9119_v61, %v2634_v62  ;;  %v4826_v31 = vpack.c.b16 %v4824_v46, %v4824_v46  ;;  %v5309_v49 = vsel %vm1574_vm3, %v5308_v19, %v5307_v13 }
 0x1e3   : > { %v2003_v28 = vsel %vm1577_vm4, %v12707_v6, %v2001_v63  ;;  %v2005_v22 = vrot.slane %v8888_v4, 7  ;;  %v5311_v29 = vsel %vm1577_vm4, %v5310_v17, %v5309_v49  ;;  %v2007_v62 = vrot.slane %v8946_v54, 6  ;;  %5019 = vrot.lane.b32.xlu1 %v5016_v18, %s8544_s29 }
 0x1e4   : > { %v2004_v21 = vsel %vm1580_vm5, %v8823_v55, %v2003_v28  ;;  %v2009_v43 = vrot.slane %v8948_v35, 5  ;;  %v2398_v16 = vrot.slane %v8969_v8, 4  ;;  %4829 = vrot.lane.b32.xlu0 %v4826_v31, %s8543_s28  ;;  %v2637_v38 = vsel %vm1592_vm12, %v2636_v48, %v2635_v37 }
 0x1e5   : > { %v2006_v45 = vsel %vm1583_vm13, %v2005_v22, %v2004_v21  ;;  %v4863_v4 = vrot.slane %v8911_v47, 1  ;;  %v9178_v49 = vsel %vm1580_vm5, %v5312_v20, %v5311_v29  ;;  %v2011_v55 = vrot.slane %v8952_v36, 4  ;;  %v8393_v22 = vld [vmem:[#allocation2 + $0x10] ss:$0 sps:$4 sm:$0x22]  }
 0x1e6   : > { %12708 = vst [vmem:[#allocation29_spill] sm:$0xff] %v9178_v49  ;;  %v4865_v54 = vrot.slane %v8919_v14, 7  ;;  %v4867_v35 = vrot.slane %v8922_v57, 6  ;;  %v2008_v6 = vsel %vm1586_vm10, %v2007_v62, %v2006_v45  ;;  %v5561_v46 = vrot.slane %v9092_v10, 7 }
 0x1e7   : > { %v4864_v31 = vsel %vm1574_vm3, %v8914_v1, %v4863_v4  ;;  %v5562_v48 = vrot.slane %v9117_v60, 6  ;;  %v2402_v13 = vrot.slane %v8897_v25, 2  ;;  %v2010_v20 = vsel %vm1589_vm11, %v2009_v43, %v2008_v6  ;;  %5132 = vrot.lane.b32.xlu1 %v5016_v18, %s8543_s28  ;;  %v9212_v43 = vld [vmem:[#allocation2 + $0x34] ss:$0 sps:$4 sm:$0x11]  }
 0x1e8   : > { %v4866_v19 = vsel %vm1577_vm4, %v4865_v54, %v4864_v31  ;;  %v5564_v36 = vrot.slane %v9119_v61, 5  ;;  %5007 = vrot.lane.b32.xlu0 %v8986_v12, %s8544_s29  ;;  %v9195_v63 = vpack.c.b16 %v2637_v38, %v2637_v38  ;;  %v9199_v37 = vpack.c.b16 %v9178_v49, %v9003_v27  ;;  %v8396_v57 = vld [vmem:[#allocation2 + $0x34] ss:$0 sps:$4 sm:$0x22]  }
 0x1e9   : > { %v9202_v17 = vsel %vm1580_vm5, %v4867_v35, %v4866_v19  ;;  %v2404_v28 = vrot.slane %v9132_v5, 1  ;;  %v5563_v29 = vsel %vm1574_vm3, %v5562_v48, %v5561_v46  ;;  %v5566_v18 = vrot.slane %v9121_v11, 4  ;;  %v9220_v35 = vld [vmem:[#allocation2 + $0x4c] ss:$0 sps:$4 sm:$0x11]  }
 0x1ea   : > { %12709 = vst [vmem:[#allocation30_spill] sm:$0xff] %v9195_v63  ;;  %12710 = vst [vmem:[#allocation31_spill] sm:$0xff] %v9199_v37  ;;  %v12712_v21 = vrot.slane %v8873_v53, 5  ;;  %v2012_v27 = vsel %vm1592_vm12, %v2011_v55, %v2010_v20  ;;  %v5565_v38 = vsel %vm1577_vm4, %v5564_v36, %v5563_v29  ;;  %v12713_v45 = vrot.slane %v8895_v23, 3 }
 0x1eb   : > { %12711 = vst [vmem:[#allocation32_spill] sm:$0xff] %v9202_v17  ;;  %v2407_v54 = vrot.slane %v9140_v7, 7  ;;  %v2409_v31 = vrot.slane %v9143_v0, 6  ;;  %v2806_v55 = vrot.slane %v9092_v10, 3  ;;  %5542 = vrot.lane.b32.xlu1 %v9195_v63, %s8543_s28  ;;  %v9242_v36 = vsel %vm1580_vm5, %v5566_v18, %v5565_v38 }
 0x1ec   : > { %v2399_v62 = vsel %vm1574_vm3, %v2398_v16, %v12712_v21  ;;  %v12714_v16 = vrot.slane %v8795_v32, 5  ;;  %v9229_v48 = vld [vmem:[#allocation2 + $0x58] ss:$0 sps:$4 sm:$0x11]   ;;  %5315 = vrot.lane.b32.xlu0 %v9199_v37, %s8543_s28  ;;  %v2808_v32 = vrot.slane %v9117_v60, 2  ;;  %12716 = vst [vmem:[#allocation33_spill] sm:$0xff] %v9242_v36  ;;  %v9259_v18 = vpack.c.b16 %v9202_v17, %v9202_v17 }
 0x1ed   : > { %v2401_v4 = vsel %vm1577_vm4, %v12713_v45, %v2399_v62  ;;  %v9248_v62 = vunpack.c.l.b16 %v9212_v43  ;;  %v9254_v45 = vunpack.c.l.b16 %v9220_v35  ;;  %v9261_v38 = vld [vmem:[#allocation2 + $0x40] ss:$0 sps:$4 sm:$0x11]   ;;  %v8395_v37 = vld [vmem:[#allocation2 + $0x28] ss:$0 sps:$4 sm:$0x22]  }
 0x1ee   : > { %v2403_v6 = vsel %vm1580_vm5, %v2402_v13, %v2401_v4  ;;  %v2803_v46 = vsel %vm1577_vm4, %v12714_v16, %v9104_v50  ;;  %v12715_v13 = vrot.slane %v8797_v33, 4  ;;  %v2810_v50 = vrot.slane %v9119_v61, 1  ;;  %v8394_v4 = vld [vmem:[#allocation2 + $0x1c] ss:$0 sps:$4 sm:$0x22]  }
 0x1ef   : > { %v2405_v20 = vsel %vm1583_vm13, %v2404_v28, %v2403_v6  ;;  %v9250_v28 = vpack.c.b16 %v2012_v27, %v2012_v27  ;;  %v4831_v6 = vunpack.c.h.b16 %v8780_v9  ;;  %v4832_v16 = vunpack.c.h.b16 %v8786_v15  ;;  %5665 = vrot.lane.b32.xlu1 %v9195_v63, %s8544_s29  ;;  %v8397_v14 = vld [vmem:[#allocation2 + $0x40] ss:$0 sps:$4 sm:$0x22]   ;;  %v8398_v47 = vld [vmem:[#allocation2 + $0x4c] ss:$0 sps:$4 sm:$0x22]  }
 0x1f0   : > { %v2805_v19 = vsel %vm1580_vm5, %v12715_v13, %v2803_v46  ;;  %v2406_v29 = vsel %vm1586_vm10, %v9135_v40, %v2405_v20  ;;  %v9271_v27 = vpack.c.b16 %v9242_v36, %v9033_v39  ;;  %v5833_v46 = vrot.slane %v9013_v24, 5 }
 0x1f1   : > { %v2807_v21 = vsel %vm1583_vm13, %v2806_v55, %v2805_v19  ;;  %12717 = vst [vmem:[#allocation34_spill] sm:$0xff] %v9250_v28  ;;  %v2408_v33 = vsel %vm1589_vm11, %v2407_v54, %v2406_v29  ;;  %5263 = vrot.lane.b32.xlu0 %v9250_v28, %s8544_s29  ;;  %v5834_v55 = vrot.slane %v9016_v51, 4  ;;  %v9279_v20 = vunpack.c.l.b16 %v9229_v48 }
 0x1f2   : > { %12718 = vst [vmem:[#allocation35_spill] sm:$0xff] %v9271_v27  ;;  %v2809_v54 = vsel %vm1586_vm10, %v2808_v32, %v2807_v21  ;;  %v2410_v9 = vsel %vm1592_vm12, %v2409_v31, %v2408_v33  ;;  %v5840_v13 = vrot.slane %v9248_v62, 1  ;;  %v5836_v19 = vrot.slane %v9022_v34, 3  ;;  %v8392_v21 = vld [vmem:[#allocation2 + $0x4] ss:$0 sps:$4 sm:$0x22]  }
 0x1f3   : > { %v2811_v15 = vsel %vm1589_vm11, %v2810_v50, %v2809_v54  ;;  %v5842_v39 = vrot.slane %v9254_v45, 7  ;;  %v4833_v29 = vunpack.c.h.b16 %v8809_v44  ;;  %v4834_v32 = vunpack.c.h.b16 %v8819_v52  ;;  %4881 = vrot.lane.b32.xlu1 %v9259_v18, %s8544_s29 }
 0x1f4   : > { %v9287_v31 = vunpack.c.l.b16 %v9261_v38  ;;  %v5838_v50 = vrot.slane %v9025_v26, 2  ;;  %v4835_v33 = vunpack.c.h.b16 %v8876_v56  ;;  %v4836_v54 = vunpack.c.h.b16 %v8886_v3 }
 0x1f5   : > { %5569 = vrot.lane.b32.xlu0 %v9271_v27, %s8543_s28  ;;  %v9296_v44 = vpack.c.b16 %v2410_v9, %v2410_v9  ;;  %v2812_v52 = vsel %vm1592_vm12, %v9121_v11, %v2811_v15  ;;  %v5835_v1 = vsel %vm1586_vm10, %v5834_v55, %v5833_v46  ;;  %v4837_v56 = vunpack.c.h.b16 %v8899_v30 }
 0x1f6   : > { %v5841_v3 = vsel %vm1574_vm3, %v9287_v31, %v5840_v13  ;;  %v4839_v63 = vrot.slane %v4832_v16, 7  ;;  %v4841_v58 = vrot.slane %v4833_v29, 6  ;;  %v4843_v17 = vrot.slane %v4834_v32, 5 }
 0x1f7   : > { %12719 = vst [vmem:[#allocation36_spill] sm:$0xff] %v9296_v44  ;;  %v5837_v36 = vsel %vm1589_vm11, %v5836_v19, %v5835_v1  ;;  %v5843_v27 = vsel %vm1577_vm4, %v5842_v39, %v5841_v3  ;;  %v5844_v9 = vrot.slane %v9279_v20, 6  ;;  %v4845_v49 = vrot.slane %v4835_v33, 4  ;;  %4872 = vrot.lane.b32.xlu1 %v8986_v12, %s8543_s28 }
 0x1f8   : > { %v4838_v15 = vunpack.c.h.b16 %v8903_v41  ;;  %v4840_v46 = vsel %vm1574_vm3, %v4839_v63, %v4831_v6  ;;  %v4847_v55 = vrot.slane %v4836_v54, 3  ;;  %v4849_v30 = vrot.slane %v4837_v56, 2 }
 0x1f9   : > { %5538 = vrot.lane.b32.xlu0 %v9296_v44, %s8544_s29  ;;  %v4842_v16 = vsel %vm1577_vm4, %v4841_v58, %v4840_v46  ;;  %v9314_v1 = vunpack.c.l.b16 %v8392_v21  ;;  %v9316_v13 = vunpack.c.l.b16 %v8393_v22  ;;  %v9318_v19 = vunpack.c.l.b16 %v8394_v4  ;;  %v8399_v21 = vld [vmem:[#allocation2 + $0x58] ss:$0 sps:$4 sm:$0x22]  }
 0x1fa   : > { %v4844_v41 = vsel %vm1580_vm5, %v4843_v17, %v4842_v16  ;;  %v9321_v39 = vunpack.c.l.b16 %v8395_v37  ;;  %v9323_v63 = vunpack.c.l.b16 %v8396_v57  ;;  %v9325_v6 = vunpack.c.l.b16 %v8397_v14  ;;  %v12721_v14 = vld [vmem:[#allocation22_spill] sm:$0xff] }
 0x1fb   : > { %v9327_v29 = vpack.c.b16 %v2812_v52, %v2812_v52  ;;  %v9330_v32 = vsel %vm1580_vm5, %v5844_v9, %v5843_v27  ;;  %v4846_v58 = vsel %vm1583_vm13, %v4845_v49, %v4844_v41  ;;  %v9333_v22 = vunpack.c.l.b16 %v8398_v47  ;;  %5011 = vrot.lane.b32.xlu1 %v12721_v14, %s8543_s28 }
 0x1fc   : > { %v2227_v4 = vrot.slane %v8895_v23, 2  ;;  %v9337_v17 = vsel %vm1592_vm12, %v5838_v50, %v5837_v36  ;;  %v4848_v57 = vsel %vm1586_vm10, %v4847_v55, %v4846_v58  ;;  %v4851_v37 = vrot.slane %v4838_v15, 1 }
 0x1fd   : > { %12720 = vst [vmem:[#allocation37_spill] sm:$0xff] %v9327_v29  ;;  %5816 = vrot.lane.b32.xlu0 %v9327_v29, %s8544_s29  ;;  %v4850_v27 = vsel %vm1589_vm11, %v4849_v30, %v4848_v57  ;;  %v6087_v49 = vrot.slane %v9314_v1, 7  ;;  %v6088_v47 = vrot.slane %v9316_v13, 6  ;;  %v6090_v33 = vrot.slane %v9318_v19, 5 }
 0x1fe   : > { %v9350_v36 = vpack.c.b16 %v9330_v32, %v9337_v17  ;;  %v6092_v50 = vrot.slane %v9321_v39, 4  ;;  %v6094_v54 = vrot.slane %v9323_v63, 3  ;;  %v6095_v52 = vrot.slane %v9325_v6, 2 }
 0x1ff   : > { %v9355_v56 = vunpack.c.l.b16 %v8399_v21  ;;  %v6089_v3 = vsel %vm1586_vm10, %v6088_v47, %v6087_v49  ;;  %v6097_v9 = vrot.slane %v9333_v22, 1  ;;  %v5153_v15 = vrot.slane %v8969_v8, 7  ;;  %5003 = vrot.lane.b32.xlu1 %v9259_v18, %s8543_s28 }
 0x200   : > { %12722 = vst [vmem:[#allocation38_spill] sm:$0xff] %v9350_v36  ;;  %v4852_v46 = vsel %vm1592_vm12, %v4851_v37, %v4850_v27  ;;  %v6091_v55 = vsel %vm1589_vm11, %v6090_v33, %v6089_v3  ;;  %v6096_v30 = vsel %vm1574_vm3, %v6095_v52, %v6094_v54  ;;  %v5155_v16 = vrot.slane %v8895_v23, 6 }
 0x201   : > { %v2225_v41 = vrot.slane %v8969_v8, 3  ;;  %5847 = vrot.lane.b32.xlu0 %v9350_v36, %s8543_s28  ;;  %v6098_v58 = vsel %vm1577_vm4, %v6097_v9, %v6096_v30  ;;  %v5157_v21 = vrot.slane %v8897_v25, 5  ;;  %v5159_v57 = vrot.slane %v9132_v5, 4 }
 0x202   : > { %v9373_v37 = vsel %vm1592_vm12, %v6092_v50, %v6091_v55  ;;  %v9377_v23 = vsel %vm1580_vm5, %v9355_v56, %v6098_v58  ;;  %v5154_v8 = vsel %vm1586_vm10, %v5153_v15, %v8873_v53  ;;  %v5160_v18 = vrot.slane %v9135_v40, 3  ;;  %v12724_v55 = vld [vmem:[#allocation24_spill] sm:$0xff] }
 0x203   : > { %v4853_v27 = vpack.c.b16 %v4852_v46, %v4852_v46  ;;  %v9384_v49 = vpack.c.b16 %v9377_v23, %v9373_v37  ;;  %v5156_v47 = vsel %vm1589_vm11, %v5155_v16, %v5154_v8  ;;  %v5162_v33 = vrot.slane %v9140_v7, 2 }
 0x204   : > { %v2229_v50 = vrot.slane %v8897_v25, 1  ;;  %v5161_v54 = vsel %vm1574_vm3, %v5160_v18, %v5159_v57  ;;  %v5164_v52 = vrot.slane %v9143_v0, 1  ;;  %v5275_v3 = vunpack.c.h.b16 %v9065_v59 }
 0x205   : > { %12723 = vst [vmem:[#allocation39_spill] sm:$0xff] %v9384_v49  ;;  %4854 = vrot.lane.b32.xlu1 %v4853_v27, %s8544_s29  ;;  %6101 = vrot.lane.b32.xlu0 %v9384_v49, %s8543_s28  ;;  %v5163_v9 = vsel %vm1577_vm4, %v5162_v33, %v5161_v54  ;;  %v5276_v15 = vunpack.c.h.b16 %v9067_v2  ;;  %v5277_v46 = vunpack.c.h.b16 %v9076_v42  ;;  %v5278_v30 = vunpack.c.h.b16 %v12724_v55  ;;  %v12727_v54 = vld [vmem:[#allocation26_spill] sm:$0xff] }
 0x206   : > { %v5158_v25 = vsel %vm1592_vm12, %v5157_v21, %v5156_v47  ;;  %v5165_v16 = vsel %vm1580_vm5, %v5164_v52, %v5163_v9  ;;  %v5285_v58 = vrot.slane %v5275_v3, 4  ;;  %v12726_v18 = vrot.slane %v8873_v53, 4 }
 0x207   : > { %v9401_v57 = vpack.c.b16 %v5165_v16, %v5158_v25  ;;  %v5286_v59 = vrot.slane %v5276_v15, 3  ;;  %v5288_v8 = vrot.slane %v5277_v46, 2  ;;  %v5290_v33 = vrot.slane %v5278_v30, 1  ;;  %v12728_v15 = vld [vmem:[#allocation18_spill] sm:$0xff] }
 0x208   : > { %v2226_v27 = vsel %vm1574_vm3, %v2225_v41, %v12726_v18  ;;  %v9414_v52 = vpack.c.b16 %v12727_v54, %v12727_v54  ;;  %v2232_v41 = vrot.slane %v9135_v40, 7  ;;  %v2234_v3 = vrot.slane %v9140_v7, 6 }
 0x209   : > { %12725 = vst [vmem:[#allocation24_spill] sm:$0xff] %v9401_v57  ;;  %v2228_v2 = vsel %vm1577_vm4, %v2227_v4, %v2226_v27  ;;  %5167 = vrot.lane.b32.xlu1 %v9401_v57, %s8543_s28  ;;  %v5287_v42 = vsel %vm1574_vm3, %v5286_v59, %v5285_v58  ;;  %v3205_v9 = vrot.slane %v9025_v26, 6  ;;  %v5683_v46 = vunpack.c.h.b16 %v12728_v15 }
 0x20a   : > { %v2230_v21 = vsel %vm1580_vm5, %v2229_v50, %v2228_v2  ;;  %v5289_v47 = vsel %vm1577_vm4, %v5288_v8, %v5287_v42  ;;  %v3201_v50 = vrot.slane %v9013_v24, 1  ;;  %v3203_v55 = vrot.slane %v9022_v34, 7 }
 0x20b   : > { %v5291_v53 = vsel %vm1580_vm5, %v5290_v33, %v5289_v47  ;;  %v2231_v4 = vsel %vm1583_vm13, %v9132_v5, %v2230_v21  ;;  %v3426_v30 = vrot.slane %v9314_v1, 2  ;;  %v2236_v40 = vrot.slane %v9143_v0, 5 }
 0x20c   : > { %v9428_v25 = vpack.c.b16 %v5291_v53, %v5291_v53  ;;  %v2233_v16 = vsel %vm1586_vm10, %v2232_v41, %v2231_v4  ;;  %v5960_v5 = vrot.slane %v9314_v1, 6  ;;  %v5961_v7 = vrot.slane %v9316_v13, 5 }
 0x20d   : > { %5148 = vrot.lane.b32.xlu1 %v9414_v52, %s8544_s29  ;;  %v5963_v58 = vrot.slane %v9318_v19, 4  ;;  %v2235_v59 = vsel %vm1589_vm11, %v2234_v3, %v2233_v16  ;;  %v5965_v8 = vrot.slane %v9321_v39, 3  ;;  %v5967_v18 = vrot.slane %v9323_v63, 2 }
 0x20e   : > { %v5968_v27 = vrot.slane %v9325_v6, 1  ;;  %v3427_v0 = vrot.slane %v9316_v13, 1  ;;  %v5962_v33 = vsel %vm1586_vm10, %v5961_v7, %v5960_v5  ;;  %v5971_v2 = vrot.slane %v9355_v56, 7 }
 0x20f   : > { %v5712_v42 = vrot.slane %v9287_v31, 7  ;;  %v5434_v21 = vrot.slane %v9092_v10, 6  ;;  %v5964_v47 = vsel %vm1589_vm11, %v5963_v58, %v5962_v33  ;;  %v5714_v53 = vrot.slane %v9254_v45, 6 }
 0x210   : > { %v5969_v54 = vsel %vm1574_vm3, %v5968_v27, %v5967_v18  ;;  %v2237_v41 = vsel %vm1592_vm12, %v2236_v40, %v2235_v59  ;;  %v9451_v4 = vsel %vm1592_vm12, %v5965_v8, %v5964_v47  ;;  %v5435_v10 = vrot.slane %v9117_v60, 5  ;;  %v9472_v27 = vpop.f32.mrf.mxu1 }
 0x211   : > { %5296 = vrot.lane.b32.xlu1 %v9428_v25, %s8544_s29  ;;  %v5970_v3 = vsel %vm1577_vm4, %v9333_v22, %v5969_v54  ;;  %v5713_v16 = vsel %vm1574_vm3, %v5712_v42, %v9248_v62  ;;  %v5716_v40 = vrot.slane %v9279_v20, 5  ;;  %v3430_v58 = vrot.slane %v9321_v39, 7 }
 0x212   : > { %v9461_v5 = vsel %vm1580_vm5, %v5971_v2, %v5970_v3  ;;  %v5715_v7 = vsel %vm1577_vm4, %v5714_v53, %v5713_v16  ;;  %v5437_v59 = vrot.slane %v9119_v61, 4  ;;  %v3026_v18 = vrot.slane %v9016_v51, 7  ;;  %v12731_v61 = vld [vmem:[#allocation23_spill] sm:$0xff] }
 0x213   : > { %v9469_v8 = vpack.c.b16 %v9461_v5, %v9451_v4  ;;  %v9474_v60 = vpack.c.b16 %v2237_v41, %v2237_v41  ;;  %v9477_v33 = vsel %vm1580_vm5, %v5716_v40, %v5715_v7  ;;  %v3028_v2 = vrot.slane %v9022_v34, 6  ;;  %v7748_v41 = vpop.f32.mrf.mxu1 }
 0x214   : > { %v3030_v42 = vrot.slane %v9025_v26, 5  ;;  %v5439_v47 = vrot.slane %v9121_v11, 3  ;;  %v9484_v54 = vpack.c.b16 %v9477_v33, %v12731_v61  ;;  %v3027_v53 = vsel %vm1574_vm3, %v3026_v18, %v9013_v24 }
 0x215   : > { %5140 = vrot.lane.b32.xlu1 %v9250_v28, %s8543_s28  ;;  %12729 = vst [vmem:[#allocation26_spill] sm:$0xff] %v9469_v8  ;;  %12730 = vst [vmem:[#allocation18_spill] sm:$0xff] %v9474_v60  ;;  %v3032_v3 = vrot.slane %v9248_v62, 4  ;;  %v5436_v16 = vsel %vm1574_vm3, %v5435_v10, %v5434_v21  ;;  %v3029_v34 = vsel %vm1577_vm4, %v3028_v2, %v3027_v53  ;;  %v3034_v26 = vrot.slane %v9287_v31, 3  ;;  %v1714_v61 = vpop.f32.mrf.mxu1 }
 0x216   : > { %12732 = vst [vmem:[#allocation23_spill] sm:$0xff] %v9484_v54  ;;  %v3036_v11 = vrot.slane %v9254_v45, 2  ;;  %v5438_v7 = vsel %vm1577_vm4, %v5437_v59, %v5436_v16  ;;  %v3031_v40 = vsel %vm1580_vm5, %v3030_v42, %v3029_v34  ;;  %v3038_v24 = vrot.slane %v9279_v20, 1  ;;  %v12734_v61 = vld [vmem:[#allocation21_spill] sm:$0xff] }
 0x217   : > { %v3202_v18 = vsel %vm1574_vm3, %v9016_v51, %v3201_v50  ;;  %v3033_v41 = vsel %vm1583_vm13, %v3032_v3, %v3031_v40  ;;  %v3207_v10 = vrot.slane %v9248_v62, 5  ;;  %v3209_v2 = vrot.slane %v9287_v31, 4  ;;  %v7749_v34 = vpop.f32.mrf.mxu1 }
 0x218   : > { %v3204_v21 = vsel %vm1577_vm4, %v3203_v55, %v3202_v18  ;;  %v3035_v53 = vsel %vm1586_vm10, %v3034_v26, %v3033_v41  ;;  %v3211_v42 = vrot.slane %v9254_v45, 3  ;;  %v3213_v16 = vrot.slane %v9279_v20, 2 }
 0x219   : > { %5267 = vrot.lane.b32.xlu1 %v9474_v60, %s8543_s28  ;;  %v3206_v59 = vsel %vm1580_vm5, %v3205_v9, %v3204_v21  ;;  %v3037_v51 = vsel %vm1589_vm11, %v3036_v11, %v3035_v53  ;;  %v3428_v62 = vsel %vm1574_vm3, %v3427_v0, %v3426_v30  ;;  %v3432_v31 = vrot.slane %v9323_v63, 6  ;;  %v12733_v0 = vld [vmem:[#allocation19_spill] sm:$0xff] }
 0x21a   : > { %v3208_v50 = vsel %vm1583_vm13, %v3207_v10, %v3206_v59  ;;  %v9517_v9 = vsel %vm1592_vm12, %v3038_v24, %v3037_v51  ;;  %v3429_v20 = vsel %vm1577_vm4, %v9318_v19, %v3428_v62  ;;  %v5440_v55 = vsel %vm1580_vm5, %v5439_v47, %v5438_v7  ;;  %v12735_v7 = vld [vmem:[#allocation9_spill] sm:$0xff] }
 0x21b   : > { %v3210_v45 = vsel %vm1586_vm10, %v3209_v2, %v3208_v50  ;;  %v3431_v26 = vsel %vm1580_vm5, %v3430_v58, %v3429_v20  ;;  %v3436_v30 = vrot.slane %v9333_v22, 4  ;;  %v5684_v11 = vunpack.c.h.b16 %v12733_v0  ;;  %v12738_v20 = vld [vmem:[#allocation29_spill] sm:$0xff] }
 0x21c   : > { %v3212_v3 = vsel %vm1589_vm11, %v3211_v42, %v3210_v45  ;;  %v3433_v24 = vsel %vm1583_vm13, %v3432_v31, %v3431_v26  ;;  %v3438_v18 = vrot.slane %v9355_v56, 3  ;;  %v5685_v41 = vunpack.c.h.b16 %v12734_v61  ;;  %v12737_v42 = vld [vmem:[#allocation17_spill] sm:$0xff]  ;;  %v8411_v61 = vld [vmem:[#allocation2 + $0x28] ss:$0 sps:$4 sm:$0x44]  }
 0x21d   : > { %5259 = vrot.lane.b32.xlu1 %v9414_v52, %s8543_s28  ;;  %v3434_v52 = vrot.slane %v9325_v6, 5  ;;  %v9529_v40 = vsel %vm1592_vm12, %v3213_v16, %v3212_v3  ;;  %v9538_v58 = vpack.c.b16 %v5440_v55, %v12735_v7  ;;  %v5686_v2 = vunpack.c.h.b16 %v9212_v43  ;;  %v8413_v7 = vld [vmem:[#allocation2 + $0x40] ss:$0 sps:$4 sm:$0x44]  }
 0x21e   : > { %v5687_v53 = vunpack.c.h.b16 %v9261_v38  ;;  %v5688_v59 = vunpack.c.h.b16 %v9220_v35  ;;  %v5682_v16 = vunpack.c.h.b16 %v12737_v42  ;;  %v5689_v34 = vunpack.c.h.b16 %v9229_v48 }
 0x21f   : > { %v3435_v47 = vsel %vm1586_vm10, %v3434_v52, %v3433_v24  ;;  %12736 = vst [vmem:[#allocation19_spill] sm:$0xff] %v9538_v58  ;;  %v5690_v51 = vrot.slane %v5683_v46, 7  ;;  %v5692_v50 = vrot.slane %v5684_v11, 6  ;;  %v5694_v62 = vrot.slane %v5685_v41, 5 }
 0x220   : > { %v3437_v21 = vsel %vm1589_vm11, %v3436_v30, %v3435_v47  ;;  %v5696_v31 = vrot.slane %v5686_v2, 4  ;;  %v5698_v43 = vrot.slane %v5687_v53, 3  ;;  %v5420_v38 = vpack.c.b16 %v12738_v20, %v12738_v20  ;;  %v8408_v11 = vld [vmem:[#allocation2 + $0x4] ss:$0 sps:$4 sm:$0x44]  }
 0x221   : > { %5136 = vrot.lane.b32.xlu1 %v12721_v14, %s8544_s29  ;;  %v9542_v10 = vsel %vm1592_vm12, %v3438_v18, %v3437_v21  ;;  %v5691_v45 = vsel %vm1574_vm3, %v5690_v51, %v5682_v16  ;;  %v5700_v52 = vrot.slane %v5688_v59, 2  ;;  %v5702_v3 = vrot.slane %v5689_v34, 1  ;;  %v8409_v24 = vld [vmem:[#allocation2 + $0x10] ss:$0 sps:$4 sm:$0x44]  }
 0x222   : > { %v5693_v35 = vsel %vm1577_vm4, %v5692_v50, %v5691_v45  ;;  %v9561_v26 = vpack.c.b16 %v5440_v55, %v5440_v55  ;;  %v8410_v18 = vld [vmem:[#allocation2 + $0x1c] ss:$0 sps:$4 sm:$0x44]   ;;  %v8412_v41 = vld [vmem:[#allocation2 + $0x34] ss:$0 sps:$4 sm:$0x44]   ;;  %v9576_v59 = vunpack.c.l.b16 %v8408_v11  ;;  %v9578_v42 = vunpack.c.l.b16 %v8409_v24 }
 0x223   : > { %v5695_v48 = vsel %vm1580_vm5, %v5694_v62, %v5693_v35  ;;  %v3599_v47 = vrot.slane %v9314_v1, 3  ;;  %v3600_v55 = vrot.slane %v9316_v13, 2  ;;  %v3602_v21 = vrot.slane %v9318_v19, 1  ;;  %v8414_v2 = vld [vmem:[#allocation2 + $0x4c] ss:$0 sps:$4 sm:$0x44]  }
 0x224   : > { %v5697_v15 = vsel %vm1583_vm13, %v5696_v31, %v5695_v48  ;;  %v8415_v53 = vld [vmem:[#allocation2 + $0x58] ss:$0 sps:$4 sm:$0x44]   ;;  %v9580_v16 = vunpack.c.l.b16 %v8410_v18  ;;  %v9582_v34 = vunpack.c.l.b16 %v8411_v61  ;;  %v9584_v51 = vunpack.c.l.b16 %v8412_v41  ;;  %v12739_v41 = vld [vmem:[#allocation33_spill] sm:$0xff] }
 0x225   : > { %5442 = vrot.lane.b32.xlu1 %v9538_v58, %s8543_s28  ;;  %v5699_v46 = vsel %vm1586_vm10, %v5698_v43, %v5697_v15  ;;  %v3601_v1 = vsel %vm1574_vm3, %v3600_v55, %v3599_v47  ;;  %v3605_v13 = vrot.slane %v9323_v63, 7  ;;  %v3607_v19 = vrot.slane %v9325_v6, 6 }
 0x226   : > { %v5701_v30 = vsel %vm1589_vm11, %v5700_v52, %v5699_v46  ;;  %v9592_v50 = vunpack.c.l.b16 %v8414_v2  ;;  %v3603_v62 = vsel %vm1577_vm4, %v3602_v21, %v3601_v1  ;;  %v3609_v31 = vrot.slane %v9333_v22, 5 }
 0x227   : > { %v9565_v0 = vsel %vm1592_vm12, %v5702_v3, %v5701_v30  ;;  %v9596_v45 = vunpack.c.l.b16 %v8415_v53  ;;  %v3824_v43 = vrot.slane %v9576_v59, 4  ;;  %v3604_v20 = vsel %vm1580_vm5, %v9321_v39, %v3603_v62 }
 0x228   : > { %v3611_v63 = vrot.slane %v9355_v56, 4  ;;  %v3606_v6 = vsel %vm1583_vm13, %v3605_v13, %v3604_v20  ;;  %v6333_v35 = vunpack.c.h.b16 %v8409_v24  ;;  %v6334_v52 = vunpack.c.h.b16 %v8410_v18  ;;  %v8424_v20 = vld [vmem:[#allocation2 + $0x4] ss:$0 sps:$4 sm:$0x88]  }
 0x229   : > { %5423 = vrot.lane.b32.xlu1 %v5420_v38, %s8544_s29  ;;  %v3608_v48 = vsel %vm1586_vm10, %v3607_v19, %v3606_v6  ;;  %v6335_v3 = vunpack.c.h.b16 %v8411_v61  ;;  %v3825_v15 = vrot.slane %v9578_v42, 3  ;;  %v3827_v22 = vrot.slane %v9580_v16, 2  ;;  %v8427_v6 = vld [vmem:[#allocation2 + $0x28] ss:$0 sps:$4 sm:$0x88]  }
 0x22a   : > { %v3610_v46 = vsel %vm1589_vm11, %v3609_v31, %v3608_v48  ;;  %v6340_v39 = vrot.slane %v6333_v35, 7  ;;  %v6342_v30 = vrot.slane %v6334_v52, 6  ;;  %v3829_v56 = vrot.slane %v9582_v34, 1  ;;  %v8428_v35 = vld [vmem:[#allocation2 + $0x34] ss:$0 sps:$4 sm:$0x88]  }
 0x22b   : > { %v6344_v24 = vrot.slane %v6335_v3, 5  ;;  %v3826_v18 = vsel %vm1574_vm3, %v3825_v15, %v3824_v43  ;;  %v5674_v47 = vpack.c.b16 %v12739_v41, %v12739_v41  ;;  %v3834_v21 = vrot.slane %v9592_v50, 6  ;;  %v8429_v52 = vld [vmem:[#allocation2 + $0x40] ss:$0 sps:$4 sm:$0x88]  }
 0x22c   : > { %v3836_v1 = vrot.slane %v9596_v45, 5  ;;  %v8430_v48 = vld [vmem:[#allocation2 + $0x4c] ss:$0 sps:$4 sm:$0x88]   ;;  %v9636_v15 = vunpack.c.l.b16 %v8424_v20  ;;  %v9654_v41 = vunpack.c.l.b16 %v8428_v35  ;;  %v4007_v20 = vrot.slane %v9592_v50, 7 }
 0x22d   : > { %5550 = vrot.lane.b32.xlu1 %v9561_v26, %s8544_s29  ;;  %v8431_v3 = vld [vmem:[#allocation2 + $0x58] ss:$0 sps:$4 sm:$0x88]  }
 0x22e   : > { %12740 = vst [vmem:[#allocation21_spill] sm:$0xff] %v9636_v15  ;;  %v4406_v58 = vrot.slane %v9654_v41, 3 }
 0x231   : > { %5415 = vrot.lane.b32.xlu1 %v9296_v44, %s8543_s28 }
 0x235   : > { %5407 = vrot.lane.b32.xlu1 %v9428_v25, %s8543_s28  ;;  %v9590_v25 = vunpack.c.l.b16 %v8413_v7  ;;  %v3828_v7 = vsel %vm1577_vm4, %v3827_v22, %v3826_v18  ;;  %v3997_v22 = vrot.slane %v9576_v59, 5  ;;  %v9651_v18 = vpack.c.b16 %v9461_v5, %v9461_v5 }
 0x236   : > { %v3830_v53 = vsel %vm1580_vm5, %v3829_v56, %v3828_v7  ;;  %v4000_v56 = vrot.slane %v9580_v16, 3  ;;  %v9660_v7 = vunpack.c.l.b16 %v8431_v3 }
 0x237   : > { %v3832_v61 = vrot.slane %v9590_v25, 7  ;;  %v3831_v19 = vsel %vm1583_vm13, %v9584_v51, %v3830_v53 }
 0x238   : > { %12745 = vst [vmem:[#allocation40_spill] sm:$0xff] %v9660_v7 }
 0x239   : > { %5534 = vrot.lane.b32.xlu1 %v5420_v38, %s8543_s28  ;;  %v6332_v38 = vunpack.c.h.b16 %v8408_v11  ;;  %v9611_v11 = vsel %vm1592_vm12, %v3611_v63, %v3610_v46  ;;  %v3833_v62 = vsel %vm1586_vm10, %v3832_v61, %v3831_v19  ;;  %v8425_v63 = vld [vmem:[#allocation2 + $0x10] ss:$0 sps:$4 sm:$0x88]   ;;  %v3998_v46 = vrot.slane %v9578_v42, 4 }
 0x23a   : > { %v3835_v31 = vsel %vm1589_vm11, %v3834_v21, %v3833_v62  ;;  %v4002_v61 = vrot.slane %v9582_v34, 2  ;;  %v4399_v21 = vrot.slane %v9636_v15, 7 }
 0x23b   : > { %v6341_v55 = vsel %vm1586_vm10, %v6340_v39, %v6332_v38  ;;  %v9632_v43 = vsel %vm1592_vm12, %v3836_v1, %v3835_v31  ;;  %v8426_v38 = vld [vmem:[#allocation2 + $0x1c] ss:$0 sps:$4 sm:$0x88]   ;;  %v9642_v39 = vunpack.c.l.b16 %v8425_v63  ;;  %v3999_v5 = vsel %vm1574_vm3, %v3998_v46, %v3997_v22 }
 0x23c   : > { %v6343_v2 = vsel %vm1589_vm11, %v6342_v30, %v6341_v55  ;;  %v9644_v30 = vunpack.c.l.b16 %v8427_v6  ;;  %v9658_v55 = vunpack.c.l.b16 %v8430_v48  ;;  %v4004_v1 = vrot.slane %v9584_v51, 1 }
 0x23d   : > { %5411 = vrot.lane.b32.xlu1 %v9474_v60, %s8544_s29  ;;  %v9625_v13 = vsel %vm1592_vm12, %v6344_v24, %v6343_v2  ;;  %12741 = vst [vmem:[#allocation9_spill] sm:$0xff] %v9642_v39  ;;  %v9647_v24 = vunpack.c.l.b16 %v8426_v38  ;;  %v4400_v53 = vrot.slane %v9642_v39, 6  ;;  %v4001_v31 = vsel %vm1577_vm4, %v4000_v56, %v3999_v5  ;;  %v9687_v5 = vld [vmem:[#allocation2 + $0x14] ss:$0 sps:$4 sm:$0x11]  }
 0x23e   : > { %12742 = vst [vmem:[#allocation17_spill] sm:$0xff] %v9644_v30  ;;  %12744 = vst [vmem:[#allocation33_spill] sm:$0xff] %v9658_v55  ;;  %v4229_v2 = vrot.slane %v9644_v30, 3  ;;  %v4404_v62 = vrot.slane %v9644_v30, 4  ;;  %v4003_v63 = vsel %vm1580_vm5, %v4002_v61, %v4001_v31  ;;  %v4224_v6 = vrot.slane %v9636_v15, 6 }
 0x23f   : > { %12743 = vst [vmem:[#allocation29_spill] sm:$0xff] %v9647_v24  ;;  %v4402_v19 = vrot.slane %v9647_v24, 5  ;;  %v4225_v38 = vrot.slane %v9642_v39, 5  ;;  %v4005_v35 = vsel %vm1583_vm13, %v4004_v1, %v4003_v63  ;;  %v4231_v48 = vrot.slane %v9654_v41, 2  ;;  %v9952_v39 = vld [vmem:[%s8726_s26 + $0x8] sm:$0x1] }
 0x240   : > { %v4006_v22 = vsel %vm1586_vm10, %v9590_v25, %v4005_v35  ;;  %v4236_v56 = vrot.slane %v9660_v7, 7  ;;  %v4401_v61 = vsel %vm1574_vm3, %v4400_v53, %v4399_v21  ;;  %v9699_v21 = vld [vmem:[#allocation2 + $0x8] ss:$0 sps:$4 sm:$0x11]  }
 0x241   : > { %5677 = vrot.lane.b32.xlu1 %v5674_v47, %s8544_s29  ;;  %v4226_v46 = vsel %vm1574_vm3, %v4225_v38, %v4224_v6  ;;  %v4008_v1 = vsel %vm1589_vm11, %v4007_v20, %v4006_v22  ;;  %v4403_v63 = vsel %vm1577_vm4, %v4402_v19, %v4401_v61  ;;  %v9704_v19 = vld [vmem:[#allocation2 + $0x20] ss:$0 sps:$4 sm:$0x11]   ;;  %v9712_v22 = vld [vmem:[#allocation2 + $0x44] ss:$0 sps:$4 sm:$0x11]  }
 0x242   : > { %v4405_v6 = vsel %vm1580_vm5, %v4404_v62, %v4403_v63  ;;  %v9710_v62 = vld [vmem:[#allocation2 + $0x2c] ss:$0 sps:$4 sm:$0x11]   ;;  %v9719_v61 = vld [vmem:[#allocation2 + $0x5c] ss:$0 sps:$4 sm:$0x11]   ;;  %v9732_v63 = vunpack.c.l.b16 %v9687_v5 }
 0x243   : > { %v4407_v20 = vsel %vm1583_vm13, %v4406_v58, %v4405_v6  ;;  %v9739_v6 = vunpack.c.l.b16 %v9704_v19 }
 0x244   : > { %12750 = vst [vmem:[#allocation45_spill] sm:$0xff] %v9732_v63 }
 0x245   : > { %5669 = vrot.lane.b32.xlu1 %v9327_v29, %s8543_s28  ;;  %12751 = vst [vmem:[#allocation46_spill] sm:$0xff] %v9739_v6 }
 0x249   : > { %5661 = vrot.lane.b32.xlu1 %v9561_v26, %s8543_s28  ;;  %v9656_v26 = vunpack.c.l.b16 %v8429_v52  ;;  %v4227_v52 = vrot.slane %v9647_v24, 4  ;;  %v6910_v24 = vrot.slane %v9732_v63, 4 }
 0x24b   : > { %v4233_v3 = vrot.slane %v9656_v26, 1  ;;  %v4228_v31 = vsel %vm1577_vm4, %v4227_v52, %v4226_v46  ;;  %v4408_v38 = vrot.slane %v9656_v26, 2  ;;  %v4410_v52 = vrot.slane %v9658_v55, 1  ;;  %v9717_v46 = vld [vmem:[#allocation2 + $0x50] ss:$0 sps:$4 sm:$0x11]  }
 0x24c   : > { %v4230_v35 = vsel %vm1580_vm5, %v4229_v2, %v4228_v31  ;;  %v9729_v31 = vunpack.c.l.b16 %v9699_v21 }
 0x24d   : > { %5812 = vrot.lane.b32.xlu1 %v5674_v47, %s8543_s28  ;;  %v4009_v47 = vrot.slane %v9596_v45, 6  ;;  %v4232_v53 = vsel %vm1583_vm13, %v4231_v48, %v4230_v35  ;;  %v4409_v2 = vsel %vm1586_vm10, %v4408_v38, %v4407_v20  ;;  %v9736_v35 = vld [vmem:[#allocation2 + $0x38] ss:$0 sps:$4 sm:$0x11]   ;;  %v9745_v38 = vunpack.c.l.b16 %v9712_v22 }
 0x24e   : > { %v4411_v58 = vsel %vm1589_vm11, %v4410_v52, %v4409_v2  ;;  %12749 = vst [vmem:[#allocation44_spill] sm:$0xff] %v9729_v31  ;;  %v9751_v20 = vunpack.c.l.b16 %v9719_v61  ;;  %v9755_v52 = vpack.c.b16 %v9477_v33, %v9477_v33  ;;  %v6767_v2 = vrot.slane %v9732_v63, 3 }
 0x24f   : > { %v9694_v57 = vsel %vm1592_vm12, %v4009_v47, %v4008_v1  ;;  %v4234_v47 = vsel %vm1586_vm10, %v4233_v3, %v4232_v53  ;;  %v9726_v3 = vsel %vm1592_vm12, %v9660_v7, %v4411_v58  ;;  %12753 = vst [vmem:[#allocation48_spill] sm:$0xff] %v9745_v38  ;;  %v9748_v53 = vunpack.c.l.b16 %v9717_v46 }
 0x250   : > { %12746 = vst [vmem:[#allocation41_spill] sm:$0xff] %v9694_v57  ;;  %v4235_v48 = vsel %vm1589_vm11, %v9658_v55, %v4234_v47  ;;  %12748 = vst [vmem:[#allocation43_spill] sm:$0xff] %v9726_v3  ;;  %v6766_v47 = vrot.slane %v9729_v31, 4  ;;  %v6769_v58 = vrot.slane %v9739_v6, 2  ;;  %v6773_v12 = vrot.slane %v9745_v38, 7 }
 0x251   : > { %5974 = vrot.lane.b32.xlu1 %v9469_v8, %s8543_s28  ;;  %v9722_v1 = vsel %vm1592_vm12, %v4236_v56, %v4235_v48  ;;  %v9742_v56 = vunpack.c.l.b16 %v9710_v62  ;;  %12754 = vst [vmem:[#allocation49_spill] sm:$0xff] %v9748_v53  ;;  %12755 = vst [vmem:[#allocation50_spill] sm:$0xff] %v9751_v20  ;;  %v9762_v48 = vunpack.c.l.b16 %v9736_v35  ;;  %v6775_v33 = vrot.slane %v9748_v53, 6 }
 0x252   : > { %12747 = vst [vmem:[#allocation42_spill] sm:$0xff] %v9722_v1  ;;  %v6768_v49 = vsel %vm1586_vm10, %v6767_v2, %v6766_v47  ;;  %v6777_v36 = vrot.slane %v9751_v20, 5  ;;  %v9772_v3 = vpack.c.b16 %v9517_v9, %v9517_v9  ;;  %v6894_v57 = vrot.slane %v9729_v31, 1 }
 0x253   : > { %12752 = vst [vmem:[#allocation47_spill] sm:$0xff] %v9742_v56  ;;  %12756 = vst [vmem:[#allocation51_spill] sm:$0xff] %v9762_v48  ;;  %v6770_v8 = vsel %vm1589_vm11, %v6769_v58, %v6768_v49  ;;  %v6774_v1 = vsel %vm1574_vm3, %v6773_v12, %v9762_v48  ;;  %v6896_v2 = vrot.slane %v9739_v6, 7  ;;  %v6898_v12 = vrot.slane %v9742_v56, 6 }
 0x254   : > { %v6776_v47 = vsel %vm1577_vm4, %v6775_v33, %v6774_v1  ;;  %v6895_v49 = vsel %vm1574_vm3, %v9732_v63, %v6894_v57  ;;  %v9793_v58 = vpack.c.b16 %v9330_v32, %v9330_v32  ;;  %v6900_v1 = vrot.slane %v9762_v48, 5 }
 0x255   : > { %6082 = vrot.lane.b32.xlu1 %v9651_v18, %s8544_s29  ;;  %v9786_v9 = vsel %vm1580_vm5, %v6777_v36, %v6776_v47  ;;  %v6902_v33 = vrot.slane %v9745_v38, 4  ;;  %v6904_v57 = vrot.slane %v9748_v53, 3  ;;  %v6906_v47 = vrot.slane %v9751_v20, 2 }
 0x256   : > { %12758 = vst [vmem:[#allocation53_spill] sm:$0xff] %v9786_v9  ;;  %v6909_v32 = vrot.slane %v9729_v31, 5 }
 0x259   : > { %5719 = vrot.lane.b32.xlu1 %v9484_v54, %s8543_s28  ;;  %v6771_v54 = vrot.slane %v9742_v56, 1 }
 0x25b   : > { %v9779_v30 = vsel %vm1592_vm12, %v6771_v54, %v6770_v8  ;;  %v6897_v54 = vsel %vm1577_vm4, %v6896_v2, %v6895_v49  ;;  %v6912_v49 = vrot.slane %v9739_v6, 3 }
 0x25c   : > { %12757 = vst [vmem:[#allocation52_spill] sm:$0xff] %v9779_v30  ;;  %v9797_v8 = vpack.c.b16 %v9786_v9, %v9779_v30  ;;  %v6899_v36 = vsel %vm1580_vm5, %v6898_v12, %v6897_v54  ;;  %v6914_v12 = vrot.slane %v9742_v56, 2  ;;  %v6916_v54 = vrot.slane %v9762_v48, 1 }
 0x25d   : > { %5828 = vrot.lane.b32.xlu1 %v9755_v52, %s8544_s29  ;;  %v6901_v7 = vsel %vm1583_vm13, %v6900_v1, %v6899_v36  ;;  %v6911_v9 = vsel %vm1586_vm10, %v6910_v24, %v6909_v32  ;;  %v6918_v1 = vrot.slane %v9748_v53, 7  ;;  %v6920_v36 = vrot.slane %v9751_v20, 6 }
 0x25e   : > { %12759 = vst [vmem:[#allocation54_spill] sm:$0xff] %v9797_v8  ;;  %v6903_v2 = vsel %vm1586_vm10, %v6902_v33, %v6901_v7  ;;  %v9820_v8 = vpack.c.b16 %v9529_v40, %v9529_v40  ;;  %v6913_v33 = vsel %vm1589_vm11, %v6912_v49, %v6911_v9  ;;  %v6917_v48 = vsel %vm1574_vm3, %v9745_v38, %v6916_v54 }
 0x25f   : > { %v6905_v30 = vsel %vm1589_vm11, %v6904_v57, %v6903_v2  ;;  %v9829_v57 = vsel %vm1592_vm12, %v6914_v12, %v6913_v33  ;;  %v6919_v24 = vsel %vm1577_vm4, %v6918_v1, %v6917_v48  ;;  %v9839_v40 = vpack.c.b16 %v9542_v10, %v9542_v10 }
 0x260   : > { %12760 = vst [vmem:[#allocation55_spill] sm:$0xff] %v9820_v8  ;;  %v9823_v7 = vsel %vm1592_vm12, %v6906_v47, %v6905_v30  ;;  %12762 = vst [vmem:[#allocation57_spill] sm:$0xff] %v9829_v57  ;;  %v9835_v32 = vsel %vm1580_vm5, %v6920_v36, %v6919_v24  ;;  %v6744_v9 = vunpack.c.h.b16 %v9687_v5  ;;  %v6745_v47 = vunpack.c.h.b16 %v9704_v19 }
 0x261   : > { %5820 = vrot.lane.b32.xlu1 %v9772_v3, %s8543_s28  ;;  %12761 = vst [vmem:[#allocation56_spill] sm:$0xff] %v9823_v7  ;;  %12763 = vst [vmem:[#allocation58_spill] sm:$0xff] %v9835_v32  ;;  %v6746_v2 = vunpack.c.h.b16 %v9710_v62  ;;  %v6747_v48 = vunpack.c.h.b16 %v9736_v35  ;;  %v6748_v49 = vunpack.c.h.b16 %v9712_v22  ;;  %v6749_v12 = vunpack.c.h.b16 %v9717_v46 }
 0x262   : > { %12764 = vst [vmem:[#allocation59_spill] sm:$0xff] %v9839_v40  ;;  %v6743_v54 = vunpack.c.h.b16 %v9699_v21  ;;  %v6750_v10 = vunpack.c.h.b16 %v9719_v61  ;;  %v6751_v1 = vrot.slane %v6744_v9, 7  ;;  %v6753_v36 = vrot.slane %v6745_v47, 6 }
 0x263   : > { %v6755_v5 = vrot.slane %v6746_v2, 5  ;;  %v6757_v33 = vrot.slane %v6747_v48, 4  ;;  %v6759_v62 = vrot.slane %v6748_v49, 3  ;;  %v6761_v24 = vrot.slane %v6749_v12, 2  ;;  %v9862_v2 = vpop.permute.xlu0 %1538  ;;  %v12767_v48 = vld [vmem:[#allocation3_spill] sm:$0xff]  ;;  %v12768_v49 = vld [vmem:[#allocation5_spill] sm:$0xff] }
 0x264   : > { %v6752_v19 = vsel %vm1574_vm3, %v6751_v1, %v6743_v54  ;;  %v6763_v46 = vrot.slane %v6750_v10, 1  ;;  %12766 = vst [vmem:[#allocation61_spill] sm:$0xff] %v9862_v2  ;;  %v1884_v54 = vrot.slane %v12767_v48, 1  ;;  %v1886_v1 = vrot.slane %v12768_v49, 7 }
 0x265   : > { %5955 = vrot.lane.b32.xlu1 %v9793_v58, %s8544_s29  ;;  %v6754_v35 = vsel %vm1577_vm4, %v6753_v36, %v6752_v19  ;;  %v12769_v36 = vld [vmem:[#allocation4_spill] sm:$0xff] }
 0x266   : > { %v6756_v22 = vsel %vm1580_vm5, %v6755_v5, %v6754_v35  ;;  %v1885_v12 = vsel %vm1574_vm3, %v12769_v36, %v1884_v54 }
 0x267   : > { %v6758_v21 = vsel %vm1583_vm13, %v6757_v33, %v6756_v22  ;;  %v9868_v5 = vpop.permute.xlu0 %1643  ;;  %v12770_v33 = vld [vmem:[#allocation6_spill] sm:$0xff] }
 0x268   : > { %v6760_v61 = vsel %vm1586_vm10, %v6759_v62, %v6758_v21  ;;  %v1888_v19 = vrot.slane %v12770_v33, 6  ;;  %v1712_v62 = vadd.f32 %v9472_v27, %v9868_v5  ;;  %v9880_v27 = vld [vmem:[%s12503_s8] sm:$0x3] }
 0x269   : > { %5947 = vrot.lane.b32.xlu1 %v9820_v8, %s8543_s28  ;;  %v6762_v9 = vsel %vm1589_vm11, %v6761_v24, %v6760_v61  ;;  %v1887_v24 = vsel %vm1577_vm4, %v1886_v1, %v1885_v12  ;;  %v12771_v1 = vmov 0.0  }
 0x26a   : > { %v9860_v47 = vsel %vm1592_vm12, %v6763_v46, %v6762_v9  ;;  %v1889_v61 = vsel %vm1580_vm5, %v1888_v19, %v1887_v24  ;;  %v9914_v19 = vld [vmem:[%s8726_s26 + $0x8] sm:$0x2]  ;;  %v9921_v24 = vld [vmem:[%s8726_s26 + $0x18] sm:$0x2] }
 0x26b   : > { %12765 = vst [vmem:[#allocation60_spill] sm:$0xff] %v9860_v47  ;;  %v1890_v47 = vpack.c.b16 %v1889_v61, %v1889_v61 }
 0x26d   : > { %6074 = vrot.lane.b32.xlu1 %v9839_v40, %s8543_s28  ;;  %v1892_v12 = vsel %vm1673_vm6, %v1890_v47, 0  ;;  %v9904_v47 = vld [vmem:[%s12499_s4] sm:$0x3] }
 0x294   : > { %v1635_v10 = vpop.f32.mrf.mxu0 }
 0x295   : > { %v1636_v35 = vadd.f32 %v1635_v10, %v9862_v2  ;;  %v9911_v10 = vld [vmem:[%s8726_s26] sm:$0x2] }
 0x296   : > { %v1878_v22 = vpop.f32.mrf.mxu1  ;;  %v7742_v21 = vpop.f32.mrf.mxu0 }
 0x297   : > { %v1717_v46 = vadd.f32 %v1712_v62, %v1636_v35  ;;  %v7171_v62 = vcombine.low %v9911_v10, %v9911_v10  ;;  %v7172_v35 = vcombine.low %v9914_v19, %v9914_v19 }
 0x298   : > { %v7760_v9 = vpop.f32.mrf.mxu1  ;;  %v1638_v54 = vpop.f32.mrf.mxu0 }
 0x299   : > { %v1718_v48 = vmax.f32 %v1717_v46, 0.0  ;;  %v9924_v46 = vld [vmem:[%s8726_s26 + $0x10] sm:$0x2]  ;;  %v9926_v21 = vunpack.c.l.b16 %v7171_v62  ;;  %v9928_v61 = vunpack.c.l.b16 %v7172_v35  ;;  %v9930_v9 = vpop.permute.xlu1 %1722  ;;  %v7174_v54 = vcombine.low %v9921_v24, %v9921_v24 }
 0x29a   : > { %v1881_v49 = vpop.f32.mrf.mxu1  ;;  %v7743_v30 = vpop.f32.mrf.mxu0  ;;  %12772 = vst [vmem:[#allocation3_spill] sm:$0xff] %v9930_v9 }
 0x29b   : > { %v1719_v36 = vpack.c.bf16 %v1718_v48, %v1718_v48  ;;  %v2015_v30 = vsel %vm462_vm1, %v9250_v28, 0  ;;  %v9939_v35 = vunpack.c.l.b16 %v7174_v54 }
 0x29c   : > { %v7761_v33 = vpop.f32.mrf.mxu1 }
 0x29d   : > { %v1729_v57 = vsel %vm1673_vm6, %v1719_v36, 0  ;;  %v7173_v36 = vcombine.low %v9924_v46, %v9924_v46 }
 0x29e   : > { %7751 = vmatpush3.bf16.msra.mxu0 %v1729_v57  ;;  %v9892_v57 = vld [vmem:[%s12501_s6] sm:$0x3] }
 0x29f   : > { %7762 = vmatprep.subr.bf16.mxu0 %v12771_v1  ;;  %v9941_v7 = vunpack.c.l.b16 %v7173_v36 }
 0x2a1   : > { %7753 = vmatmul.mubr.msk.bf16.vlgmr.msra.gmra.mxu0 %vm1669_vm7, %v9880_v27 }
 0x2a2   : > { %7763 = vmatpush3.bf16.msra.mxu0 %v1892_v12  ;;  %7764 = vmatprep.mubr.msk.bf16.mxu0 %vm8542_vm2, %v12771_v1  ;;  %v2073_v12 = vrot.slane %v9926_v21, 2 }
 0x2a3   : > { %7774 = vmatprep.subr.bf16.mxu0 %v12771_v1 }
 0x2a9   : > { %7765 = vmatmul.mubr.msk.bf16.vlgmr.msra.gmra.mxu0 %vm1669_vm7, %v9892_v57 }
 0x2aa   : > { %7775 = vmatpush3.bf16.msra.mxu0 %v2015_v30  ;;  %7776 = vmatprep.mubr.msk.bf16.mxu0 %vm8542_vm2, %v12771_v1  ;;  %v2074_v30 = vrot.slane %v9928_v61, 1 }
 0x2ab   : > { %7786 = vmatprep.subr.bf16.mxu0 %v12771_v1 }
 0x2ac   : > { %v2075_v53 = vsel %vm1574_vm3, %v2074_v30, %v2073_v12 }
 0x2b1   : > { %7777 = vmatmul.mubr.msk.bf16.vlgmr.msra.gmra.mxu0 %vm455_vm0, %v9904_v47 }
 0x2b2   : > { %7788 = vmatprep.mubr.msk.bf16.mxu0 %vm8542_vm2, %v12771_v1 }
 0x361   : > { %v1765_v48 = vpop.f32.mrf.mxu0 }
 0x362   : > { %v1766_v49 = vadd.f32 %v1765_v48, %v9930_v9  ;;  %v2077_v48 = vrot.slane %v9939_v35, 7 }
 0x363   : > { %v7754_v33 = vpop.f32.mrf.mxu0 }
 0x364   : > { %v7157_v62 = vmul.f32 -1.442695, %v1766_v49  ;;  %v1879_v33 = vadd.f32 %v1878_v22, %v9862_v2  ;;  %v2076_v49 = vsel %vm1577_vm4, %v9941_v7, %v2075_v53 }
 0x365   : > { %v1768_v32 = vpop.f32.mrf.mxu0  ;;  %v2078_v36 = vsel %vm1580_vm5, %v2077_v48, %v2076_v49 }
 0x366   : > { %8451 = vpow2.f32 %v7157_v62  ;;  %v2079_v30 = vpack.c.b16 %v2078_v36, %v2078_v36 }
 0x367   : > { %v7755_v20 = vpop.f32.mrf.mxu0 }
 0x369   : > { %v1928_v38 = vpop.f32.mrf.mxu0 }
 0x36a   : > { %v1929_v56 = vadd.f32 %v1928_v38, %v9868_v5  ;;  %v12573_v38 = vunpack.c.l.bf16 %v9952_v39 }
 0x36b   : > { %v7766_v32 = vpop.f32.mrf.mxu0 }
 0x36c   : > { %v1934_v54 = vadd.f32 %v1929_v56, %v1879_v33  ;;  %v2081_v56 = vsel %vm1673_vm6, %v2079_v30, 0  ;;  %v9958_v33 = vld [vmem:[%s8726_s26 + $0x10] sm:$0x1]  ;;  %v9964_v32 = vld [vmem:[%s8726_s26] sm:$0x1] }
 0x36d   : > { %v1931_v31 = vpop.f32.mrf.mxu0  ;;  %v12574_v49 = vunpack.c.l.bf16 %v9958_v33 }
 0x36e   : > { %v1935_v20 = vmax.f32 %v1934_v54, 0.0  ;;  %v1785_v54 = vrot.slane %v12573_v38, 7 }
 0x36f   : > { %v7767_v62 = vpop.f32.mrf.mxu0 }
 0x370   : > { %v1936_v12 = vpack.c.bf16 %v1935_v20, %v1935_v20  ;;  %v9973_v20 = vld [vmem:[%s8726_s26 + $0x18] sm:$0x1] }
 0x371   : > { %v2051_v6 = vpop.f32.mrf.mxu0  ;;  %v12572_v62 = vunpack.c.l.bf16 %v9973_v20 }
 0x372   : > { %v1938_v63 = vsel %vm1673_vm6, %v1936_v12, 0  ;;  %v1787_v12 = vrot.slane %v12574_v49, 6 }
 0x373   : > { %v8452_v22 = vpop.eup %8451  ;;  %7769 = vmatpush3.bf16.msra.mxu1 %v1938_v63  ;;  %v7778_v53 = vpop.f32.mrf.mxu0  ;;  %v12575_v63 = vunpack.c.l.bf16 %v9964_v32 }
 0x374   : > { %v1774_v31 = vadd.f32 1.0, %v8452_v22  ;;  %7780 = vmatprep.subr.bf16.mxu1 %v12771_v1  ;;  %v1789_v22 = vrot.slane %v12572_v62, 5  ;;  %v2240_v53 = vsel %vm462_vm1, %v9474_v60, 0 }
 0x375   : > { %v2054_v48 = vpop.f32.mrf.mxu0  ;;  %v1786_v30 = vsel %vm1574_vm3, %v1785_v54, %v12575_v63  ;;  %v2282_v63 = vrot.slane %v9926_v21, 3 }
 0x376   : > { %8453 = vrcp.f32 %v1774_v31  ;;  %7771 = vmatmul.mubr.msk.bf16.vlgmr.msra.gmra.mxu1 %vm1669_vm7, %v9880_v27  ;;  %v1788_v31 = vsel %vm1577_vm4, %v1787_v12, %v1786_v30 }
 0x377   : > { %7781 = vmatpush3.bf16.msra.mxu1 %v2081_v56  ;;  %7782 = vmatprep.mubr.msk.bf16.mxu1 %vm8542_vm2, %v12771_v1  ;;  %v7779_v36 = vpop.f32.mrf.mxu0  ;;  %v1790_v56 = vsel %vm1580_vm5, %v1789_v22, %v1788_v31  ;;  %v12775_v31 = vld [vmem:[#allocation12_spill] sm:$0xff] }
 0x378   : > { %7792 = vmatprep.subr.bf16.mxu1 %v12771_v1 }
 0x37e   : > { %7783 = vmatmul.mubr.msk.bf16.vlgmr.msra.gmra.mxu1 %vm1669_vm7, %v9892_v57 }
 0x37f   : > { %7793 = vmatpush3.bf16.msra.mxu1 %v2240_v53  ;;  %7794 = vmatprep.mubr.msk.bf16.mxu1 %vm8542_vm2, %v12771_v1  ;;  %v12774_v53 = vld [vmem:[#allocation32_spill] sm:$0xff] }
 0x380   : > { %7804 = vmatprep.subr.bf16.mxu1 %v12771_v1 }
 0x383   : > { %v8454_v48 = vpop.eup %8453 }
 0x384   : > { %v1792_v54 = vmul.f32 %v8454_v48, %v1790_v56  ;;  %v12776_v56 = vpack.c.b16 %v12774_v53, %v12775_v31 }
 0x386   : > { %7795 = vmatmul.mubr.msk.bf16.vlgmr.msra.gmra.mxu1 %vm455_vm0, %v9904_v47  ;;  %v9994_v36 = vpack.c.bf16 %v1792_v54, %v1792_v54  ;;  %v4919_v48 = vsel %vm1673_vm6, 0, %v12776_v56 }
 0x387   : > { %7806 = vmatprep.mubr.msk.bf16.mxu1 %vm8542_vm2, %v12771_v1 }
 0x388   : > { %12773 = vst [vmem:[#allocation5_spill] sm:$0xff] %v9994_v36  ;;  %5009 = vrot.lane.b32.xlu1 %v9994_v36, %s8544_s29  ;;  %v4883_v12 = vrot.slane %v9994_v36, 6  ;;  %v12576_v30 = vrot.slane %v9994_v36, 4  ;;  %v4871_v22 = vrot.slane %v9994_v36, 2  ;;  %v2285_v36 = vrot.slane %v9941_v7, 1 }
 0x38a   : > { %4884 = vrot.lane.b32.xlu0 %v4883_v12, %s8544_s29  ;;  %v10013_v54 = vsel %vm4909_vm14, %v4919_v48, %v4871_v22  ;;  %v2052_v22 = vadd.f32 %v2051_v6, %v9862_v2 }
 0x38b   : > { %12777 = vst [vmem:[#allocation4_spill] sm:$0xff] %v10013_v54 }
 0x38e   : > { %4875 = vrot.lane.b32.xlu0 %v12576_v30, %s8543_s28  ;;  %v2283_v30 = vrot.slane %v9928_v61, 2 }
 0x390   : > { %v2284_v53 = vsel %vm1574_vm3, %v2283_v30, %v2282_v63 }
 0x392   : > { %5005 = vrot.lane.b32.xlu0 %v4883_v12, %s8543_s28 }
 0x436   : > { %v1974_v62 = vpop.f32.mrf.mxu1 }
 0x437   : > { %v1975_v38 = vadd.f32 %v1974_v62, %v9930_v9  ;;  %v2286_v62 = vsel %vm1577_vm4, %v2285_v36, %v2284_v53 }
 0x438   : > { %v7772_v49 = vpop.f32.mrf.mxu1  ;;  %v2287_v61 = vsel %vm1580_vm5, %v9939_v35, %v2286_v62  ;;  %v12778_v35 = vunpack.c.l.bf16 %v9964_v32  ;;  %v12779_v62 = vunpack.c.l.bf16 %v9958_v33  ;;  %v2413_v32 = vsel %vm462_vm1, %v9296_v44, 0 }
 0x439   : > { %v7169_v12 = vmul.f32 -1.442695, %v1975_v38  ;;  %v2288_v7 = vpack.c.b16 %v2287_v61, %v2287_v61  ;;  %v12781_v61 = vunpack.c.l.bf16 %v9973_v20 }
 0x43a   : > { %v1977_v15 = vpop.f32.mrf.mxu1 }
 0x43b   : > { %8455 = vpow2.f32 %v7169_v12  ;;  %v2290_v36 = vsel %vm1673_vm6, %v2288_v7, 0 }
 0x43c   : > { %v7773_v55 = vpop.f32.mrf.mxu1 }
 0x43e   : > { %v2117_v31 = vpop.f32.mrf.mxu1 }
 0x43f   : > { %v2118_v56 = vadd.f32 %v2117_v31, %v9868_v5 }
 0x440   : > { %v7784_v49 = vpop.f32.mrf.mxu1 }
 0x441   : > { %v2123_v48 = vadd.f32 %v2118_v56, %v2052_v22  ;;  %v1986_v22 = vrot.slane %v12778_v35, 1  ;;  %v1988_v49 = vrot.slane %v12779_v62, 7 }
 0x442   : > { %v2120_v21 = vpop.f32.mrf.mxu1 }
 0x443   : > { %v2124_v15 = vmax.f32 %v2123_v48, 0.0  ;;  %v12780_v48 = vunpack.c.l.bf16 %v9952_v39 }
 0x444   : > { %v7785_v38 = vpop.f32.mrf.mxu1 }
 0x445   : > { %v2125_v12 = vpack.c.bf16 %v2124_v15, %v2124_v15  ;;  %v1987_v21 = vsel %vm1574_vm3, %v12780_v48, %v1986_v22  ;;  %v1990_v15 = vrot.slane %v12781_v61, 6  ;;  %v12583_v22 = vunpack.c.l.bf16 %v9914_v19  ;;  %v10120_v48 = vld [vmem:[%s8726_s26 + $0x10] sm:$0x4] }
 0x446   : > { %v10025_v55 = vpop.f32.mrf.mxu1  ;;  %v1989_v38 = vsel %vm1577_vm4, %v1988_v49, %v1987_v21  ;;  %v10114_v49 = vld [vmem:[%s8726_s26] sm:$0x4] }
 0x447   : > { %v2127_v63 = vsel %vm1673_vm6, %v2125_v12, 0  ;;  %v1991_v39 = vsel %vm1580_vm5, %v1990_v15, %v1989_v38  ;;  %v2184_v62 = vrot.slane %v12583_v22, 1  ;;  %v7191_v21 = vcombine.low %v10114_v49, %v10114_v49  ;;  %v10127_v15 = vld [vmem:[%s8726_s26 + $0x18] sm:$0x4] }
 0x448   : > { %v8456_v30 = vpop.eup %8455  ;;  %7787 = vmatpush3.bf16.msra.mxu0 %v2127_v63  ;;  %v7796_v6 = vpop.f32.mrf.mxu1 }
 0x449   : > { %v1983_v31 = vadd.f32 1.0, %v8456_v30  ;;  %7798 = vmatprep.subr.bf16.mxu0 %v12771_v1  ;;  %v10131_v38 = vunpack.c.l.b16 %v7191_v21 }
 0x44a   : > { %v2279_v53 = vpop.f32.mrf.mxu1 }
 0x44b   : > { %8457 = vrcp.f32 %v1983_v31  ;;  %7789 = vmatmul.mubr.msk.bf16.vlgmr.msra.gmra.mxu0 %vm1669_vm7, %v9880_v27  ;;  %v10077_v31 = vpack.c.b16 %v9337_v17, %v9337_v17  ;;  %v10086_v53 = vpack.c.b16 %v9451_v4, %v9451_v4  ;;  %v10100_v4 = vpack.c.b16 %v9565_v0, %v9565_v0  ;;  %v10117_v0 = vld [vmem:[%s8726_s26 + $0x8] sm:$0x4] }
 0x44c   : > { %7799 = vmatpush3.bf16.msra.mxu0 %v2290_v36  ;;  %7800 = vmatprep.mubr.msk.bf16.mxu0 %vm8542_vm2, %v12771_v1  ;;  %v7797_v56 = vpop.f32.mrf.mxu1  ;;  %v10080_v36 = vpop.permute.xlu1 %5659  ;;  %v7192_v61 = vcombine.low %v10117_v0, %v10117_v0 }
 0x44d   : > { %7810 = vmatprep.subr.bf16.mxu0 %v12771_v1  ;;  %12784 = vst [vmem:[#allocation12_spill] sm:$0xff] %v10080_v36  ;;  %12785 = vst [vmem:[#allocation62_spill] sm:$0xff] %v10086_v53 }
 0x44e   : > { %12787 = vst [vmem:[#allocation64_spill] sm:$0xff] %v10100_v4 }
 0x450   : > { %v10092_v17 = vpop.permute.xlu1 %4879 }
 0x451   : > { %12786 = vst [vmem:[#allocation63_spill] sm:$0xff] %v10092_v17 }
 0x453   : > { %7801 = vmatmul.mubr.msk.bf16.vlgmr.msra.gmra.mxu0 %vm1669_vm7, %v9892_v57 }
 0x454   : > { %7811 = vmatpush3.bf16.msra.mxu0 %v2413_v32  ;;  %7812 = vmatprep.mubr.msk.bf16.mxu0 %vm8542_vm2, %v12771_v1  ;;  %v10102_v35 = vpop.permute.xlu1 %4827  ;;  %v7193_v32 = vcombine.low %v10120_v48, %v10120_v48 }
 0x455   : > { %7822 = vmatprep.subr.bf16.mxu0 %v12771_v1  ;;  %12788 = vst [vmem:[#allocation65_spill] sm:$0xff] %v10102_v35 }
 0x458   : > { %v8458_v33 = vpop.eup %8457 }
 0x459   : > { %v1993_v12 = vmul.f32 %v8458_v33, %v1991_v39  ;;  %v10133_v39 = vunpack.c.l.b16 %v7192_v61 }
 0x45b   : > { %7813 = vmatmul.mubr.msk.bf16.vlgmr.msra.gmra.mxu0 %vm455_vm0, %v9904_v47  ;;  %v10055_v20 = vpack.c.bf16 %v1993_v12, %v1993_v12  ;;  %v7194_v12 = vcombine.low %v10127_v15, %v10127_v15 }
 0x45c   : > { %7824 = vmatprep.mubr.msk.bf16.mxu0 %vm8542_vm2, %v12771_v1 }
 0x45d   : > { %12782 = vst [vmem:[#allocation6_spill] sm:$0xff] %v10055_v20  ;;  %5138 = vrot.lane.b32.xlu1 %v10055_v20, %s8544_s29  ;;  %v5021_v7 = vrot.slane %v10055_v20, 6  ;;  %v12582_v63 = vrot.slane %v10055_v20, 2  ;;  %v4940_v30 = vrot.slane %v10055_v20, 4  ;;  %v10142_v36 = vunpack.c.l.b16 %v7194_v12 }
 0x45f   : > { %5022 = vrot.lane.b32.xlu0 %v5021_v7, %s8544_s29  ;;  %v10071_v6 = vsel %vm462_vm1, %v12721_v14, %v4940_v30 }
 0x460   : > { %12783 = vst [vmem:[#allocation32_spill] sm:$0xff] %v10071_v6 }
 0x461   : > { %4904 = vrot.lane.b32.xlu1 %v12582_v63, %s8543_s28  ;;  %v2472_v63 = vrot.slane %v10133_v39, 3 }
 0x463   : > { %5013 = vrot.lane.b32.xlu0 %v4940_v30, %s8543_s28  ;;  %v10138_v30 = vunpack.c.l.b16 %v7193_v32  ;;  %v2277_v32 = vadd.f32 %v10025_v55, %v9862_v2 }
 0x465   : > { %4944 = vrot.lane.b32.xlu1 %v10071_v6, %s8544_s29  ;;  %v2474_v21 = vrot.slane %v10138_v30, 2 }
 0x467   : > { %5134 = vrot.lane.b32.xlu0 %v5021_v7, %s8543_s28 }
 0x469   : > { %5953 = vrot.lane.b32.xlu1 %v10077_v31, %s8544_s29 }
 0x46b   : > { %6080 = vrot.lane.b32.xlu0 %v10086_v53, %s8544_s29 }
 0x46d   : > { %5939 = vrot.lane.b32.xlu1 %v9755_v52, %s8543_s28  ;;  %v12584_v52 = vunpack.c.l.bf16 %v9911_v10 }
 0x46f   : > { %6070 = vrot.lane.b32.xlu0 %v9820_v8, %s8544_s29  ;;  %v2183_v56 = vrot.slane %v12584_v52, 2 }
 0x471   : > { %6066 = vrot.lane.b32.xlu1 %v9793_v58, %s8543_s28  ;;  %v2185_v58 = vsel %vm1574_vm3, %v2184_v62, %v2183_v56  ;;  %v2471_v62 = vrot.slane %v10131_v38, 4 }
 0x475   : > { %5943 = vrot.lane.b32.xlu1 %v10100_v4, %s8544_s29  ;;  %v2473_v4 = vsel %vm1574_vm3, %v2472_v63, %v2471_v62 }
 0x476   : > { %v2475_v35 = vsel %vm1577_vm4, %v2474_v21, %v2473_v4 }
 0x50b   : > { %v2163_v33 = vpop.f32.mrf.mxu0 }
 0x50c   : > { %v2164_v7 = vadd.f32 %v2163_v33, %v9930_v9  ;;  %v2476_v33 = vrot.slane %v10142_v36, 1 }
 0x50d   : > { %v7790_v56 = vpop.f32.mrf.mxu0 }
 0x50e   : > { %v7177_v22 = vmul.f32 -1.442695, %v2164_v7 }
 0x50f   : > { %v2166_v52 = vpop.f32.mrf.mxu0 }
 0x510   : > { %8459 = vpow2.f32 %v7177_v22  ;;  %v2477_v22 = vsel %vm1580_vm5, %v2476_v33, %v2475_v35 }
 0x511   : > { %v7791_v61 = vpop.f32.mrf.mxu0  ;;  %v2478_v14 = vpack.c.b16 %v2477_v22, %v2477_v22 }
 0x513   : > { %v2326_v6 = vpop.f32.mrf.mxu0 }
 0x514   : > { %v2327_v56 = vadd.f32 %v2326_v6, %v9868_v5  ;;  %v2480_v6 = vsel %vm1673_vm6, %v2478_v14, 0  ;;  %v12789_v14 = vld [vmem:[#allocation30_spill] sm:$0xff] }
 0x515   : > { %v7802_v7 = vpop.f32.mrf.mxu0  ;;  %v2640_v35 = vsel %vm462_vm1, %v12789_v14, 0 }
 0x516   : > { %v2332_v52 = vadd.f32 %v2327_v56, %v2277_v32 }
 0x517   : > { %v2329_v12 = vpop.f32.mrf.mxu0 }
 0x518   : > { %v2333_v54 = vmax.f32 %v2332_v52, 0.0 }
 0x519   : > { %v7803_v17 = vpop.f32.mrf.mxu0 }
 0x51a   : > { %v2334_v61 = vpack.c.bf16 %v2333_v54, %v2333_v54  ;;  %v2178_v17 = vunpack.c.l.bf16 %v9921_v24 }
 0x51b   : > { %v2449_v63 = vpop.f32.mrf.mxu0 }
 0x51c   : > { %v2336_v62 = vsel %vm1673_vm6, %v2334_v61, 0  ;;  %v12792_v61 = vunpack.c.l.bf16 %v9911_v10 }
 0x51d   : > { %v8460_v20 = vpop.eup %8459  ;;  %7805 = vmatpush3.bf16.msra.mxu1 %v2336_v62  ;;  %v7814_v53 = vpop.f32.mrf.mxu0 }
 0x51e   : > { %v2172_v55 = vadd.f32 1.0, %v8460_v20  ;;  %7816 = vmatprep.subr.bf16.mxu1 %v12771_v1  ;;  %v2177_v20 = vunpack.c.l.bf16 %v9924_v46  ;;  %v2187_v53 = vrot.slane %v2178_v17, 7  ;;  %v2384_v62 = vrot.slane %v12792_v61, 3 }
 0x51f   : > { %v2452_v4 = vpop.f32.mrf.mxu0  ;;  %v2687_v61 = vrot.slane %v10142_v36, 2 }
 0x520   : > { %8461 = vrcp.f32 %v2172_v55  ;;  %7807 = vmatmul.mubr.msk.bf16.vlgmr.msra.gmra.mxu1 %vm1669_vm7, %v9880_v27  ;;  %v2186_v21 = vsel %vm1577_vm4, %v2177_v20, %v2185_v58  ;;  %v12793_v55 = vunpack.c.l.bf16 %v9914_v19 }
 0x521   : > { %7817 = vmatpush3.bf16.msra.mxu1 %v2480_v6  ;;  %7818 = vmatprep.mubr.msk.bf16.mxu1 %vm8542_vm2, %v12771_v1  ;;  %v7815_v54 = vpop.f32.mrf.mxu0  ;;  %v2188_v33 = vsel %vm1580_vm5, %v2187_v53, %v2186_v21  ;;  %v2682_v21 = vrot.slane %v10131_v38, 5 }
 0x522   : > { %7828 = vmatprep.subr.bf16.mxu1 %v12771_v1  ;;  %v2385_v6 = vrot.slane %v12793_v55, 2 }
 0x524   : > { %v2386_v4 = vsel %vm1574_vm3, %v2385_v6, %v2384_v62  ;;  %v2450_v62 = vadd.f32 %v2449_v63, %v9862_v2 }
 0x528   : > { %7819 = vmatmul.mubr.msk.bf16.vlgmr.msra.gmra.mxu1 %vm1669_vm7, %v9892_v57 }
 0x529   : > { %7829 = vmatpush3.bf16.msra.mxu1 %v2640_v35  ;;  %7830 = vmatprep.mubr.msk.bf16.mxu1 %vm8542_vm2, %v12771_v1 }
 0x52a   : > { %7840 = vmatprep.subr.bf16.mxu1 %v12771_v1 }
 0x52d   : > { %v8462_v32 = vpop.eup %8461 }
 0x52e   : > { %v2190_v56 = vmul.f32 %v8462_v32, %v2188_v33  ;;  %v2683_v33 = vrot.slane %v10133_v39, 4 }
 0x530   : > { %7831 = vmatmul.mubr.msk.bf16.vlgmr.msra.gmra.mxu1 %vm455_vm0, %v9904_v47  ;;  %v10177_v7 = vpack.c.bf16 %v2190_v56, %v2190_v56 }
 0x531   : > { %7842 = vmatprep.mubr.msk.bf16.mxu1 %vm8542_vm2, %v12771_v1 }
 0x532   : > { %12790 = vst [vmem:[#allocation66_spill] sm:$0xff] %v10177_v7  ;;  %5265 = vrot.lane.b32.xlu0 %v10177_v7, %s8544_s29  ;;  %v12592_v58 = vrot.slane %v10177_v7, 2  ;;  %v5150_v52 = vrot.slane %v10177_v7, 6  ;;  %v5078_v12 = vrot.slane %v10177_v7, 4 }
 0x534   : > { %v10194_v22 = vsel %vm462_vm1, %v9250_v28, %v5078_v12 }
 0x535   : > { %12791 = vst [vmem:[#allocation67_spill] sm:$0xff] %v10194_v22 }
 0x536   : > { %5042 = vrot.lane.b32.xlu0 %v12592_v58, %s8543_s28 }
 0x53a   : > { %5151 = vrot.lane.b32.xlu0 %v5150_v52, %s8544_s29 }
 0x53e   : > { %5142 = vrot.lane.b32.xlu0 %v5078_v12, %s8543_s28  ;;  %v2684_v12 = vsel %vm1574_vm3, %v2683_v33, %v2682_v21 }
 0x542   : > { %5261 = vrot.lane.b32.xlu0 %v5150_v52, %s8543_s28  ;;  %v2685_v52 = vrot.slane %v10138_v30, 3 }
 0x544   : > { %v2686_v6 = vsel %vm1577_vm4, %v2685_v52, %v2684_v12 }
 0x546   : > { %5082 = vrot.lane.b32.xlu0 %v10194_v22, %s8544_s29 }
 0x5e0   : > { %v2372_v54 = vpop.f32.mrf.mxu1 }
 0x5e1   : > { %v2373_v53 = vadd.f32 %v2372_v54, %v9930_v9 }
 0x5e2   : > { %v7808_v35 = vpop.f32.mrf.mxu1 }
 0x5e3   : > { %v7189_v32 = vmul.f32 -1.442695, %v2373_v53  ;;  %v2688_v53 = vsel %vm1580_vm5, %v2687_v61, %v2686_v6  ;;  %v2387_v61 = vrot.slane %v2177_v20, 1 }
 0x5e4   : > { %v2375_v56 = vpop.f32.mrf.mxu1 }
 0x5e5   : > { %8463 = vpow2.f32 %v7189_v32  ;;  %v2689_v56 = vpack.c.b16 %v2688_v53, %v2688_v53  ;;  %v2388_v6 = vsel %vm1577_vm4, %v2387_v61, %v2386_v4 }
 0x5e6   : > { %v7809_v10 = vpop.f32.mrf.mxu1  ;;  %v2389_v46 = vsel %vm1580_vm5, %v2178_v17, %v2388_v6  ;;  %v8522_v6 = vld [vmem:[#allocation2 + $0x40] ss:$0 sps:$4 sm:$0x44]  }
 0x5e7   : > { %v2691_v52 = vsel %vm1673_vm6, %v2689_v56, 0  ;;  %v6214_v56 = vrot.slane %v9578_v42, 7 }
 0x5e8   : > { %v2516_v19 = vpop.f32.mrf.mxu1 }
 0x5e9   : > { %v2517_v55 = vadd.f32 %v2516_v19, %v9868_v5 }
 0x5ea   : > { %v7820_v38 = vpop.f32.mrf.mxu1 }
 0x5eb   : > { %v2522_v54 = vadd.f32 %v2517_v55, %v2450_v62  ;;  %v10225_v62 = vpop.permute.xlu1 %5146  ;;  %v2815_v55 = vsel %vm462_vm1, %v9327_v29, 0 }
 0x5ec   : > { %v2519_v39 = vpop.f32.mrf.mxu1  ;;  %12794 = vst [vmem:[#allocation68_spill] sm:$0xff] %v10225_v62 }
 0x5ed   : > { %v2523_v35 = vmax.f32 %v2522_v54, 0.0 }
 0x5ee   : > { %v7821_v32 = vpop.f32.mrf.mxu1 }
 0x5ef   : > { %v2524_v30 = vpack.c.bf16 %v2523_v35, %v2523_v35  ;;  %v10238_v20 = vpop.permute.xlu1 %5130  ;;  %v6220_v35 = vrot.slane %v9584_v51, 4  ;;  %v6221_v32 = vrot.slane %v9590_v25, 3 }
 0x5f0   : > { %v10213_v10 = vpop.f32.mrf.mxu1  ;;  %12795 = vst [vmem:[#allocation69_spill] sm:$0xff] %v10238_v20 }
 0x5f1   : > { %v2526_v21 = vsel %vm1673_vm6, %v2524_v30, 0  ;;  %v6223_v30 = vrot.slane %v9592_v50, 2 }
 0x5f2   : > { %v8464_v36 = vpop.eup %8463  ;;  %7823 = vmatpush3.bf16.msra.mxu0 %v2526_v21  ;;  %v7832_v63 = vpop.f32.mrf.mxu1  ;;  %v6368_v21 = vrot.slane %v9584_v51, 5  ;;  %v6222_v51 = vsel %vm1574_vm3, %v6221_v32, %v6220_v35  ;;  %v6373_v32 = vrot.slane %v9596_v45, 2 }
 0x5f3   : > { %v2381_v33 = vadd.f32 1.0, %v8464_v36  ;;  %7834 = vmatprep.subr.bf16.mxu0 %v12771_v1  ;;  %v10246_v4 = vpop.permute.xlu1 %5421  ;;  %v6369_v36 = vrot.slane %v9590_v25, 4 }
 0x5f4   : > { %v2679_v12 = vpop.f32.mrf.mxu1  ;;  %12796 = vst [vmem:[#allocation70_spill] sm:$0xff] %v10246_v4 }
 0x5f5   : > { %8465 = vrcp.f32 %v2381_v33  ;;  %7825 = vmatmul.mubr.msk.bf16.vlgmr.msra.gmra.mxu0 %vm1669_vm7, %v9880_v27  ;;  %v6216_v33 = vrot.slane %v9580_v16, 6  ;;  %v6362_v12 = vrot.slane %v9576_v59, 1  ;;  %v6370_v35 = vsel %vm1574_vm3, %v6369_v36, %v6368_v21 }
 0x5f6   : > { %7835 = vmatpush3.bf16.msra.mxu0 %v2691_v52  ;;  %7836 = vmatprep.mubr.msk.bf16.mxu0 %vm8542_vm2, %v12771_v1  ;;  %v7833_v19 = vpop.f32.mrf.mxu1  ;;  %v6225_v52 = vrot.slane %v9596_v45, 1  ;;  %v12800_v45 = vld [vmem:[#allocation25_spill] sm:$0xff] }
 0x5f7   : > { %7846 = vmatprep.subr.bf16.mxu0 %v12771_v1  ;;  %v10263_v63 = vpop.permute.xlu1 %5405  ;;  %v6371_v19 = vrot.slane %v9592_v50, 3  ;;  %v6215_v50 = vsel %vm1586_vm10, %v6214_v56, %v9576_v59  ;;  %v8524_v59 = vld [vmem:[#allocation2 + $0x58] ss:$0 sps:$4 sm:$0x44]  }
 0x5f8   : > { %12797 = vst [vmem:[#allocation71_spill] sm:$0xff] %v10263_v63  ;;  %v6339_v56 = vunpack.c.h.b16 %v8524_v59 }
 0x5fb   : > { %v10291_v21 = vpop.permute.xlu1 %5675 }
 0x5fc   : > { %12799 = vst [vmem:[#allocation73_spill] sm:$0xff] %v10291_v21 }
 0x5fd   : > { %7837 = vmatmul.mubr.msk.bf16.vlgmr.msra.gmra.mxu0 %vm1669_vm7, %v9892_v57 }
 0x5fe   : > { %7847 = vmatpush3.bf16.msra.mxu0 %v2815_v55  ;;  %7848 = vmatprep.mubr.msk.bf16.mxu0 %vm8542_vm2, %v12771_v1  ;;  %v8521_v55 = vld [vmem:[#allocation2 + $0x34] ss:$0 sps:$4 sm:$0x44]  }
 0x5ff   : > { %7858 = vmatprep.subr.bf16.mxu0 %v12771_v1  ;;  %v6336_v25 = vunpack.c.h.b16 %v8521_v55  ;;  %v6217_v55 = vsel %vm1589_vm11, %v6216_v33, %v6215_v50  ;;  %v12596_v50 = vunpack.c.l.bf16 %v10117_v0 }
 0x602   : > { %v8466_v38 = vpop.eup %8465 }
 0x603   : > { %v2391_v54 = vmul.f32 %v8466_v38, %v2389_v46  ;;  %v6337_v46 = vunpack.c.h.b16 %v8522_v6  ;;  %v6224_v38 = vsel %vm1577_vm4, %v6223_v30, %v6222_v51  ;;  %v6363_v30 = vsel %vm1586_vm10, %v9578_v42, %v6362_v12 }
 0x604   : > { %v6226_v51 = vsel %vm1580_vm5, %v6225_v52, %v6224_v38  ;;  %v6346_v6 = vrot.slane %v6336_v25, 4 }
 0x605   : > { %7849 = vmatmul.mubr.msk.bf16.vlgmr.msra.gmra.mxu0 %vm455_vm0, %v9904_v47  ;;  %v10242_v39 = vpack.c.bf16 %v2391_v54, %v2391_v54  ;;  %v6364_v54 = vrot.slane %v9580_v16, 7  ;;  %v6366_v16 = vrot.slane %v9582_v34, 6  ;;  %v6347_v22 = vrot.slane %v6337_v46, 3  ;;  %v10319_v46 = vpop.permute.xlu1 %4900 }
 0x606   : > { %7860 = vmatprep.mubr.msk.bf16.mxu0 %vm8542_vm2, %v12771_v1 }
 0x607   : > { %5413 = vrot.lane.b32.xlu1 %v10242_v39, %s8544_s29  ;;  %v5298_v24 = vrot.slane %v10242_v39, 6  ;;  %v12591_v17 = vrot.slane %v10242_v39, 2  ;;  %v5205_v53 = vrot.slane %v10242_v39, 4  ;;  %v6348_v12 = vsel %vm1574_vm3, %v6347_v22, %v6346_v6  ;;  %v10351_v6 = vld [vmem:[%s8726_s26 + $0x8] sm:$0x8] }
 0x609   : > { %5299 = vrot.lane.b32.xlu0 %v5298_v24, %s8544_s29  ;;  %v10272_v61 = vsel %vm462_vm1, %v9474_v60, %v5205_v53 }
 0x60a   : > { %12798 = vst [vmem:[#allocation72_spill] sm:$0xff] %v10272_v61 }
 0x60b   : > { %5171 = vrot.lane.b32.xlu1 %v12591_v17, %s8543_s28  ;;  %v8523_v17 = vld [vmem:[#allocation2 + $0x4c] ss:$0 sps:$4 sm:$0x44]  }
 0x60c   : > { %v6338_v58 = vunpack.c.h.b16 %v8523_v17  ;;  %v6372_v17 = vsel %vm1577_vm4, %v6371_v19, %v6370_v35  ;;  %v6351_v19 = vrot.slane %v6339_v56, 1  ;;  %v12594_v35 = vunpack.c.l.bf16 %v10127_v15  ;;  %v10348_v56 = vld [vmem:[%s8726_s26] sm:$0x8] }
 0x60d   : > { %5269 = vrot.lane.b32.xlu0 %v5205_v53, %s8543_s28  ;;  %v6218_v53 = vrot.slane %v9582_v34, 5  ;;  %v10298_v34 = vsel %vm1580_vm5, %v6373_v32, %v6372_v17 }
 0x60e   : > { %v6349_v36 = vrot.slane %v6338_v58, 2 }
 0x60f   : > { %5209 = vrot.lane.b32.xlu1 %v10272_v61, %s8544_s29  ;;  %v6219_v42 = vsel %vm1592_vm12, %v6218_v53, %v6217_v55  ;;  %v12595_v53 = vunpack.c.l.bf16 %v10120_v48  ;;  %v2583_v55 = vrot.slane %v12596_v50, 3 }
 0x610   : > { %v10302_v33 = vpack.c.b16 %v6226_v51, %v6219_v42  ;;  %v6350_v25 = vsel %vm1577_vm4, %v6349_v36, %v6348_v12  ;;  %v7212_v36 = vcombine.low %v10351_v6, %v10351_v6  ;;  %v10361_v42 = vld [vmem:[%s8726_s26 + $0x18] sm:$0x8] }
 0x611   : > { %5409 = vrot.lane.b32.xlu0 %v5298_v24, %s8543_s28  ;;  %v6365_v24 = vsel %vm1589_vm11, %v6364_v54, %v6363_v30  ;;  %v6352_v22 = vsel %vm1580_vm5, %v6351_v19, %v6350_v25  ;;  %v10328_v54 = vpop.permute.xlu1 %5019  ;;  %v2585_v30 = vrot.slane %v12595_v53, 2 }
 0x612   : > { %v10305_v52 = vsel %vm1592_vm12, %v6366_v16, %v6365_v24  ;;  %v10326_v38 = vpack.c.b16 %v6352_v22, %v6352_v22  ;;  %12802 = vst [vmem:[#allocation74_spill] sm:$0xff] %v10328_v54  ;;  %v2587_v16 = vrot.slane %v12594_v35, 1  ;;  %v7211_v24 = vcombine.low %v10348_v56, %v10348_v56 }
 0x613   : > { %5937 = vrot.lane.b32.xlu1 %v12800_v45, %s8543_s28  ;;  %v10312_v58 = vpack.c.b16 %v10298_v34, %v10305_v52  ;;  %v10354_v45 = vld [vmem:[%s8726_s26 + $0x10] sm:$0x8]  ;;  %v10367_v25 = vunpack.c.l.b16 %v7212_v36 }
 0x614   : > { %v7213_v12 = vcombine.low %v10354_v45, %v10354_v45  ;;  %v10365_v19 = vunpack.c.l.b16 %v7211_v24 }
 0x615   : > { %6064 = vrot.lane.b32.xlu0 %v10077_v31, %s8543_s28  ;;  %12801 = vst [vmem:[#allocation25_spill] sm:$0xff] %v10312_v58  ;;  %v10317_v31 = vpack.c.b16 %v9377_v23, %v9377_v23  ;;  %v12597_v23 = vunpack.c.l.bf16 %v10114_v49 }
 0x617   : > { %6228 = vrot.lane.b32.xlu1 %v10302_v33, %s8543_s28  ;;  %v2582_v32 = vrot.slane %v12597_v23, 4 }
 0x619   : > { %6376 = vrot.lane.b32.xlu0 %v10312_v58, %s8543_s28  ;;  %v2584_v17 = vsel %vm1574_vm3, %v2583_v55, %v2582_v32  ;;  %v7214_v32 = vcombine.low %v10361_v42, %v10361_v42 }
 0x61a   : > { %v2586_v51 = vsel %vm1577_vm4, %v2585_v30, %v2584_v17  ;;  %v10372_v30 = vunpack.c.l.b16 %v7213_v12  ;;  %v2873_v17 = vrot.slane %v10365_v19, 6  ;;  %v2677_v12 = vadd.f32 %v10213_v10, %v9862_v2 }
 0x61b   : > { %6209 = vrot.lane.b32.xlu1 %v10317_v31, %s8544_s29  ;;  %v2588_v59 = vsel %vm1580_vm5, %v2587_v16, %v2586_v51  ;;  %v2874_v51 = vrot.slane %v10367_v25, 5  ;;  %v10376_v50 = vunpack.c.l.b16 %v7214_v32 }
 0x61c   : > { %v2876_v24 = vrot.slane %v10372_v30, 4 }
 0x61d   : > { %v2875_v23 = vsel %vm1574_vm3, %v2874_v51, %v2873_v17 }
 0x61e   : > { %v2877_v54 = vsel %vm1577_vm4, %v2876_v24, %v2875_v23 }
 0x61f   : > { %6357 = vrot.lane.b32.xlu1 %v10326_v38, %s8544_s29 }
 0x6b5   : > { %v2562_v22 = vpop.f32.mrf.mxu0 }
 0x6b6   : > { %v2563_v55 = vadd.f32 %v2562_v22, %v9930_v9  ;;  %v2878_v22 = vrot.slane %v10376_v50, 3 }
 0x6b7   : > { %v7826_v16 = vpop.f32.mrf.mxu0 }
 0x6b8   : > { %v7197_v35 = vmul.f32 -1.442695, %v2563_v55 }
 0x6b9   : > { %v2565_v53 = vpop.f32.mrf.mxu0 }
 0x6ba   : > { %8467 = vpow2.f32 %v7197_v35  ;;  %v2879_v35 = vsel %vm1580_vm5, %v2878_v22, %v2877_v54 }
 0x6bb   : > { %v7827_v36 = vpop.f32.mrf.mxu0  ;;  %v2880_v61 = vpack.c.b16 %v2879_v35, %v2879_v35 }
 0x6bd   : > { %v2727_v28 = vpop.f32.mrf.mxu0 }
 0x6be   : > { %v2728_v16 = vadd.f32 %v2727_v28, %v9868_v5  ;;  %v2882_v28 = vsel %vm1673_vm6, %v2880_v61, 0 }
 0x6bf   : > { %v7838_v55 = vpop.f32.mrf.mxu0 }
 0x6c0   : > { %v2733_v53 = vadd.f32 %v2728_v16, %v2677_v12  ;;  %v12805_v12 = vunpack.c.l.bf16 %v10114_v49  ;;  %v12806_v55 = vunpack.c.l.bf16 %v10117_v0  ;;  %v3085_v0 = vrot.slane %v10367_v25, 6 }
 0x6c1   : > { %v2730_v32 = vpop.f32.mrf.mxu0 }
 0x6c2   : > { %v2734_v58 = vmax.f32 %v2733_v53, 0.0  ;;  %v2785_v16 = vrot.slane %v12805_v12, 5  ;;  %v2786_v53 = vrot.slane %v12806_v55, 4  ;;  %v12807_v32 = vunpack.c.l.bf16 %v10120_v48 }
 0x6c3   : > { %v7839_v21 = vpop.f32.mrf.mxu0 }
 0x6c4   : > { %v2735_v36 = vpack.c.bf16 %v2734_v58, %v2734_v58  ;;  %v2788_v35 = vrot.slane %v12807_v32, 3 }
 0x6c5   : > { %v2851_v17 = vpop.f32.mrf.mxu0 }
 0x6c6   : > { %v2737_v51 = vsel %vm1673_vm6, %v2735_v36, 0  ;;  %v12808_v36 = vunpack.c.l.bf16 %v10127_v15  ;;  %v3087_v15 = vrot.slane %v10372_v30, 5  ;;  %v2852_v55 = vadd.f32 %v2851_v17, %v9862_v2 }
 0x6c7   : > { %v8468_v63 = vpop.eup %8467  ;;  %7841 = vmatpush3.bf16.msra.mxu1 %v2737_v51  ;;  %v7850_v4 = vpop.f32.mrf.mxu0 }
 0x6c8   : > { %v2571_v10 = vadd.f32 1.0, %v8468_v63  ;;  %7852 = vmatprep.subr.bf16.mxu1 %v12771_v1  ;;  %v3042_v4 = vsel %vm462_vm1, %v9772_v3, 0  ;;  %v2790_v51 = vrot.slane %v12808_v36, 2 }
 0x6c9   : > { %v2854_v23 = vpop.f32.mrf.mxu0 }
 0x6ca   : > { %8469 = vrcp.f32 %v2571_v10  ;;  %7843 = vmatmul.mubr.msk.bf16.vlgmr.msra.gmra.mxu1 %vm1669_vm7, %v9880_v27  ;;  %v2787_v10 = vsel %vm1574_vm3, %v2786_v53, %v2785_v16  ;;  %v3089_v16 = vrot.slane %v10376_v50, 4 }
 0x6cb   : > { %7853 = vmatpush3.bf16.msra.mxu1 %v2882_v28  ;;  %7854 = vmatprep.mubr.msk.bf16.mxu1 %vm8542_vm2, %v12771_v1  ;;  %v7851_v21 = vpop.f32.mrf.mxu0  ;;  %v2789_v28 = vsel %vm1577_vm4, %v2788_v35, %v2787_v10 }
 0x6cc   : > { %7864 = vmatprep.subr.bf16.mxu1 %v12771_v1  ;;  %v2791_v23 = vsel %vm1580_vm5, %v2790_v51, %v2789_v28 }
 0x6d2   : > { %7855 = vmatmul.mubr.msk.bf16.vlgmr.msra.gmra.mxu1 %vm1669_vm7, %v9892_v57 }
 0x6d3   : > { %7865 = vmatpush3.bf16.msra.mxu1 %v3042_v4  ;;  %7866 = vmatprep.mubr.msk.bf16.mxu1 %vm8542_vm2, %v12771_v1 }
 0x6d4   : > { %7876 = vmatprep.subr.bf16.mxu1 %v12771_v1 }
 0x6d7   : > { %v8470_v63 = vpop.eup %8469 }
 0x6d8   : > { %v2590_v61 = vmul.f32 %v8470_v63, %v2588_v59  ;;  %v3084_v63 = vrot.slane %v10365_v19, 7 }
 0x6da   : > { %7867 = vmatmul.mubr.msk.bf16.vlgmr.msra.gmra.mxu1 %vm455_vm0, %v9904_v47  ;;  %v10403_v58 = vpack.c.bf16 %v2590_v61, %v2590_v61 }
 0x6db   : > { %7878 = vmatprep.mubr.msk.bf16.mxu1 %vm8542_vm2, %v12771_v1 }
 0x6dc   : > { %12803 = vst [vmem:[#allocation75_spill] sm:$0xff] %v10403_v58  ;;  %5540 = vrot.lane.b32.xlu0 %v10403_v58, %s8544_s29  ;;  %v12602_v54 = vrot.slane %v10403_v58, 2  ;;  %v5425_v24 = vrot.slane %v10403_v58, 6  ;;  %v5353_v59 = vrot.slane %v10403_v58, 4 }
 0x6de   : > { %v10420_v22 = vsel %vm462_vm1, %v9296_v44, %v5353_v59 }
 0x6df   : > { %12804 = vst [vmem:[#allocation76_spill] sm:$0xff] %v10420_v22 }
 0x6e0   : > { %5319 = vrot.lane.b32.xlu0 %v12602_v54, %s8543_s28 }
 0x6e4   : > { %5426 = vrot.lane.b32.xlu0 %v5425_v24, %s8544_s29 }
 0x6e8   : > { %5417 = vrot.lane.b32.xlu0 %v5353_v59, %s8543_s28  ;;  %v3086_v59 = vsel %vm1574_vm3, %v3085_v0, %v3084_v63 }
 0x6e9   : > { %v3088_v32 = vsel %vm1577_vm4, %v3087_v15, %v3086_v59  ;;  %v3217_v15 = vsel %vm462_vm1, %v9820_v8, 0 }
 0x6ea   : > { %v3090_v36 = vsel %vm1580_vm5, %v3089_v16, %v3088_v32  ;;  %v10495_v32 = vpack.c.b16 %v9611_v11, %v9611_v11  ;;  %v10515_v11 = vpack.c.b16 %v9373_v37, %v9373_v37  ;;  %v12604_v37 = vunpack.c.l.bf16 %v10354_v45 }
 0x6eb   : > { %v3091_v28 = vpack.c.b16 %v3090_v36, %v3090_v36 }
 0x6ec   : > { %5536 = vrot.lane.b32.xlu0 %v5425_v24, %s8543_s28  ;;  %12814 = vst [vmem:[#allocation82_spill] sm:$0xff] %v10495_v32 }
 0x6ed   : > { %v3093_v63 = vsel %vm1673_vm6, %v3091_v28, 0 }
 0x6f0   : > { %5357 = vrot.lane.b32.xlu0 %v10420_v22, %s8544_s29 }
 0x78a   : > { %v2773_v21 = vpop.f32.mrf.mxu1 }
 0x78b   : > { %v2774_v4 = vadd.f32 %v2773_v21, %v9930_v9 }
 0x78c   : > { %v7844_v49 = vpop.f32.mrf.mxu1 }
 0x78d   : > { %v7209_v61 = vmul.f32 -1.442695, %v2774_v4 }
 0x78e   : > { %v2776_v48 = vpop.f32.mrf.mxu1 }
 0x78f   : > { %8471 = vpow2.f32 %v7209_v61  ;;  %v10455_v48 = vpop.permute.xlu1 %5132 }
 0x790   : > { %v7845_v24 = vpop.f32.mrf.mxu1  ;;  %12809 = vst [vmem:[#allocation77_spill] sm:$0xff] %v10455_v48 }
 0x792   : > { %v2918_v12 = vpop.f32.mrf.mxu1 }
 0x793   : > { %v2919_v53 = vadd.f32 %v2918_v12, %v9868_v5 }
 0x794   : > { %v7856_v19 = vpop.f32.mrf.mxu1 }
 0x795   : > { %v2924_v35 = vadd.f32 %v2919_v53, %v2852_v55 }
 0x796   : > { %v2921_v25 = vpop.f32.mrf.mxu1 }
 0x797   : > { %v2925_v51 = vmax.f32 %v2924_v35, 0.0  ;;  %v10503_v35 = vpack.c.b16 %v9625_v13, %v9625_v13  ;;  %v10509_v25 = vpack.c.b16 %v9632_v43, %v9632_v43  ;;  %v12606_v43 = vunpack.c.l.bf16 %v10348_v56 }
 0x798   : > { %v7857_v10 = vpop.f32.mrf.mxu1 }
 0x799   : > { %v2926_v30 = vpack.c.bf16 %v2925_v51, %v2925_v51  ;;  %12815 = vst [vmem:[#allocation83_spill] sm:$0xff] %v10509_v25  ;;  %v12605_v51 = vunpack.c.l.bf16 %v10351_v6  ;;  %v12603_v10 = vunpack.c.l.bf16 %v10361_v42 }
 0x79a   : > { %v10445_v21 = vpop.f32.mrf.mxu1 }
 0x79b   : > { %v2928_v4 = vsel %vm1673_vm6, %v2926_v30, 0  ;;  %v2984_v30 = vrot.slane %v12606_v43, 6  ;;  %v2985_v28 = vrot.slane %v12605_v51, 5 }
 0x79c   : > { %v8472_v50 = vpop.eup %8471  ;;  %7859 = vmatpush3.bf16.msra.mxu0 %v2928_v4  ;;  %v7868_v17 = vpop.f32.mrf.mxu1  ;;  %v2987_v4 = vrot.slane %v12604_v37, 4 }
 0x79d   : > { %v2782_v49 = vadd.f32 1.0, %v8472_v50  ;;  %7870 = vmatprep.subr.bf16.mxu0 %v12771_v1  ;;  %v2986_v50 = vsel %vm1574_vm3, %v2985_v28, %v2984_v30 }
 0x79e   : > { %v3081_v0 = vpop.f32.mrf.mxu1  ;;  %v2988_v17 = vsel %vm1577_vm4, %v2987_v4, %v2986_v50 }
 0x79f   : > { %8473 = vrcp.f32 %v2782_v49  ;;  %7861 = vmatmul.mubr.msk.bf16.vlgmr.msra.gmra.mxu0 %vm1669_vm7, %v9880_v27  ;;  %v10464_v27 = vpop.permute.xlu1 %5542  ;;  %v10544_v0 = vld [vmem:[%s8726_s26 + $0x14] sm:$0x1] }
 0x7a0   : > { %7871 = vmatpush3.bf16.msra.mxu0 %v3093_v63  ;;  %7872 = vmatprep.mubr.msk.bf16.mxu0 %vm8542_vm2, %v12771_v1  ;;  %v7869_v61 = vpop.f32.mrf.mxu1  ;;  %12810 = vst [vmem:[#allocation78_spill] sm:$0xff] %v10464_v27  ;;  %v10541_v63 = vld [vmem:[%s8726_s26 + $0xc] sm:$0x1] }
 0x7a1   : > { %7882 = vmatprep.subr.bf16.mxu0 %v12771_v1  ;;  %v7232_v61 = vcombine.low %v10541_v63, %v10541_v63 }
 0x7a7   : > { %7873 = vmatmul.mubr.msk.bf16.vlgmr.msra.gmra.mxu0 %vm1669_vm7, %v9892_v57  ;;  %v10472_v57 = vpop.permute.xlu1 %5665 }
 0x7a8   : > { %7883 = vmatpush3.bf16.msra.mxu0 %v3217_v15  ;;  %7884 = vmatprep.mubr.msk.bf16.mxu0 %vm8542_vm2, %v12771_v1  ;;  %12812 = vst [vmem:[#allocation80_spill] sm:$0xff] %v10472_v57  ;;  %v10549_v15 = vld [vmem:[%s8726_s26 + $0x4] sm:$0x1] }
 0x7a9   : > { %7894 = vmatprep.subr.bf16.mxu0 %v12771_v1 }
 0x7ac   : > { %v8474_v24 = vpop.eup %8473 }
 0x7ad   : > { %v2793_v59 = vmul.f32 %v8474_v24, %v2791_v23  ;;  %v10552_v24 = vld [vmem:[%s8726_s26 + $0x1c] sm:$0x1] }
 0x7ae   : > { %v7234_v28 = vcombine.low %v10552_v24, %v10552_v24 }
 0x7af   : > { %7885 = vmatmul.mubr.msk.bf16.vlgmr.msra.gmra.mxu0 %vm455_vm0, %v9904_v47  ;;  %v10468_v12 = vpack.c.bf16 %v2793_v59, %v2793_v59  ;;  %v10483_v47 = vpop.permute.xlu1 %4881  ;;  %v7233_v59 = vcombine.low %v10544_v0, %v10544_v0 }
 0x7b0   : > { %7896 = vmatprep.mubr.msk.bf16.mxu0 %vm8542_vm2, %v12771_v1  ;;  %v10568_v37 = vunpack.c.l.b16 %v7234_v28 }
 0x7b1   : > { %12811 = vst [vmem:[#allocation79_spill] sm:$0xff] %v10468_v12  ;;  %5667 = vrot.lane.b32.xlu1 %v10468_v12, %s8544_s29  ;;  %v5552_v16 = vrot.slane %v10468_v12, 6  ;;  %v12601_v55 = vrot.slane %v10468_v12, 2  ;;  %v5480_v23 = vrot.slane %v10468_v12, 4 }
 0x7b3   : > { %5553 = vrot.lane.b32.xlu0 %v5552_v16, %s8544_s29  ;;  %v10488_v53 = vsel %vm462_vm1, %v12789_v14, %v5480_v23  ;;  %v10497_v19 = vpop.permute.xlu1 %4872 }
 0x7b4   : > { %12813 = vst [vmem:[#allocation81_spill] sm:$0xff] %v10488_v53 }
 0x7b5   : > { %5446 = vrot.lane.b32.xlu1 %v12601_v55, %s8543_s28 }
 0x7b7   : > { %5544 = vrot.lane.b32.xlu0 %v5480_v23, %s8543_s28  ;;  %v10517_v36 = vpop.permute.xlu1 %5011  ;;  %v10558_v23 = vunpack.c.l.b16 %v7232_v61 }
 0x7b8   : > { %12816 = vst [vmem:[#allocation84_spill] sm:$0xff] %v10517_v36 }
 0x7b9   : > { %5484 = vrot.lane.b32.xlu1 %v10488_v53, %s8544_s29  ;;  %v3275_v55 = vrot.slane %v10558_v23, 7 }
 0x7bb   : > { %5663 = vrot.lane.b32.xlu0 %v5552_v16, %s8543_s28  ;;  %v10521_v13 = vpop.permute.xlu1 %5003  ;;  %v7231_v16 = vcombine.low %v10549_v15, %v10549_v15 }
 0x7bc   : > { %12817 = vst [vmem:[#allocation85_spill] sm:$0xff] %v10521_v13 }
 0x7bd   : > { %6201 = vrot.lane.b32.xlu1 %v10495_v32, %s8543_s28 }
 0x7bf   : > { %6355 = vrot.lane.b32.xlu0 %v10503_v35, %s8544_s29 }
 0x7c1   : > { %6328 = vrot.lane.b32.xlu1 %v10509_v25, %s8543_s28 }
 0x7c5   : > { %6207 = vrot.lane.b32.xlu1 %v10515_v11, %s8544_s29 }
 0x7c9   : > { %6193 = vrot.lane.b32.xlu1 %v9651_v18, %s8543_s28  ;;  %v2989_v18 = vrot.slane %v12603_v10, 3 }
 0x7cb   : > { %v2990_v49 = vsel %vm1580_vm5, %v2989_v18, %v2988_v17  ;;  %v10563_v18 = vunpack.c.l.b16 %v7233_v59  ;;  %v10565_v17 = vunpack.c.l.b16 %v7231_v16  ;;  %v3279_v59 = vrot.slane %v10568_v37, 5 }
 0x7cc   : > { %v3079_v16 = vadd.f32 %v10445_v21, %v9862_v2 }
 0x7cd   : > { %v3277_v61 = vrot.slane %v10563_v18, 6  ;;  %v3276_v43 = vsel %vm1574_vm3, %v3275_v55, %v10565_v17 }
 0x85f   : > { %v2964_v30 = vpop.f32.mrf.mxu0 }
 0x860   : > { %v2965_v4 = vadd.f32 %v2964_v30, %v9930_v9 }
 0x861   : > { %v7862_v50 = vpop.f32.mrf.mxu0 }
 0x862   : > { %v7217_v54 = vmul.f32 -1.442695, %v2965_v4  ;;  %v3278_v4 = vsel %vm1577_vm4, %v3277_v61, %v3276_v43  ;;  %v10585_v61 = vld [vmem:[%s12503_s8] sm:$0x3] }
 0x863   : > { %v2967_v10 = vpop.f32.mrf.mxu0 }
 0x864   : > { %8475 = vpow2.f32 %v7217_v54  ;;  %v3280_v54 = vsel %vm1580_vm5, %v3279_v59, %v3278_v4 }
 0x865   : > { %v7863_v51 = vpop.f32.mrf.mxu0  ;;  %v3281_v13 = vpack.c.b16 %v3280_v54, %v3280_v54 }
 0x867   : > { %v3129_v22 = vpop.f32.mrf.mxu0 }
 0x868   : > { %v3130_v30 = vadd.f32 %v3129_v22, %v9868_v5  ;;  %v3283_v22 = vsel %vm1673_vm6, %v3281_v13, 0  ;;  %v10607_v13 = vld [vmem:[%s12499_s4] sm:$0x3] }
 0x869   : > { %v7874_v10 = vpop.f32.mrf.mxu0 }
 0x86a   : > { %v3135_v28 = vadd.f32 %v3130_v30, %v3079_v16  ;;  %v10617_v16 = vpop.permute.xlu0 %5548 }
 0x86b   : > { %v3132_v50 = vpop.f32.mrf.mxu0  ;;  %12819 = vst [vmem:[#allocation87_spill] sm:$0xff] %v10617_v16 }
 0x86c   : > { %v3136_v27 = vmax.f32 %v3135_v28, 0.0 }
 0x86d   : > { %v7875_v51 = vpop.f32.mrf.mxu0 }
 0x86e   : > { %v3137_v44 = vpack.c.bf16 %v3136_v27, %v3136_v27  ;;  %v10595_v27 = vld [vmem:[%s12501_s6] sm:$0x3]  ;;  %v10624_v4 = vpop.permute.xlu0 %5017  ;;  %v12824_v51 = vunpack.c.l.bf16 %v10348_v56 }
 0x86f   : > { %v3253_v55 = vpop.f32.mrf.mxu0  ;;  %12820 = vst [vmem:[#allocation88_spill] sm:$0xff] %v10624_v4 }
 0x870   : > { %v3139_v36 = vsel %vm1673_vm6, %v3137_v44, 0 }
 0x871   : > { %v8476_v53 = vpop.eup %8475  ;;  %7877 = vmatpush3.bf16.msra.mxu1 %v3139_v36  ;;  %v7886_v57 = vpop.f32.mrf.mxu0 }
 0x872   : > { %v2973_v21 = vadd.f32 1.0, %v8476_v53  ;;  %7888 = vmatprep.subr.bf16.mxu1 %v12771_v1  ;;  %v3442_v57 = vsel %vm462_vm1, %v9839_v40, 0  ;;  %v10629_v28 = vpop.permute.xlu0 %5001 }
 0x873   : > { %v3256_v43 = vpop.f32.mrf.mxu0  ;;  %12821 = vst [vmem:[#allocation89_spill] sm:$0xff] %v10629_v28 }
 0x874   : > { %8477 = vrcp.f32 %v2973_v21  ;;  %7879 = vmatmul.mubr.msk.bf16.vlgmr.msra.gmra.mxu1 %vm1669_vm7, %v10585_v61  ;;  %v3187_v21 = vrot.slane %v12824_v51, 7  ;;  %v3484_v51 = vrot.slane %v10565_v17, 1 }
 0x875   : > { %7889 = vmatpush3.bf16.msra.mxu1 %v3283_v22  ;;  %7890 = vmatprep.mubr.msk.bf16.mxu1 %vm8542_vm2, %v12771_v1  ;;  %v7887_v44 = vpop.f32.mrf.mxu0  ;;  %v12825_v22 = vunpack.c.l.bf16 %v10351_v6 }
 0x876   : > { %7900 = vmatprep.subr.bf16.mxu1 %v12771_v1  ;;  %v10636_v54 = vpop.permute.xlu0 %5294  ;;  %v12826_v44 = vunpack.c.l.bf16 %v10354_v45  ;;  %v3486_v45 = vrot.slane %v10563_v18, 7 }
 0x877   : > { %12823 = vst [vmem:[#allocation91_spill] sm:$0xff] %v10636_v54  ;;  %v3188_v43 = vrot.slane %v12825_v22, 6 }
 0x87c   : > { %7891 = vmatmul.mubr.msk.bf16.vlgmr.msra.gmra.mxu1 %vm1669_vm7, %v10595_v27 }
 0x87d   : > { %7901 = vmatpush3.bf16.msra.mxu1 %v3442_v57  ;;  %7902 = vmatprep.mubr.msk.bf16.mxu1 %vm8542_vm2, %v12771_v1  ;;  %v3190_v57 = vrot.slane %v12826_v44, 5 }
 0x87e   : > { %7912 = vmatprep.subr.bf16.mxu1 %v12771_v1 }
 0x881   : > { %v8478_v53 = vpop.eup %8477 }
 0x882   : > { %v2992_v36 = vmul.f32 %v8478_v53, %v2990_v49  ;;  %v12827_v53 = vunpack.c.l.bf16 %v10361_v42  ;;  %v3485_v42 = vsel %vm1574_vm3, %v10558_v23, %v3484_v51 }
 0x884   : > { %7903 = vmatmul.mubr.msk.bf16.vlgmr.msra.gmra.mxu1 %vm455_vm0, %v10607_v13  ;;  %v10611_v59 = vpack.c.bf16 %v2992_v36, %v2992_v36  ;;  %v3192_v36 = vrot.slane %v12827_v53, 4 }
 0x885   : > { %7914 = vmatprep.mubr.msk.bf16.mxu1 %vm8542_vm2, %v12771_v1 }
 0x886   : > { %12818 = vst [vmem:[#allocation86_spill] sm:$0xff] %v10611_v59  ;;  %5818 = vrot.lane.b32.xlu0 %v10611_v59, %s8544_s29  ;;  %v12610_v49 = vrot.slane %v10611_v59, 2  ;;  %v5679_v30 = vrot.slane %v10611_v59, 6  ;;  %v5607_v10 = vrot.slane %v10611_v59, 4 }
 0x888   : > { %v10634_v50 = vsel %vm462_vm1, %v9327_v29, %v5607_v10  ;;  %v12840_v29 = vld [vmem:[#allocation40_spill] sm:$0xff] }
 0x889   : > { %12822 = vst [vmem:[#allocation90_spill] sm:$0xff] %v10634_v50  ;;  %v6500_v28 = vrot.slane %v12840_v29, 3 }
 0x88a   : > { %5573 = vrot.lane.b32.xlu0 %v12610_v49, %s8543_s28 }
 0x88e   : > { %5680 = vrot.lane.b32.xlu0 %v5679_v30, %s8544_s29 }
 0x892   : > { %5671 = vrot.lane.b32.xlu0 %v5607_v10, %s8543_s28 }
 0x896   : > { %5814 = vrot.lane.b32.xlu0 %v5679_v30, %s8543_s28  ;;  %v3189_v30 = vsel %vm1574_vm3, %v3188_v43, %v3187_v21  ;;  %v3488_v43 = vrot.slane %v10568_v37, 6 }
 0x897   : > { %v3191_v10 = vsel %vm1577_vm4, %v3190_v57, %v3189_v30  ;;  %v3254_v57 = vadd.f32 %v3253_v55, %v9862_v2 }
 0x898   : > { %v3193_v49 = vsel %vm1580_vm5, %v3192_v36, %v3191_v10 }
 0x89a   : > { %5611 = vrot.lane.b32.xlu0 %v10634_v50, %s8544_s29 }
 0x934   : > { %v3175_v16 = vpop.f32.mrf.mxu1 }
 0x935   : > { %v3176_v50 = vadd.f32 %v3175_v16, %v9930_v9  ;;  %v3487_v16 = vsel %vm1577_vm4, %v3486_v45, %v3485_v42 }
 0x936   : > { %v7880_v56 = vpop.f32.mrf.mxu1  ;;  %v3489_v30 = vsel %vm1580_vm5, %v3488_v43, %v3487_v16  ;;  %v3615_v43 = vsel %vm462_vm1, %v10495_v32, 0 }
 0x937   : > { %v7229_v6 = vmul.f32 -1.442695, %v3176_v50 }
 0x938   : > { %v3178_v22 = vpop.f32.mrf.mxu1 }
 0x939   : > { %8479 = vpow2.f32 %v7229_v6  ;;  %v3490_v6 = vpack.c.b16 %v3489_v30, %v3489_v30 }
 0x93a   : > { %v7881_v44 = vpop.f32.mrf.mxu1 }
 0x93b   : > { %v3492_v45 = vsel %vm1673_vm6, %v3490_v6, 0 }
 0x93c   : > { %v3319_v21 = vpop.f32.mrf.mxu1 }
 0x93d   : > { %v3320_v53 = vadd.f32 %v3319_v21, %v9868_v5  ;;  %v10671_v21 = vpop.permute.xlu1 %4854 }
 0x93e   : > { %v7892_v36 = vpop.f32.mrf.mxu1 }
 0x93f   : > { %v3325_v17 = vadd.f32 %v3320_v53, %v3254_v57  ;;  %v10679_v57 = vpop.permute.xlu0 %5257 }
 0x940   : > { %v3322_v50 = vpop.f32.mrf.mxu1  ;;  %12828 = vst [vmem:[#allocation92_spill] sm:$0xff] %v10679_v57  ;;  %v6627_v57 = vrot.slane %v12840_v29, 4 }
 0x941   : > { %v3326_v10 = vmax.f32 %v3325_v17, 0.0  ;;  %v10682_v53 = vpop.permute.xlu1 %5167 }
 0x942   : > { %v7893_v18 = vpop.f32.mrf.mxu1 }
 0x943   : > { %v3327_v56 = vpack.c.bf16 %v3326_v10, %v3326_v10  ;;  %v10684_v17 = vpop.permute.xlu0 %5532 }
 0x944   : > { %v10661_v22 = vpop.f32.mrf.mxu1  ;;  %12829 = vst [vmem:[#allocation93_spill] sm:$0xff] %v10684_v17 }
 0x945   : > { %v3329_v23 = vsel %vm1673_vm6, %v3327_v56, 0  ;;  %v10692_v30 = vpop.permute.xlu1 %5148 }
 0x946   : > { %v8480_v37 = vpop.eup %8479  ;;  %7895 = vmatpush3.bf16.msra.mxu0 %v3329_v23  ;;  %v7904_v55 = vpop.f32.mrf.mxu1 }
 0x947   : > { %v3184_v51 = vadd.f32 1.0, %v8480_v37  ;;  %7906 = vmatprep.subr.bf16.mxu0 %v12771_v1  ;;  %v10700_v56 = vpop.permute.xlu0 %5810  ;;  %v6622_v37 = vrot.slane %v9654_v41, 7  ;;  %v6623_v55 = vrot.slane %v9656_v26, 6 }
 0x948   : > { %v3481_v44 = vpop.f32.mrf.mxu1  ;;  %12831 = vst [vmem:[#allocation95_spill] sm:$0xff] %v10700_v56  ;;  %v12839_v56 = vld [vmem:[#allocation29_spill] sm:$0xff] }
 0x949   : > { %8481 = vrcp.f32 %v3184_v51  ;;  %7897 = vmatmul.mubr.msk.bf16.vlgmr.msra.gmra.mxu0 %vm1669_vm7, %v10585_v61  ;;  %v10705_v6 = vpop.permute.xlu1 %5296  ;;  %v6619_v17 = vrot.slane %v12839_v56, 1 }
 0x94a   : > { %7907 = vmatpush3.bf16.msra.mxu0 %v3492_v45  ;;  %7908 = vmatprep.mubr.msk.bf16.mxu0 %vm8542_vm2, %v12771_v1  ;;  %v7905_v42 = vpop.f32.mrf.mxu1  ;;  %12832 = vst [vmem:[#allocation96_spill] sm:$0xff] %v10705_v6  ;;  %v12835_v45 = vld [vmem:[#allocation33_spill] sm:$0xff] }
 0x94b   : > { %7918 = vmatprep.subr.bf16.mxu0 %v12771_v1  ;;  %v10716_v51 = vpop.permute.xlu0 %5826  ;;  %v6625_v44 = vrot.slane %v12835_v45, 5  ;;  %v12836_v42 = vld [vmem:[#allocation21_spill] sm:$0xff] }
 0x94c   : > { %12834 = vst [vmem:[#allocation98_spill] sm:$0xff] %v10716_v51  ;;  %v6498_v51 = vrot.slane %v12835_v45, 4  ;;  %v6489_v54 = vrot.slane %v12836_v42, 2 }
 0x94f   : > { %v10740_v45 = vpop.permute.xlu0 %5038 }
 0x950   : > { %12841 = vst [vmem:[#allocation21_spill] sm:$0xff] %v10740_v45 }
 0x951   : > { %7909 = vmatmul.mubr.msk.bf16.vlgmr.msra.gmra.mxu0 %vm1669_vm7, %v10595_v27 }
 0x952   : > { %7919 = vmatpush3.bf16.msra.mxu0 %v3615_v43  ;;  %7920 = vmatprep.mubr.msk.bf16.mxu0 %vm8542_vm2, %v12771_v1  ;;  %v6616_v43 = vrot.slane %v12836_v42, 3 }
 0x953   : > { %7930 = vmatprep.subr.bf16.mxu0 %v12771_v1 }
 0x956   : > { %v8482_v16 = vpop.eup %8481 }
 0x957   : > { %v3195_v36 = vmul.f32 %v8482_v16, %v3193_v49  ;;  %v12837_v16 = vld [vmem:[#allocation9_spill] sm:$0xff] }
 0x958   : > { %v6490_v6 = vrot.slane %v12837_v16, 1 }
 0x959   : > { %7921 = vmatmul.mubr.msk.bf16.vlgmr.msra.gmra.mxu0 %vm455_vm0, %v10607_v13  ;;  %v10688_v50 = vpack.c.bf16 %v3195_v36, %v3195_v36  ;;  %v6617_v36 = vrot.slane %v12837_v16, 2  ;;  %v12843_v16 = vld [vmem:[#allocation17_spill] sm:$0xff] }
 0x95a   : > { %7932 = vmatprep.mubr.msk.bf16.mxu0 %vm8542_vm2, %v12771_v1 }
 0x95b   : > { %12830 = vst [vmem:[#allocation94_spill] sm:$0xff] %v10688_v50  ;;  %5945 = vrot.lane.b32.xlu1 %v10688_v50, %s8544_s29  ;;  %v5830_v10 = vrot.slane %v10688_v50, 6  ;;  %v12612_v49 = vrot.slane %v10688_v50, 2  ;;  %v5758_v18 = vrot.slane %v10688_v50, 4 }
 0x95d   : > { %5831 = vrot.lane.b32.xlu0 %v5830_v10, %s8544_s29  ;;  %v10710_v23 = vsel %vm462_vm1, %v9772_v3, %v5758_v18  ;;  %v6495_v3 = vrot.slane %v9654_v41, 6 }
 0x95e   : > { %12833 = vst [vmem:[#allocation97_spill] sm:$0xff] %v10710_v23 }
 0x95f   : > { %5723 = vrot.lane.b32.xlu1 %v12612_v49, %s8543_s28  ;;  %v10724_v49 = vpop.permute.xlu1 %5140 }
 0x960   : > { %12838 = vst [vmem:[#allocation33_spill] sm:$0xff] %v10724_v49 }
 0x961   : > { %5822 = vrot.lane.b32.xlu0 %v5758_v18, %s8543_s28  ;;  %v6496_v18 = vrot.slane %v9656_v26, 5  ;;  %v6618_v26 = vsel %vm1586_vm10, %v6617_v36, %v6616_v43  ;;  %v6493_v43 = vrot.slane %v12843_v16, 7 }
 0x963   : > { %5762 = vrot.lane.b32.xlu1 %v10710_v23, %s8544_s29  ;;  %v10751_v36 = vpop.permute.xlu1 %5267 }
 0x964   : > { %12844 = vst [vmem:[#allocation29_spill] sm:$0xff] %v10751_v36  ;;  %v12624_v36 = vunpack.c.l.bf16 %v10549_v15 }
 0x965   : > { %5941 = vrot.lane.b32.xlu0 %v5830_v10, %s8543_s28  ;;  %v6624_v10 = vsel %vm1574_vm3, %v6623_v55, %v6622_v37  ;;  %v6620_v37 = vsel %vm1589_vm11, %v6619_v17, %v6618_v26 }
 0x966   : > { %v6626_v41 = vsel %vm1577_vm4, %v6625_v44, %v6624_v10  ;;  %v6491_v44 = vsel %vm1586_vm10, %v6490_v6, %v6489_v54  ;;  %v10759_v17 = vsel %vm1592_vm12, %v12843_v16, %v6620_v37  ;;  %v12846_v54 = vld [vmem:[#allocation62_spill] sm:$0xff]  ;;  %v10800_v37 = vld [vmem:[%s8726_s26 + $0x14] sm:$0x2] }
 0x967   : > { %6320 = vrot.lane.b32.xlu1 %v10317_v31, %s8543_s28  ;;  %v6497_v31 = vsel %vm1574_vm3, %v6496_v18, %v6495_v3  ;;  %v10747_v42 = vsel %vm1580_vm5, %v6627_v57, %v6626_v41  ;;  %v6492_v29 = vsel %vm1589_vm11, %v12839_v56, %v6491_v44  ;;  %12845 = vst [vmem:[#allocation40_spill] sm:$0xff] %v10759_v17  ;;  %v10773_v56 = vpop.permute.xlu0 %4829  ;;  %v10792_v41 = vld [vmem:[%s8726_s26 + $0x4] sm:$0x2]  ;;  %v12619_v16 = vunpack.c.l.bf16 %v10800_v37 }
 0x968   : > { %v6499_v55 = vsel %vm1577_vm4, %v6498_v51, %v6497_v31  ;;  %12842 = vst [vmem:[#allocation9_spill] sm:$0xff] %v10747_v42  ;;  %v10768_v6 = vpack.c.b16 %v10747_v42, %v10759_v17  ;;  %v10797_v31 = vld [vmem:[%s8726_s26 + $0xc] sm:$0x2]  ;;  %v7253_v50 = vcombine.low %v10800_v37, %v10800_v37 }
 0x969   : > { %6324 = vrot.lane.b32.xlu0 %v10495_v32, %s8544_s29  ;;  %v10762_v57 = vsel %vm1580_vm5, %v6500_v28, %v6499_v55  ;;  %v10781_v28 = vpop.permute.xlu1 %5259  ;;  %v12617_v55 = vunpack.c.l.bf16 %v10792_v41  ;;  %v12618_v44 = vunpack.c.l.bf16 %v10797_v31 }
 0x96a   : > { %12847 = vst [vmem:[#allocation17_spill] sm:$0xff] %v10768_v6  ;;  %12849 = vst [vmem:[#allocation99_spill] sm:$0xff] %v10781_v28  ;;  %v12621_v28 = vunpack.c.l.bf16 %v10541_v63  ;;  %v10894_v12 = vunpack.c.l.b16 %v7253_v50 }
 0x96b   : > { %6197 = vrot.lane.b32.xlu1 %v9839_v40, %s8544_s29  ;;  %v10785_v3 = vpop.permute.xlu0 %5007 }
 0x96c   : > { %12850 = vst [vmem:[#allocation100_spill] sm:$0xff] %v10785_v3 }
 0x96d   : > { %6318 = vrot.lane.b32.xlu0 %v10515_v11, %s8543_s28  ;;  %v10771_v11 = vsel %vm1592_vm12, %v6493_v43, %v6492_v29  ;;  %v3984_v43 = vrot.slane %v12617_v55, 3  ;;  %v3985_v29 = vrot.slane %v12618_v44, 2  ;;  %v12622_v55 = vunpack.c.l.bf16 %v10544_v0 }
 0x96e   : > { %v10779_v51 = vpack.c.b16 %v10762_v57, %v10771_v11 }
 0x96f   : > { %6191 = vrot.lane.b32.xlu1 %v12846_v54, %s8543_s28  ;;  %v10787_v18 = vpop.permute.xlu0 %5315  ;;  %v3987_v54 = vrot.slane %v12619_v16, 1  ;;  %v3986_v17 = vsel %vm1574_vm3, %v3985_v29, %v3984_v43  ;;  %v12623_v16 = vunpack.c.l.bf16 %v10552_v24  ;;  %v3385_v43 = vrot.slane %v12621_v28, 7 }
 0x970   : > { %12848 = vst [vmem:[#allocation62_spill] sm:$0xff] %v10779_v51  ;;  %12851 = vst [vmem:[#allocation101_spill] sm:$0xff] %v10787_v18  ;;  %v3387_v29 = vrot.slane %v12622_v55, 6 }
 0x971   : > { %6630 = vrot.lane.b32.xlu0 %v10768_v6, %s8543_s28  ;;  %v10812_v6 = vld [vmem:[%s8726_s26 + $0x1c] sm:$0x2]  ;;  %v3988_v42 = vsel %vm1577_vm4, %v3987_v54, %v3986_v17  ;;  %v3389_v17 = vrot.slane %v12623_v16, 5 }
 0x973   : > { %6503 = vrot.lane.b32.xlu1 %v10779_v51, %s8543_s28  ;;  %v10789_v10 = vpop.permute.xlu0 %5263 }
 0x974   : > { %12852 = vst [vmem:[#allocation102_spill] sm:$0xff] %v10789_v10 }
 0x977   : > { %v10794_v26 = vpop.permute.xlu0 %5569 }
 0x978   : > { %12853 = vst [vmem:[#allocation103_spill] sm:$0xff] %v10794_v26  ;;  %v12620_v26 = vunpack.c.l.bf16 %v10812_v6 }
 0x97a   : > { %v10824_v44 = vsel %vm1580_vm5, %v12620_v26, %v3988_v42  ;;  %v3386_v42 = vsel %vm1574_vm3, %v3385_v43, %v12624_v36 }
 0x97b   : > { %v10816_v10 = vpop.permute.xlu0 %5538  ;;  %v3388_v54 = vsel %vm1577_vm4, %v3387_v29, %v3386_v42 }
 0x97c   : > { %12854 = vst [vmem:[#allocation104_spill] sm:$0xff] %v10816_v10  ;;  %v10841_v26 = vsel %vm1580_vm5, %v3389_v17, %v3388_v54 }
 0x97f   : > { %v10832_v10 = vpop.permute.xlu0 %5816 }
 0x980   : > { %12855 = vst [vmem:[#allocation105_spill] sm:$0xff] %v10832_v10 }
 0x983   : > { %v10843_v18 = vpop.permute.xlu0 %5847 }
 0x987   : > { %v10845_v28 = vpop.permute.xlu0 %6101 }
 0x98b   : > { %v10847_v3 = vpop.permute.xlu0 %4884 }
 0x98f   : > { %v10849_v55 = vpop.permute.xlu0 %4875 }
 0x993   : > { %v10851_v10 = vpop.permute.xlu0 %5005 }
 0x994   : > { %12856 = vst [vmem:[#allocation106_spill] sm:$0xff] %v10851_v10  ;;  %v7251_v10 = vcombine.low %v10792_v41, %v10792_v41 }
 0x997   : > { %v10853_v16 = vpop.permute.xlu0 %5022 }
 0x998   : > { %12857 = vst [vmem:[#allocation107_spill] sm:$0xff] %v10853_v16 }
 0x99b   : > { %v10855_v4 = vpop.permute.xlu0 %5013 }
 0x99c   : > { %12858 = vst [vmem:[#allocation108_spill] sm:$0xff] %v10855_v4  ;;  %v7252_v4 = vcombine.low %v10797_v31, %v10797_v31 }
 0x99f   : > { %v10857_v43 = vpop.permute.xlu0 %5134 }
 0x9a0   : > { %12859 = vst [vmem:[#allocation109_spill] sm:$0xff] %v10857_v43 }
 0x9a3   : > { %v10859_v29 = vpop.permute.xlu0 %6080 }
 0x9a4   : > { %12860 = vst [vmem:[#allocation110_spill] sm:$0xff] %v10859_v29  ;;  %v10879_v29 = vunpack.c.l.b16 %v7251_v10 }
 0x9a6   : > { %v3673_v14 = vrot.slane %v10879_v29, 2 }
 0x9a7   : > { %v10861_v17 = vpop.permute.xlu0 %6070 }
 0x9a8   : > { %12861 = vst [vmem:[#allocation111_spill] sm:$0xff] %v10861_v17  ;;  %v10881_v17 = vunpack.c.l.b16 %v7252_v4 }
 0x9ab   : > { %v10863_v42 = vpop.permute.xlu0 %5265 }
 0x9ac   : > { %12862 = vst [vmem:[#allocation112_spill] sm:$0xff] %v10863_v42 }
 0x9af   : > { %v10865_v54 = vpop.permute.xlu0 %5042 }
 0x9b0   : > { %12863 = vst [vmem:[#allocation113_spill] sm:$0xff] %v10865_v54  ;;  %v7254_v54 = vcombine.low %v10812_v6, %v10812_v6 }
 0x9b2   : > { %v10892_v4 = vunpack.c.l.b16 %v7254_v54 }
 0x9b3   : > { %v10867_v36 = vpop.permute.xlu0 %5151 }
 0x9b4   : > { %v3677_v43 = vrot.slane %v10892_v4, 7 }
 0x9b7   : > { %v10869_v45 = vpop.permute.xlu0 %5142 }
 0x9b8   : > { %12864 = vst [vmem:[#allocation114_spill] sm:$0xff] %v10869_v45 }
 0x9bb   : > { %v10871_v23 = vpop.permute.xlu0 %5261 }
 0x9bc   : > { %12865 = vst [vmem:[#allocation115_spill] sm:$0xff] %v10871_v23 }
 0x9bf   : > { %v10877_v16 = vpop.permute.xlu0 %5082 }
 0x9c0   : > { %12866 = vst [vmem:[#allocation116_spill] sm:$0xff] %v10877_v16  ;;  %v3674_v16 = vrot.slane %v10881_v17, 1 }
 0x9c3   : > { %v10885_v59 = vpop.permute.xlu0 %5299 }
 0x9c4   : > { %12867 = vst [vmem:[#allocation117_spill] sm:$0xff] %v10885_v59  ;;  %v3675_v59 = vsel %vm1574_vm3, %v3674_v16, %v3673_v14 }
 0x9c7   : > { %v10897_v48 = vpop.permute.xlu0 %5269 }
 0x9c8   : > { %12868 = vst [vmem:[#allocation118_spill] sm:$0xff] %v10897_v48 }
 0xa09   : > { %v3365_v42 = vpop.f32.mrf.mxu0 }
 0xa0a   : > { %v3366_v23 = vadd.f32 %v3365_v42, %v9930_v9 }
 0xa0b   : > { %v7898_v58 = vpop.f32.mrf.mxu0 }
 0xa0c   : > { %v7237_v10 = vmul.f32 -1.442695, %v3366_v23  ;;  %v3479_v58 = vadd.f32 %v10661_v22, %v9862_v2  ;;  %v3676_v23 = vsel %vm1577_vm4, %v10894_v12, %v3675_v59 }
 0xa0d   : > { %v3368_v51 = vpop.f32.mrf.mxu0 }
 0xa0e   : > { %8483 = vpow2.f32 %v7237_v10  ;;  %v10906_v10 = vpop.permute.xlu0 %5409 }
 0xa0f   : > { %v7899_v20 = vpop.f32.mrf.mxu0  ;;  %12869 = vst [vmem:[#allocation119_spill] sm:$0xff] %v10906_v10 }
 0xa10   : > { %v3678_v20 = vsel %vm1580_vm5, %v3677_v43, %v3676_v23 }
 0xa11   : > { %v3528_v42 = vpop.f32.mrf.mxu0  ;;  %v3679_v62 = vpack.c.b16 %v3678_v20, %v3678_v20 }
 0xa12   : > { %v3529_v7 = vadd.f32 %v3528_v42, %v9868_v5  ;;  %v10911_v60 = vpop.permute.xlu0 %6064 }
 0xa13   : > { %v7910_v51 = vpop.f32.mrf.mxu0  ;;  %12870 = vst [vmem:[#allocation120_spill] sm:$0xff] %v10911_v60 }
 0xa14   : > { %v3534_v54 = vadd.f32 %v3529_v7, %v3479_v58  ;;  %v3681_v7 = vsel %vm1673_vm6, %v3679_v62, 0  ;;  %v3840_v62 = vsel %vm462_vm1, %v10509_v25, 0 }
 0xa15   : > { %v3531_v50 = vpop.f32.mrf.mxu0 }
 0xa16   : > { %v3535_v14 = vmax.f32 %v3534_v54, 0.0  ;;  %v10920_v58 = vpop.permute.xlu0 %6376 }
 0xa17   : > { %v7911_v16 = vpop.f32.mrf.mxu0 }
 0xa18   : > { %v3536_v48 = vpack.c.bf16 %v3535_v14, %v3535_v14 }
 0xa19   : > { %v10908_v49 = vpop.f32.mrf.mxu0 }
 0xa1a   : > { %v3538_v22 = vsel %vm1673_vm6, %v3536_v48, 0  ;;  %v10922_v23 = vpop.permute.xlu0 %5540 }
 0xa1b   : > { %v8484_v45 = vpop.eup %8483  ;;  %7913 = vmatpush3.bf16.msra.mxu1 %v3538_v22  ;;  %v7922_v42 = vpop.f32.mrf.mxu0  ;;  %12871 = vst [vmem:[#allocation121_spill] sm:$0xff] %v10922_v23  ;;  %v12888_v23 = vunpack.c.l.bf16 %v10544_v0 }
 0xa1c   : > { %v3374_v59 = vadd.f32 1.0, %v8484_v45  ;;  %7924 = vmatprep.subr.bf16.mxu1 %v12771_v1 }
 0xa1d   : > { %v3654_v43 = vpop.f32.mrf.mxu0 }
 0xa1e   : > { %8485 = vrcp.f32 %v3374_v59  ;;  %7915 = vmatmul.mubr.msk.bf16.vlgmr.msra.gmra.mxu1 %vm1669_vm7, %v10585_v61  ;;  %v10931_v51 = vpop.permute.xlu0 %5319 }
 0xa1f   : > { %7925 = vmatpush3.bf16.msra.mxu1 %v3681_v7  ;;  %7926 = vmatprep.mubr.msk.bf16.mxu1 %vm8542_vm2, %v12771_v1  ;;  %v7923_v48 = vpop.f32.mrf.mxu0  ;;  %12872 = vst [vmem:[#allocation122_spill] sm:$0xff] %v10931_v51 }
 0xa20   : > { %7936 = vmatprep.subr.bf16.mxu1 %v12771_v1 }
 0xa22   : > { %v10942_v20 = vpop.permute.xlu0 %5426 }
 0xa26   : > { %7927 = vmatmul.mubr.msk.bf16.vlgmr.msra.gmra.mxu1 %vm1669_vm7, %v10595_v27  ;;  %v10949_v16 = vpop.permute.xlu0 %5417 }
 0xa27   : > { %7937 = vmatpush3.bf16.msra.mxu1 %v3840_v62  ;;  %7938 = vmatprep.mubr.msk.bf16.mxu1 %vm8542_vm2, %v12771_v1 }
 0xa28   : > { %7948 = vmatprep.subr.bf16.mxu1 %v12771_v1 }
 0xa2a   : > { %v10954_v42 = vpop.permute.xlu0 %5536 }
 0xa2b   : > { %v8486_v45 = vpop.eup %8485  ;;  %12874 = vst [vmem:[#allocation124_spill] sm:$0xff] %v10954_v42 }
 0xa2c   : > { %v3392_v54 = vmul.f32 %v8486_v45, %v10841_v26 }
 0xa2e   : > { %7939 = vmatmul.mubr.msk.bf16.vlgmr.msra.gmra.mxu1 %vm455_vm0, %v10607_v13  ;;  %v10936_v50 = vpack.c.bf16 %v3392_v54, %v3392_v54  ;;  %v10961_v7 = vpop.permute.xlu0 %5357 }
 0xa2f   : > { %7950 = vmatprep.mubr.msk.bf16.mxu1 %vm8542_vm2, %v12771_v1  ;;  %12876 = vst [vmem:[#allocation126_spill] sm:$0xff] %v10961_v7 }
 0xa30   : > { %12873 = vst [vmem:[#allocation123_spill] sm:$0xff] %v10936_v50  ;;  %6072 = vrot.lane.b32.xlu0 %v10936_v50, %s8544_s29  ;;  %v12639_v14 = vrot.slane %v10936_v50, 2  ;;  %v5957_v26 = vrot.slane %v10936_v50, 6  ;;  %v5885_v22 = vrot.slane %v10936_v50, 4 }
 0xa32   : > { %v10959_v59 = vsel %vm462_vm1, %v9820_v8, %v5885_v22  ;;  %v10965_v43 = vpop.permute.xlu0 %5553 }
 0xa33   : > { %12875 = vst [vmem:[#allocation125_spill] sm:$0xff] %v10959_v59  ;;  %12877 = vst [vmem:[#allocation127_spill] sm:$0xff] %v10965_v43 }
 0xa34   : > { %5851 = vrot.lane.b32.xlu0 %v12639_v14, %s8543_s28 }
 0xa36   : > { %v10967_v48 = vpop.permute.xlu0 %5544 }
 0xa37   : > { %12878 = vst [vmem:[#allocation128_spill] sm:$0xff] %v10967_v48  ;;  %v3588_v48 = vrot.slane %v12888_v23, 7 }
 0xa38   : > { %5958 = vrot.lane.b32.xlu0 %v5957_v26, %s8544_s29 }
 0xa3a   : > { %v10969_v62 = vpop.permute.xlu0 %5663 }
 0xa3b   : > { %12879 = vst [vmem:[#allocation129_spill] sm:$0xff] %v10969_v62 }
 0xa3c   : > { %5949 = vrot.lane.b32.xlu0 %v5885_v22, %s8543_s28 }
 0xa3e   : > { %v10971_v45 = vpop.permute.xlu0 %6355 }
 0xa3f   : > { %12880 = vst [vmem:[#allocation130_spill] sm:$0xff] %v10971_v45  ;;  %v12890_v45 = vunpack.c.l.bf16 %v10552_v24 }
 0xa40   : > { %6068 = vrot.lane.b32.xlu0 %v5957_v26, %s8543_s28 }
 0xa42   : > { %v10973_v54 = vpop.permute.xlu0 %5818 }
 0xa43   : > { %12881 = vst [vmem:[#allocation131_spill] sm:$0xff] %v10973_v54  ;;  %v3590_v54 = vrot.slane %v12890_v45, 6 }
 0xa44   : > { %5889 = vrot.lane.b32.xlu0 %v10959_v59, %s8544_s29  ;;  %v12887_v59 = vunpack.c.l.bf16 %v10549_v15 }
 0xa46   : > { %v10975_v26 = vpop.permute.xlu0 %5573  ;;  %v3586_v42 = vrot.slane %v12887_v59, 1 }
 0xa47   : > { %12882 = vst [vmem:[#allocation132_spill] sm:$0xff] %v10975_v26  ;;  %v12891_v26 = vunpack.c.l.bf16 %v10541_v63  ;;  %v5881_v63 = vsel %vm1673_vm6, %v10936_v50, %v10843_v18 }
 0xa49   : > { %v3587_v51 = vsel %vm1574_vm3, %v12891_v26, %v3586_v42  ;;  %v3883_v26 = vrot.slane %v10881_v17, 2 }
 0xa4a   : > { %v10977_v14 = vpop.permute.xlu0 %5680  ;;  %v3589_v7 = vsel %vm1577_vm4, %v3588_v48, %v3587_v51 }
 0xa4b   : > { %12883 = vst [vmem:[#allocation133_spill] sm:$0xff] %v10977_v14 }
 0xa4e   : > { %v10979_v22 = vpop.permute.xlu0 %5671 }
 0xa4f   : > { %12884 = vst [vmem:[#allocation134_spill] sm:$0xff] %v10979_v22 }
 0xa52   : > { %v10981_v60 = vpop.permute.xlu0 %5814 }
 0xa53   : > { %12885 = vst [vmem:[#allocation135_spill] sm:$0xff] %v10981_v60  ;;  %v3591_v60 = vsel %vm1580_vm5, %v3590_v54, %v3589_v7  ;;  %v3882_v54 = vrot.slane %v10879_v29, 3 }
 0xa55   : > { %v3884_v18 = vsel %vm1574_vm3, %v3883_v26, %v3882_v54 }
 0xa56   : > { %v10983_v8 = vpop.permute.xlu0 %5611 }
 0xa57   : > { %12886 = vst [vmem:[#allocation136_spill] sm:$0xff] %v10983_v8 }
 0xa5a   : > { %v10989_v43 = vpop.permute.xlu0 %5831 }
 0xa5b   : > { %12889 = vst [vmem:[#allocation137_spill] sm:$0xff] %v10989_v43 }
 0xa5e   : > { %v10998_v8 = vpop.permute.xlu0 %5822 }
 0xa5f   : > { %12892 = vst [vmem:[#allocation138_spill] sm:$0xff] %v10998_v8 }
 0xa62   : > { %v11000_v15 = vpop.permute.xlu0 %5941 }
 0xa63   : > { %12893 = vst [vmem:[#allocation139_spill] sm:$0xff] %v11000_v15 }
 0xa66   : > { %v11002_v59 = vpop.permute.xlu0 %6324 }
 0xa67   : > { %12894 = vst [vmem:[#allocation140_spill] sm:$0xff] %v11002_v59  ;;  %v3885_v59 = vrot.slane %v10894_v12, 1 }
 0xa6a   : > { %v11004_v0 = vpop.permute.xlu0 %6318 }
 0xa6b   : > { %12895 = vst [vmem:[#allocation141_spill] sm:$0xff] %v11004_v0 }
 0xa6e   : > { %v11006_v23 = vpop.permute.xlu0 %6630 }
 0xa6f   : > { %12896 = vst [vmem:[#allocation142_spill] sm:$0xff] %v11006_v23 }
 0xaa2   : > { %v11008_v24 = vpop.permute.xlu0 %6072 }
 0xaa6   : > { %v5852_v42 = vpop.permute.xlu0 %5851 }
 0xaa7   : > { %v11014_v51 = vsel %vm4909_vm14, %v5881_v63, %v5852_v42  ;;  %v3652_v63 = vadd.f32 %v10908_v49, %v9862_v2 }
 0xaa8   : > { %12897 = vst [vmem:[#allocation143_spill] sm:$0xff] %v11014_v51 }
 0xade   : > { %v3574_v7 = vpop.f32.mrf.mxu1 }
 0xadf   : > { %v3575_v48 = vadd.f32 %v3574_v7, %v9930_v9  ;;  %v3886_v7 = vsel %vm1577_vm4, %v3885_v59, %v3884_v18  ;;  %v11037_v18 = vpop.permute.xlu1 %5136 }
 0xae0   : > { %v7916_v45 = vpop.f32.mrf.mxu1  ;;  %v3887_v17 = vsel %vm1580_vm5, %v10892_v4, %v3886_v7 }
 0xae1   : > { %v7249_v0 = vmul.f32 -1.442695, %v3575_v48 }
 0xae2   : > { %v3577_v23 = vpop.f32.mrf.mxu1 }
 0xae3   : > { %8487 = vpow2.f32 %v7249_v0 }
 0xae4   : > { %v7917_v8 = vpop.f32.mrf.mxu1 }
 0xae5   : > { %v3888_v8 = vpack.c.b16 %v3887_v17, %v3887_v17 }
 0xae6   : > { %v3717_v43 = vpop.f32.mrf.mxu1 }
 0xae7   : > { %v3718_v42 = vadd.f32 %v3717_v43, %v9868_v5  ;;  %v3890_v59 = vsel %vm1673_vm6, %v3888_v8, 0 }
 0xae8   : > { %v7928_v45 = vpop.f32.mrf.mxu1 }
 0xae9   : > { %v3723_v29 = vadd.f32 %v3718_v42, %v3652_v63  ;;  %v12898_v63 = vld [vmem:[#allocation41_spill] sm:$0xff]  ;;  %v11049_v45 = vpop.permute.xlu1 %5442 }
 0xaea   : > { %v3720_v51 = vpop.f32.mrf.mxu1  ;;  %v11041_v42 = vpack.c.b16 %v12898_v63, %v12898_v63 }
 0xaeb   : > { %v3724_v0 = vmax.f32 %v3723_v29, 0.0 }
 0xaec   : > { %v7929_v23 = vpop.f32.mrf.mxu1  ;;  %12899 = vst [vmem:[#allocation41_spill] sm:$0xff] %v11041_v42  ;;  %v4013_v7 = vsel %vm462_vm1, %v11041_v42, 0 }
 0xaed   : > { %v3725_v12 = vpack.c.bf16 %v3724_v0, %v3724_v0  ;;  %v11052_v0 = vpop.permute.xlu1 %5423 }
 0xaee   : > { %v11027_v48 = vpop.f32.mrf.mxu1 }
 0xaef   : > { %v3727_v54 = vsel %vm1673_vm6, %v3725_v12, 0 }
 0xaf0   : > { %v8488_v26 = vpop.eup %8487  ;;  %7931 = vmatpush3.bf16.msra.mxu0 %v3727_v54  ;;  %v7940_v49 = vpop.f32.mrf.mxu1 }
 0xaf1   : > { %v3583_v43 = vadd.f32 1.0, %v8488_v26  ;;  %7942 = vmatprep.subr.bf16.mxu0 %v12771_v1  ;;  %v11066_v54 = vpop.permute.xlu1 %5550 }
 0xaf2   : > { %v3879_v51 = vpop.f32.mrf.mxu1  ;;  %12901 = vst [vmem:[#allocation145_spill] sm:$0xff] %v11066_v54 }
 0xaf3   : > { %8489 = vrcp.f32 %v3583_v43  ;;  %7933 = vmatmul.mubr.msk.bf16.vlgmr.msra.gmra.mxu0 %vm1669_vm7, %v10585_v61  ;;  %v11080_v43 = vpack.c.b16 %v10298_v34, %v10298_v34  ;;  %v11093_v51 = vpack.c.b16 %v10762_v57, %v10762_v57  ;;  %v11111_v57 = vpack.c.b16 %v10305_v52, %v10305_v52 }
 0xaf4   : > { %7943 = vmatpush3.bf16.msra.mxu0 %v3890_v59  ;;  %7944 = vmatprep.mubr.msk.bf16.mxu0 %vm8542_vm2, %v12771_v1  ;;  %v7941_v4 = vpop.f32.mrf.mxu1  ;;  %v11087_v59 = vpack.c.b16 %v10771_v11, %v10771_v11  ;;  %v12907_v11 = vld [vmem:[#allocation42_spill] sm:$0xff] }
 0xaf5   : > { %7954 = vmatprep.subr.bf16.mxu0 %v12771_v1  ;;  %v11076_v49 = vpop.permute.xlu1 %5415  ;;  %12904 = vst [vmem:[#allocation148_spill] sm:$0xff] %v11093_v51  ;;  %v11105_v63 = vpack.c.b16 %v12907_v11, %v12907_v11  ;;  %12908 = vst [vmem:[#allocation42_spill] sm:$0xff] %v11111_v57 }
 0xaf6   : > { %12903 = vst [vmem:[#allocation147_spill] sm:$0xff] %v11087_v59 }
 0xaf9   : > { %v11095_v4 = vpop.permute.xlu1 %5407 }
 0xafa   : > { %12905 = vst [vmem:[#allocation149_spill] sm:$0xff] %v11095_v4 }
 0xafb   : > { %7945 = vmatmul.mubr.msk.bf16.vlgmr.msra.gmra.mxu0 %vm1669_vm7, %v10595_v27 }
 0xafc   : > { %7955 = vmatpush3.bf16.msra.mxu0 %v4013_v7  ;;  %7956 = vmatprep.mubr.msk.bf16.mxu0 %vm8542_vm2, %v12771_v1 }
 0xafd   : > { %7966 = vmatprep.subr.bf16.mxu0 %v12771_v1  ;;  %v11101_v34 = vpop.permute.xlu1 %5534 }
 0xafe   : > { %12906 = vst [vmem:[#allocation150_spill] sm:$0xff] %v11101_v34  ;;  %v12914_v34 = vunpack.c.l.bf16 %v10812_v6 }
 0xb00   : > { %v8490_v29 = vpop.eup %8489 }
 0xb01   : > { %v3593_v17 = vmul.f32 %v8490_v29, %v3591_v60  ;;  %v11113_v7 = vpop.permute.xlu1 %5411  ;;  %v12910_v29 = vld [vmem:[#allocation26_spill] sm:$0xff] }
 0xb02   : > { %12909 = vst [vmem:[#allocation151_spill] sm:$0xff] %v11113_v7 }
 0xb03   : > { %7957 = vmatmul.mubr.msk.bf16.vlgmr.msra.gmra.mxu0 %vm455_vm0, %v10607_v13  ;;  %v11056_v23 = vpack.c.bf16 %v3593_v17, %v3593_v17  ;;  %v6118_v17 = vsel %vm1673_vm6, %v11008_v24, %v12910_v29  ;;  %v11135_v29 = vld [vmem:[%s8726_s26 + $0x4] sm:$0x4] }
 0xb04   : > { %7968 = vmatprep.mubr.msk.bf16.mxu0 %vm8542_vm2, %v12771_v1 }
 0xb05   : > { %12900 = vst [vmem:[#allocation144_spill] sm:$0xff] %v11056_v23  ;;  %6199 = vrot.lane.b32.xlu1 %v11056_v23, %s8544_s29  ;;  %v6084_v12 = vrot.slane %v11056_v23, 6  ;;  %v5977_v8 = vrot.slane %v11056_v23, 2  ;;  %v6012_v60 = vrot.slane %v11056_v23, 4 }
 0xb07   : > { %6085 = vrot.lane.b32.xlu0 %v6084_v12, %s8544_s29  ;;  %v11072_v26 = vsel %vm462_vm1, %v9839_v40, %v6012_v60 }
 0xb08   : > { %12902 = vst [vmem:[#allocation146_spill] sm:$0xff] %v11072_v26 }
 0xb09   : > { %5978 = vrot.lane.b32.xlu1 %v5977_v8, %s8543_s28 }
 0xb0b   : > { %6076 = vrot.lane.b32.xlu0 %v6012_v60, %s8543_s28  ;;  %v12912_v60 = vunpack.c.l.bf16 %v10792_v41  ;;  %v11141_v41 = vld [vmem:[%s8726_s26 + $0x14] sm:$0x4] }
 0xb0d   : > { %6016 = vrot.lane.b32.xlu1 %v11072_v26, %s8544_s29  ;;  %v3783_v11 = vrot.slane %v12912_v60, 2 }
 0xb0f   : > { %6195 = vrot.lane.b32.xlu0 %v6084_v12, %s8543_s28  ;;  %v11121_v12 = vsel %vm4909_vm14, %v6118_v17, %v5977_v8  ;;  %v11138_v8 = vld [vmem:[%s8726_s26 + $0xc] sm:$0x4] }
 0xb10   : > { %12911 = vst [vmem:[#allocation26_spill] sm:$0xff] %v11121_v12  ;;  %v7272_v6 = vcombine.low %v11138_v8, %v11138_v8 }
 0xb11   : > { %6484 = vrot.lane.b32.xlu1 %v11080_v43, %s8544_s29 }
 0xb13   : > { %6609 = vrot.lane.b32.xlu0 %v11087_v59, %s8544_s29  ;;  %v12913_v59 = vunpack.c.l.bf16 %v10797_v31  ;;  %v7271_v31 = vcombine.low %v11135_v29, %v11135_v29 }
 0xb15   : > { %6611 = vrot.lane.b32.xlu1 %v11093_v51, %s8544_s29  ;;  %v3784_v52 = vrot.slane %v12913_v59, 1  ;;  %v3787_v51 = vrot.slane %v12914_v34, 7  ;;  %v11148_v59 = vld [vmem:[%s8726_s26 + $0x1c] sm:$0x4] }
 0xb16   : > { %v7274_v34 = vcombine.low %v11148_v59, %v11148_v59 }
 0xb17   : > { %v3785_v54 = vsel %vm1574_vm3, %v3784_v52, %v3783_v11 }
 0xb18   : > { %v11163_v50 = vunpack.c.l.b16 %v7274_v34 }
 0xb19   : > { %6476 = vrot.lane.b32.xlu1 %v11041_v42, %s8543_s28 }
 0xb1d   : > { %6603 = vrot.lane.b32.xlu1 %v11105_v63, %s8543_s28 }
 0xb21   : > { %6482 = vrot.lane.b32.xlu1 %v11111_v57, %s8544_s29  ;;  %v12915_v57 = vunpack.c.l.bf16 %v10800_v37  ;;  %v7273_v37 = vcombine.low %v11141_v41, %v11141_v41 }
 0xb23   : > { %v3786_v26 = vsel %vm1577_vm4, %v12915_v57, %v3785_v54  ;;  %v11152_v54 = vunpack.c.l.b16 %v7271_v31  ;;  %v11159_v17 = vunpack.c.l.b16 %v7273_v37  ;;  %v3877_v37 = vadd.f32 %v11027_v48, %v9862_v2 }
 0xb24   : > { %v3788_v24 = vsel %vm1580_vm5, %v3787_v51, %v3786_v26  ;;  %v11154_v26 = vunpack.c.l.b16 %v7272_v6 }
 0xb25   : > { %v4071_v11 = vrot.slane %v11152_v54, 4  ;;  %v4074_v31 = vrot.slane %v11159_v17, 2 }
 0xb26   : > { %v4072_v52 = vrot.slane %v11154_v26, 3 }
 0xb28   : > { %v4073_v40 = vsel %vm1574_vm3, %v4072_v52, %v4071_v11 }
 0xb29   : > { %v4075_v62 = vsel %vm1577_vm4, %v4074_v31, %v4073_v40 }
 0xbb3   : > { %v3763_v51 = vpop.f32.mrf.mxu0 }
 0xbb4   : > { %v3764_v57 = vadd.f32 %v3763_v51, %v9930_v9  ;;  %v4076_v51 = vrot.slane %v11163_v50, 1 }
 0xbb5   : > { %v7934_v60 = vpop.f32.mrf.mxu0 }
 0xbb6   : > { %v7257_v12 = vmul.f32 -1.442695, %v3764_v57 }
 0xbb7   : > { %v3766_v15 = vpop.f32.mrf.mxu0 }
 0xbb8   : > { %8491 = vpow2.f32 %v7257_v12  ;;  %v4077_v12 = vsel %vm1580_vm5, %v4076_v51, %v4075_v62 }
 0xbb9   : > { %v7935_v6 = vpop.f32.mrf.mxu0  ;;  %v4078_v7 = vpack.c.b16 %v4077_v12, %v4077_v12 }
 0xbbb   : > { %v3926_v23 = vpop.f32.mrf.mxu0  ;;  %v4080_v40 = vsel %vm1673_vm6, %v4078_v7, 0 }
 0xbbc   : > { %v3927_v60 = vadd.f32 %v3926_v23, %v9868_v5 }
 0xbbd   : > { %v7946_v57 = vpop.f32.mrf.mxu0 }
 0xbbe   : > { %v3932_v15 = vadd.f32 %v3927_v60, %v3877_v37  ;;  %v11211_v37 = vpop.permute.xlu0 %5958 }
 0xbbf   : > { %v3929_v34 = vpop.f32.mrf.mxu0  ;;  %12918 = vst [vmem:[#allocation154_spill] sm:$0xff] %v11211_v37 }
 0xbc0   : > { %v3933_v22 = vmax.f32 %v3932_v15, 0.0 }
 0xbc1   : > { %v7947_v14 = vpop.f32.mrf.mxu0 }
 0xbc2   : > { %v3934_v6 = vpack.c.bf16 %v3933_v22, %v3933_v22  ;;  %v11213_v60 = vpop.permute.xlu0 %5949 }
 0xbc3   : > { %v4049_v11 = vpop.f32.mrf.mxu0  ;;  %12919 = vst [vmem:[#allocation155_spill] sm:$0xff] %v11213_v60 }
 0xbc4   : > { %v3936_v52 = vsel %vm1673_vm6, %v3934_v6, 0 }
 0xbc5   : > { %v8492_v4 = vpop.eup %8491  ;;  %7949 = vmatpush3.bf16.msra.mxu1 %v3936_v52  ;;  %v7958_v10 = vpop.f32.mrf.mxu0 }
 0xbc6   : > { %v3772_v48 = vadd.f32 1.0, %v8492_v4  ;;  %7960 = vmatprep.subr.bf16.mxu1 %v12771_v1  ;;  %v4240_v10 = vsel %vm462_vm1, %v11105_v63, 0  ;;  %v11215_v57 = vpop.permute.xlu0 %6068 }
 0xbc7   : > { %v4052_v23 = vpop.f32.mrf.mxu0  ;;  %12920 = vst [vmem:[#allocation156_spill] sm:$0xff] %v11215_v57 }
 0xbc8   : > { %8493 = vrcp.f32 %v3772_v48  ;;  %7951 = vmatmul.mubr.msk.bf16.vlgmr.msra.gmra.mxu1 %vm1669_vm7, %v10585_v61 }
 0xbc9   : > { %7961 = vmatpush3.bf16.msra.mxu1 %v4080_v40  ;;  %7962 = vmatprep.mubr.msk.bf16.mxu1 %vm8542_vm2, %v12771_v1  ;;  %v7959_v14 = vpop.f32.mrf.mxu0 }
 0xbca   : > { %7972 = vmatprep.subr.bf16.mxu1 %v12771_v1  ;;  %v11217_v15 = vpop.permute.xlu0 %5889 }
 0xbcb   : > { %12921 = vst [vmem:[#allocation157_spill] sm:$0xff] %v11217_v15  ;;  %v12936_v15 = vld [vmem:[#allocation45_spill] sm:$0xff] }
 0xbce   : > { %v11219_v34 = vpop.permute.xlu0 %6085 }
 0xbcf   : > { %12922 = vst [vmem:[#allocation158_spill] sm:$0xff] %v11219_v34 }
 0xbd0   : > { %7963 = vmatmul.mubr.msk.bf16.vlgmr.msra.gmra.mxu1 %vm1669_vm7, %v10595_v27 }
 0xbd1   : > { %7973 = vmatpush3.bf16.msra.mxu1 %v4240_v10  ;;  %7974 = vmatprep.mubr.msk.bf16.mxu1 %vm8542_vm2, %v12771_v1 }
 0xbd2   : > { %7984 = vmatprep.subr.bf16.mxu1 %v12771_v1  ;;  %v11221_v12 = vpop.permute.xlu0 %6076 }
 0xbd3   : > { %12923 = vst [vmem:[#allocation159_spill] sm:$0xff] %v11221_v12 }
 0xbd5   : > { %v8494_v62 = vpop.eup %8493 }
 0xbd6   : > { %v3790_v22 = vmul.f32 %v8494_v62, %v3788_v24  ;;  %v11223_v6 = vpop.permute.xlu0 %6195 }
 0xbd7   : > { %12924 = vst [vmem:[#allocation160_spill] sm:$0xff] %v11223_v6 }
 0xbd8   : > { %7975 = vmatmul.mubr.msk.bf16.vlgmr.msra.gmra.mxu1 %vm455_vm0, %v10607_v13  ;;  %v11190_v4 = vpack.c.bf16 %v3790_v22, %v3790_v22 }
 0xbd9   : > { %7986 = vmatprep.mubr.msk.bf16.mxu1 %vm8542_vm2, %v12771_v1 }
 0xbda   : > { %12916 = vst [vmem:[#allocation152_spill] sm:$0xff] %v11190_v4  ;;  %6326 = vrot.lane.b32.xlu0 %v11190_v4, %s8544_s29  ;;  %v12649_v7 = vrot.slane %v11190_v4, 2  ;;  %v6211_v31 = vrot.slane %v11190_v4, 6  ;;  %v6139_v24 = vrot.slane %v11190_v4, 4  ;;  %v11225_v52 = vpop.permute.xlu0 %6609  ;;  %v6135_v40 = vsel %vm1673_vm6, %v11190_v4, %v10845_v28  ;;  %v12939_v4 = vld [vmem:[#allocation47_spill] sm:$0xff] }
 0xbdb   : > { %12925 = vst [vmem:[#allocation161_spill] sm:$0xff] %v11225_v52 }
 0xbdc   : > { %v11207_v51 = vsel %vm462_vm1, %v10495_v32, %v6139_v24 }
 0xbdd   : > { %12917 = vst [vmem:[#allocation153_spill] sm:$0xff] %v11207_v51 }
 0xbde   : > { %6105 = vrot.lane.b32.xlu0 %v12649_v7, %s8543_s28 }
 0xbe2   : > { %6212 = vrot.lane.b32.xlu0 %v6211_v31, %s8544_s29 }
 0xbe6   : > { %6203 = vrot.lane.b32.xlu0 %v6139_v24, %s8543_s28  ;;  %v4283_v24 = vrot.slane %v11154_v26, 4 }
 0xbea   : > { %6322 = vrot.lane.b32.xlu0 %v6211_v31, %s8543_s28  ;;  %v4282_v31 = vrot.slane %v11152_v54, 5 }
 0xbec   : > { %v4284_v28 = vsel %vm1574_vm3, %v4283_v24, %v4282_v31 }
 0xbee   : > { %6143 = vrot.lane.b32.xlu0 %v11207_v51, %s8544_s29  ;;  %v4285_v51 = vrot.slane %v11159_v17, 3 }
 0xc4c   : > { %v11227_v48 = vpop.permute.xlu0 %6326 }
 0xc50   : > { %v6106_v23 = vpop.permute.xlu0 %6105 }
 0xc51   : > { %v11233_v14 = vsel %vm4909_vm14, %v6135_v40, %v6106_v23  ;;  %v4287_v40 = vrot.slane %v11163_v50, 2  ;;  %v4050_v23 = vadd.f32 %v4049_v11, %v9862_v2 }
 0xc52   : > { %12926 = vst [vmem:[#allocation162_spill] sm:$0xff] %v11233_v14 }
 0xc88   : > { %v3972_v10 = vpop.f32.mrf.mxu1 }
 0xc89   : > { %v3973_v62 = vadd.f32 %v3972_v10, %v9930_v9 }
 0xc8a   : > { %v7952_v22 = vpop.f32.mrf.mxu1 }
 0xc8b   : > { %v7269_v7 = vmul.f32 -1.442695, %v3973_v62  ;;  %v4286_v22 = vsel %vm1577_vm4, %v4285_v51, %v4284_v28  ;;  %v12927_v28 = vld [vmem:[#allocation43_spill] sm:$0xff] }
 0xc8c   : > { %v3975_v52 = vpop.f32.mrf.mxu1 }
 0xc8d   : > { %8495 = vpow2.f32 %v7269_v7  ;;  %v4288_v52 = vsel %vm1580_vm5, %v4287_v40, %v4286_v22  ;;  %v11257_v40 = vpack.c.b16 %v12927_v28, %v12927_v28 }
 0xc8e   : > { %v7953_v57 = vpop.f32.mrf.mxu1 }
 0xc8f   : > { %v4289_v57 = vpack.c.b16 %v4288_v52, %v4288_v52  ;;  %12928 = vst [vmem:[#allocation43_spill] sm:$0xff] %v11257_v40 }
 0xc90   : > { %v4116_v12 = vpop.f32.mrf.mxu1 }
 0xc91   : > { %v4117_v10 = vadd.f32 %v4116_v12, %v9868_v5  ;;  %v4291_v51 = vsel %vm1673_vm6, %v4289_v57, 0 }
 0xc92   : > { %v7964_v54 = vpop.f32.mrf.mxu1 }
 0xc93   : > { %v4122_v32 = vadd.f32 %v4117_v10, %v4050_v23  ;;  %v11259_v23 = vpop.permute.xlu1 %5677  ;;  %v4415_v10 = vsel %vm462_vm1, %v11257_v40, 0  ;;  %v4626_v40 = vrot.slane %v12936_v15, 7 }
 0xc94   : > { %v4119_v26 = vpop.f32.mrf.mxu1 }
 0xc95   : > { %v4123_v7 = vmax.f32 %v4122_v32, 0.0 }
 0xc96   : > { %v7965_v62 = vpop.f32.mrf.mxu1 }
 0xc97   : > { %v4124_v17 = vpack.c.bf16 %v4123_v7, %v4123_v7  ;;  %v11268_v22 = vpop.permute.xlu1 %5669 }
 0xc98   : > { %v11245_v14 = vpop.f32.mrf.mxu1 }
 0xc99   : > { %v4126_v31 = vsel %vm1673_vm6, %v4124_v17, 0  ;;  %v4277_v6 = vadd.f32 %v11245_v14, %v9862_v2 }
 0xc9a   : > { %v8496_v50 = vpop.eup %8495  ;;  %7967 = vmatpush3.bf16.msra.mxu0 %v4126_v31  ;;  %v7976_v11 = vpop.f32.mrf.mxu1 }
 0xc9b   : > { %v3981_v24 = vadd.f32 1.0, %v8496_v50  ;;  %7978 = vmatprep.subr.bf16.mxu0 %v12771_v1  ;;  %v11280_v62 = vpop.permute.xlu1 %5661  ;;  %v12654_v11 = vunpack.c.l.bf16 %v11138_v8 }
 0xc9c   : > { %v4279_v12 = vpop.f32.mrf.mxu1  ;;  %12930 = vst [vmem:[#allocation164_spill] sm:$0xff] %v11280_v62  ;;  %v12941_v62 = vld [vmem:[#allocation48_spill] sm:$0xff] }
 0xc9d   : > { %8497 = vrcp.f32 %v3981_v24  ;;  %7969 = vmatmul.mubr.msk.bf16.vlgmr.msra.gmra.mxu0 %vm1669_vm7, %v10585_v61  ;;  %v12653_v24 = vunpack.c.l.bf16 %v11141_v41  ;;  %v4183_v12 = vrot.slane %v12654_v11, 3 }
 0xc9e   : > { %7979 = vmatpush3.bf16.msra.mxu0 %v4291_v51  ;;  %7980 = vmatprep.mubr.msk.bf16.mxu0 %vm8542_vm2, %v12771_v1  ;;  %v7977_v32 = vpop.f32.mrf.mxu1  ;;  %v12652_v51 = vunpack.c.l.bf16 %v11148_v59 }
 0xc9f   : > { %7990 = vmatprep.subr.bf16.mxu0 %v12771_v1 }
 0xca5   : > { %7981 = vmatmul.mubr.msk.bf16.vlgmr.msra.gmra.mxu0 %vm1669_vm7, %v10595_v27 }
 0xca6   : > { %7991 = vmatpush3.bf16.msra.mxu0 %v4415_v10  ;;  %7992 = vmatprep.mubr.msk.bf16.mxu0 %vm8542_vm2, %v12771_v1 }
 0xca7   : > { %8002 = vmatprep.subr.bf16.mxu0 %v12771_v1 }
 0xcaa   : > { %v8498_v61 = vpop.eup %8497 }
 0xcab   : > { %v3991_v54 = vmul.f32 %v8498_v61, %v10824_v44  ;;  %v11293_v44 = vpop.permute.xlu1 %5812  ;;  %v11335_v61 = vld [vmem:[%s8726_s26 + $0x4] sm:$0x8] }
 0xcac   : > { %12932 = vst [vmem:[#allocation166_spill] sm:$0xff] %v11293_v44 }
 0xcad   : > { %7993 = vmatmul.mubr.msk.bf16.vlgmr.msra.gmra.mxu0 %vm455_vm0, %v10607_v13  ;;  %v11273_v26 = vpack.c.bf16 %v3991_v54, %v3991_v54  ;;  %v11338_v54 = vld [vmem:[%s8726_s26 + $0xc] sm:$0x8] }
 0xcae   : > { %8004 = vmatprep.mubr.msk.bf16.mxu0 %vm8542_vm2, %v12771_v1 }
 0xcaf   : > { %12929 = vst [vmem:[#allocation163_spill] sm:$0xff] %v11273_v26  ;;  %v12656_v27 = vrot.slane %v11273_v26, 6  ;;  %v6231_v52 = vrot.slane %v11273_v26, 2  ;;  %v6266_v7 = vrot.slane %v11273_v26, 4  ;;  %v11297_v17 = vpop.permute.xlu1 %5974 }
 0xcb0   : > { %12933 = vst [vmem:[#allocation167_spill] sm:$0xff] %v11297_v17 }
 0xcb1   : > { %6360 = vrot.lane.b32.xlu0 %v12656_v27, %s8544_s29  ;;  %6232 = vrot.lane.b32.xlu1 %v6231_v52, %s8543_s28  ;;  %v11288_v13 = vsel %vm462_vm1, %v10509_v25, %v6266_v7 }
 0xcb2   : > { %12931 = vst [vmem:[#allocation165_spill] sm:$0xff] %v11288_v13 }
 0xcb3   : > { %v11303_v57 = vpop.permute.xlu1 %6082 }
 0xcb4   : > { %12934 = vst [vmem:[#allocation168_spill] sm:$0xff] %v11303_v57 }
 0xcb5   : > { %6330 = vrot.lane.b32.xlu0 %v6266_v7, %s8543_s28  ;;  %6270 = vrot.lane.b32.xlu1 %v11288_v13, %s8544_s29  ;;  %v7291_v7 = vcombine.low %v11335_v61, %v11335_v61 }
 0xcb7   : > { %v11307_v31 = vpop.permute.xlu1 %5719 }
 0xcb9   : > { %6474 = vrot.lane.b32.xlu1 %v11273_v26, %s8544_s29 }
 0xcbd   : > { %6468 = vrot.lane.b32.xlu1 %v10326_v38, %s8543_s28  ;;  %v6393_v38 = vsel %vm1673_vm6, %v11227_v48, %v10302_v33  ;;  %v4185_v33 = vrot.slane %v12653_v24, 2  ;;  %v4187_v48 = vrot.slane %v12652_v51, 1  ;;  %v11348_v51 = vld [vmem:[%s8726_s26 + $0x1c] sm:$0x8] }
 0xcbe   : > { %v11315_v50 = vsel %vm4909_vm14, %v6393_v38, %v6231_v52  ;;  %v11341_v52 = vld [vmem:[%s8726_s26 + $0x14] sm:$0x8]  ;;  %v7292_v38 = vcombine.low %v11338_v54, %v11338_v54 }
 0xcbf   : > { %12935 = vst [vmem:[#allocation169_spill] sm:$0xff] %v11315_v50 }
 0xcc1   : > { %6595 = vrot.lane.b32.xlu1 %v11080_v43, %s8543_s28  ;;  %v12655_v43 = vunpack.c.l.bf16 %v11135_v29 }
 0xcc5   : > { %6472 = vrot.lane.b32.xlu1 %v10509_v25, %s8544_s29 }
 0xcc9   : > { %6466 = vrot.lane.b32.xlu1 %v10503_v35, %s8543_s28  ;;  %v4182_v35 = vrot.slane %v12655_v43, 4 }
 0xccb   : > { %v4184_v32 = vsel %vm1574_vm3, %v4183_v12, %v4182_v35  ;;  %v7293_v35 = vcombine.low %v11341_v52, %v11341_v52  ;;  %v11352_v12 = vunpack.c.l.b16 %v7291_v7 }
 0xccc   : > { %v4186_v28 = vsel %vm1577_vm4, %v4185_v33, %v4184_v32  ;;  %v11354_v33 = vunpack.c.l.b16 %v7292_v38  ;;  %v7294_v32 = vcombine.low %v11348_v51, %v11348_v51 }
 0xccd   : > { %v11332_v10 = vsel %vm1580_vm5, %v4187_v48, %v4186_v28  ;;  %v11359_v24 = vunpack.c.l.b16 %v7293_v35  ;;  %v4473_v43 = vrot.slane %v11352_v12, 6 }
 0xcce   : > { %v4474_v27 = vrot.slane %v11354_v33, 5  ;;  %v11363_v34 = vunpack.c.l.b16 %v7294_v32 }
 0xccf   : > { %v4476_v7 = vrot.slane %v11359_v24, 4 }
 0xcd0   : > { %v4475_v44 = vsel %vm1574_vm3, %v4474_v27, %v4473_v43  ;;  %v4630_v27 = vrot.slane %v12939_v4, 5 }
 0xcd1   : > { %v4477_v32 = vsel %vm1577_vm4, %v4476_v7, %v4475_v44  ;;  %v4634_v44 = vrot.slane %v12941_v62, 3 }
 0xd5d   : > { %v4162_v48 = vpop.f32.mrf.mxu0 }
 0xd5e   : > { %v4163_v28 = vadd.f32 %v4162_v48, %v9930_v9  ;;  %v12937_v48 = vld [vmem:[#allocation46_spill] sm:$0xff] }
 0xd5f   : > { %v7970_v11 = vpop.f32.mrf.mxu0  ;;  %v4628_v35 = vrot.slane %v12937_v48, 6  ;;  %v12940_v48 = vld [vmem:[#allocation51_spill] sm:$0xff] }
 0xd60   : > { %v7277_v50 = vmul.f32 -1.442695, %v4163_v28  ;;  %v4478_v11 = vrot.slane %v11363_v34, 3  ;;  %v12938_v28 = vld [vmem:[#allocation44_spill] sm:$0xff]  ;;  %v4632_v25 = vrot.slane %v12940_v48, 4 }
 0xd61   : > { %v4165_v57 = vpop.f32.mrf.mxu0 }
 0xd62   : > { %8499 = vpow2.f32 %v7277_v50  ;;  %v4479_v37 = vsel %vm1580_vm5, %v4478_v11, %v4477_v32  ;;  %v12943_v11 = vld [vmem:[#allocation50_spill] sm:$0xff] }
 0xd63   : > { %v7971_v38 = vpop.f32.mrf.mxu0  ;;  %v4638_v32 = vrot.slane %v12943_v11, 1 }
 0xd64   : > { %v4627_v38 = vsel %vm1574_vm3, %v4626_v40, %v12938_v28  ;;  %v12942_v28 = vld [vmem:[#allocation49_spill] sm:$0xff] }
 0xd65   : > { %v4327_v13 = vpop.f32.mrf.mxu0  ;;  %v4629_v15 = vsel %vm1577_vm4, %v4628_v35, %v4627_v38  ;;  %v4636_v4 = vrot.slane %v12942_v28, 2 }
 0xd66   : > { %v4328_v57 = vadd.f32 %v4327_v13, %v9868_v5  ;;  %v4631_v13 = vsel %vm1580_vm5, %v4630_v27, %v4629_v15 }
 0xd67   : > { %v7982_v50 = vpop.f32.mrf.mxu0  ;;  %v4633_v40 = vsel %vm1583_vm13, %v4632_v25, %v4631_v13 }
 0xd68   : > { %v4333_v43 = vadd.f32 %v4328_v57, %v4277_v6  ;;  %v4480_v50 = vpack.c.b16 %v4479_v37, %v4479_v37 }
 0xd69   : > { %v4330_v60 = vpop.f32.mrf.mxu0 }
 0xd6a   : > { %v4334_v17 = vmax.f32 %v4333_v43, 0.0  ;;  %v4635_v60 = vsel %vm1586_vm10, %v4634_v44, %v4633_v40  ;;  %v4482_v37 = vsel %vm1673_vm6, %v4480_v50, 0  ;;  %v8530_v50 = vld [vmem:[%s12499_s4] sm:$0x3] }
 0xd6b   : > { %v7983_v14 = vpop.f32.mrf.mxu0  ;;  %v4637_v25 = vsel %vm1589_vm11, %v4636_v4, %v4635_v60  ;;  %v12948_v60 = vunpack.c.l.bf16 %v11135_v29  ;;  %v11463_v29 = vpop.permute.xlu1 %5828 }
 0xd6c   : > { %v4335_v7 = vpack.c.bf16 %v4334_v17, %v4334_v17  ;;  %v11395_v17 = vld [vmem:[%s12503_s8] sm:$0x3]  ;;  %v4639_v43 = vsel %vm1592_vm12, %v4638_v32, %v4637_v25  ;;  %v12949_v32 = vunpack.c.l.bf16 %v11138_v8  ;;  %v12951_v25 = vunpack.c.l.bf16 %v11148_v59  ;;  %12953 = vst [vmem:[#allocation51_spill] sm:$0xff] %v11463_v29 }
 0xd6d   : > { %v11384_v6 = vpop.f32.mrf.mxu0  ;;  %v11403_v48 = vpack.c.b16 %v4639_v43, %v4639_v43  ;;  %v11408_v14 = vld [vmem:[%s12501_s6] sm:$0x3]  ;;  %v4385_v11 = vrot.slane %v12948_v60, 5  ;;  %v4687_v29 = vrot.slane %v11359_v24, 5 }
 0xd6e   : > { %v4337_v35 = vsel %vm1673_vm6, %v4335_v7, 0 }
 0xd6f   : > { %v8500_v57 = vpop.eup %8499  ;;  %7985 = vmatpush3.bf16.msra.mxu1 %v4337_v35  ;;  %v7994_v38 = vpop.f32.mrf.mxu0  ;;  %12944 = vst [vmem:[#allocation45_spill] sm:$0xff] %v11403_v48  ;;  %v4642_v13 = vsel %vm462_vm1, %v11403_v48, 0 }
 0xd70   : > { %v4171_v27 = vadd.f32 1.0, %v8500_v57  ;;  %7996 = vmatprep.subr.bf16.mxu1 %v12771_v1  ;;  %v12947_v57 = vrot.slane %v11273_v26, 6  ;;  %v4386_v38 = vrot.slane %v12949_v32, 4  ;;  %v11467_v8 = vpop.permute.xlu1 %5820 }
 0xd71   : > { %v4454_v62 = vpop.f32.mrf.mxu0  ;;  %12955 = vst [vmem:[#allocation49_spill] sm:$0xff] %v11467_v8 }
 0xd72   : > { %8501 = vrcp.f32 %v4171_v27  ;;  %7987 = vmatmul.mubr.msk.bf16.vlgmr.msra.gmra.mxu1 %vm1669_vm7, %v11395_v17  ;;  %v12950_v27 = vunpack.c.l.bf16 %v11141_v41  ;;  %v4390_v62 = vrot.slane %v12951_v25, 2  ;;  %v4387_v43 = vsel %vm1574_vm3, %v4386_v38, %v4385_v11 }
 0xd73   : > { %7997 = vmatpush3.bf16.msra.mxu1 %v4482_v37  ;;  %7998 = vmatprep.mubr.msk.bf16.mxu1 %vm8542_vm2, %v12771_v1  ;;  %v7995_v15 = vpop.f32.mrf.mxu0 }
 0xd74   : > { %8008 = vmatprep.subr.bf16.mxu1 %v12771_v1  ;;  %v4388_v37 = vrot.slane %v12950_v27, 3 }
 0xd76   : > { %v4389_v15 = vsel %vm1577_vm4, %v4388_v37, %v4387_v43 }
 0xd7a   : > { %7999 = vmatmul.mubr.msk.bf16.vlgmr.msra.gmra.mxu1 %vm1669_vm7, %v11408_v14 }
 0xd7b   : > { %8009 = vmatpush3.bf16.msra.mxu1 %v4642_v13  ;;  %8010 = vmatprep.mubr.msk.bf16.mxu1 %vm8542_vm2, %v12771_v1  ;;  %v11459_v13 = vsel %vm1580_vm5, %v4390_v62, %v4389_v15 }
 0xd7c   : > { %8020 = vmatprep.subr.bf16.mxu1 %v12771_v1 }
 0xd7f   : > { %v8502_v44 = vpop.eup %8501 }
 0xd80   : > { %v4190_v7 = vmul.f32 %v8502_v44, %v11332_v10  ;;  %v11461_v44 = vpop.permute.xlu0 %6212 }
 0xd81   : > { %12952 = vst [vmem:[#allocation47_spill] sm:$0xff] %v11461_v44  ;;  %v4689_v44 = vrot.slane %v11363_v34, 4 }
 0xd82   : > { %8011 = vmatmul.mubr.msk.bf16.vlgmr.msra.gmra.mxu1 %vm455_vm0, %v8530_v50  ;;  %v11422_v40 = vpack.c.bf16 %v4190_v7, %v4190_v7  ;;  %v11471_v50 = vpop.permute.xlu1 %5955  ;;  %vm4999_vm0 = vcmask 125952  }
 0xd83   : > { %8022 = vmatprep.mubr.msk.bf16.mxu1 %vm8542_vm2, %v12771_v1 }
 0xd84   : > { %12945 = vst [vmem:[#allocation46_spill] sm:$0xff] %v11422_v40  ;;  %6601 = vrot.lane.b32.xlu0 %v11422_v40, %s8544_s29  ;;  %v12662_v28 = vrot.slane %v11422_v40, 2  ;;  %v6486_v10 = vrot.slane %v11422_v40, 6  ;;  %v6414_v4 = vrot.slane %v11422_v40, 4  ;;  %v11465_v7 = vpop.permute.xlu0 %6203  ;;  %v6410_v27 = vsel %vm1673_vm6, %v11422_v40, %v10920_v58 }
 0xd85   : > { %12954 = vst [vmem:[#allocation48_spill] sm:$0xff] %v11465_v7 }
 0xd86   : > { %v11438_v35 = vsel %vm462_vm1, %v11041_v42, %v6414_v4 }
 0xd87   : > { %12946 = vst [vmem:[#allocation44_spill] sm:$0xff] %v11438_v35 }
 0xd88   : > { %6380 = vrot.lane.b32.xlu0 %v12662_v28, %s8543_s28  ;;  %v11469_v41 = vpop.permute.xlu0 %6322 }
 0xd89   : > { %12956 = vst [vmem:[#allocation50_spill] sm:$0xff] %v11469_v41 }
 0xd8c   : > { %6487 = vrot.lane.b32.xlu0 %v6486_v10, %s8544_s29  ;;  %v11473_v59 = vpop.permute.xlu0 %6143 }
 0xd8d   : > { %12957 = vst [vmem:[#allocation170_spill] sm:$0xff] %v11473_v59  ;;  %v4685_v59 = vrot.slane %v11354_v33, 6 }
 0xd90   : > { %6478 = vrot.lane.b32.xlu0 %v6414_v4, %s8543_s28  ;;  %v11477_v4 = vpop.permute.xlu0 %6360 }
 0xd91   : > { %12958 = vst [vmem:[#allocation171_spill] sm:$0xff] %v11477_v4 }
 0xd94   : > { %6418 = vrot.lane.b32.xlu0 %v11438_v35, %s8544_s29  ;;  %v11481_v60 = vpop.permute.xlu0 %6330 }
 0xd95   : > { %12960 = vst [vmem:[#allocation173_spill] sm:$0xff] %v11481_v60 }
 0xd98   : > { %6470 = vrot.lane.b32.xlu0 %v12947_v57, %s8543_s28 }
 0xd9c   : > { %6597 = vrot.lane.b32.xlu0 %v6486_v10, %s8543_s28  ;;  %v11475_v10 = vpop.permute.xlu1 %5947 }
 0xda0   : > { %6599 = vrot.lane.b32.xlu0 %v11041_v42, %s8544_s29  ;;  %v11479_v57 = vpop.permute.xlu1 %6074 }
 0xda1   : > { %12959 = vst [vmem:[#allocation172_spill] sm:$0xff] %v11479_v57  ;;  %v4684_v57 = vrot.slane %v11352_v12, 7 }
 0xda3   : > { %v4686_v40 = vsel %vm1574_vm3, %v4685_v59, %v4684_v57 }
 0xda4   : > { %v11483_v11 = vpop.permute.xlu1 %5009  ;;  %v4688_v33 = vsel %vm1577_vm4, %v4687_v29, %v4686_v40 }
 0xda5   : > { %12961 = vst [vmem:[#allocation174_spill] sm:$0xff] %v11483_v11 }
 0xda8   : > { %v11487_v38 = vpop.permute.xlu1 %5138 }
 0xdac   : > { %v11495_v62 = vpop.permute.xlu1 %4904 }
 0xdb0   : > { %v4945_v43 = vpop.permute.xlu1 %4944 }
 0xdb4   : > { %v11497_v15 = vpop.permute.xlu1 %5953 }
 0xdb8   : > { %v11499_v28 = vpop.permute.xlu1 %5939 }
 0xdbc   : > { %v11501_v35 = vpop.permute.xlu1 %6066 }
 0xdbd   : > { %12963 = vst [vmem:[#allocation176_spill] sm:$0xff] %v11501_v35 }
 0xdc0   : > { %v11503_v41 = vpop.permute.xlu1 %5943 }
 0xdc4   : > { %v11505_v60 = vpop.permute.xlu1 %5413 }
 0xdc8   : > { %v11507_v42 = vpop.permute.xlu1 %5171 }
 0xdcc   : > { %v11509_v58 = vpop.permute.xlu1 %5209 }
 0xdd0   : > { %v11511_v4 = vpop.permute.xlu1 %5937 }
 0xdd4   : > { %v11517_v48 = vpop.permute.xlu1 %6228 }
 0xdf6   : > { %v11485_v32 = vpop.permute.xlu0 %6601 }
 0xdfa   : > { %v6381_v37 = vpop.permute.xlu0 %6380 }
 0xdfb   : > { %v11493_v25 = vsel %vm4909_vm14, %v6410_v27, %v6381_v37 }
 0xdfc   : > { %12962 = vst [vmem:[#allocation175_spill] sm:$0xff] %v11493_v25 }
 0xe32   : > { %v4373_v27 = vpop.f32.mrf.mxu1 }
 0xe33   : > { %v4374_v37 = vadd.f32 %v4373_v27, %v9930_v9 }
 0xe34   : > { %v7988_v25 = vpop.f32.mrf.mxu1 }
 0xe35   : > { %v7289_v8 = vmul.f32 -1.442695, %v4374_v37  ;;  %v4452_v25 = vadd.f32 %v11384_v6, %v9862_v2  ;;  %v4690_v37 = vsel %vm1580_vm5, %v4689_v44, %v4688_v33  ;;  %v12964_v33 = vld [vmem:[#allocation8_spill] sm:$0xff] }
 0xe36   : > { %v4376_v35 = vpop.f32.mrf.mxu1  ;;  %v4691_v57 = vpack.c.b16 %v4690_v37, %v4690_v37 }
 0xe37   : > { %8503 = vpow2.f32 %v7289_v8  ;;  %v11525_v8 = vpop.permute.xlu1 %6209 }
 0xe38   : > { %v7989_v11 = vpop.f32.mrf.mxu1 }
 0xe3a   : > { %v4518_v7 = vpop.f32.mrf.mxu1 }
 0xe3b   : > { %v4519_v12 = vadd.f32 %v4518_v7, %v9868_v5  ;;  %v11531_v2 = vpop.permute.xlu1 %6357  ;;  %v4693_v7 = vsel %vm1673_vm6, %v4691_v57, 0  ;;  %v12967_v57 = vld [vmem:[#allocation7_spill] sm:$0xff] }
 0xe3c   : > { %v8000_v27 = vpop.f32.mrf.mxu1 }
 0xe3d   : > { %v4524_v35 = vadd.f32 %v4519_v12, %v4452_v25  ;;  %v4797_v27 = vrot.slane %v12964_v33, 7 }
 0xe3e   : > { %v4521_v24 = vpop.f32.mrf.mxu1 }
 0xe3f   : > { %v4525_v11 = vmax.f32 %v4524_v35, 0.0  ;;  %v4956_v35 = vsel %vm4909_vm14, %v4945_v43, 0  ;;  %v12965_v24 = vld [vmem:[#allocation10_spill] sm:$0xff] }
 0xe40   : > { %v8001_v9 = vpop.f32.mrf.mxu1  ;;  %v4799_v37 = vrot.slane %v12965_v24, 6  ;;  %v12971_v24 = vld [vmem:[#allocation22_spill] sm:$0xff] }
 0xe41   : > { %v4526_v59 = vpack.c.bf16 %v4525_v11, %v4525_v11  ;;  %v11537_v9 = vpop.permute.xlu1 %5667  ;;  %v12966_v11 = vld [vmem:[#allocation6_spill] sm:$0xff] }
 0xe42   : > { %v11528_v26 = vpop.f32.mrf.mxu1 }
 0xe43   : > { %v4528_v34 = vsel %vm1673_vm6, %v4526_v59, 0  ;;  %v4936_v59 = vsel %vm1673_vm6, %v12966_v11, %v10319_v46 }
 0xe44   : > { %v8504_v6 = vpop.eup %8503  ;;  %8003 = vmatpush3.bf16.msra.mxu0 %v4528_v34  ;;  %v8012_v40 = vpop.f32.mrf.mxu1  ;;  %v4798_v34 = vsel %vm1574_vm3, %v4797_v27, %v12967_v57  ;;  %v12970_v27 = vld [vmem:[#allocation14_spill] sm:$0xff] }
 0xe45   : > { %v4382_v29 = vadd.f32 1.0, %v8504_v6  ;;  %8014 = vmatprep.subr.bf16.mxu0 %v12771_v1  ;;  %v11542_v12 = vpop.permute.xlu1 %5446  ;;  %v12968_v6 = vld [vmem:[#allocation11_spill] sm:$0xff] }
 0xe46   : > { %v4681_v25 = vpop.f32.mrf.mxu1  ;;  %v4801_v43 = vrot.slane %v12968_v6, 5 }
 0xe47   : > { %8505 = vrcp.f32 %v4382_v29  ;;  %8005 = vmatmul.mubr.msk.bf16.vlgmr.msra.gmra.mxu0 %vm1669_vm7, %v11395_v17  ;;  %v4800_v29 = vsel %vm1577_vm4, %v4799_v37, %v4798_v34  ;;  %v12972_v34 = vld [vmem:[#allocation15_spill] sm:$0xff] }
 0xe48   : > { %8015 = vmatpush3.bf16.msra.mxu0 %v4693_v7  ;;  %8016 = vmatprep.mubr.msk.bf16.mxu0 %vm8542_vm2, %v12771_v1  ;;  %v8013_v44 = vpop.f32.mrf.mxu1  ;;  %v12969_v7 = vld [vmem:[#allocation13_spill] sm:$0xff] }
 0xe49   : > { %8026 = vmatprep.subr.bf16.mxu0 %v12771_v1  ;;  %v4803_v25 = vrot.slane %v12969_v7, 4  ;;  %v4931_v44 = vsel %vm1673_vm6, %v10483_v47, %v10847_v3  ;;  %v11565_v33 = vpop.permute.xlu1 %5484  ;;  %v4807_v47 = vrot.slane %v12972_v34, 2  ;;  %v4925_v3 = vsel %vm462_vm1, %v10497_v19, %v10849_v55  ;;  %v12974_v19 = vld [vmem:[#allocation63_spill] sm:$0xff] }
 0xe4a   : > { %v4932_v37 = vsel %vm462_vm1, %v4931_v44, %v12971_v24  ;;  %v4927_v55 = vsel %vm4909_vm14, %v4925_v3, %v12974_v19  ;;  %v4914_v24 = vsel %vm1673_vm6, %v10773_v56, 0  ;;  %v12977_v3 = vld [vmem:[#allocation65_spill] sm:$0xff]  ;;  %v11625_v56 = vld [vmem:[%s12505_s10] sm:$0x3] }
 0xe4f   : > { %8017 = vmatmul.mubr.msk.bf16.vlgmr.msra.gmra.mxu0 %vm1669_vm7, %v11408_v14  ;;  %v4938_v14 = vsel %vm4909_vm14, %v4936_v59, %v11495_v62  ;;  %v4802_v62 = vsel %vm1580_vm5, %v4801_v43, %v4800_v29  ;;  %v11583_v43 = vpop.permute.xlu1 %6201 }
 0xe50   : > { %8027 = vmatpush3.bf16.msra.mxu0 %v4956_v35  ;;  %8040 = vmatprep.mubr.msk.bf16.mxu0 %vm8542_vm2, %v12771_v1  ;;  %v4805_v35 = vrot.slane %v12970_v27, 3  ;;  %v4804_v57 = vsel %vm1583_vm13, %v4803_v25, %v4802_v62 }
 0xe51   : > { %8028 = vmatprep.subr.bf16.mxu0 %v12771_v1 }
 0xe52   : > { %v4806_v7 = vsel %vm1586_vm10, %v4805_v35, %v4804_v57  ;;  %v12975_v35 = vld [vmem:[#allocation4_spill] sm:$0xff]  ;;  %v12976_v57 = vld [vmem:[#allocation54_spill] sm:$0xff] }
 0xe53   : > { %v4808_v25 = vsel %vm1589_vm11, %v4807_v47, %v4806_v7  ;;  %v11606_v27 = vpop.permute.xlu1 %6328 }
 0xe54   : > { %v8506_v40 = vpop.eup %8505  ;;  %8029 = vmatpush3.bf16.msra.mxu0 %v4938_v14 }
 0xe55   : > { %v4393_v46 = vmul.f32 %v8506_v40, %v11459_v13  ;;  %8030 = vmatprep.subr.bf16.mxu0 %v12771_v1  ;;  %v12973_v40 = vld [vmem:[#allocation16_spill] sm:$0xff] }
 0xe56   : > { %v4809_v29 = vrot.slane %v12973_v40, 1 }
 0xe57   : > { %v11573_v59 = vpack.c.bf16 %v4393_v46, %v4393_v46  ;;  %v11618_v47 = vpop.permute.xlu1 %6207 }
 0xe58   : > { %8031 = vmatpush3.bf16.msra.mxu0 %v4932_v37  ;;  %v4810_v46 = vsel %vm1592_vm12, %v4809_v29, %v4808_v25  ;;  %v4916_v37 = vsel %vm462_vm1, %v4914_v24, %v10671_v21  ;;  %v5212_v21 = vsel %vm4909_vm14, %v11509_v58, 0  ;;  %v5201_v29 = vsel %vm1673_vm6, %v10242_v39, %v10682_v53 }
 0xe59   : > { %8032 = vmatprep.subr.bf16.mxu0 %v12771_v1  ;;  %v6613_v13 = vrot.slane %v11573_v59, 6  ;;  %v6506_v6 = vrot.slane %v11573_v59, 2  ;;  %v6541_v14 = vrot.slane %v11573_v59, 4  ;;  %v4811_v62 = vpack.c.b16 %v4810_v46, %v4810_v46  ;;  %v12979_v46 = vld [vmem:[#allocation114_spill] sm:$0xff] }
 0xe5a   : > { %v5203_v7 = vsel %vm4909_vm14, %v5201_v29, %v11507_v42  ;;  %v5196_v58 = vsel %vm1673_vm6, %v10692_v30, %v10867_v36  ;;  %v12981_v42 = vld [vmem:[#allocation68_spill] sm:$0xff]  ;;  %v12982_v36 = vld [vmem:[#allocation27_spill] sm:$0xff] }
 0xe5b   : > { %6614 = vrot.lane.b32.xlu0 %v6613_v13, %s8544_s29  ;;  %6507 = vrot.lane.b32.xlu1 %v6506_v6, %s8543_s28  ;;  %v11600_v44 = vsel %vm462_vm1, %v11105_v63, %v6541_v14  ;;  %v4908_v34 = vsel %vm462_vm1, %v4811_v62, 0  ;;  %v11632_v40 = vpop.permute.xlu1 %6193  ;;  %v5184_v24 = vsel %vm1673_vm6, %v11487_v38, %v12982_v36  ;;  %v12987_v38 = vld [vmem:[#allocation69_spill] sm:$0xff]  ;;  %v12990_v36 = vld [vmem:[#allocation62_spill] sm:$0xff] }
 0xe5c   : > { %8033 = vmatpush3.bf16.msra.mxu0 %v4927_v55  ;;  %v12978_v55 = vld [vmem:[#allocation18_spill] sm:$0xff] }
 0xe5d   : > { %8034 = vmatprep.subr.bf16.mxu0 %v12771_v1  ;;  %v5197_v25 = vsel %vm462_vm1, %v5196_v58, %v12978_v55 }
 0xe5f   : > { %6605 = vrot.lane.b32.xlu0 %v6541_v14, %s8543_s28  ;;  %6545 = vrot.lane.b32.xlu1 %v11600_v44, %s8544_s29  ;;  %v4911_v14 = vsel %vm4909_vm14, %v4908_v34, %v12977_v3  ;;  %v11645_v19 = vpop.permute.xlu1 %5945 }
 0xe60   : > { %8035 = vmatpush3.bf16.msra.mxu0 %v12975_v35  ;;  %v12980_v35 = vld [vmem:[#allocation33_spill] sm:$0xff] }
 0xe61   : > { %8036 = vmatprep.subr.bf16.mxu0 %v12771_v1  ;;  %v5190_v62 = vsel %vm462_vm1, %v12980_v35, %v12979_v46  ;;  %v5487_v35 = vsel %vm4909_vm14, %v11565_v33, 0  ;;  %v5471_v33 = vsel %vm1673_vm6, %v11052_v0, %v10942_v20  ;;  %v5465_v20 = vsel %vm462_vm1, %v11076_v49, %v10949_v16  ;;  %v12992_v0 = vld [vmem:[#allocation70_spill] sm:$0xff] }
 0xe62   : > { %v5192_v30 = vsel %vm4909_vm14, %v5190_v62, %v12981_v42  ;;  %v4579_v49 = vunpack.c.l.bf16 %v11348_v51 }
 0xe63   : > { %6780 = vrot.lane.b32.xlu1 %v12976_v57, %s8543_s28  ;;  %v11654_v53 = vpop.permute.xlu1 %5723 }
 0xe64   : > { %8037 = vmatpush3.bf16.msra.mxu0 %v4916_v37  ;;  %v12983_v37 = vld [vmem:[#allocation66_spill] sm:$0xff] }
 0xe65   : > { %8038 = vmatprep.subr.bf16.mxu0 %v12771_v1  ;;  %v12984_v34 = vrot.slane %v12983_v37, 2 }
 0xe67   : > { %v5186_v3 = vsel %vm4909_vm14, %v5184_v24, %v12984_v34  ;;  %v6647_v24 = vsel %vm1673_vm6, %v11485_v32, %v12990_v36  ;;  %v5467_v32 = vsel %vm4909_vm14, %v5465_v20, %v12992_v0 }
 0xe68   : > { %8039 = vmatpush3.bf16.msra.mxu0 %v4911_v14  ;;  %v12985_v14 = vld [vmem:[#allocation109_spill] sm:$0xff] }
 0xe69   : > { %8062 = vmatprep.subr.bf16.mxu0 %v12771_v1 }
 0xe6b   : > { %8041 = vmatmul.mubr.msk.bf16.vlgmr.msra.gmra.mxu0 %vm4951_vm15, %v11625_v56 }
 0xe6c   : > { %8063 = vmatpush3.bf16.msra.mxu0 %v5212_v21  ;;  %8076 = vmatprep.mubr.msk.bf16.mxu0 %vm8542_vm2, %v12771_v1  ;;  %v12986_v21 = vld [vmem:[#allocation77_spill] sm:$0xff] }
 0xe6d   : > { %8064 = vmatprep.subr.bf16.mxu0 %v12771_v1  ;;  %v5178_v29 = vsel %vm1673_vm6, %v12986_v21, %v12985_v14  ;;  %v4576_v21 = vunpack.c.l.bf16 %v11335_v61 }
 0xe6e   : > { %v5180_v58 = vsel %vm462_vm1, %v5178_v29, %v11037_v18  ;;  %v12989_v18 = vld [vmem:[#allocation79_spill] sm:$0xff]  ;;  %v4578_v29 = vunpack.c.l.bf16 %v11341_v52 }
 0xe6f   : > { %v5476_v42 = vsel %vm1673_vm6, %v12989_v18, %v11049_v45  ;;  %v11704_v45 = vsel %vm4909_vm14, %v6647_v24, %v6506_v6  ;;  %v4577_v6 = vunpack.c.l.bf16 %v11338_v54  ;;  %v4584_v36 = vrot.slane %v4576_v21, 6  ;;  %v13112_v54 = vld [vmem:[#allocation23_spill] sm:$0xff] }
 0xe70   : > { %8065 = vmatpush3.bf16.msra.mxu0 %v5203_v7  ;;  %v5763_v7 = vpop.permute.xlu1 %5762 }
 0xe71   : > { %8066 = vmatprep.subr.bf16.mxu0 %v12771_v1  ;;  %v4585_v24 = vrot.slane %v4577_v6, 5 }
 0xe73   : > { %v4586_v0 = vsel %vm1574_vm3, %v4585_v24, %v4584_v36  ;;  %v13001_v36 = vld [vmem:[#allocation94_spill] sm:$0xff] }
 0xe74   : > { %8067 = vmatpush3.bf16.msra.mxu0 %v5197_v25  ;;  %v11672_v55 = vpop.permute.xlu1 %6320  ;;  %v12988_v25 = vld [vmem:[#allocation32_spill] sm:$0xff]  ;;  %v5754_v24 = vsel %vm1673_vm6, %v13001_v36, %v11307_v31  ;;  %v13005_v31 = vld [vmem:[#allocation73_spill] sm:$0xff]  ;;  %v13114_v51 = vrot.slane %v13001_v36, 2  ;;  %v13119_v36 = vld [vmem:[#allocation90_spill] sm:$0xff] }
 0xe75   : > { %8068 = vmatprep.subr.bf16.mxu0 %v12771_v1  ;;  %v5174_v46 = vsel %vm4909_vm14, %v12988_v25, %v12987_v38  ;;  %v12994_v38 = vld [vmem:[#allocation75_spill] sm:$0xff] }
 0xe76   : > { %v12995_v25 = vrot.slane %v12994_v38, 2 }
 0xe78   : > { %8069 = vmatpush3.bf16.msra.mxu0 %v5192_v30  ;;  %v11682_v62 = vpop.permute.xlu1 %6197  ;;  %v5478_v30 = vsel %vm4909_vm14, %v5476_v42, %v11542_v12  ;;  %v12997_v42 = vld [vmem:[#allocation149_spill] sm:$0xff] }
 0xe79   : > { %8070 = vmatprep.subr.bf16.mxu0 %v12771_v1 }
 0xe7c   : > { %8071 = vmatpush3.bf16.msra.mxu0 %v5186_v3  ;;  %v11699_v34 = vpop.permute.xlu1 %6191  ;;  %v12991_v3 = vld [vmem:[#allocation30_spill] sm:$0xff] }
 0xe7d   : > { %8072 = vmatprep.subr.bf16.mxu0 %v12771_v1  ;;  %v5472_v12 = vsel %vm462_vm1, %v5471_v33, %v12991_v3  ;;  %v4589_v3 = vrot.slane %v4579_v49, 3 }
 0xe80   : > { %8073 = vmatpush3.bf16.msra.mxu0 %v5180_v58  ;;  %v11714_v14 = vpop.permute.xlu1 %6503  ;;  %v12993_v58 = vld [vmem:[#allocation31_spill] sm:$0xff] }
 0xe81   : > { %8074 = vmatprep.subr.bf16.mxu0 %v12771_v1  ;;  %v5459_v16 = vsel %vm1673_vm6, %v11505_v60, %v12993_v58  ;;  %v4587_v60 = vrot.slane %v4578_v29, 4 }
 0xe84   : > { %8075 = vmatpush3.bf16.msra.mxu0 %v5174_v46  ;;  %v5461_v46 = vsel %vm4909_vm14, %v5459_v16, %v12995_v25  ;;  %v11730_v33 = vpop.permute.xlu1 %6199  ;;  %v12999_v25 = vld [vmem:[#allocation71_spill] sm:$0xff] }
 0xe85   : > { %8098 = vmatprep.subr.bf16.mxu0 %v12771_v1 }
 0xe87   : > { %8077 = vmatmul.mubr.msk.bf16.vlgmr.msra.gmra.mxu0 %vm4951_vm15, %v11625_v56 }
 0xe88   : > { %8099 = vmatpush3.bf16.msra.mxu0 %v5487_v35  ;;  %8112 = vmatprep.mubr.msk.bf16.mxu0 %vm8542_vm2, %v12771_v1  ;;  %v12996_v35 = vld [vmem:[#allocation119_spill] sm:$0xff]  ;;  %v5979_v58 = vpop.permute.xlu1 %5978 }
 0xe89   : > { %8100 = vmatprep.subr.bf16.mxu0 %v12771_v1 }
 0xe8c   : > { %8101 = vmatpush3.bf16.msra.mxu0 %v5478_v30  ;;  %v5453_v30 = vsel %vm1673_vm6, %v12997_v42, %v12996_v35  ;;  %v5765_v42 = vsel %vm4909_vm14, %v5763_v7, 0 }
 0xe8d   : > { %8102 = vmatprep.subr.bf16.mxu0 %v12771_v1 }
 0xe90   : > { %8103 = vmatpush3.bf16.msra.mxu0 %v5472_v12  ;;  %v12998_v12 = vld [vmem:[#allocation151_spill] sm:$0xff] }
 0xe91   : > { %8104 = vmatprep.subr.bf16.mxu0 %v12771_v1  ;;  %v5455_v20 = vsel %vm462_vm1, %v5453_v30, %v12998_v12  ;;  %v6017_v30 = vpop.permute.xlu1 %6016 }
 0xe94   : > { %8105 = vmatpush3.bf16.msra.mxu0 %v5467_v32  ;;  %v4588_v32 = vsel %vm1577_vm4, %v4587_v60, %v4586_v0  ;;  %v5756_v60 = vsel %vm4909_vm14, %v5754_v24, %v11654_v53 }
 0xe95   : > { %8106 = vmatprep.subr.bf16.mxu0 %v12771_v1  ;;  %v11747_v16 = vsel %vm1580_vm5, %v4589_v3, %v4588_v32  ;;  %v13002_v3 = vld [vmem:[#allocation133_spill] sm:$0xff]  ;;  %v11768_v12 = vpop.permute.xlu1 %6484  ;;  %v13004_v32 = vld [vmem:[#allocation134_spill] sm:$0xff] }
 0xe96   : > { %v5748_v7 = vsel %vm1673_vm6, %v11259_v23, %v13002_v3  ;;  %v13006_v23 = vld [vmem:[#allocation35_spill] sm:$0xff]  ;;  %v13010_v3 = vld [vmem:[#allocation164_spill] sm:$0xff] }
 0xe98   : > { %8107 = vmatpush3.bf16.msra.mxu0 %v5461_v46  ;;  %v13000_v46 = vld [vmem:[#allocation72_spill] sm:$0xff] }
 0xe99   : > { %8108 = vmatprep.subr.bf16.mxu0 %v12771_v1  ;;  %v5449_v35 = vsel %vm4909_vm14, %v13000_v46, %v12999_v25  ;;  %v5742_v25 = vsel %vm462_vm1, %v11268_v22, %v13004_v32  ;;  %v11778_v46 = vpop.permute.xlu1 %6611  ;;  %v13009_v22 = vld [vmem:[#allocation129_spill] sm:$0xff] }
 0xe9a   : > { %v5744_v53 = vsel %vm4909_vm14, %v5742_v25, %v13005_v31  ;;  %v13013_v25 = vld [vmem:[#allocation81_spill] sm:$0xff] }
 0xe9c   : > { %8109 = vmatpush3.bf16.msra.mxu0 %v5455_v20  ;;  %v13003_v20 = vld [vmem:[#allocation64_spill] sm:$0xff] }
 0xe9d   : > { %8110 = vmatprep.subr.bf16.mxu0 %v12771_v1  ;;  %v5750_v0 = vsel %vm462_vm1, %v5748_v7, %v13003_v20  ;;  %v5730_v7 = vsel %vm1673_vm6, %v13010_v3, %v13009_v22  ;;  %v11791_v20 = vpop.permute.xlu1 %6476 }
 0xea0   : > { %8111 = vmatpush3.bf16.msra.mxu0 %v5449_v35  ;;  %v5736_v35 = vsel %vm1673_vm6, %v11537_v9, %v13006_v23  ;;  %v13012_v9 = vld [vmem:[#allocation12_spill] sm:$0xff]  ;;  %v6019_v23 = vsel %vm4909_vm14, %v6017_v30, 0 }
 0xea1   : > { %8134 = vmatprep.subr.bf16.mxu0 %v12771_v1  ;;  %v5726_v31 = vsel %vm4909_vm14, %v13013_v25, %v13012_v9  ;;  %v13018_v25 = vld [vmem:[#allocation155_spill] sm:$0xff] }
 0xea3   : > { %8113 = vmatmul.mubr.msk.bf16.vlgmr.msra.gmra.mxu0 %vm4951_vm15, %v11625_v56 }
 0xea4   : > { %8135 = vmatpush3.bf16.msra.mxu0 %v5765_v42  ;;  %8148 = vmatprep.mubr.msk.bf16.mxu0 %vm8542_vm2, %v12771_v1  ;;  %v13007_v42 = vld [vmem:[#allocation86_spill] sm:$0xff] }
 0xea5   : > { %8136 = vmatprep.subr.bf16.mxu0 %v12771_v1  ;;  %v13008_v24 = vrot.slane %v13007_v42, 2 }
 0xea8   : > { %8137 = vmatpush3.bf16.msra.mxu0 %v5756_v60  ;;  %v5738_v60 = vsel %vm4909_vm14, %v5736_v35, %v13008_v24  ;;  %v13014_v35 = vld [vmem:[#allocation167_spill] sm:$0xff]  ;;  %v13015_v24 = vld [vmem:[#allocation144_spill] sm:$0xff] }
 0xea9   : > { %8138 = vmatprep.subr.bf16.mxu0 %v12771_v1 }
 0xeac   : > { %8139 = vmatpush3.bf16.msra.mxu0 %v5750_v0  ;;  %v13011_v0 = vld [vmem:[#allocation80_spill] sm:$0xff] }
 0xead   : > { %8140 = vmatprep.subr.bf16.mxu0 %v12771_v1  ;;  %v5732_v32 = vsel %vm462_vm1, %v5730_v7, %v13011_v0  ;;  %v13016_v7 = vld [vmem:[#allocation154_spill] sm:$0xff] }
 0xeae   : > { %v6003_v30 = vsel %vm1673_vm6, %v11471_v50, %v13016_v7  ;;  %v13019_v50 = vld [vmem:[#allocation38_spill] sm:$0xff]  ;;  %v13022_v7 = vld [vmem:[#allocation139_spill] sm:$0xff] }
 0xeb0   : > { %8141 = vmatpush3.bf16.msra.mxu0 %v5744_v53  ;;  %v11799_v53 = vpop.permute.xlu1 %6603 }
 0xeb1   : > { %8142 = vmatprep.subr.bf16.mxu0 %v12771_v1 }
 0xeb4   : > { %8143 = vmatpush3.bf16.msra.mxu0 %v5738_v60  ;;  %v6008_v60 = vsel %vm1673_vm6, %v13015_v24, %v13014_v35  ;;  %v11811_v22 = vpop.permute.xlu1 %6482  ;;  %v5991_v35 = vsel %vm1673_vm6, %v11645_v19, %v13019_v50  ;;  %v13020_v24 = vld [vmem:[#allocation123_spill] sm:$0xff]  ;;  %v13023_v19 = vld [vmem:[#allocation97_spill] sm:$0xff] }
 0xeb5   : > { %8144 = vmatprep.subr.bf16.mxu0 %v12771_v1  ;;  %v6010_v3 = vsel %vm4909_vm14, %v6008_v60, %v5979_v58  ;;  %v13021_v60 = vrot.slane %v13020_v24, 2  ;;  %v13026_v50 = vld [vmem:[#allocation83_spill] sm:$0xff]  ;;  %v13027_v24 = vld [vmem:[#allocation48_spill] sm:$0xff] }
 0xeb8   : > { %8145 = vmatpush3.bf16.msra.mxu0 %v5732_v32  ;;  %v6233_v0 = vpop.permute.xlu1 %6232  ;;  %v13017_v32 = vld [vmem:[#allocation59_spill] sm:$0xff] }
 0xeb9   : > { %8146 = vmatprep.subr.bf16.mxu0 %v12771_v1  ;;  %v6004_v9 = vsel %vm462_vm1, %v6003_v30, %v13017_v32  ;;  %v5981_v32 = vsel %vm4909_vm14, %v13023_v19, %v11511_v4 }
 0xebc   : > { %8147 = vmatpush3.bf16.msra.mxu0 %v5726_v31  ;;  %v5997_v31 = vsel %vm462_vm1, %v11475_v10, %v13018_v25  ;;  %v5985_v10 = vsel %vm1673_vm6, %v11499_v28, %v13022_v7 }
 0xebd   : > { %8170 = vmatprep.subr.bf16.mxu0 %v12771_v1  ;;  %v5999_v58 = vsel %vm4909_vm14, %v5997_v31, %v11497_v15  ;;  %v5987_v30 = vsel %vm462_vm1, %v5985_v10, %v11503_v41  ;;  %v13024_v41 = vld [vmem:[#allocation163_spill] sm:$0xff]  ;;  %v13029_v10 = vld [vmem:[#allocation152_spill] sm:$0xff] }
 0xebe   : > { %v6262_v25 = vsel %vm1673_vm6, %v13024_v41, %v11517_v48  ;;  %v13032_v41 = vld [vmem:[#allocation146_spill] sm:$0xff] }
 0xebf   : > { %8149 = vmatmul.mubr.msk.bf16.vlgmr.msra.gmra.mxu0 %vm4951_vm15, %v11625_v56  ;;  %v6264_v31 = vsel %vm4909_vm14, %v6262_v25, %v6233_v0  ;;  %v6235_v25 = vsel %vm4909_vm14, %v13032_v41, %v11699_v34  ;;  %v6537_v34 = vsel %vm1673_vm6, %v11573_v59, %v11714_v14 }
 0xec0   : > { %8171 = vmatpush3.bf16.msra.mxu0 %v6019_v23  ;;  %8184 = vmatprep.mubr.msk.bf16.mxu0 %vm8542_vm2, %v12771_v1  ;;  %v6271_v23 = vpop.permute.xlu1 %6270 }
 0xec1   : > { %8172 = vmatprep.subr.bf16.mxu0 %v12771_v1  ;;  %v6273_v28 = vsel %vm4909_vm14, %v6271_v23, 0 }
 0xec4   : > { %8173 = vmatpush3.bf16.msra.mxu0 %v6010_v3  ;;  %v5993_v3 = vsel %vm4909_vm14, %v5991_v35, %v13021_v60  ;;  %v11837_v15 = vpop.permute.xlu1 %6474  ;;  %v6251_v60 = vsel %vm462_vm1, %v11583_v43, %v13027_v24  ;;  %v13031_v43 = vld [vmem:[#allocation160_spill] sm:$0xff] }
 0xec5   : > { %8174 = vmatprep.subr.bf16.mxu0 %v12771_v1  ;;  %v6253_v48 = vsel %vm4909_vm14, %v6251_v60, %v11618_v47 }
 0xec8   : > { %8175 = vmatpush3.bf16.msra.mxu0 %v6004_v9  ;;  %v6469_v9 = vpop.permute.xlu1 %6468 }
 0xec9   : > { %8176 = vmatprep.subr.bf16.mxu0 %v12771_v1 }
 0xecc   : > { %8177 = vmatpush3.bf16.msra.mxu0 %v5999_v58  ;;  %v11855_v4 = vpop.permute.xlu1 %6595  ;;  %v13025_v58 = vld [vmem:[#allocation47_spill] sm:$0xff] }
 0xecd   : > { %8178 = vmatprep.subr.bf16.mxu0 %v12771_v1  ;;  %v6257_v23 = vsel %vm1673_vm6, %v11525_v8, %v13025_v58  ;;  %v13028_v8 = vld [vmem:[#allocation39_spill] sm:$0xff] }
 0xece   : > { %v6258_v35 = vsel %vm462_vm1, %v6257_v23, %v13026_v50  ;;  %v6245_v0 = vsel %vm1673_vm6, %v11730_v33, %v13028_v8  ;;  %v6488_v33 = vpop.permute.xlu0 %6487 }
 0xecf   : > { %v6532_v23 = vsel %vm1673_vm6, %v11768_v12, %v6488_v33  ;;  %v13033_v12 = vld [vmem:[#allocation25_spill] sm:$0xff] }
 0xed0   : > { %8179 = vmatpush3.bf16.msra.mxu0 %v5993_v3  ;;  %v6473_v3 = vpop.permute.xlu1 %6472  ;;  %v13037_v33 = vld [vmem:[#allocation165_spill] sm:$0xff] }
 0xed1   : > { %8180 = vmatprep.subr.bf16.mxu0 %v12771_v1 }
 0xed4   : > { %8181 = vmatpush3.bf16.msra.mxu0 %v5987_v30  ;;  %v6467_v7 = vpop.permute.xlu1 %6466  ;;  %v13030_v30 = vrot.slane %v13029_v10, 2 }
 0xed5   : > { %8182 = vmatprep.subr.bf16.mxu0 %v12771_v1  ;;  %v6510_v41 = vsel %vm4909_vm14, %v13037_v33, %v6467_v7  ;;  %v13048_v33 = vld [vmem:[#allocation28_spill] sm:$0xff] }
 0xed6   : > { %v6247_v19 = vsel %vm4909_vm14, %v6245_v0, %v13030_v30  ;;  %v13034_v0 = vld [vmem:[#allocation46_spill] sm:$0xff] }
 0xed7   : > { %v13035_v10 = vrot.slane %v13034_v0, 2  ;;  %v13042_v0 = vld [vmem:[#allocation107_spill] sm:$0xff] }
 0xed8   : > { %8183 = vmatpush3.bf16.msra.mxu0 %v5981_v32  ;;  %v6239_v32 = vsel %vm1673_vm6, %v11632_v40, %v13031_v43  ;;  %v6508_v47 = vpop.permute.xlu1 %6507 }
 0xed9   : > { %8206 = vmatprep.subr.bf16.mxu0 %v12771_v1  ;;  %v6539_v58 = vsel %vm4909_vm14, %v6537_v34, %v6508_v47 }
 0xedb   : > { %8185 = vmatmul.mubr.msk.bf16.vlgmr.msra.gmra.mxu0 %vm4951_vm15, %v11625_v56 }
 0xedc   : > { %8207 = vmatpush3.bf16.msra.mxu0 %v6273_v28  ;;  %8220 = vmatprep.mubr.msk.bf16.mxu0 %vm8542_vm2, %v12771_v1  ;;  %v6241_v28 = vsel %vm462_vm1, %v6239_v32, %v11682_v62  ;;  %v6479_v62 = vpop.permute.xlu0 %6478 }
 0xedd   : > { %8208 = vmatprep.subr.bf16.mxu0 %v12771_v1  ;;  %v6526_v24 = vsel %vm462_vm1, %v11791_v20, %v6479_v62 }
 0xede   : > { %v6528_v14 = vsel %vm4909_vm14, %v6526_v24, %v11811_v22  ;;  %v13039_v24 = vld [vmem:[#allocation116_spill] sm:$0xff] }
 0xee0   : > { %8209 = vmatpush3.bf16.msra.mxu0 %v6264_v31  ;;  %v6546_v31 = vpop.permute.xlu1 %6545  ;;  %v11901_v50 = vpop.permute.xlu0 %6418 }
 0xee1   : > { %8210 = vmatprep.subr.bf16.mxu0 %v12771_v1  ;;  %v6548_v40 = vsel %vm4909_vm14, %v6546_v31, 0 }
 0xee4   : > { %8211 = vmatpush3.bf16.msra.mxu0 %v6258_v35  ;;  %v6533_v35 = vsel %vm462_vm1, %v6532_v23, %v11105_v63  ;;  %v6471_v60 = vpop.permute.xlu0 %6470 }
 0xee5   : > { %8212 = vmatprep.subr.bf16.mxu0 %v12771_v1  ;;  %v6514_v20 = vsel %vm1673_vm6, %v6469_v9, %v6471_v60  ;;  %v13038_v9 = vld [vmem:[#allocation61_spill] sm:$0xff] }
 0xee6   : > { %v4679_v31 = vadd.f32 %v11528_v26, %v13038_v9  ;;  %v13040_v60 = vld [vmem:[#allocation21_spill] sm:$0xff]  ;;  %v13050_v9 = vrot.slane %v12966_v11, 2  ;;  %v13053_v11 = vld [vmem:[#allocation100_spill] sm:$0xff] }
 0xee8   : > { %8213 = vmatpush3.bf16.msra.mxu0 %v6253_v48  ;;  %v6520_v48 = vsel %vm1673_vm6, %v11837_v15, %v13033_v12  ;;  %v5074_v12 = vsel %vm1673_vm6, %v12983_v37, %v13040_v60  ;;  %v13047_v37 = vld [vmem:[#allocation88_spill] sm:$0xff] }
 0xee9   : > { %8214 = vmatprep.subr.bf16.mxu0 %v12771_v1  ;;  %v6522_v30 = vsel %vm4909_vm14, %v6520_v48, %v13035_v10  ;;  %v13041_v48 = vld [vmem:[#allocation113_spill] sm:$0xff]  ;;  %v13043_v10 = vld [vmem:[#allocation74_spill] sm:$0xff] }
 0xeec   : > { %8215 = vmatpush3.bf16.msra.mxu0 %v6247_v19  ;;  %v13036_v19 = vld [vmem:[#allocation3_spill] sm:$0xff] }
 0xeed   : > { %8216 = vmatprep.subr.bf16.mxu0 %v12771_v1 }
 0xef0   : > { %8217 = vmatpush3.bf16.msra.mxu0 %v6241_v28  ;;  %v6516_v28 = vsel %vm462_vm1, %v6514_v20, %v6473_v3 }
 0xef1   : > { %8218 = vmatprep.subr.bf16.mxu0 %v12771_v1 }
 0xef4   : > { %8219 = vmatpush3.bf16.msra.mxu0 %v6235_v25 }
 0xef5   : > { %8242 = vmatprep.subr.bf16.mxu0 %v12771_v1 }
 0xef7   : > { %8221 = vmatmul.mubr.msk.bf16.vlgmr.msra.gmra.mxu0 %vm4951_vm15, %v11625_v56 }
 0xef8   : > { %8243 = vmatpush3.bf16.msra.mxu0 %v6548_v40  ;;  %8256 = vmatprep.mubr.msk.bf16.mxu0 %vm8542_vm2, %v12771_v1 }
 0xef9   : > { %8244 = vmatprep.subr.bf16.mxu0 %v12771_v1 }
 0xefc   : > { %8245 = vmatpush3.bf16.msra.mxu0 %v6539_v58 }
 0xefd   : > { %8246 = vmatprep.subr.bf16.mxu0 %v12771_v1 }
 0xf00   : > { %8247 = vmatpush3.bf16.msra.mxu0 %v6533_v35 }
 0xf01   : > { %8248 = vmatprep.subr.bf16.mxu0 %v12771_v1 }
 0xf04   : > { %8249 = vmatpush3.bf16.msra.mxu0 %v6528_v14  ;;  %v5085_v14 = vsel %vm4909_vm14, %v13039_v24, 0 }
 0xf05   : > { %8250 = vmatprep.subr.bf16.mxu0 %v12771_v1 }
 0xf07   : > { %v4564_v8 = vpop.f32.mrf.mxu0 }
 0xf08   : > { %v4565_v43 = vadd.f32 %v4564_v8, %v13036_v19  ;;  %8251 = vmatpush3.bf16.msra.mxu0 %v6522_v30  ;;  %v5076_v8 = vsel %vm4909_vm14, %v5074_v12, %v13041_v48  ;;  %v5069_v30 = vsel %vm1673_vm6, %v13043_v10, %v13042_v0  ;;  %v13058_v12 = vld [vmem:[#allocation89_spill] sm:$0xff] }
 0xf09   : > { %v8006_v32 = vpop.f32.mrf.mxu0  ;;  %8252 = vmatprep.subr.bf16.mxu0 %v12771_v1 }
 0xf0a   : > { %v7297_v22 = vmul.f32 -1.442695, %v4565_v43  ;;  %v13045_v43 = vld [vmem:[#allocation108_spill] sm:$0xff] }
 0xf0b   : > { %v4567_v47 = vpop.f32.mrf.mxu0  ;;  %v13046_v32 = vld [vmem:[#allocation84_spill] sm:$0xff] }
 0xf0c   : > { %8507 = vpow2.f32 %v7297_v22  ;;  %8253 = vmatpush3.bf16.msra.mxu0 %v6516_v28  ;;  %v5063_v22 = vsel %vm462_vm1, %v13046_v32, %v13045_v43  ;;  %v13062_v32 = vld [vmem:[#allocation101_spill] sm:$0xff] }
 0xf0d   : > { %v8007_v15 = vpop.f32.mrf.mxu0  ;;  %8254 = vmatprep.subr.bf16.mxu0 %v12771_v1  ;;  %v5065_v47 = vsel %vm4909_vm14, %v5063_v22, %v13047_v37  ;;  %v5349_v22 = vsel %vm1673_vm6, %v12994_v38, %v13062_v32  ;;  %v13067_v38 = vld [vmem:[#allocation57_spill] sm:$0xff] }
 0xf0f   : > { %v4729_v25 = vpop.f32.mrf.mxu0 }
 0xf10   : > { %v4730_v40 = vadd.f32 %v4729_v25, %v9868_v5  ;;  %8255 = vmatpush3.bf16.msra.mxu0 %v6510_v41  ;;  %v13049_v41 = vld [vmem:[#allocation174_spill] sm:$0xff] }
 0xf11   : > { %v8018_v62 = vpop.f32.mrf.mxu0  ;;  %8278 = vmatprep.subr.bf16.mxu0 %v12771_v1  ;;  %v5057_v25 = vsel %vm1673_vm6, %v13049_v41, %v13048_v33  ;;  %v13064_v33 = vld [vmem:[#allocation117_spill] sm:$0xff]  ;;  %v13065_v41 = vld [vmem:[#allocation96_spill] sm:$0xff] }
 0xf12   : > { %v4735_v34 = vadd.f32 %v4730_v40, %v4679_v31  ;;  %v5059_v31 = vsel %vm4909_vm14, %v5057_v25, %v13050_v9  ;;  %v13051_v62 = vld [vmem:[#allocation106_spill] sm:$0xff]  ;;  %v5344_v25 = vsel %vm1673_vm6, %v13065_v41, %v13064_v33 }
 0xf13   : > { %v4732_v3 = vpop.f32.mrf.mxu0  ;;  %8257 = vmatmul.mubr.msk.bf16.vlgmr.msra.gmra.mxu0 %vm4951_vm15, %v11625_v56  ;;  %v13080_v33 = vld [vmem:[#allocation102_spill] sm:$0xff] }
 0xf14   : > { %v4736_v58 = vmax.f32 %v4735_v34, 0.0  ;;  %8292 = vmatprep.mubr.msk.bf16.mxu0 %vm8542_vm2, %v12771_v1  ;;  %v13052_v34 = vld [vmem:[#allocation85_spill] sm:$0xff] }
 0xf15   : > { %v8019_v7 = vpop.f32.mrf.mxu0  ;;  %v5051_v3 = vsel %vm1673_vm6, %v13052_v34, %v13051_v62  ;;  %v13069_v34 = vld [vmem:[#allocation36_spill] sm:$0xff] }
 0xf16   : > { %v4737_v23 = vpack.c.bf16 %v4736_v58, %v4736_v58 }
 0xf18   : > { %v4739_v35 = vsel %vm1673_vm6, %v4737_v23, 0  ;;  %v5053_v23 = vsel %vm462_vm1, %v5051_v3, %v13053_v11  ;;  %v5345_v3 = vsel %vm462_vm1, %v5344_v25, %v13069_v34  ;;  %v13071_v11 = vld [vmem:[#allocation29_spill] sm:$0xff] }
 0xf19   : > { %v8508_v26 = vpop.eup %8507  ;;  %8021 = vmatpush3.bf16.msra.mxu1 %v4739_v35  ;;  %v13054_v35 = vld [vmem:[#allocation5_spill] sm:$0xff] }
 0xf1a   : > { %v4573_v5 = vadd.f32 1.0, %v8508_v26  ;;  %8044 = vmatprep.subr.bf16.mxu1 %v12771_v1  ;;  %v13055_v26 = vrot.slane %v13054_v35, 4  ;;  %v13072_v35 = vld [vmem:[#allocation9_spill] sm:$0xff] }
 0xf1c   : > { %8509 = vrcp.f32 %v4573_v5  ;;  %8023 = vmatmul.mubr.msk.bf16.vlgmr.msra.gmra.mxu1 %vm1669_vm7, %v11395_v17  ;;  %v13044_v17 = vld [vmem:[#allocation34_spill] sm:$0xff]  ;;  %v13056_v5 = vld [vmem:[#allocation20_spill] sm:$0xff] }
 0xf1d   : > { %8045 = vmatpush3.bf16.msra.mxu1 %v5085_v14  ;;  %8058 = vmatprep.mubr.msk.bf16.mxu1 %vm8542_vm2, %v12771_v1  ;;  %v5070_v20 = vsel %vm462_vm1, %v5069_v30, %v13044_v17  ;;  %v5045_v24 = vsel %vm462_vm1, %v13056_v5, %v13055_v26  ;;  %v13057_v14 = vld [vmem:[#allocation43_spill] sm:$0xff]  ;;  %v13060_v30 = vld [vmem:[#allocation126_spill] sm:$0xff]  ;;  %v6735_v26 = vpack.c.b16 %v13072_v35, %v13072_v35  ;;  %v13087_v35 = vld [vmem:[#allocation132_spill] sm:$0xff] }
 0xf1e   : > { %8046 = vmatprep.subr.bf16.mxu1 %v12771_v1  ;;  %v5047_v48 = vsel %vm4909_vm14, %v5045_v24, %v13058_v12  ;;  %v5360_v17 = vsel %vm4909_vm14, %v13060_v30, 0  ;;  %v13073_v5 = vld [vmem:[#allocation91_spill] sm:$0xff]  ;;  %v13074_v12 = vld [vmem:[#allocation53_spill] sm:$0xff]  ;;  %v13076_v30 = vld [vmem:[#allocation112_spill] sm:$0xff] }
 0xf21   : > { %8047 = vmatpush3.bf16.msra.mxu1 %v5076_v8  ;;  %v13059_v8 = vld [vmem:[#allocation56_spill] sm:$0xff] }
 0xf22   : > { %8048 = vmatprep.subr.bf16.mxu1 %v12771_v1  ;;  %v12000_v0 = vpack.c.b16 %v13059_v8, %v13059_v8  ;;  %v13075_v8 = vld [vmem:[#allocation24_spill] sm:$0xff] }
 0xf24   : > { %v6956_v37 = vsel %vm462_vm1, %v12000_v0, 0 }
 0xf25   : > { %8049 = vmatpush3.bf16.msra.mxu1 %v5070_v20  ;;  %v13061_v20 = vld [vmem:[#allocation42_spill] sm:$0xff] }
 0xf26   : > { %8050 = vmatprep.subr.bf16.mxu1 %v12771_v1 }
 0xf29   : > { %v8510_v28 = vpop.eup %8509  ;;  %8051 = vmatpush3.bf16.msra.mxu1 %v5065_v47 }
 0xf2a   : > { %v4592_v15 = vmul.f32 %v8510_v28, %v11747_v16  ;;  %8052 = vmatprep.subr.bf16.mxu1 %v12771_v1  ;;  %v13063_v28 = vld [vmem:[#allocation122_spill] sm:$0xff] }
 0xf2b   : > { %v12002_v10 = vpop.f32.mrf.mxu0 }
 0xf2c   : > { %v11966_v40 = vpack.c.bf16 %v4592_v15, %v4592_v15  ;;  %v5351_v15 = vsel %vm4909_vm14, %v5349_v22, %v13063_v28  ;;  %v13078_v22 = vld [vmem:[#allocation115_spill] sm:$0xff] }
 0xf2d   : > { %8053 = vmatpush3.bf16.msra.mxu1 %v5059_v31  ;;  %v8042_v43 = vpop.f32.mrf.mxu0  ;;  %v13066_v31 = vld [vmem:[#allocation58_spill] sm:$0xff] }
 0xf2e   : > { %v6740_v58 = vrot.slane %v11966_v40, 6  ;;  %v6633_v16 = vrot.slane %v11966_v40, 2  ;;  %8054 = vmatprep.subr.bf16.mxu1 %v12771_v1  ;;  %v6668_v7 = vrot.slane %v11966_v40, 4  ;;  %v13068_v62 = vpack.c.b16 %v13066_v31, %v13067_v38  ;;  %v13083_v31 = vld [vmem:[#allocation67_spill] sm:$0xff] }
 0xf2f   : > { %v4995_v47 = vpop.f32.mrf.mxu0  ;;  %v13077_v43 = vrot.slane %v10242_v39, 2  ;;  %v13081_v39 = vld [vmem:[#allocation45_spill] sm:$0xff] }
 0xf30   : > { %6741 = vrot.lane.b32.xlu1 %v6740_v58, %s8544_s29  ;;  %6634 = vrot.lane.b32.xlu0 %v6633_v16, %s8543_s28  ;;  %v11990_v60 = vsel %vm462_vm1, %v13057_v14, %v6668_v7 }
 0xf31   : > { %8055 = vmatpush3.bf16.msra.mxu1 %v5053_v23  ;;  %v8043_v9 = vpop.f32.mrf.mxu0 }
 0xf32   : > { %8056 = vmatprep.subr.bf16.mxu1 %v12771_v1  ;;  %v13082_v9 = vld [vmem:[#allocation92_spill] sm:$0xff] }
 0xf33   : > { %v5322_v38 = vsel %vm4909_vm14, %v13083_v31, %v13082_v9  ;;  %v13099_v9 = vld [vmem:[#allocation150_spill] sm:$0xff] }
 0xf34   : > { %6732 = vrot.lane.b32.xlu1 %v6668_v7, %s8543_s28  ;;  %6672 = vrot.lane.b32.xlu0 %v11990_v60, %s8544_s29  ;;  %v13070_v7 = vld [vmem:[#allocation118_spill] sm:$0xff] }
 0xf35   : > { %8057 = vmatpush3.bf16.msra.mxu1 %v5047_v48  ;;  %v5338_v23 = vsel %vm462_vm1, %v13071_v11, %v13070_v7  ;;  %v6886_v48 = vpack.c.b16 %v13074_v12, %v13074_v12  ;;  %v13086_v11 = vld [vmem:[#allocation103_spill] sm:$0xff]  ;;  %v13089_v12 = vld [vmem:[#allocation145_spill] sm:$0xff] }
 0xf36   : > { %8080 = vmatprep.subr.bf16.mxu1 %v12771_v1  ;;  %v5340_v24 = vsel %vm4909_vm14, %v5338_v23, %v13073_v5  ;;  %v5603_v23 = vsel %vm1673_vm6, %v13007_v42, %v13086_v11  ;;  %v13092_v42 = vld [vmem:[#allocation128_spill] sm:$0xff] }
 0xf37   : > { %v5605_v5 = vsel %vm4909_vm14, %v5603_v23, %v13087_v35  ;;  %v13102_v23 = vld [vmem:[#allocation93_spill] sm:$0xff]  ;;  %v13103_v35 = vld [vmem:[#allocation76_spill] sm:$0xff] }
 0xf38   : > { %6593 = vrot.lane.b32.xlu0 %v13061_v20, %s8543_s28  ;;  %8059 = vmatmul.mubr.msk.bf16.vlgmr.msra.gmra.mxu1 %vm4951_vm15, %v11625_v56 }
 0xf39   : > { %8081 = vmatpush3.bf16.msra.mxu1 %v5360_v17  ;;  %8094 = vmatprep.mubr.msk.bf16.mxu1 %vm8542_vm2, %v12771_v1  ;;  %v5332_v17 = vsel %vm1673_vm6, %v13076_v30, %v13075_v8  ;;  %v13090_v8 = vld [vmem:[#allocation148_spill] sm:$0xff]  ;;  %v13091_v30 = vld [vmem:[#allocation37_spill] sm:$0xff] }
 0xf3a   : > { %8082 = vmatprep.subr.bf16.mxu1 %v12771_v1  ;;  %v5334_v32 = vsel %vm4909_vm14, %v5332_v17, %v13077_v43  ;;  %v13093_v43 = vld [vmem:[#allocation78_spill] sm:$0xff] }
 0xf3c   : > { %6958 = vrot.lane.b32.xlu0 %v6956_v37, %s8544_s29  ;;  %v13079_v37 = vld [vmem:[#allocation99_spill] sm:$0xff] }
 0xf3d   : > { %8083 = vmatpush3.bf16.msra.mxu1 %v5351_v15  ;;  %v5326_v47 = vsel %vm1673_vm6, %v13079_v37, %v13078_v22  ;;  %v13094_v22 = vld [vmem:[#allocation87_spill] sm:$0xff] }
 0xf3e   : > { %8084 = vmatprep.subr.bf16.mxu1 %v12771_v1  ;;  %v5328_v41 = vsel %vm462_vm1, %v5326_v47, %v13080_v33  ;;  %v13095_v47 = vld [vmem:[#allocation19_spill] sm:$0xff] }
 0xf40   : > { %6923 = vrot.lane.b32.xlu0 %v13068_v62, %s8543_s28  ;;  %v13084_v62 = vld [vmem:[#allocation40_spill] sm:$0xff] }
 0xf41   : > { %8085 = vmatpush3.bf16.msra.mxu1 %v5345_v3  ;;  %v12068_v34 = vpack.c.b16 %v13084_v62, %v13084_v62  ;;  %v13085_v3 = vld [vmem:[#allocation136_spill] sm:$0xff] }
 0xf42   : > { %8086 = vmatprep.subr.bf16.mxu1 %v12771_v1  ;;  %v5614_v7 = vsel %vm4909_vm14, %v13085_v3, 0  ;;  %v13100_v3 = vld [vmem:[#allocation147_spill] sm:$0xff] }
 0xf44   : > { %6738 = vrot.lane.b32.xlu0 %v6735_v26, %s8544_s29 }
 0xf45   : > { %8087 = vmatpush3.bf16.msra.mxu1 %v5340_v24  ;;  %v13088_v24 = vld [vmem:[#allocation127_spill] sm:$0xff] }
 0xf46   : > { %8088 = vmatprep.subr.bf16.mxu1 %v12771_v1 }
 0xf47   : > { %v12046_v20 = vpop.f32.mrf.mxu0 }
 0xf48   : > { %6889 = vrot.lane.b32.xlu0 %v6886_v48, %s8544_s29  ;;  %v5598_v48 = vsel %vm1673_vm6, %v13089_v12, %v13088_v24  ;;  %v13104_v24 = vld [vmem:[#allocation157_spill] sm:$0xff] }
 0xf49   : > { %8089 = vmatpush3.bf16.msra.mxu1 %v5334_v32  ;;  %v8078_v28 = vpop.f32.mrf.mxu0  ;;  %v5599_v17 = vsel %vm462_vm1, %v5598_v48, %v13091_v30  ;;  %v5592_v32 = vsel %vm462_vm1, %v13093_v43, %v13092_v42  ;;  %v5892_v12 = vsel %vm4909_vm14, %v13104_v24, 0  ;;  %v13105_v48 = vld [vmem:[#allocation137_spill] sm:$0xff]  ;;  %v13108_v42 = vld [vmem:[#allocation55_spill] sm:$0xff] }
 0xf4a   : > { %8090 = vmatprep.subr.bf16.mxu1 %v12771_v1  ;;  %v5594_v37 = vsel %vm4909_vm14, %v5592_v32, %v13094_v22  ;;  %v13096_v28 = vld [vmem:[#allocation121_spill] sm:$0xff]  ;;  %v13109_v32 = vld [vmem:[#allocation138_spill] sm:$0xff] }
 0xf4b   : > { %v5251_v15 = vpop.f32.mrf.mxu0  ;;  %v13110_v22 = vld [vmem:[#allocation49_spill] sm:$0xff] }
 0xf4c   : > { %6730 = vrot.lane.b32.xlu0 %v13057_v14, %s8543_s28  ;;  %v5586_v15 = vsel %vm1673_vm6, %v13096_v28, %v13095_v47  ;;  %v4787_v47 = vrot.slane %v4576_v21, 7  ;;  %v4788_v28 = vrot.slane %v4577_v6, 6  ;;  %v13113_v21 = vld [vmem:[#allocation131_spill] sm:$0xff] }
 0xf4d   : > { %8091 = vmatpush3.bf16.msra.mxu1 %v5328_v41  ;;  %v8079_v25 = vpop.f32.mrf.mxu0  ;;  %v13097_v41 = vrot.slane %v12989_v18, 2  ;;  %v5864_v52 = vsel %vm1673_vm6, %v13113_v21, %v13112_v54  ;;  %v13130_v54 = vld [vmem:[#allocation26_spill] sm:$0xff] }
 0xf4e   : > { %8092 = vmatprep.subr.bf16.mxu1 %v12771_v1 }
 0xf4f   : > { %v5588_v25 = vsel %vm4909_vm14, %v5586_v15, %v13097_v41  ;;  %v4790_v15 = vrot.slane %v4578_v29, 5  ;;  %v4792_v41 = vrot.slane %v4579_v49, 4  ;;  %v5866_v49 = vsel %vm4909_vm14, %v5864_v52, %v13114_v51 }
 0xf50   : > { %6881 = vrot.lane.b32.xlu0 %v13081_v39, %s8543_s28 }
 0xf51   : > { %8093 = vmatpush3.bf16.msra.mxu1 %v5322_v38 }
 0xf52   : > { %8116 = vmatprep.subr.bf16.mxu1 %v12771_v1 }
 0xf54   : > { %6736 = vrot.lane.b32.xlu0 %v12068_v34, %s8544_s29  ;;  %8095 = vmatmul.mubr.msk.bf16.vlgmr.msra.gmra.mxu1 %vm4951_vm15, %v11625_v56 }
 0xf55   : > { %8117 = vmatpush3.bf16.msra.mxu1 %v5614_v7  ;;  %8130 = vmatprep.mubr.msk.bf16.mxu1 %vm8542_vm2, %v12771_v1  ;;  %v13101_v7 = vld [vmem:[#allocation104_spill] sm:$0xff] }
 0xf56   : > { %8118 = vmatprep.subr.bf16.mxu1 %v12771_v1 }
 0xf58   : > { %6728 = vrot.lane.b32.xlu0 %v11573_v59, %s8544_s29 }
 0xf59   : > { %8119 = vmatpush3.bf16.msra.mxu1 %v5605_v5  ;;  %v5576_v5 = vsel %vm4909_vm14, %v13103_v35, %v13102_v23  ;;  %v13118_v23 = vld [vmem:[#allocation95_spill] sm:$0xff] }
 0xf5a   : > { %8120 = vmatprep.subr.bf16.mxu1 %v12771_v1  ;;  %v5854_v35 = vsel %vm4909_vm14, %v13119_v36, %v13118_v23  ;;  %v13134_v36 = vld [vmem:[#allocation171_spill] sm:$0xff] }
 0xf5c   : > { %6722 = vrot.lane.b32.xlu0 %v13090_v8, %s8543_s28  ;;  %v13106_v8 = vld [vmem:[#allocation51_spill] sm:$0xff] }
 0xf5d   : > { %8121 = vmatpush3.bf16.msra.mxu1 %v5599_v17  ;;  %v5876_v30 = vsel %vm1673_vm6, %v13106_v8, %v13105_v48  ;;  %v13107_v17 = vld [vmem:[#allocation143_spill] sm:$0xff]  ;;  %v13121_v48 = vld [vmem:[#allocation158_spill] sm:$0xff]  ;;  %v13122_v8 = vld [vmem:[#allocation168_spill] sm:$0xff] }
 0xf5e   : > { %8122 = vmatprep.subr.bf16.mxu1 %v12771_v1  ;;  %v5877_v43 = vsel %vm462_vm1, %v5876_v30, %v13108_v42  ;;  %v6130_v30 = vsel %vm1673_vm6, %v13122_v8, %v13121_v48  ;;  %v13137_v8 = vld [vmem:[#allocation173_spill] sm:$0xff] }
 0xf60   : > { %6873 = vrot.lane.b32.xlu0 %v6735_v26, %s8543_s28  ;;  %v13098_v26 = vld [vmem:[#allocation124_spill] sm:$0xff] }
 0xf61   : > { %8123 = vmatpush3.bf16.msra.mxu1 %v5594_v37  ;;  %v5580_v31 = vsel %vm1673_vm6, %v13099_v9, %v13098_v26  ;;  %v5870_v37 = vsel %vm462_vm1, %v13110_v22, %v13109_v32  ;;  %v4789_v9 = vsel %vm1574_vm3, %v4788_v28, %v4787_v47  ;;  %v13125_v22 = vld [vmem:[#allocation159_spill] sm:$0xff] }
 0xf62   : > { %8124 = vmatprep.subr.bf16.mxu1 %v12771_v1  ;;  %v5582_v11 = vsel %vm462_vm1, %v5580_v31, %v13101_v7  ;;  %v4791_v61 = vsel %vm1577_vm4, %v4790_v15, %v4789_v9  ;;  %v13115_v31 = vld [vmem:[#allocation135_spill] sm:$0xff]  ;;  %v13127_v15 = vld [vmem:[#allocation110_spill] sm:$0xff]  ;;  %v13129_v9 = vld [vmem:[#allocation176_spill] sm:$0xff] }
 0xf63   : > { %v12106_v33 = vpop.f32.mrf.mxu0  ;;  %v12166_v29 = vsel %vm1580_vm5, %v4792_v41, %v4791_v61 }
 0xf64   : > { %6726 = vrot.lane.b32.xlu0 %v11105_v63, %s8544_s29  ;;  %v1531_v63 = vld [vmem:[%s12506_s11] sm:$0xf] }
 0xf65   : > { %8125 = vmatpush3.bf16.msra.mxu1 %v5588_v25  ;;  %v8114_v38 = vpop.f32.mrf.mxu0  ;;  %v13111_v25 = vld [vmem:[#allocation98_spill] sm:$0xff] }
 0xf66   : > { %8126 = vmatprep.subr.bf16.mxu1 %v12771_v1  ;;  %v5872_v26 = vsel %vm4909_vm14, %v5870_v37, %v13111_v25  ;;  %v13116_v38 = vld [vmem:[#allocation166_spill] sm:$0xff]  ;;  %v13126_v37 = vld [vmem:[#allocation172_spill] sm:$0xff] }
 0xf67   : > { %v5526_v62 = vpop.f32.mrf.mxu0  ;;  %v6124_v47 = vsel %vm462_vm1, %v13126_v37, %v13125_v22  ;;  %v13139_v37 = vld [vmem:[#allocation50_spill] sm:$0xff] }
 0xf68   : > { %6720 = vrot.lane.b32.xlu0 %v13100_v3, %s8543_s28  ;;  %v5858_v62 = vsel %vm1673_vm6, %v13116_v38, %v13115_v31  ;;  %v6126_v41 = vsel %vm4909_vm14, %v6124_v47, %v13127_v15  ;;  %v6387_v47 = vsel %vm1673_vm6, %v11672_v55, %v13139_v37  ;;  %v13142_v55 = vld [vmem:[#allocation141_spill] sm:$0xff] }
 0xf69   : > { %8127 = vmatpush3.bf16.msra.mxu1 %v5582_v11  ;;  %v8115_v18 = vpop.f32.mrf.mxu0  ;;  %v13117_v11 = vld [vmem:[#allocation105_spill] sm:$0xff] }
 0xf6a   : > { %8128 = vmatprep.subr.bf16.mxu1 %v12771_v1 }
 0xf6c   : > { %4948 = vperm.xlu0 %8343, %v1531_v63   ;;  %v5860_v63 = vsel %vm462_vm1, %v5858_v62, %v13117_v11 }
 0xf6d   : > { %8129 = vmatpush3.bf16.msra.mxu1 %v5576_v5  ;;  %v13120_v5 = vld [vmem:[#allocation170_spill] sm:$0xff] }
 0xf6e   : > { %8152 = vmatprep.subr.bf16.mxu1 %v12771_v1  ;;  %v6146_v24 = vsel %vm4909_vm14, %v13120_v5, 0  ;;  %v13135_v5 = vld [vmem:[#allocation175_spill] sm:$0xff] }
 0xf70   : > { %8131 = vmatmul.mubr.msk.bf16.vlgmr.msra.gmra.mxu1 %vm4951_vm15, %v11625_v56 }
 0xf71   : > { %8153 = vmatpush3.bf16.msra.mxu1 %v5892_v12  ;;  %8166 = vmatprep.mubr.msk.bf16.mxu1 %vm8542_vm2, %v12771_v1  ;;  %v12188_v12 = vpop.permute.xlu0 %6597 }
 0xf72   : > { %8154 = vmatprep.subr.bf16.mxu1 %v12771_v1 }
 0xf75   : > { %8155 = vmatpush3.bf16.msra.mxu1 %v13107_v17  ;;  %v13123_v17 = vld [vmem:[#allocation162_spill] sm:$0xff]  ;;  %v12196_v42 = vpop.permute.xlu0 %6599 }
 0xf76   : > { %8156 = vmatprep.subr.bf16.mxu1 %v12771_v1 }
 0xf79   : > { %8157 = vmatpush3.bf16.msra.mxu1 %v5877_v43  ;;  %v13124_v43 = vld [vmem:[#allocation82_spill] sm:$0xff]  ;;  %v12204_v28 = vpop.permute.xlu0 %6614 }
 0xf7a   : > { %8158 = vmatprep.subr.bf16.mxu1 %v12771_v1  ;;  %v6131_v32 = vsel %vm462_vm1, %v6130_v30, %v13124_v43  ;;  %v6399_v30 = vsel %vm462_vm1, %v11606_v27, %v13137_v8  ;;  %v13138_v43 = vld [vmem:[#allocation130_spill] sm:$0xff]  ;;  %v13140_v27 = vld [vmem:[#allocation169_spill] sm:$0xff] }
 0xf7d   : > { %8159 = vmatpush3.bf16.msra.mxu1 %v5872_v26  ;;  %v13128_v26 = vld [vmem:[#allocation156_spill] sm:$0xff]  ;;  %v12215_v52 = vpop.permute.xlu0 %6605 }
 0xf7e   : > { %8160 = vmatprep.subr.bf16.mxu1 %v12771_v1  ;;  %v6112_v61 = vsel %vm1673_vm6, %v13129_v9, %v13128_v26  ;;  %v12263_v26 = vpop.permute.xlu1 %6780 }
 0xf7f   : > { %v12163_v6 = vpop.f32.mrf.mxu0 }
 0xf81   : > { %8161 = vmatpush3.bf16.msra.mxu1 %v5866_v49  ;;  %v8150_v3 = vpop.f32.mrf.mxu0  ;;  %v13131_v49 = vld [vmem:[#allocation111_spill] sm:$0xff] }
 0xf82   : > { %8162 = vmatprep.subr.bf16.mxu1 %v12771_v1  ;;  %v6114_v31 = vsel %vm462_vm1, %v6112_v61, %v13131_v49  ;;  %v13132_v3 = vld [vmem:[#allocation120_spill] sm:$0xff] }
 0xf83   : > { %v5804_v7 = vpop.f32.mrf.mxu0  ;;  %v13141_v61 = vld [vmem:[#allocation140_spill] sm:$0xff] }
 0xf84   : > { %v13133_v7 = vld [vmem:[#allocation125_spill] sm:$0xff] }
 0xf85   : > { %8163 = vmatpush3.bf16.msra.mxu1 %v5860_v63  ;;  %v8151_v18 = vpop.f32.mrf.mxu0  ;;  %v6108_v11 = vsel %vm4909_vm14, %v13133_v7, %v13132_v3 }
 0xf86   : > { %8164 = vmatprep.subr.bf16.mxu1 %v12771_v1  ;;  %v6421_v18 = vsel %vm4909_vm14, %v11901_v50, 0  ;;  %v13136_v50 = vld [vmem:[#allocation41_spill] sm:$0xff] }
 0xf89   : > { %8165 = vmatpush3.bf16.msra.mxu1 %v5854_v35  ;;  %v6405_v35 = vsel %vm1673_vm6, %v11531_v2, %v13134_v36  ;;  %v6401_v2 = vsel %vm4909_vm14, %v6399_v30, %v13138_v43  ;;  %v6653_v30 = vsel %vm462_vm1, %v11799_v53, %v12215_v52  ;;  %v6641_v53 = vsel %vm1673_vm6, %v11855_v4, %v12188_v12 }
 0xf8a   : > { %8188 = vmatprep.subr.bf16.mxu1 %v12771_v1  ;;  %v6406_v48 = vsel %vm462_vm1, %v6405_v35, %v13136_v50  ;;  %v13144_v35 = vld [vmem:[#allocation142_spill] sm:$0xff] }
 0xf8c   : > { %8167 = vmatmul.mubr.msk.bf16.vlgmr.msra.gmra.mxu1 %vm4951_vm15, %v11625_v56 }
 0xf8d   : > { %8189 = vmatpush3.bf16.msra.mxu1 %v6146_v24  ;;  %8202 = vmatprep.mubr.msk.bf16.mxu1 %vm8542_vm2, %v12771_v1 }
 0xf8e   : > { %8190 = vmatprep.subr.bf16.mxu1 %v12771_v1 }
 0xf91   : > { %8191 = vmatpush3.bf16.msra.mxu1 %v13123_v17 }
 0xf92   : > { %8192 = vmatprep.subr.bf16.mxu1 %v12771_v1 }
 0xf95   : > { %8193 = vmatpush3.bf16.msra.mxu1 %v6131_v32 }
 0xf96   : > { %8194 = vmatprep.subr.bf16.mxu1 %v12771_v1 }
 0xf99   : > { %8195 = vmatpush3.bf16.msra.mxu1 %v6126_v41 }
 0xf9a   : > { %8196 = vmatprep.subr.bf16.mxu1 %v12771_v1 }
 0xf9b   : > { %v12209_v25 = vpop.f32.mrf.mxu0 }
 0xf9d   : > { %8197 = vmatpush3.bf16.msra.mxu1 %v13130_v54  ;;  %v8186_v21 = vpop.f32.mrf.mxu0  ;;  %v6389_v54 = vsel %vm462_vm1, %v6387_v47, %v13141_v61  ;;  %v6643_v47 = vsel %vm462_vm1, %v6641_v53, %v12196_v42 }
 0xf9e   : > { %8198 = vmatprep.subr.bf16.mxu1 %v12771_v1 }
 0xf9f   : > { %v6058_v51 = vpop.f32.mrf.mxu0 }
 0xfa1   : > { %8199 = vmatpush3.bf16.msra.mxu1 %v6114_v31  ;;  %v8187_v38 = vpop.f32.mrf.mxu0  ;;  %v13143_v31 = vld [vmem:[#allocation153_spill] sm:$0xff] }
 0xfa2   : > { %v6635_v62 = vpop.permute.xlu0 %6634  ;;  %8200 = vmatprep.subr.bf16.mxu1 %v12771_v1  ;;  %v12268_v49 = vpop.permute.xlu1 %6741  ;;  %v6383_v38 = vsel %vm4909_vm14, %v13143_v31, %v13142_v55 }
 0xfa5   : > { %8201 = vmatpush3.bf16.msra.mxu1 %v6108_v11 }
 0xfa6   : > { %v6673_v63 = vpop.permute.xlu0 %6672  ;;  %8224 = vmatprep.subr.bf16.mxu1 %v12771_v1  ;;  %v6733_v11 = vpop.permute.xlu1 %6732 }
 0xfa7   : > { %v6675_v7 = vsel %vm4909_vm14, %v6673_v63, 0 }
 0xfa8   : > { %8203 = vmatmul.mubr.msk.bf16.vlgmr.msra.gmra.mxu1 %vm4951_vm15, %v11625_v56 }
 0xfa9   : > { %8225 = vmatpush3.bf16.msra.mxu1 %v6421_v18  ;;  %8238 = vmatprep.mubr.msk.bf16.mxu1 %vm8542_vm2, %v12771_v1 }
 0xfaa   : > { %v12231_v23 = vpop.permute.xlu0 %6593  ;;  %8226 = vmatprep.subr.bf16.mxu1 %v12771_v1 }
 0xfad   : > { %8227 = vmatpush3.bf16.msra.mxu1 %v13135_v5  ;;  %v6664_v5 = vsel %vm1673_vm6, %v11966_v40, %v13144_v35 }
 0xfae   : > { %v12238_v24 = vpop.permute.xlu0 %6958  ;;  %8228 = vmatprep.subr.bf16.mxu1 %v12771_v1  ;;  %v6666_v63 = vsel %vm4909_vm14, %v6664_v5, %v6635_v62  ;;  %v13145_v62 = vld [vmem:[#allocation161_spill] sm:$0xff] }
 0xfaf   : > { %v6655_v43 = vsel %vm4909_vm14, %v6653_v30, %v13145_v62  ;;  %v6961_v42 = vsel %vm4909_vm14, %v12238_v24, 0  ;;  %v13147_v30 = vld [vmem:[#allocation60_spill] sm:$0xff] }
 0xfb0   : > { %v6765_v62 = vpack.c.b16 %v13147_v30, %v13147_v30 }
 0xfb1   : > { %8229 = vmatpush3.bf16.msra.mxu1 %v6406_v48 }
 0xfb2   : > { %v12246_v17 = vpop.permute.xlu0 %6923  ;;  %8230 = vmatprep.subr.bf16.mxu1 %v12771_v1 }
 0xfb5   : > { %8231 = vmatpush3.bf16.msra.mxu1 %v6401_v2 }
 0xfb6   : > { %v12251_v32 = vpop.permute.xlu0 %6738  ;;  %8232 = vmatprep.subr.bf16.mxu1 %v12771_v1 }
 0xfb7   : > { %v12254_v22 = vpop.f32.mrf.mxu0 }
 0xfb9   : > { %8233 = vmatpush3.bf16.msra.mxu1 %v13140_v27  ;;  %v8222_v15 = vpop.f32.mrf.mxu0 }
 0xfba   : > { %v12260_v41 = vpop.permute.xlu0 %6889  ;;  %8234 = vmatprep.subr.bf16.mxu1 %v12771_v1  ;;  %v13146_v15 = vld [vmem:[#allocation44_spill] sm:$0xff] }
 0xfbb   : > { %v6312_v9 = vpop.f32.mrf.mxu0 }
 0xfbd   : > { %8235 = vmatpush3.bf16.msra.mxu1 %v6389_v54  ;;  %v8223_v21 = vpop.f32.mrf.mxu0 }
 0xfbe   : > { %v6731_v51 = vpop.permute.xlu0 %6730  ;;  %8236 = vmatprep.subr.bf16.mxu1 %v12771_v1 }
 0xfbf   : > { %v6803_v18 = vsel %vm462_vm1, %v6731_v51, %v6733_v11  ;;  %v12329_v51 = vld [vmem:[%s12505_s10] sm:$0x3] }
 0xfc1   : > { %8237 = vmatpush3.bf16.msra.mxu1 %v6383_v38 }
 0xfc2   : > { %v12273_v3 = vpop.permute.xlu0 %6881  ;;  %8260 = vmatprep.subr.bf16.mxu1 %v12771_v1 }
 0xfc4   : > { %8239 = vmatmul.mubr.msk.bf16.vlgmr.msra.gmra.mxu1 %vm4951_vm15, %v11625_v56  ;;  %v6659_v56 = vsel %vm1673_vm6, %v11778_v46, %v12204_v28 }
 0xfc5   : > { %8261 = vmatpush3.bf16.msra.mxu1 %v6675_v7  ;;  %8274 = vmatprep.mubr.msk.bf16.mxu1 %vm8542_vm2, %v12771_v1  ;;  %v6660_v8 = vsel %vm462_vm1, %v6659_v56, %v13057_v14 }
 0xfc6   : > { %v6737_v36 = vpop.permute.xlu0 %6736  ;;  %8262 = vmatprep.subr.bf16.mxu1 %v12771_v1 }
 0xfc7   : > { %v12287_v50 = vsel %vm4909_vm14, %v6803_v18, %v6737_v36 }
 0xfc9   : > { %8263 = vmatpush3.bf16.msra.mxu1 %v6666_v63 }
 0xfca   : > { %8264 = vmatprep.subr.bf16.mxu1 %v12771_v1  ;;  %v12294_v48 = vpop.permute.xlu0 %6728 }
 0xfcd   : > { %8265 = vmatpush3.bf16.msra.mxu1 %v6660_v8  ;;  %v6809_v8 = vsel %vm1673_vm6, %v12251_v32, %v12268_v49 }
 0xfce   : > { %8266 = vmatprep.subr.bf16.mxu1 %v12771_v1  ;;  %v12304_v2 = vpop.permute.xlu0 %6722 }
 0xfd1   : > { %8267 = vmatpush3.bf16.msra.mxu1 %v6655_v43  ;;  %v12383_v43 = vsel %vm462_vm1, %v6809_v8, %v6765_v62 }
 0xfd2   : > { %8268 = vmatprep.subr.bf16.mxu1 %v12771_v1  ;;  %v12312_v52 = vpop.permute.xlu0 %6873 }
 0xfd3   : > { %v6584_v46 = vpop.f32.mrf.mxu0 }
 0xfd5   : > { %8269 = vmatpush3.bf16.msra.mxu1 %v11704_v45  ;;  %v8258_v28 = vpop.f32.mrf.mxu0  ;;  %v6637_v45 = vsel %vm4909_vm14, %v13146_v15, %v12231_v23 }
 0xfd6   : > { %8270 = vmatprep.subr.bf16.mxu1 %v12771_v1  ;;  %v12320_v61 = vpop.permute.xlu0 %6726 }
 0xfd7   : > { %v6587_v37 = vpop.f32.mrf.mxu0 }
 0xfd9   : > { %8271 = vmatpush3.bf16.msra.mxu1 %v6643_v47  ;;  %v8259_v27 = vpop.f32.mrf.mxu0 }
 0xfda   : > { %8272 = vmatprep.subr.bf16.mxu1 %v12771_v1  ;;  %v12338_v24 = vpop.permute.xlu0 %6720 }
 0xfdc   : > { %v4775_v9 = vpop.f32.mrf.mxu1 }
 0xfdd   : > { %v4776_v54 = vadd.f32 %v4775_v9, %v13036_v19  ;;  %8273 = vmatpush3.bf16.msra.mxu1 %v6637_v45  ;;  %v6953_v19 = vsel %vm1673_vm6, 0, %v12246_v17 }
 0xfde   : > { %v8024_v4 = vpop.f32.mrf.mxu1  ;;  %8296 = vmatprep.subr.bf16.mxu1 %v12771_v1  ;;  %v6954_v55 = vsel %vm4909_vm14, %v6953_v19, 0 }
 0xfdf   : > { %v7309_v12 = vmul.f32 -1.442695, %v4776_v54  ;;  %v13148_v4 = vld [vmem:[#allocation52_spill] sm:$0xff] }
 0xfe0   : > { %v4778_v21 = vpop.f32.mrf.mxu1  ;;  %8275 = vmatmul.mubr.msk.bf16.vlgmr.msra.gmra.mxu1 %vm4951_vm15, %v12329_v51 }
 0xfe1   : > { %8511 = vpow2.f32 %v7309_v12  ;;  %8297 = vmatpush3.bf16.msra.mxu1 %v6961_v42  ;;  %8310 = vmatprep.mubr.msk.bf16.mxu1 %vm8542_vm2, %v12771_v1  ;;  %v6885_v12 = vpack.c.b16 %v13148_v4, %v13148_v4 }
 0xfe2   : > { %v8025_v23 = vpop.f32.mrf.mxu1  ;;  %8298 = vmatprep.subr.bf16.mxu1 %v12771_v1 }
 0xfe5   : > { %8299 = vmatpush3.bf16.msra.mxu1 %v6954_v55 }
 0xfe6   : > { %8300 = vmatprep.subr.bf16.mxu1 %v12771_v1 }
 0xfe7   : > { %v12343_v31 = vpop.permute.xlu0 %4948 }
 0xfe8   : > { %v4993_v17 = vadd.f32 %v12002_v10, %v12343_v31  ;;  %v5249_v38 = vadd.f32 %v12046_v20, %v12343_v31  ;;  %v5524_v7 = vadd.f32 %v12106_v33, %v12343_v31  ;;  %v5802_v11 = vadd.f32 %v12163_v6, %v12343_v31 }
 0xfe9   : > { %v6056_v10 = vadd.f32 %v12209_v25, %v12343_v31  ;;  %v6310_v20 = vadd.f32 %v12254_v22, %v12343_v31  ;;  %v6585_v33 = vadd.f32 %v6584_v46, %v12343_v31 }
 0xfea   : > { %v4998_v6 = vmax.f32 %v4993_v17, 0.0  ;;  %v5254_v18 = vmax.f32 %v5249_v38, 0.0  ;;  %v5529_v36 = vmax.f32 %v5524_v7, 0.0  ;;  %v5807_v35 = vmax.f32 %v5802_v11, 0.0 }
 0xfeb   : > { %v6061_v5 = vmax.f32 %v6056_v10, 0.0  ;;  %v6315_v63 = vmax.f32 %v6310_v20, 0.0  ;;  %v6590_v56 = vmax.f32 %v6585_v33, 0.0 }
 0xfec   : > { %5000 = vst.msk [vmem:[%s12356_s22] sm:$0xf] %vm4999_vm0, %v4998_v6  ;;  %7314 = vst.msk [vmem:[%s12356_s22 + $0x8] sm:$0xf] %vm4999_vm0, %v5254_v18 }
 0xfed   : > { %7318 = vst.msk [vmem:[%s12356_s22 + $0x10] sm:$0xf] %vm4999_vm0, %v5529_v36  ;;  %7322 = vst.msk [vmem:[%s12356_s22 + $0x18] sm:$0xf] %vm4999_vm0, %v5807_v35 }
 0xfee   : > { %7326 = vst.msk [vmem:[%s12356_s22 + $0x20] sm:$0xf] %vm4999_vm0, %v6061_v5  ;;  %7330 = vst.msk [vmem:[%s12356_s22 + $0x28] sm:$0xf] %vm4999_vm0, %v6315_v63  ;;  %v8512_v25 = vpop.eup %8511 }
 0xfef   : > { %7334 = vst.msk [vmem:[%s12356_s22 + $0x30] sm:$0xf] %vm4999_vm0, %v6590_v56  ;;  %v4784_v22 = vadd.f32 1.0, %v8512_v25 }
 0xff1   : > { %8513 = vrcp.f32 %v4784_v22 }
 0xff8   : > { %v5121_v46 = vpop.f32.mrf.mxu1 }
 0xff9   : > { %v5122_v28 = vadd.f32 %v5121_v46, %v12343_v31 }
 0xffa   : > { %v8060_v53 = vpop.f32.mrf.mxu1 }
 0xffb   : > { %v5127_v37 = vmax.f32 %v5122_v28, 0.0 }
 0xffc   : > { %v5124_v47 = vpop.f32.mrf.mxu1 }
 0xffd   : > { %7312 = vst.msk [vmem:[%s12356_s22 + $0x4] sm:$0xf] %vm4999_vm0, %v5127_v37 }
 0xffe   : > { %v8514_v27 = vpop.eup %8513  ;;  %v8061_v15 = vpop.f32.mrf.mxu1 }
 0xfff   : > { %v4795_v45 = vmul.f32 %v8514_v27, %v12166_v29 }
0x1001   : > { %v12389_v32 = vpack.c.bf16 %v4795_v45, %v4795_v45 }
0x1003   : > { %v6783_v49 = vrot.slane %v12389_v32, 2  ;;  %v6891_v9 = vrot.slane %v12389_v32, 6  ;;  %v6819_v54 = vrot.slane %v12389_v32, 4 }
0x1005   : > { %6784 = vrot.lane.b32.xlu1 %v6783_v49, %s8543_s28  ;;  %v6821_v29 = vsel %vm462_vm1, %v13081_v39, %v6819_v54 }
0x1009   : > { %6892 = vrot.lane.b32.xlu1 %v6891_v9, %s8544_s29 }
0x100d   : > { %6883 = vrot.lane.b32.xlu1 %v6819_v54, %s8543_s28 }
0x1011   : > { %6823 = vrot.lane.b32.xlu1 %v6821_v29, %s8544_s29 }
0x1014   : > { %v5396_v42 = vpop.f32.mrf.mxu1 }
0x1015   : > { %v5397_v21 = vadd.f32 %v5396_v42, %v12343_v31  ;;  %6887 = vrot.lane.b32.xlu1 %v6885_v12, %s8544_s29  ;;  %v13149_v12 = vld [vmem:[#allocation17_spill] sm:$0xff] }
0x1016   : > { %v8096_v19 = vpop.f32.mrf.mxu1  ;;  %v6797_v42 = vsel %vm1673_vm6, %v12294_v48, %v13149_v12 }
0x1017   : > { %v5402_v23 = vmax.f32 %v5397_v21, 0.0 }
0x1018   : > { %v5399_v55 = vpop.f32.mrf.mxu1 }
0x1019   : > { %7316 = vst.msk [vmem:[%s12356_s22 + $0xc] sm:$0xf] %vm4999_vm0, %v5402_v23  ;;  %6879 = vrot.lane.b32.xlu1 %v11966_v40, %s8544_s29 }
0x101a   : > { %v8097_v39 = vpop.f32.mrf.mxu1 }
0x101d   : > { %6724 = vrot.lane.b32.xlu1 %v6613_v13, %s8543_s28 }
0x1021   : > { %6875 = vrot.lane.b32.xlu1 %v6740_v58, %s8543_s28 }
0x1025   : > { %6877 = vrot.lane.b32.xlu1 %v13057_v14, %s8544_s29 }
0x1029   : > { %6871 = vrot.lane.b32.xlu1 %v12068_v34, %s8543_s28 }
0x1030   : > { %v5650_v17 = vpop.f32.mrf.mxu1 }
0x1031   : > { %v5651_v38 = vadd.f32 %v5650_v17, %v12343_v31 }
0x1032   : > { %v8132_v7 = vpop.f32.mrf.mxu1 }
0x1033   : > { %v5656_v11 = vmax.f32 %v5651_v38, 0.0 }
0x1034   : > { %v5653_v10 = vpop.f32.mrf.mxu1 }
0x1035   : > { %7320 = vst.msk [vmem:[%s12356_s22 + $0x14] sm:$0xf] %vm4999_vm0, %v5656_v11 }
0x1036   : > { %v8133_v59 = vpop.f32.mrf.mxu1 }
0x104c   : > { %v5928_v13 = vpop.f32.mrf.mxu1 }
0x104d   : > { %v5929_v20 = vadd.f32 %v5928_v13, %v12343_v31 }
0x104e   : > { %v8168_v58 = vpop.f32.mrf.mxu1 }
0x104f   : > { %v5934_v33 = vmax.f32 %v5929_v20, 0.0 }
0x1050   : > { %v5931_v6 = vpop.f32.mrf.mxu1 }
0x1051   : > { %7324 = vst.msk [vmem:[%s12356_s22 + $0x1c] sm:$0xf] %vm4999_vm0, %v5934_v33 }
0x1052   : > { %v8169_v14 = vpop.f32.mrf.mxu1 }
0x1068   : > { %v6182_v34 = vpop.f32.mrf.mxu1 }
0x1069   : > { %v6183_v18 = vadd.f32 %v6182_v34, %v12343_v31 }
0x106a   : > { %v8204_v36 = vpop.f32.mrf.mxu1 }
0x106b   : > { %v6188_v35 = vmax.f32 %v6183_v18, 0.0 }
0x106c   : > { %v6185_v5 = vpop.f32.mrf.mxu1 }
0x106d   : > { %7328 = vst.msk [vmem:[%s12356_s22 + $0x24] sm:$0xf] %vm4999_vm0, %v6188_v35 }
0x106e   : > { %v8205_v63 = vpop.f32.mrf.mxu1 }
0x1077   : > { %v6785_v56 = vpop.permute.xlu1 %6784 }
0x107b   : > { %v6893_v25 = vpop.permute.xlu1 %6892 }
0x107c   : > { %v6948_v22 = vsel %vm1673_vm6, %v12260_v41, %v6893_v25  ;;  %v6815_v41 = vsel %vm1673_vm6, %v12389_v32, %v12263_v26 }
0x107d   : > { %v6950_v8 = vsel %vm462_vm1, %v6948_v22, %v12000_v0  ;;  %v6817_v15 = vsel %vm4909_vm14, %v6815_v41, %v6785_v56 }
0x107e   : > { %8301 = vmatpush3.bf16.msra.mxu1 %v6950_v8 }
0x107f   : > { %v6884_v30 = vpop.permute.xlu1 %6883  ;;  %8302 = vmatprep.subr.bf16.mxu1 %v12771_v1 }
0x1080   : > { %v6942_v0 = vsel %vm462_vm1, %v12273_v3, %v6884_v30 }
0x1083   : > { %v6824_v62 = vpop.permute.xlu1 %6823 }
0x1084   : > { %v6826_v46 = vsel %vm4909_vm14, %v6824_v62, 0  ;;  %v6457_v28 = vpop.f32.mrf.mxu1 }
0x1085   : > { %v6458_v53 = vadd.f32 %v6457_v28, %v12343_v31  ;;  %8279 = vmatpush3.bf16.msra.mxu0 %v6826_v46 }
0x1086   : > { %8280 = vmatprep.subr.bf16.mxu0 %v12771_v1  ;;  %v8240_v37 = vpop.f32.mrf.mxu1 }
0x1087   : > { %v6463_v47 = vmax.f32 %v6458_v53, 0.0  ;;  %v6888_v27 = vpop.permute.xlu1 %6887 }
0x1088   : > { %v6944_v45 = vsel %vm4909_vm14, %v6942_v0, %v6888_v27  ;;  %v6460_v9 = vpop.f32.mrf.mxu1 }
0x1089   : > { %7332 = vst.msk [vmem:[%s12356_s22 + $0x2c] sm:$0xf] %vm4999_vm0, %v6463_v47  ;;  %8281 = vmatpush3.bf16.msra.mxu0 %v6817_v15  ;;  %8303 = vmatpush3.bf16.msra.mxu1 %v6944_v45 }
0x108a   : > { %8282 = vmatprep.subr.bf16.mxu0 %v12771_v1  ;;  %8304 = vmatprep.subr.bf16.mxu1 %v12771_v1  ;;  %v8241_v54 = vpop.f32.mrf.mxu1 }
0x108b   : > { %v6880_v26 = vpop.permute.xlu1 %6879 }
0x108c   : > { %v6936_v3 = vsel %vm1673_vm6, %v6880_v26, %v12976_v57 }
0x108d   : > { %8283 = vmatpush3.bf16.msra.mxu0 %v12383_v43  ;;  %v6938_v29 = vsel %vm4909_vm14, %v6936_v3, %v6783_v49  ;;  %v6799_v43 = vsel %vm4909_vm14, %v6797_v42, %v6633_v16  ;;  %v6787_v16 = vsel %vm4909_vm14, %v11600_v44, %v12338_v24 }
0x108e   : > { %8305 = vmatpush3.bf16.msra.mxu1 %v6938_v29  ;;  %8284 = vmatprep.subr.bf16.mxu0 %v12771_v1 }
0x108f   : > { %v6725_v4 = vpop.permute.xlu1 %6724  ;;  %8306 = vmatprep.subr.bf16.mxu1 %v12771_v1 }
0x1090   : > { %v6791_v32 = vsel %vm1673_vm6, %v12304_v2, %v6725_v4 }
0x1091   : > { %8285 = vmatpush3.bf16.msra.mxu0 %v12287_v50  ;;  %v6793_v50 = vsel %vm462_vm1, %v6791_v32, %v12320_v61 }
0x1092   : > { %8286 = vmatprep.subr.bf16.mxu0 %v12771_v1 }
0x1093   : > { %v6876_v57 = vpop.permute.xlu1 %6875 }
0x1094   : > { %v6930_v49 = vsel %vm1673_vm6, %v12312_v52, %v6876_v57 }
0x1095   : > { %8287 = vmatpush3.bf16.msra.mxu0 %v6799_v43 }
0x1096   : > { %8288 = vmatprep.subr.bf16.mxu0 %v12771_v1 }
0x1097   : > { %v6878_v21 = vpop.permute.xlu1 %6877 }
0x1098   : > { %v6932_v48 = vsel %vm462_vm1, %v6930_v49, %v6878_v21 }
0x1099   : > { %8289 = vmatpush3.bf16.msra.mxu0 %v6793_v50  ;;  %8307 = vmatpush3.bf16.msra.mxu1 %v6932_v48 }
0x109a   : > { %8290 = vmatprep.subr.bf16.mxu0 %v12771_v1  ;;  %8308 = vmatprep.subr.bf16.mxu1 %v12771_v1 }
0x109b   : > { %v6872_v40 = vpop.permute.xlu1 %6871 }
0x109c   : > { %v6926_v2 = vsel %vm4909_vm14, %v11990_v60, %v6872_v40 }
0x109d   : > { %8291 = vmatpush3.bf16.msra.mxu0 %v6787_v16  ;;  %8309 = vmatpush3.bf16.msra.mxu1 %v6926_v2 }
0x10a0   : > { %v6711_v52 = vpop.f32.mrf.mxu1  ;;  %8293 = vmatmul.mubr.msk.bf16.vlgmr.msra.gmra.mxu0 %vm4951_vm15, %v12329_v51  ;;  %8311 = vmatmul.mubr.msk.bf16.vlgmr.msra.gmra.mxu1 %vm4951_vm15, %v12329_v51 }
0x10a1   : > { %v6712_v61 = vadd.f32 %v6711_v52, %v12343_v31 }
0x10a2   : > { %v8276_v1 = vpop.f32.mrf.mxu1 }
0x10a3   : > { %v6717_v19 = vmax.f32 %v6712_v61, 0.0 }
0x10a4   : > { %v6714_v23 = vpop.f32.mrf.mxu1 }
0x10a5   : > { %7336 = vst.msk [vmem:[%s12356_s22 + $0x34] sm:$0xf] %vm4999_vm0, %v6717_v19 }
0x10a6   : > { %v8277_v44 = vpop.f32.mrf.mxu1 }
0x1160   : > { %v6862_v60 = vpop.f32.mrf.mxu0  ;;  %v6997_v24 = vpop.f32.mrf.mxu1 }
0x1161   : > { %v6863_v55 = vadd.f32 %v6862_v60, %v12343_v31  ;;  %v6998_v39 = vadd.f32 %v6997_v24, %v12343_v31 }
0x1162   : > { %v8294_v17 = vpop.f32.mrf.mxu0  ;;  %v8312_v38 = vpop.f32.mrf.mxu1 }
0x1163   : > { %v6868_v7 = vmax.f32 %v6863_v55, 0.0  ;;  %v7003_v51 = vmax.f32 %v6998_v39, 0.0 }
0x1164   : > { %v6865_v11 = vpop.f32.mrf.mxu0  ;;  %v7000_v10 = vpop.f32.mrf.mxu1 }
0x1165   : > { %7338 = vst.msk [vmem:[%s12356_s22 + $0x38] sm:$0xf] %vm4999_vm0, %v6868_v7  ;;  %7340 = vst.msk [vmem:[%s12356_s22 + $0x3c] sm:$0xf] %vm4999_vm0, %v7003_v51 }
0x1166   : > { %v8295_v59 = vpop.f32.mrf.mxu0  ;;  %v8313_v13 = vpop.f32.mrf.mxu1 }
0x1167 PF: > { %s22_s21 = sadd.s32 1, %s8538_s21  }
0x1168   : > { %p19_p4 = scmp.ge.s32.totalorder %s22_s21, 4  }
0x116a   :  { %21 = sbr.rel (!%p19_p4) target bundleno = 1 (0x1), region = 116 }

</bundles_post_ra>
